<compile_context>
chip_gen: v5e
topology: v5e:2x2
jax: 0.10.0
libtpu: 0.0.40
codegen_flags: <defaults>
</compile_context>

<pallas_src>
import functools

import jax
import jax.numpy as jnp
from jax.experimental import pallas as pl
from jax.experimental.pallas import tpu as pltpu

# ---------------------------------------------------------------------------
# Padded-pitch geometry
#   14x14 grid -> pitch 16 (one zero ring), 256 rows / image
#    6x6  grid -> pitch 8  (one zero ring),  64 rows / image
# Margins cover the largest positive row shifts:
#   pitch-16: conv2 valid taps up to +34            -> TP14 >= 34
#   pitch-8 : conv3 +/-9, conv4 +18, pool-4x4 +27   -> LP6 >= 9, TP6 >= 27
# ---------------------------------------------------------------------------
LP14, TP14 = 8, 40
LP6, TP6 = 16, 32


# ---------------------------------------------------------------------------
# Fused kernel: grid=(2,) over {pipe1, pipe2}; classifier fused via split-K.
# ---------------------------------------------------------------------------
def _fused_kernel(xcol_ref, w1_ref, b1_ref, w2_ref, b2_ref, w3_ref, b3_ref,
                  w4_ref, b4_ref, wf1_ref, bf1_ref, wf2_ref, bf2_ref,
                  w1c_ref, b1c_ref, w2c_ref, b2c_ref,
                  pipe_out_ref, main_out_ref,
                  s14a, s14b, s6a, s6b, p2s, hacc, *, B):
    f32 = jnp.float32
    R14 = B * 256
    R6 = B * 64

    # --- minimal zero-init ---
    # s6a MUST be fully zero: the pool-1 gather only writes the 36 valid rows per
    # image and the untouched pad-ring rows are conv3's "same" zero padding.
    s6a[...] = jnp.zeros(s6a.shape, f32)
    # p2s rows B..BP-1 are never written; keep them zero (feeds classifier matmuls).
    p2s[...] = jnp.zeros(p2s.shape, f32)
    # Big pitch-16/pitch-8 buffers: interiors are fully overwritten before being
    # read, so only the margins get (defensive) zeros -> far less store traffic.
    s14a[pl.ds(0, LP14), :] = jnp.zeros((LP14, s14a.shape[1]), f32)
    s14a[pl.ds(LP14 + R14, TP14), :] = jnp.zeros((TP14, s14a.shape[1]), f32)
    s14b[pl.ds(0, LP14), :] = jnp.zeros((LP14, s14b.shape[1]), f32)
    s14b[pl.ds(LP14 + R14, TP14), :] = jnp.zeros((TP14, s14b.shape[1]), f32)
    s6b[pl.ds(0, LP6), :] = jnp.zeros((LP6, s6b.shape[1]), f32)
    s6b[pl.ds(LP6 + R6, TP6), :] = jnp.zeros((TP6, s6b.shape[1]), f32)

    def conv3x3(src, base, pitch, k_ref, cin, rows, same):
        """3x3 conv as 9 shifted MXU matmuls; 3 independent partial accumulators
        (one per kernel row) so consecutive matmul pushes overlap."""
        parts = []
        for kh in range(3):
            acc = None
            for kw in range(3):
                t = 3 * kh + kw
                s = ((kh - 1) * pitch + (kw - 1)) if same else (kh * pitch + kw)
                at = src[pl.ds(base + s, rows), :]
                wt = k_ref[0, pl.ds(t * cin, cin), :]
                d = jnp.dot(at, wt, preferred_element_type=f32)
                acc = d if acc is None else acc + d
            parts.append(acc)
        return parts[0] + parts[1] + parts[2]

    # ---- conv1: 1 -> 16, 3x3 "same"; host im2col -> one [R14,9]x[9,16] MXU matmul ----
    a1 = jnp.maximum(
        jnp.dot(xcol_ref[0], w1_ref[0], preferred_element_type=f32) + b1_ref[0], 0.0)
    s14a[pl.ds(LP14, R14), :] = a1                        # padded-pitch-16 layout

    # ---- conv2: 16 -> 32, 3x3 valid ----
    a2 = jnp.maximum(conv3x3(s14a, LP14, 16, w2_ref, 16, R14, same=False)
                     + b2_ref[0], 0.0)
    s14b[pl.ds(LP14, R14), :] = a2

    # ---- maxpool 2x2 stride 2: windowed max + strided row gathers (no O(B^2) matmul) ----
    m = s14b[pl.ds(LP14, R14), :]
    for s in (1, 16, 17):
        m = jnp.maximum(m, s14b[pl.ds(LP14 + s, R14), :])
    s14b[pl.ds(LP14, R14), :] = m                         # reuse s14b as gather source
    for b in range(B):
        for pi in range(6):
            src = LP14 + b * 256 + (2 * pi + 1) * 16 + 1  # conv2 pixels (2pi, 0..11) windows
            dst = LP6 + b * 64 + (pi + 1) * 8 + 1         # pooled row (pi, 0..5), pitch 8
            s6a[pl.ds(dst, 6), :] = s14b[pl.ds(src, 6, stride=2), :]

    # ---- conv3: 32 -> 64, 3x3 "same" (zero ring rows of s6a are the padding) ----
    a3 = jnp.maximum(conv3x3(s6a, LP6, 8, w3_ref, 32, R6, same=True)
                     + b3_ref[0], 0.0)
    s6b[pl.ds(LP6, R6), :] = a3

    # ---- conv4: 64 -> 64, 3x3 valid ----
    a4 = jnp.maximum(conv3x3(s6b, LP6, 8, w4_ref, 64, R6, same=False)
                     + b4_ref[0], 0.0)
    s6b[pl.ds(LP6, R6), :] = a4                           # a3 no longer needed

    # ---- maxpool 4x4: shifted max over 16 window offsets + one strided copy ----
    m2 = s6b[pl.ds(LP6, R6), :]
    for di in range(4):
        for dj in range(4):
            if di == 0 and dj == 0:
                continue
            m2 = jnp.maximum(m2, s6b[pl.ds(LP6 + di * 8 + dj, R6), :])
    s6b[pl.ds(LP6, R6), :] = m2
    # pooled feature of image b lives at row b*64 + 9 (window anchored at pixel (0,0))
    p2s[pl.ds(0, B), :] = s6b[pl.ds(LP6 + 9, B, stride=64), :]

    # ---- pipe classifier: 64 -> 100 -> 10 (output lane-padded to 128, unmasked vst) ----
    h = jnp.maximum(
        jnp.dot(p2s[...], wf1_ref[0], preferred_element_type=f32) + bf1_ref[0], 0.0)
    y = jnp.dot(h, wf2_ref[0], preferred_element_type=f32) + bf2_ref[0]   # [BP, 128]
    pipe_out_ref[...] = y

    # ---- fused final classifier: split-K accumulation across the pipe grid axis ----
    # concat([x1_pipe, x2_pipe]) @ W1  ==  x1_pipe @ W1[0:10] + x2_pipe @ W1[10:20]
    part = jnp.dot(y, w1c_ref[0], preferred_element_type=f32)             # [BP, 32]
    p = pl.program_id(0)

    @pl.when(p == 0)
    def _():
        hacc[...] = part

    @pl.when(p == pl.num_programs(0) - 1)
    def _():
        h2 = jnp.maximum(hacc[...] + part + b1c_ref[...], 0.0)
        main_out_ref[...] = (jnp.dot(h2, w2c_ref[...], preferred_element_type=f32)
                             + b2c_ref[...])


# ---------------------------------------------------------------------------
# VMEM budget computed from the actual footprint (f32, (8,128) tile rounding)
# ---------------------------------------------------------------------------
def _vmem_limit_bytes(B, BP, T14, T6):
    def tile(r, c):
        return (-(-r // 8) * 8) * (-(-c // 128) * 128) * 4

    scratch = (tile(T14, 16) + tile(T14, 32) + tile(T6, 32) + tile(T6, 64)
               + tile(BP, 64) + tile(BP, 32))
    blocks = (tile(B * 256, 9) + tile(9, 16) + tile(1, 16) + tile(144, 32)
              + tile(1, 32) + tile(288, 64) + tile(1, 64) + tile(576, 64)
              + tile(1, 64) + tile(64, 100) + tile(1, 100) + tile(100, 128)
              + tile(1, 128) + tile(128, 32) + tile(1, 32) + tile(32, 128)
              + tile(1, 128) + 3 * tile(BP, 128))
    est = scratch + 2 * blocks            # inputs/outputs may be double-buffered
    return int(min(48 * 1024 * 1024, max(16 * 1024 * 1024, 2 * est)))


def run_fused(xcol, pw, cw, B, BP):
    R14, R6 = B * 256, B * 64
    T14 = LP14 + R14 + TP14
    T6 = LP6 + R6 + TP6
    kernel = functools.partial(_fused_kernel, B=B)

    in_specs = [
        pl.BlockSpec((1, R14, 9), lambda p: (p, 0, 0)),      # conv1 im2col taps
        pl.BlockSpec((1, 9, 16), lambda p: (p, 0, 0)),       # w1
        pl.BlockSpec((1, 1, 16), lambda p: (p, 0, 0)),       # b1
        pl.BlockSpec((1, 144, 32), lambda p: (p, 0, 0)),     # w2
        pl.BlockSpec((1, 1, 32), lambda p: (p, 0, 0)),       # b2
        pl.BlockSpec((1, 288, 64), lambda p: (p, 0, 0)),     # w3
        pl.BlockSpec((1, 1, 64), lambda p: (p, 0, 0)),       # b3
        pl.BlockSpec((1, 576, 64), lambda p: (p, 0, 0)),     # w4
        pl.BlockSpec((1, 1, 64), lambda p: (p, 0, 0)),       # b4
        pl.BlockSpec((1, 64, 100), lambda p: (p, 0, 0)),     # wf1
        pl.BlockSpec((1, 1, 100), lambda p: (p, 0, 0)),      # bf1
        pl.BlockSpec((1, 100, 128), lambda p: (p, 0, 0)),    # wf2 (lane-padded)
        pl.BlockSpec((1, 1, 128), lambda p: (p, 0, 0)),      # bf2
        pl.BlockSpec((1, 128, 32), lambda p: (p, 0, 0)),     # classifier W1 split (per pipe)
        pl.BlockSpec((1, 32), lambda p: (0, 0)),             # classifier b1
        pl.BlockSpec((32, 128), lambda p: (0, 0)),           # classifier W2 (lane-padded)
        pl.BlockSpec((1, 128), lambda p: (0, 0)),            # classifier b2
    ]
    out_specs = (
        pl.BlockSpec((BP, 128), lambda p: (p, 0)),           # pipe classifier outputs
        pl.BlockSpec((BP, 128), lambda p: (0, 0)),           # final classifier (last step)
    )
    out_shape = (jax.ShapeDtypeStruct((2 * BP, 128), jnp.float32),
                 jax.ShapeDtypeStruct((BP, 128), jnp.float32))
    scratch = [
        pltpu.VMEM((T14, 16), jnp.float32),   # conv1 output (padded-pitch 16)
        pltpu.VMEM((T14, 32), jnp.float32),   # conv2 output / pool-1 windowed max
        pltpu.VMEM((T6, 32), jnp.float32),    # pool-1 output / conv3 input (padded-pitch 8)
        pltpu.VMEM((T6, 64), jnp.float32),    # conv3 output -> conv4 output -> pool-2 max
        pltpu.VMEM((BP, 64), jnp.float32),    # pooled feature vectors
        pltpu.VMEM((BP, 32), jnp.float32),    # split-K accumulator for final classifier
    ]
    return pl.pallas_call(
        kernel,
        out_shape=out_shape,
        grid_spec=pltpu.PrefetchScalarGridSpec(
            num_scalar_prefetch=0, grid=(2,),
            in_specs=in_specs, out_specs=out_specs,
            scratch_shapes=scratch),
        compiler_params=pltpu.CompilerParams(
            dimension_semantics=("arbitrary",),   # pipe axis carries the classifier acc
            vmem_limit_bytes=_vmem_limit_bytes(B, BP, T14, T6)),
    )(xcol, pw["w1"], pw["b1"], pw["w2"], pw["b2"], pw["w3"], pw["b3"],
      pw["w4"], pw["b4"], pw["wf1"], pw["bf1"], pw["wf2"], pw["bf2"],
      cw["w1"], cw["b1"], cw["w2"], cw["b2"])


# ---------------------------------------------------------------------------
# Host-side prep (layout only; input is tiny so im2col here is free)
# ---------------------------------------------------------------------------
def prep_input(x_nchw):
    """NCHW [B,2,14,14] -> per-pipe conv1 im2col slabs [2, B*256, 9].
    Row b*256 + pi*16 + pj holds the 9 taps of the "same" conv anchored at padded-pitch
    coordinate (pi,pj); valid outputs live at (pi,pj) in 1..14 (matching conv2's reads)."""
    B = x_nchw.shape[0]
    cols = []
    for c in range(2):
        xp = jnp.pad(x_nchw[:, c, :, :], ((0, 0), (2, 2), (2, 2)))        # [B,18,18]
        taps = [xp[:, kh:kh + 16, kw:kw + 16] for kh in range(3) for kw in range(3)]
        cols.append(jnp.stack(taps, axis=-1).reshape(B * 256, 9))
    return jnp.stack(cols)


def prep_kernel_params(params):
    def conv_w(w):  # torch-layout [Cout,Cin,3,3] -> [(kh,kw,ci), Cout]
        ci, co = w.shape[1], w.shape[0]
        return jnp.transpose(w, (2, 3, 1, 0)).reshape(9 * ci, co).astype(jnp.float32)

    def pad_lanes(a, n):
        return jnp.pad(a, ((0, 0), (0, n - a.shape[1])))

    pw = {}
    for name, key in (("w1", "c1_w"), ("w2", "c2_w"), ("w3", "c3_w"), ("w4", "c4_w")):
        pw[name] = jnp.stack([conv_w(params["pipe1"][key]), conv_w(params["pipe2"][key])])
    for name, key in (("b1", "c1_b"), ("b2", "c2_b"), ("b3", "c3_b"), ("b4", "c4_b")):
        pw[name] = jnp.stack([params["pipe1"][key].reshape(1, -1),
                              params["pipe2"][key].reshape(1, -1)])

    (w1p1, b1p1), (w2p1, b2p1) = params["pc1"]
    (w1p2, b1p2), (w2p2, b2p2) = params["pc2"]
    pw["wf1"] = jnp.stack([w1p1, w1p2])
    pw["bf1"] = jnp.stack([b1p1.reshape(1, -1), b1p2.reshape(1, -1)])
    pw["wf2"] = jnp.stack([pad_lanes(w2p1, 128), pad_lanes(w2p2, 128)])
    pw["bf2"] = jnp.stack([pad_lanes(b2p1.reshape(1, -1), 128),
                           pad_lanes(b2p2.reshape(1, -1), 128)])

    (wc1, bc1), (wc2, bc2) = params["cls"]
    cw = {
        # split-K halves of the [20,32] weight, zero-padded to 128 rows so the
        # lane-padded pipe outputs can feed them directly (pad lanes hit zero rows)
        "w1": jnp.stack([jnp.pad(wc1[0:10, :], ((0, 118), (0, 0))),
                         jnp.pad(wc1[10:20, :], ((0, 118), (0, 0)))]),
        "b1": bc1.reshape(1, -1),
        "w2": pad_lanes(wc2, 128),
        "b2": pad_lanes(bc2.reshape(1, -1), 128),
    }
    return pw, cw


def forward(x_nchw, params):
    """x_nchw: [B,2,14,14] -> (x_main [B,2], (x1_pipe [B,10], x2_pipe [B,10]))."""
    B = x_nchw.shape[0]
    BP = max(8, ((B + 7) // 8) * 8)
    xcol = prep_input(x_nchw.astype(jnp.float32))
    pw, cw = prep_kernel_params(params)

    pipes, main = run_fused(xcol, pw, cw, B, BP)
    x1_pipe = pipes[0:B, 0:10]
    x2_pipe = pipes[BP:BP + B, 0:10]
    x_main = main[0:B, 0:2]
    return x_main, (x1_pipe, x2_pipe)


# ---------------------------------------------------------------------------
# Deterministic parameter init (PyTorch-like uniform(-1/sqrt(fan_in), +1/sqrt(fan_in)))
# ---------------------------------------------------------------------------
def _uniform(key, shape, fan_in):
    bound = 1.0 / (fan_in ** 0.5)
    return jax.random.uniform(key, shape, jnp.float32, -bound, bound)


def init_pipe(key):
    ks = jax.random.split(key, 8)
    return {
        "c1_w": _uniform(ks[0], (16, 1, 3, 3), 9),
        "c1_b": _uniform(ks[1], (16,), 9),
        "c2_w": _uniform(ks[2], (32, 16, 3, 3), 144),
        "c2_b": _uniform(ks[3], (32,), 144),
        "c3_w": _uniform(ks[4], (64, 32, 3, 3), 288),
        "c3_b": _uniform(ks[5], (64,), 288),
        "c4_w": _uniform(ks[6], (64, 64, 3, 3), 576),
        "c4_b": _uniform(ks[7], (64,), 576),
    }


def init_mlp(key, dims):
    layers = []
    ks = jax.random.split(key, 2 * (len(dims) - 1))
    for i in range(len(dims) - 1):
        w = _uniform(ks[2 * i], (dims[i], dims[i + 1]), dims[i])
        b = _uniform(ks[2 * i + 1], (dims[i + 1],), dims[i])
        layers.append((w, b))
    return layers


# ---------------------------------------------------------------------------
if __name__ == "__main__":
    weight_sharing = False  # matches the module's default

    key = jax.random.PRNGKey(0)
    k_in, k1, k2, k3, k4, k5 = jax.random.split(key, 6)

    params = {
        "pipe1": init_pipe(k1),
        "pc1": init_mlp(k2, (64, 100, 10)),
        "cls": init_mlp(k5, (20, 32, 2)),
    }
    if weight_sharing:
        params["pipe2"] = params["pipe1"]
        params["pc2"] = params["pc1"]
    else:
        params["pipe2"] = init_pipe(k3)
        params["pc2"] = init_mlp(k4, (64, 100, 10))

    # Small deterministic input: batch=2, 2 channels, 14x14 (input_size=196)
    x = jax.random.normal(k_in, (2, 2, 14, 14), jnp.float32)

    fwd = jax.jit(forward)
    x_main, (x1_pipe, x2_pipe) = fwd(x, params)
    jax.block_until_ready((x_main, x1_pipe, x2_pipe))

    assert x_main.shape == (2, 2)
    assert x1_pipe.shape == (2, 10) and x2_pipe.shape == (2, 10)
    print("KERNEL_OK")
</pallas_src>

<mosaic_0001>
module attributes {stable_mosaic.version = 11 : i64} {
  func.func @_fused_kernel(%arg0: i32, %arg1: memref<1x512x9xf32, #tpu.memory_space<vmem>>, %arg2: memref<1x9x16xf32, #tpu.memory_space<vmem>>, %arg3: memref<1x1x16xf32, #tpu.memory_space<vmem>>, %arg4: memref<1x144x32xf32, #tpu.memory_space<vmem>>, %arg5: memref<1x1x32xf32, #tpu.memory_space<vmem>>, %arg6: memref<1x288x64xf32, #tpu.memory_space<vmem>>, %arg7: memref<1x1x64xf32, #tpu.memory_space<vmem>>, %arg8: memref<1x576x64xf32, #tpu.memory_space<vmem>>, %arg9: memref<1x1x64xf32, #tpu.memory_space<vmem>>, %arg10: memref<1x64x100xf32, #tpu.memory_space<vmem>>, %arg11: memref<1x1x100xf32, #tpu.memory_space<vmem>>, %arg12: memref<1x100x128xf32, #tpu.memory_space<vmem>>, %arg13: memref<1x1x128xf32, #tpu.memory_space<vmem>>, %arg14: memref<1x128x32xf32, #tpu.memory_space<vmem>>, %arg15: memref<1x32xf32, #tpu.memory_space<vmem>>, %arg16: memref<32x128xf32, #tpu.memory_space<vmem>>, %arg17: memref<1x128xf32, #tpu.memory_space<vmem>>, %arg18: memref<8x128xf32, #tpu.memory_space<vmem>>, %arg19: memref<8x128xf32, #tpu.memory_space<vmem>>, %arg20: memref<560x16xf32, #tpu.memory_space<vmem>>, %arg21: memref<560x32xf32, #tpu.memory_space<vmem>>, %arg22: memref<176x32xf32, #tpu.memory_space<vmem>>, %arg23: memref<176x64xf32, #tpu.memory_space<vmem>>, %arg24: memref<8x64xf32, #tpu.memory_space<vmem>>, %arg25: memref<8x32xf32, #tpu.memory_space<vmem>>) attributes {dimension_semantics = [#tpu.dimension_semantics<arbitrary>], iteration_bounds = array<i64: 2>, scalar_prefetch = 0 : i64, scratch_operands = 6 : i64, tpu.core_type = #tpu.core_type<tc>, window_params = [{transform_indices = @transform_0, window_bounds = array<i64: 1, 512, 9>}, {transform_indices = @transform_1, window_bounds = array<i64: 1, 9, 16>}, {transform_indices = @transform_2, window_bounds = array<i64: 1, 1, 16>}, {transform_indices = @transform_3, window_bounds = array<i64: 1, 144, 32>}, {transform_indices = @transform_4, window_bounds = array<i64: 1, 1, 32>}, {transform_indices = @transform_5, window_bounds = array<i64: 1, 288, 64>}, {transform_indices = @transform_6, window_bounds = array<i64: 1, 1, 64>}, {transform_indices = @transform_7, window_bounds = array<i64: 1, 576, 64>}, {transform_indices = @transform_8, window_bounds = array<i64: 1, 1, 64>}, {transform_indices = @transform_9, window_bounds = array<i64: 1, 64, 100>}, {transform_indices = @transform_10, window_bounds = array<i64: 1, 1, 100>}, {transform_indices = @transform_11, window_bounds = array<i64: 1, 100, 128>}, {transform_indices = @transform_12, window_bounds = array<i64: 1, 1, 128>}, {transform_indices = @transform_13, window_bounds = array<i64: 1, 128, 32>}, {pipeline_mode = #tpu.pipeline_mode<synchronous>, transform_indices = @transform_14, window_bounds = array<i64: 1, 32>}, {pipeline_mode = #tpu.pipeline_mode<synchronous>, transform_indices = @transform_15, window_bounds = array<i64: 32, 128>}, {pipeline_mode = #tpu.pipeline_mode<synchronous>, transform_indices = @transform_16, window_bounds = array<i64: 1, 128>}, {transform_indices = @transform_17, window_bounds = array<i64: 8, 128>}, {pipeline_mode = #tpu.pipeline_mode<synchronous>, transform_indices = @transform_18, window_bounds = array<i64: 8, 128>}]} {
    %cst = arith.constant 0.000000e+00 : f32
    %0 = vector.broadcast %cst : f32 to vector<176x32xf32>
    %c0 = arith.constant 0 : index
    %c0_0 = arith.constant 0 : index
    %1 = vector.load %arg22[%c0, %c0_0] : memref<176x32xf32, #tpu.memory_space<vmem>>, vector<176x32xf32>
    tpu.vector_store %arg22[%c0, %c0_0], %0 {strides = array<i32>} : memref<176x32xf32, #tpu.memory_space<vmem>>, vector<176x32xf32>,
    %cst_1 = arith.constant 0.000000e+00 : f32
    %2 = vector.broadcast %cst_1 : f32 to vector<8x64xf32>
    %c0_2 = arith.constant 0 : index
    %c0_3 = arith.constant 0 : index
    %3 = vector.load %arg24[%c0_2, %c0_3] : memref<8x64xf32, #tpu.memory_space<vmem>>, vector<8x64xf32>
    tpu.vector_store %arg24[%c0_2, %c0_3], %2 {strides = array<i32>} : memref<8x64xf32, #tpu.memory_space<vmem>>, vector<8x64xf32>,
    %cst_4 = arith.constant 0.000000e+00 : f32
    %4 = vector.broadcast %cst_4 : f32 to vector<8x16xf32>
    %c0_5 = arith.constant 0 : index
    %c0_6 = arith.constant 0 : index
    %5 = vector.load %arg20[%c0_5, %c0_6] : memref<560x16xf32, #tpu.memory_space<vmem>>, vector<8x16xf32>
    tpu.vector_store %arg20[%c0_5, %c0_6], %4 {strides = array<i32>} : memref<560x16xf32, #tpu.memory_space<vmem>>, vector<8x16xf32>,
    %cst_7 = arith.constant 0.000000e+00 : f32
    %6 = vector.broadcast %cst_7 : f32 to vector<40x16xf32>
    %c520 = arith.constant 520 : index
    %c0_8 = arith.constant 0 : index
    %7 = vector.load %arg20[%c520, %c0_8] : memref<560x16xf32, #tpu.memory_space<vmem>>, vector<40x16xf32>
    tpu.vector_store %arg20[%c520, %c0_8], %6 {strides = array<i32>} : memref<560x16xf32, #tpu.memory_space<vmem>>, vector<40x16xf32>,
    %cst_9 = arith.constant 0.000000e+00 : f32
    %8 = vector.broadcast %cst_9 : f32 to vector<8x32xf32>
    %c0_10 = arith.constant 0 : index
    %c0_11 = arith.constant 0 : index
    %9 = vector.load %arg21[%c0_10, %c0_11] : memref<560x32xf32, #tpu.memory_space<vmem>>, vector<8x32xf32>
    tpu.vector_store %arg21[%c0_10, %c0_11], %8 {strides = array<i32>} : memref<560x32xf32, #tpu.memory_space<vmem>>, vector<8x32xf32>,
    %cst_12 = arith.constant 0.000000e+00 : f32
    %10 = vector.broadcast %cst_12 : f32 to vector<40x32xf32>
    %c520_13 = arith.constant 520 : index
    %c0_14 = arith.constant 0 : index
    %11 = vector.load %arg21[%c520_13, %c0_14] : memref<560x32xf32, #tpu.memory_space<vmem>>, vector<40x32xf32>
    tpu.vector_store %arg21[%c520_13, %c0_14], %10 {strides = array<i32>} : memref<560x32xf32, #tpu.memory_space<vmem>>, vector<40x32xf32>,
    %cst_15 = arith.constant 0.000000e+00 : f32
    %12 = vector.broadcast %cst_15 : f32 to vector<16x64xf32>
    %c0_16 = arith.constant 0 : index
    %c0_17 = arith.constant 0 : index
    %13 = vector.load %arg23[%c0_16, %c0_17] : memref<176x64xf32, #tpu.memory_space<vmem>>, vector<16x64xf32>
    tpu.vector_store %arg23[%c0_16, %c0_17], %12 {strides = array<i32>} : memref<176x64xf32, #tpu.memory_space<vmem>>, vector<16x64xf32>,
    %cst_18 = arith.constant 0.000000e+00 : f32
    %14 = vector.broadcast %cst_18 : f32 to vector<32x64xf32>
    %c144 = arith.constant 144 : index
    %c0_19 = arith.constant 0 : index
    %15 = vector.load %arg23[%c144, %c0_19] : memref<176x64xf32, #tpu.memory_space<vmem>>, vector<32x64xf32>
    tpu.vector_store %arg23[%c144, %c0_19], %14 {strides = array<i32>} : memref<176x64xf32, #tpu.memory_space<vmem>>, vector<32x64xf32>,
    %c0_20 = arith.constant 0 : index
    %c0_21 = arith.constant 0 : index
    %c0_22 = arith.constant 0 : index
    %16 = vector.load %arg1[%c0_20, %c0_21, %c0_22] : memref<1x512x9xf32, #tpu.memory_space<vmem>>, vector<1x512x9xf32>
    %17 = vector.shape_cast %16 : vector<1x512x9xf32> to vector<512x9xf32>
    %c0_23 = arith.constant 0 : index
    %c0_24 = arith.constant 0 : index
    %c0_25 = arith.constant 0 : index
    %18 = vector.load %arg2[%c0_23, %c0_24, %c0_25] : memref<1x9x16xf32, #tpu.memory_space<vmem>>, vector<1x9x16xf32>
    %19 = vector.shape_cast %18 : vector<1x9x16xf32> to vector<9x16xf32>
    %cst_26 = arith.constant dense<0.000000e+00> : vector<512x16xf32>
    %20 = tpu.matmul %17, %19, %cst_26 {dimension_numbers = #tpu.dot_dimension_numbers<[1], [0], [0], [1], [0, 0, 1, 1], [], []>} : vector<512x9xf32>, vector<9x16xf32>, vector<512x16xf32> -> vector<512x16xf32>
    %c0_27 = arith.constant 0 : index
    %c0_28 = arith.constant 0 : index
    %c0_29 = arith.constant 0 : index
    %21 = vector.load %arg3[%c0_27, %c0_28, %c0_29] : memref<1x1x16xf32, #tpu.memory_space<vmem>>, vector<1x1x16xf32>
    %22 = vector.shape_cast %21 : vector<1x1x16xf32> to vector<1x16xf32>
    %23 = vector.broadcast %22 : vector<1x16xf32> to vector<512x16xf32>
    %24 = arith.addf %20, %23 : vector<512x16xf32>
    %cst_30 = arith.constant 0.000000e+00 : f32
    %25 = vector.broadcast %cst_30 : f32 to vector<512x16xf32>
    %26 = arith.maximumf %24, %25 : vector<512x16xf32>
    %c8 = arith.constant 8 : index
    %c0_31 = arith.constant 0 : index
    %27 = vector.load %arg20[%c8, %c0_31] : memref<560x16xf32, #tpu.memory_space<vmem>>, vector<512x16xf32>
    tpu.vector_store %arg20[%c8, %c0_31], %26 {strides = array<i32>} : memref<560x16xf32, #tpu.memory_space<vmem>>, vector<512x16xf32>,
    %c8_32 = arith.constant 8 : index
    %c0_33 = arith.constant 0 : index
    %28 = vector.load %arg20[%c8_32, %c0_33] : memref<560x16xf32, #tpu.memory_space<vmem>>, vector<512x16xf32>
    %c0_34 = arith.constant 0 : index
    %c0_35 = arith.constant 0 : index
    %c0_36 = arith.constant 0 : index
    %29 = vector.load %arg4[%c0_34, %c0_35, %c0_36] : memref<1x144x32xf32, #tpu.memory_space<vmem>>, vector<1x16x32xf32>
    %30 = vector.shape_cast %29 : vector<1x16x32xf32> to vector<16x32xf32>
    %cst_37 = arith.constant dense<0.000000e+00> : vector<512x32xf32>
    %31 = tpu.matmul %28, %30, %cst_37 {dimension_numbers = #tpu.dot_dimension_numbers<[1], [0], [0], [1], [0, 0, 1, 1], [], []>} : vector<512x16xf32>, vector<16x32xf32>, vector<512x32xf32> -> vector<512x32xf32>
    %c9 = arith.constant 9 : index
    %c0_38 = arith.constant 0 : index
    %32 = vector.load %arg20[%c9, %c0_38] : memref<560x16xf32, #tpu.memory_space<vmem>>, vector<512x16xf32>
    %c0_39 = arith.constant 0 : index
    %c16 = arith.constant 16 : index
    %c0_40 = arith.constant 0 : index
    %33 = vector.load %arg4[%c0_39, %c16, %c0_40] : memref<1x144x32xf32, #tpu.memory_space<vmem>>, vector<1x16x32xf32>
    %34 = vector.shape_cast %33 : vector<1x16x32xf32> to vector<16x32xf32>
    %cst_41 = arith.constant dense<0.000000e+00> : vector<512x32xf32>
    %35 = tpu.matmul %32, %34, %cst_41 {dimension_numbers = #tpu.dot_dimension_numbers<[1], [0], [0], [1], [0, 0, 1, 1], [], []>} : vector<512x16xf32>, vector<16x32xf32>, vector<512x32xf32> -> vector<512x32xf32>
    %36 = arith.addf %31, %35 : vector<512x32xf32>
    %c10 = arith.constant 10 : index
    %c0_42 = arith.constant 0 : index
    %37 = vector.load %arg20[%c10, %c0_42] : memref<560x16xf32, #tpu.memory_space<vmem>>, vector<512x16xf32>
    %c0_43 = arith.constant 0 : index
    %c32 = arith.constant 32 : index
    %c0_44 = arith.constant 0 : index
    %38 = vector.load %arg4[%c0_43, %c32, %c0_44] : memref<1x144x32xf32, #tpu.memory_space<vmem>>, vector<1x16x32xf32>
    %39 = vector.shape_cast %38 : vector<1x16x32xf32> to vector<16x32xf32>
    %cst_45 = arith.constant dense<0.000000e+00> : vector<512x32xf32>
    %40 = tpu.matmul %37, %39, %cst_45 {dimension_numbers = #tpu.dot_dimension_numbers<[1], [0], [0], [1], [0, 0, 1, 1], [], []>} : vector<512x16xf32>, vector<16x32xf32>, vector<512x32xf32> -> vector<512x32xf32>
    %41 = arith.addf %36, %40 : vector<512x32xf32>
    %c24 = arith.constant 24 : index
    %c0_46 = arith.constant 0 : index
    %42 = vector.load %arg20[%c24, %c0_46] : memref<560x16xf32, #tpu.memory_space<vmem>>, vector<512x16xf32>
    %c0_47 = arith.constant 0 : index
    %c48 = arith.constant 48 : index
    %c0_48 = arith.constant 0 : index
    %43 = vector.load %arg4[%c0_47, %c48, %c0_48] : memref<1x144x32xf32, #tpu.memory_space<vmem>>, vector<1x16x32xf32>
    %44 = vector.shape_cast %43 : vector<1x16x32xf32> to vector<16x32xf32>
    %cst_49 = arith.constant dense<0.000000e+00> : vector<512x32xf32>
    %45 = tpu.matmul %42, %44, %cst_49 {dimension_numbers = #tpu.dot_dimension_numbers<[1], [0], [0], [1], [0, 0, 1, 1], [], []>} : vector<512x16xf32>, vector<16x32xf32>, vector<512x32xf32> -> vector<512x32xf32>
    %c25 = arith.constant 25 : index
    %c0_50 = arith.constant 0 : index
    %46 = vector.load %arg20[%c25, %c0_50] : memref<560x16xf32, #tpu.memory_space<vmem>>, vector<512x16xf32>
    %c0_51 = arith.constant 0 : index
    %c64 = arith.constant 64 : index
    %c0_52 = arith.constant 0 : index
    %47 = vector.load %arg4[%c0_51, %c64, %c0_52] : memref<1x144x32xf32, #tpu.memory_space<vmem>>, vector<1x16x32xf32>
    %48 = vector.shape_cast %47 : vector<1x16x32xf32> to vector<16x32xf32>
    %cst_53 = arith.constant dense<0.000000e+00> : vector<512x32xf32>
    %49 = tpu.matmul %46, %48, %cst_53 {dimension_numbers = #tpu.dot_dimension_numbers<[1], [0], [0], [1], [0, 0, 1, 1], [], []>} : vector<512x16xf32>, vector<16x32xf32>, vector<512x32xf32> -> vector<512x32xf32>
    %50 = arith.addf %45, %49 : vector<512x32xf32>
    %c26 = arith.constant 26 : index
    %c0_54 = arith.constant 0 : index
    %51 = vector.load %arg20[%c26, %c0_54] : memref<560x16xf32, #tpu.memory_space<vmem>>, vector<512x16xf32>
    %c0_55 = arith.constant 0 : index
    %c80 = arith.constant 80 : index
    %c0_56 = arith.constant 0 : index
    %52 = vector.load %arg4[%c0_55, %c80, %c0_56] : memref<1x144x32xf32, #tpu.memory_space<vmem>>, vector<1x16x32xf32>
    %53 = vector.shape_cast %52 : vector<1x16x32xf32> to vector<16x32xf32>
    %cst_57 = arith.constant dense<0.000000e+00> : vector<512x32xf32>
    %54 = tpu.matmul %51, %53, %cst_57 {dimension_numbers = #tpu.dot_dimension_numbers<[1], [0], [0], [1], [0, 0, 1, 1], [], []>} : vector<512x16xf32>, vector<16x32xf32>, vector<512x32xf32> -> vector<512x32xf32>
    %55 = arith.addf %50, %54 : vector<512x32xf32>
    %c40 = arith.constant 40 : index
    %c0_58 = arith.constant 0 : index
    %56 = vector.load %arg20[%c40, %c0_58] : memref<560x16xf32, #tpu.memory_space<vmem>>, vector<512x16xf32>
    %c0_59 = arith.constant 0 : index
    %c96 = arith.constant 96 : index
    %c0_60 = arith.constant 0 : index
    %57 = vector.load %arg4[%c0_59, %c96, %c0_60] : memref<1x144x32xf32, #tpu.memory_space<vmem>>, vector<1x16x32xf32>
    %58 = vector.shape_cast %57 : vector<1x16x32xf32> to vector<16x32xf32>
    %cst_61 = arith.constant dense<0.000000e+00> : vector<512x32xf32>
    %59 = tpu.matmul %56, %58, %cst_61 {dimension_numbers = #tpu.dot_dimension_numbers<[1], [0], [0], [1], [0, 0, 1, 1], [], []>} : vector<512x16xf32>, vector<16x32xf32>, vector<512x32xf32> -> vector<512x32xf32>
    %c41 = arith.constant 41 : index
    %c0_62 = arith.constant 0 : index
    %60 = vector.load %arg20[%c41, %c0_62] : memref<560x16xf32, #tpu.memory_space<vmem>>, vector<512x16xf32>
    %c0_63 = arith.constant 0 : index
    %c112 = arith.constant 112 : index
    %c0_64 = arith.constant 0 : index
    %61 = vector.load %arg4[%c0_63, %c112, %c0_64] : memref<1x144x32xf32, #tpu.memory_space<vmem>>, vector<1x16x32xf32>
    %62 = vector.shape_cast %61 : vector<1x16x32xf32> to vector<16x32xf32>
    %cst_65 = arith.constant dense<0.000000e+00> : vector<512x32xf32>
    %63 = tpu.matmul %60, %62, %cst_65 {dimension_numbers = #tpu.dot_dimension_numbers<[1], [0], [0], [1], [0, 0, 1, 1], [], []>} : vector<512x16xf32>, vector<16x32xf32>, vector<512x32xf32> -> vector<512x32xf32>
    %64 = arith.addf %59, %63 : vector<512x32xf32>
    %c42 = arith.constant 42 : index
    %c0_66 = arith.constant 0 : index
    %65 = vector.load %arg20[%c42, %c0_66] : memref<560x16xf32, #tpu.memory_space<vmem>>, vector<512x16xf32>
    %c0_67 = arith.constant 0 : index
    %c128 = arith.constant 128 : index
    %c0_68 = arith.constant 0 : index
    %66 = vector.load %arg4[%c0_67, %c128, %c0_68] : memref<1x144x32xf32, #tpu.memory_space<vmem>>, vector<1x16x32xf32>
    %67 = vector.shape_cast %66 : vector<1x16x32xf32> to vector<16x32xf32>
    %cst_69 = arith.constant dense<0.000000e+00> : vector<512x32xf32>
    %68 = tpu.matmul %65, %67, %cst_69 {dimension_numbers = #tpu.dot_dimension_numbers<[1], [0], [0], [1], [0, 0, 1, 1], [], []>} : vector<512x16xf32>, vector<16x32xf32>, vector<512x32xf32> -> vector<512x32xf32>
    %69 = arith.addf %64, %68 : vector<512x32xf32>
    %70 = arith.addf %41, %55 : vector<512x32xf32>
    %71 = arith.addf %70, %69 : vector<512x32xf32>
    %c0_70 = arith.constant 0 : index
    %c0_71 = arith.constant 0 : index
    %c0_72 = arith.constant 0 : index
    %72 = vector.load %arg5[%c0_70, %c0_71, %c0_72] : memref<1x1x32xf32, #tpu.memory_space<vmem>>, vector<1x1x32xf32>
    %73 = vector.shape_cast %72 : vector<1x1x32xf32> to vector<1x32xf32>
    %74 = vector.broadcast %73 : vector<1x32xf32> to vector<512x32xf32>
    %75 = arith.addf %71, %74 : vector<512x32xf32>
    %cst_73 = arith.constant 0.000000e+00 : f32
    %76 = vector.broadcast %cst_73 : f32 to vector<512x32xf32>
    %77 = arith.maximumf %75, %76 : vector<512x32xf32>
    %c8_74 = arith.constant 8 : index
    %c0_75 = arith.constant 0 : index
    %78 = vector.load %arg21[%c8_74, %c0_75] : memref<560x32xf32, #tpu.memory_space<vmem>>, vector<512x32xf32>
    tpu.vector_store %arg21[%c8_74, %c0_75], %77 {strides = array<i32>} : memref<560x32xf32, #tpu.memory_space<vmem>>, vector<512x32xf32>,
    %c8_76 = arith.constant 8 : index
    %c0_77 = arith.constant 0 : index
    %79 = vector.load %arg21[%c8_76, %c0_77] : memref<560x32xf32, #tpu.memory_space<vmem>>, vector<512x32xf32>
    %c9_78 = arith.constant 9 : index
    %c0_79 = arith.constant 0 : index
    %80 = vector.load %arg21[%c9_78, %c0_79] : memref<560x32xf32, #tpu.memory_space<vmem>>, vector<512x32xf32>
    %81 = arith.maximumf %79, %80 : vector<512x32xf32>
    %c24_80 = arith.constant 24 : index
    %c0_81 = arith.constant 0 : index
    %82 = vector.load %arg21[%c24_80, %c0_81] : memref<560x32xf32, #tpu.memory_space<vmem>>, vector<512x32xf32>
    %83 = arith.maximumf %81, %82 : vector<512x32xf32>
    %c25_82 = arith.constant 25 : index
    %c0_83 = arith.constant 0 : index
    %84 = vector.load %arg21[%c25_82, %c0_83] : memref<560x32xf32, #tpu.memory_space<vmem>>, vector<512x32xf32>
    %85 = arith.maximumf %83, %84 : vector<512x32xf32>
    %c8_84 = arith.constant 8 : index
    %c0_85 = arith.constant 0 : index
    %86 = vector.load %arg21[%c8_84, %c0_85] : memref<560x32xf32, #tpu.memory_space<vmem>>, vector<512x32xf32>
    tpu.vector_store %arg21[%c8_84, %c0_85], %85 {strides = array<i32>} : memref<560x32xf32, #tpu.memory_space<vmem>>, vector<512x32xf32>,
    %c25_86 = arith.constant 25 : index
    %c0_87 = arith.constant 0 : index
    %87 = tpu.strided_load %arg21[%c25_86, %c0_87] {strides = array<i32: 2, 1>} : memref<560x32xf32, #tpu.memory_space<vmem>>, vector<6x32xf32>
    %c25_88 = arith.constant 25 : index
    %c0_89 = arith.constant 0 : index
    %88 = vector.load %arg22[%c25_88, %c0_89] : memref<176x32xf32, #tpu.memory_space<vmem>>, vector<6x32xf32>
    tpu.vector_store %arg22[%c25_88, %c0_89], %87 {strides = array<i32>} : memref<176x32xf32, #tpu.memory_space<vmem>>, vector<6x32xf32>,
    %c57 = arith.constant 57 : index
    %c0_90 = arith.constant 0 : index
    %89 = tpu.strided_load %arg21[%c57, %c0_90] {strides = array<i32: 2, 1>} : memref<560x32xf32, #tpu.memory_space<vmem>>, vector<6x32xf32>
    %c33 = arith.constant 33 : index
    %c0_91 = arith.constant 0 : index
    %90 = vector.load %arg22[%c33, %c0_91] : memref<176x32xf32, #tpu.memory_space<vmem>>, vector<6x32xf32>
    tpu.vector_store %arg22[%c33, %c0_91], %89 {strides = array<i32>} : memref<176x32xf32, #tpu.memory_space<vmem>>, vector<6x32xf32>,
    %c89 = arith.constant 89 : index
    %c0_92 = arith.constant 0 : index
    %91 = tpu.strided_load %arg21[%c89, %c0_92] {strides = array<i32: 2, 1>} : memref<560x32xf32, #tpu.memory_space<vmem>>, vector<6x32xf32>
    %c41_93 = arith.constant 41 : index
    %c0_94 = arith.constant 0 : index
    %92 = vector.load %arg22[%c41_93, %c0_94] : memref<176x32xf32, #tpu.memory_space<vmem>>, vector<6x32xf32>
    tpu.vector_store %arg22[%c41_93, %c0_94], %91 {strides = array<i32>} : memref<176x32xf32, #tpu.memory_space<vmem>>, vector<6x32xf32>,
    %c121 = arith.constant 121 : index
    %c0_95 = arith.constant 0 : index
    %93 = tpu.strided_load %arg21[%c121, %c0_95] {strides = array<i32: 2, 1>} : memref<560x32xf32, #tpu.memory_space<vmem>>, vector<6x32xf32>
    %c49 = arith.constant 49 : index
    %c0_96 = arith.constant 0 : index
    %94 = vector.load %arg22[%c49, %c0_96] : memref<176x32xf32, #tpu.memory_space<vmem>>, vector<6x32xf32>
    tpu.vector_store %arg22[%c49, %c0_96], %93 {strides = array<i32>} : memref<176x32xf32, #tpu.memory_space<vmem>>, vector<6x32xf32>,
    %c153 = arith.constant 153 : index
    %c0_97 = arith.constant 0 : index
    %95 = tpu.strided_load %arg21[%c153, %c0_97] {strides = array<i32: 2, 1>} : memref<560x32xf32, #tpu.memory_space<vmem>>, vector<6x32xf32>
    %c57_98 = arith.constant 57 : index
    %c0_99 = arith.constant 0 : index
    %96 = vector.load %arg22[%c57_98, %c0_99] : memref<176x32xf32, #tpu.memory_space<vmem>>, vector<6x32xf32>
    tpu.vector_store %arg22[%c57_98, %c0_99], %95 {strides = array<i32>} : memref<176x32xf32, #tpu.memory_space<vmem>>, vector<6x32xf32>,
    %c185 = arith.constant 185 : index
    %c0_100 = arith.constant 0 : index
    %97 = tpu.strided_load %arg21[%c185, %c0_100] {strides = array<i32: 2, 1>} : memref<560x32xf32, #tpu.memory_space<vmem>>, vector<6x32xf32>
    %c65 = arith.constant 65 : index
    %c0_101 = arith.constant 0 : index
    %98 = vector.load %arg22[%c65, %c0_101] : memref<176x32xf32, #tpu.memory_space<vmem>>, vector<6x32xf32>
    tpu.vector_store %arg22[%c65, %c0_101], %97 {strides = array<i32>} : memref<176x32xf32, #tpu.memory_space<vmem>>, vector<6x32xf32>,
    %c281 = arith.constant 281 : index
    %c0_102 = arith.constant 0 : index
    %99 = tpu.strided_load %arg21[%c281, %c0_102] {strides = array<i32: 2, 1>} : memref<560x32xf32, #tpu.memory_space<vmem>>, vector<6x32xf32>
    %c89_103 = arith.constant 89 : index
    %c0_104 = arith.constant 0 : index
    %100 = vector.load %arg22[%c89_103, %c0_104] : memref<176x32xf32, #tpu.memory_space<vmem>>, vector<6x32xf32>
    tpu.vector_store %arg22[%c89_103, %c0_104], %99 {strides = array<i32>} : memref<176x32xf32, #tpu.memory_space<vmem>>, vector<6x32xf32>,
    %c313 = arith.constant 313 : index
    %c0_105 = arith.constant 0 : index
    %101 = tpu.strided_load %arg21[%c313, %c0_105] {strides = array<i32: 2, 1>} : memref<560x32xf32, #tpu.memory_space<vmem>>, vector<6x32xf32>
    %c97 = arith.constant 97 : index
    %c0_106 = arith.constant 0 : index
    %102 = vector.load %arg22[%c97, %c0_106] : memref<176x32xf32, #tpu.memory_space<vmem>>, vector<6x32xf32>
    tpu.vector_store %arg22[%c97, %c0_106], %101 {strides = array<i32>} : memref<176x32xf32, #tpu.memory_space<vmem>>, vector<6x32xf32>,
    %c345 = arith.constant 345 : index
    %c0_107 = arith.constant 0 : index
    %103 = tpu.strided_load %arg21[%c345, %c0_107] {strides = array<i32: 2, 1>} : memref<560x32xf32, #tpu.memory_space<vmem>>, vector<6x32xf32>
    %c105 = arith.constant 105 : index
    %c0_108 = arith.constant 0 : index
    %104 = vector.load %arg22[%c105, %c0_108] : memref<176x32xf32, #tpu.memory_space<vmem>>, vector<6x32xf32>
    tpu.vector_store %arg22[%c105, %c0_108], %103 {strides = array<i32>} : memref<176x32xf32, #tpu.memory_space<vmem>>, vector<6x32xf32>,
    %c377 = arith.constant 377 : index
    %c0_109 = arith.constant 0 : index
    %105 = tpu.strided_load %arg21[%c377, %c0_109] {strides = array<i32: 2, 1>} : memref<560x32xf32, #tpu.memory_space<vmem>>, vector<6x32xf32>
    %c113 = arith.constant 113 : index
    %c0_110 = arith.constant 0 : index
    %106 = vector.load %arg22[%c113, %c0_110] : memref<176x32xf32, #tpu.memory_space<vmem>>, vector<6x32xf32>
    tpu.vector_store %arg22[%c113, %c0_110], %105 {strides = array<i32>} : memref<176x32xf32, #tpu.memory_space<vmem>>, vector<6x32xf32>,
    %c409 = arith.constant 409 : index
    %c0_111 = arith.constant 0 : index
    %107 = tpu.strided_load %arg21[%c409, %c0_111] {strides = array<i32: 2, 1>} : memref<560x32xf32, #tpu.memory_space<vmem>>, vector<6x32xf32>
    %c121_112 = arith.constant 121 : index
    %c0_113 = arith.constant 0 : index
    %108 = vector.load %arg22[%c121_112, %c0_113] : memref<176x32xf32, #tpu.memory_space<vmem>>, vector<6x32xf32>
    tpu.vector_store %arg22[%c121_112, %c0_113], %107 {strides = array<i32>} : memref<176x32xf32, #tpu.memory_space<vmem>>, vector<6x32xf32>,
    %c441 = arith.constant 441 : index
    %c0_114 = arith.constant 0 : index
    %109 = tpu.strided_load %arg21[%c441, %c0_114] {strides = array<i32: 2, 1>} : memref<560x32xf32, #tpu.memory_space<vmem>>, vector<6x32xf32>
    %c129 = arith.constant 129 : index
    %c0_115 = arith.constant 0 : index
    %110 = vector.load %arg22[%c129, %c0_115] : memref<176x32xf32, #tpu.memory_space<vmem>>, vector<6x32xf32>
    tpu.vector_store %arg22[%c129, %c0_115], %109 {strides = array<i32>} : memref<176x32xf32, #tpu.memory_space<vmem>>, vector<6x32xf32>,
    %c7 = arith.constant 7 : index
    %c0_116 = arith.constant 0 : index
    %111 = vector.load %arg22[%c7, %c0_116] : memref<176x32xf32, #tpu.memory_space<vmem>>, vector<128x32xf32>
    %c0_117 = arith.constant 0 : index
    %c0_118 = arith.constant 0 : index
    %c0_119 = arith.constant 0 : index
    %112 = vector.load %arg6[%c0_117, %c0_118, %c0_119] : memref<1x288x64xf32, #tpu.memory_space<vmem>>, vector<1x32x64xf32>
    %113 = vector.shape_cast %112 : vector<1x32x64xf32> to vector<32x64xf32>
    %cst_120 = arith.constant dense<0.000000e+00> : vector<128x64xf32>
    %114 = tpu.matmul %111, %113, %cst_120 {dimension_numbers = #tpu.dot_dimension_numbers<[1], [0], [0], [1], [0, 0, 1, 1], [], []>} : vector<128x32xf32>, vector<32x64xf32>, vector<128x64xf32> -> vector<128x64xf32>
    %c8_121 = arith.constant 8 : index
    %c0_122 = arith.constant 0 : index
    %115 = vector.load %arg22[%c8_121, %c0_122] : memref<176x32xf32, #tpu.memory_space<vmem>>, vector<128x32xf32>
    %c0_123 = arith.constant 0 : index
    %c32_124 = arith.constant 32 : index
    %c0_125 = arith.constant 0 : index
    %116 = vector.load %arg6[%c0_123, %c32_124, %c0_125] : memref<1x288x64xf32, #tpu.memory_space<vmem>>, vector<1x32x64xf32>
    %117 = vector.shape_cast %116 : vector<1x32x64xf32> to vector<32x64xf32>
    %cst_126 = arith.constant dense<0.000000e+00> : vector<128x64xf32>
    %118 = tpu.matmul %115, %117, %cst_126 {dimension_numbers = #tpu.dot_dimension_numbers<[1], [0], [0], [1], [0, 0, 1, 1], [], []>} : vector<128x32xf32>, vector<32x64xf32>, vector<128x64xf32> -> vector<128x64xf32>
    %119 = arith.addf %114, %118 : vector<128x64xf32>
    %c9_127 = arith.constant 9 : index
    %c0_128 = arith.constant 0 : index
    %120 = vector.load %arg22[%c9_127, %c0_128] : memref<176x32xf32, #tpu.memory_space<vmem>>, vector<128x32xf32>
    %c0_129 = arith.constant 0 : index
    %c64_130 = arith.constant 64 : index
    %c0_131 = arith.constant 0 : index
    %121 = vector.load %arg6[%c0_129, %c64_130, %c0_131] : memref<1x288x64xf32, #tpu.memory_space<vmem>>, vector<1x32x64xf32>
    %122 = vector.shape_cast %121 : vector<1x32x64xf32> to vector<32x64xf32>
    %cst_132 = arith.constant dense<0.000000e+00> : vector<128x64xf32>
    %123 = tpu.matmul %120, %122, %cst_132 {dimension_numbers = #tpu.dot_dimension_numbers<[1], [0], [0], [1], [0, 0, 1, 1], [], []>} : vector<128x32xf32>, vector<32x64xf32>, vector<128x64xf32> -> vector<128x64xf32>
    %124 = arith.addf %119, %123 : vector<128x64xf32>
    %c15 = arith.constant 15 : index
    %c0_133 = arith.constant 0 : index
    %125 = vector.load %arg22[%c15, %c0_133] : memref<176x32xf32, #tpu.memory_space<vmem>>, vector<128x32xf32>
    %c0_134 = arith.constant 0 : index
    %c96_135 = arith.constant 96 : index
    %c0_136 = arith.constant 0 : index
    %126 = vector.load %arg6[%c0_134, %c96_135, %c0_136] : memref<1x288x64xf32, #tpu.memory_space<vmem>>, vector<1x32x64xf32>
    %127 = vector.shape_cast %126 : vector<1x32x64xf32> to vector<32x64xf32>
    %cst_137 = arith.constant dense<0.000000e+00> : vector<128x64xf32>
    %128 = tpu.matmul %125, %127, %cst_137 {dimension_numbers = #tpu.dot_dimension_numbers<[1], [0], [0], [1], [0, 0, 1, 1], [], []>} : vector<128x32xf32>, vector<32x64xf32>, vector<128x64xf32> -> vector<128x64xf32>
    %c16_138 = arith.constant 16 : index
    %c0_139 = arith.constant 0 : index
    %129 = vector.load %arg22[%c16_138, %c0_139] : memref<176x32xf32, #tpu.memory_space<vmem>>, vector<128x32xf32>
    %c0_140 = arith.constant 0 : index
    %c128_141 = arith.constant 128 : index
    %c0_142 = arith.constant 0 : index
    %130 = vector.load %arg6[%c0_140, %c128_141, %c0_142] : memref<1x288x64xf32, #tpu.memory_space<vmem>>, vector<1x32x64xf32>
    %131 = vector.shape_cast %130 : vector<1x32x64xf32> to vector<32x64xf32>
    %cst_143 = arith.constant dense<0.000000e+00> : vector<128x64xf32>
    %132 = tpu.matmul %129, %131, %cst_143 {dimension_numbers = #tpu.dot_dimension_numbers<[1], [0], [0], [1], [0, 0, 1, 1], [], []>} : vector<128x32xf32>, vector<32x64xf32>, vector<128x64xf32> -> vector<128x64xf32>
    %133 = arith.addf %128, %132 : vector<128x64xf32>
    %c17 = arith.constant 17 : index
    %c0_144 = arith.constant 0 : index
    %134 = vector.load %arg22[%c17, %c0_144] : memref<176x32xf32, #tpu.memory_space<vmem>>, vector<128x32xf32>
    %c0_145 = arith.constant 0 : index
    %c160 = arith.constant 160 : index
    %c0_146 = arith.constant 0 : index
    %135 = vector.load %arg6[%c0_145, %c160, %c0_146] : memref<1x288x64xf32, #tpu.memory_space<vmem>>, vector<1x32x64xf32>
    %136 = vector.shape_cast %135 : vector<1x32x64xf32> to vector<32x64xf32>
    %cst_147 = arith.constant dense<0.000000e+00> : vector<128x64xf32>
    %137 = tpu.matmul %134, %136, %cst_147 {dimension_numbers = #tpu.dot_dimension_numbers<[1], [0], [0], [1], [0, 0, 1, 1], [], []>} : vector<128x32xf32>, vector<32x64xf32>, vector<128x64xf32> -> vector<128x64xf32>
    %138 = arith.addf %133, %137 : vector<128x64xf32>
    %c23 = arith.constant 23 : index
    %c0_148 = arith.constant 0 : index
    %139 = vector.load %arg22[%c23, %c0_148] : memref<176x32xf32, #tpu.memory_space<vmem>>, vector<128x32xf32>
    %c0_149 = arith.constant 0 : index
    %c192 = arith.constant 192 : index
    %c0_150 = arith.constant 0 : index
    %140 = vector.load %arg6[%c0_149, %c192, %c0_150] : memref<1x288x64xf32, #tpu.memory_space<vmem>>, vector<1x32x64xf32>
    %141 = vector.shape_cast %140 : vector<1x32x64xf32> to vector<32x64xf32>
    %cst_151 = arith.constant dense<0.000000e+00> : vector<128x64xf32>
    %142 = tpu.matmul %139, %141, %cst_151 {dimension_numbers = #tpu.dot_dimension_numbers<[1], [0], [0], [1], [0, 0, 1, 1], [], []>} : vector<128x32xf32>, vector<32x64xf32>, vector<128x64xf32> -> vector<128x64xf32>
    %c24_152 = arith.constant 24 : index
    %c0_153 = arith.constant 0 : index
    %143 = vector.load %arg22[%c24_152, %c0_153] : memref<176x32xf32, #tpu.memory_space<vmem>>, vector<128x32xf32>
    %c0_154 = arith.constant 0 : index
    %c224 = arith.constant 224 : index
    %c0_155 = arith.constant 0 : index
    %144 = vector.load %arg6[%c0_154, %c224, %c0_155] : memref<1x288x64xf32, #tpu.memory_space<vmem>>, vector<1x32x64xf32>
    %145 = vector.shape_cast %144 : vector<1x32x64xf32> to vector<32x64xf32>
    %cst_156 = arith.constant dense<0.000000e+00> : vector<128x64xf32>
    %146 = tpu.matmul %143, %145, %cst_156 {dimension_numbers = #tpu.dot_dimension_numbers<[1], [0], [0], [1], [0, 0, 1, 1], [], []>} : vector<128x32xf32>, vector<32x64xf32>, vector<128x64xf32> -> vector<128x64xf32>
    %147 = arith.addf %142, %146 : vector<128x64xf32>
    %c25_157 = arith.constant 25 : index
    %c0_158 = arith.constant 0 : index
    %148 = vector.load %arg22[%c25_157, %c0_158] : memref<176x32xf32, #tpu.memory_space<vmem>>, vector<128x32xf32>
    %c0_159 = arith.constant 0 : index
    %c256 = arith.constant 256 : index
    %c0_160 = arith.constant 0 : index
    %149 = vector.load %arg6[%c0_159, %c256, %c0_160] : memref<1x288x64xf32, #tpu.memory_space<vmem>>, vector<1x32x64xf32>
    %150 = vector.shape_cast %149 : vector<1x32x64xf32> to vector<32x64xf32>
    %cst_161 = arith.constant dense<0.000000e+00> : vector<128x64xf32>
    %151 = tpu.matmul %148, %150, %cst_161 {dimension_numbers = #tpu.dot_dimension_numbers<[1], [0], [0], [1], [0, 0, 1, 1], [], []>} : vector<128x32xf32>, vector<32x64xf32>, vector<128x64xf32> -> vector<128x64xf32>
    %152 = arith.addf %147, %151 : vector<128x64xf32>
    %153 = arith.addf %124, %138 : vector<128x64xf32>
    %154 = arith.addf %153, %152 : vector<128x64xf32>
    %c0_162 = arith.constant 0 : index
    %c0_163 = arith.constant 0 : index
    %c0_164 = arith.constant 0 : index
    %155 = vector.load %arg7[%c0_162, %c0_163, %c0_164] : memref<1x1x64xf32, #tpu.memory_space<vmem>>, vector<1x1x64xf32>
    %156 = vector.shape_cast %155 : vector<1x1x64xf32> to vector<1x64xf32>
    %157 = vector.broadcast %156 : vector<1x64xf32> to vector<128x64xf32>
    %158 = arith.addf %154, %157 : vector<128x64xf32>
    %cst_165 = arith.constant 0.000000e+00 : f32
    %159 = vector.broadcast %cst_165 : f32 to vector<128x64xf32>
    %160 = arith.maximumf %158, %159 : vector<128x64xf32>
    %c16_166 = arith.constant 16 : index
    %c0_167 = arith.constant 0 : index
    %161 = vector.load %arg23[%c16_166, %c0_167] : memref<176x64xf32, #tpu.memory_space<vmem>>, vector<128x64xf32>
    tpu.vector_store %arg23[%c16_166, %c0_167], %160 {strides = array<i32>} : memref<176x64xf32, #tpu.memory_space<vmem>>, vector<128x64xf32>,
    %c16_168 = arith.constant 16 : index
    %c0_169 = arith.constant 0 : index
    %162 = vector.load %arg23[%c16_168, %c0_169] : memref<176x64xf32, #tpu.memory_space<vmem>>, vector<128x64xf32>
    %c0_170 = arith.constant 0 : index
    %c0_171 = arith.constant 0 : index
    %c0_172 = arith.constant 0 : index
    %163 = vector.load %arg8[%c0_170, %c0_171, %c0_172] : memref<1x576x64xf32, #tpu.memory_space<vmem>>, vector<1x64x64xf32>
    %164 = vector.shape_cast %163 : vector<1x64x64xf32> to vector<64x64xf32>
    %cst_173 = arith.constant dense<0.000000e+00> : vector<128x64xf32>
    %165 = tpu.matmul %162, %164, %cst_173 {dimension_numbers = #tpu.dot_dimension_numbers<[1], [0], [0], [1], [0, 0, 1, 1], [], []>} : vector<128x64xf32>, vector<64x64xf32>, vector<128x64xf32> -> vector<128x64xf32>
    %c17_174 = arith.constant 17 : index
    %c0_175 = arith.constant 0 : index
    %166 = vector.load %arg23[%c17_174, %c0_175] : memref<176x64xf32, #tpu.memory_space<vmem>>, vector<128x64xf32>
    %c0_176 = arith.constant 0 : index
    %c64_177 = arith.constant 64 : index
    %c0_178 = arith.constant 0 : index
    %167 = vector.load %arg8[%c0_176, %c64_177, %c0_178] : memref<1x576x64xf32, #tpu.memory_space<vmem>>, vector<1x64x64xf32>
    %168 = vector.shape_cast %167 : vector<1x64x64xf32> to vector<64x64xf32>
    %cst_179 = arith.constant dense<0.000000e+00> : vector<128x64xf32>
    %169 = tpu.matmul %166, %168, %cst_179 {dimension_numbers = #tpu.dot_dimension_numbers<[1], [0], [0], [1], [0, 0, 1, 1], [], []>} : vector<128x64xf32>, vector<64x64xf32>, vector<128x64xf32> -> vector<128x64xf32>
    %170 = arith.addf %165, %169 : vector<128x64xf32>
    %c18 = arith.constant 18 : index
    %c0_180 = arith.constant 0 : index
    %171 = vector.load %arg23[%c18, %c0_180] : memref<176x64xf32, #tpu.memory_space<vmem>>, vector<128x64xf32>
    %c0_181 = arith.constant 0 : index
    %c128_182 = arith.constant 128 : index
    %c0_183 = arith.constant 0 : index
    %172 = vector.load %arg8[%c0_181, %c128_182, %c0_183] : memref<1x576x64xf32, #tpu.memory_space<vmem>>, vector<1x64x64xf32>
    %173 = vector.shape_cast %172 : vector<1x64x64xf32> to vector<64x64xf32>
    %cst_184 = arith.constant dense<0.000000e+00> : vector<128x64xf32>
    %174 = tpu.matmul %171, %173, %cst_184 {dimension_numbers = #tpu.dot_dimension_numbers<[1], [0], [0], [1], [0, 0, 1, 1], [], []>} : vector<128x64xf32>, vector<64x64xf32>, vector<128x64xf32> -> vector<128x64xf32>
    %175 = arith.addf %170, %174 : vector<128x64xf32>
    %c24_185 = arith.constant 24 : index
    %c0_186 = arith.constant 0 : index
    %176 = vector.load %arg23[%c24_185, %c0_186] : memref<176x64xf32, #tpu.memory_space<vmem>>, vector<128x64xf32>
    %c0_187 = arith.constant 0 : index
    %c192_188 = arith.constant 192 : index
    %c0_189 = arith.constant 0 : index
    %177 = vector.load %arg8[%c0_187, %c192_188, %c0_189] : memref<1x576x64xf32, #tpu.memory_space<vmem>>, vector<1x64x64xf32>
    %178 = vector.shape_cast %177 : vector<1x64x64xf32> to vector<64x64xf32>
    %cst_190 = arith.constant dense<0.000000e+00> : vector<128x64xf32>
    %179 = tpu.matmul %176, %178, %cst_190 {dimension_numbers = #tpu.dot_dimension_numbers<[1], [0], [0], [1], [0, 0, 1, 1], [], []>} : vector<128x64xf32>, vector<64x64xf32>, vector<128x64xf32> -> vector<128x64xf32>
    %c25_191 = arith.constant 25 : index
    %c0_192 = arith.constant 0 : index
    %180 = vector.load %arg23[%c25_191, %c0_192] : memref<176x64xf32, #tpu.memory_space<vmem>>, vector<128x64xf32>
    %c0_193 = arith.constant 0 : index
    %c256_194 = arith.constant 256 : index
    %c0_195 = arith.constant 0 : index
    %181 = vector.load %arg8[%c0_193, %c256_194, %c0_195] : memref<1x576x64xf32, #tpu.memory_space<vmem>>, vector<1x64x64xf32>
    %182 = vector.shape_cast %181 : vector<1x64x64xf32> to vector<64x64xf32>
    %cst_196 = arith.constant dense<0.000000e+00> : vector<128x64xf32>
    %183 = tpu.matmul %180, %182, %cst_196 {dimension_numbers = #tpu.dot_dimension_numbers<[1], [0], [0], [1], [0, 0, 1, 1], [], []>} : vector<128x64xf32>, vector<64x64xf32>, vector<128x64xf32> -> vector<128x64xf32>
    %184 = arith.addf %179, %183 : vector<128x64xf32>
    %c26_197 = arith.constant 26 : index
    %c0_198 = arith.constant 0 : index
    %185 = vector.load %arg23[%c26_197, %c0_198] : memref<176x64xf32, #tpu.memory_space<vmem>>, vector<128x64xf32>
    %c0_199 = arith.constant 0 : index
    %c320 = arith.constant 320 : index
    %c0_200 = arith.constant 0 : index
    %186 = vector.load %arg8[%c0_199, %c320, %c0_200] : memref<1x576x64xf32, #tpu.memory_space<vmem>>, vector<1x64x64xf32>
    %187 = vector.shape_cast %186 : vector<1x64x64xf32> to vector<64x64xf32>
    %cst_201 = arith.constant dense<0.000000e+00> : vector<128x64xf32>
    %188 = tpu.matmul %185, %187, %cst_201 {dimension_numbers = #tpu.dot_dimension_numbers<[1], [0], [0], [1], [0, 0, 1, 1], [], []>} : vector<128x64xf32>, vector<64x64xf32>, vector<128x64xf32> -> vector<128x64xf32>
    %189 = arith.addf %184, %188 : vector<128x64xf32>
    %c32_202 = arith.constant 32 : index
    %c0_203 = arith.constant 0 : index
    %190 = vector.load %arg23[%c32_202, %c0_203] : memref<176x64xf32, #tpu.memory_space<vmem>>, vector<128x64xf32>
    %c0_204 = arith.constant 0 : index
    %c384 = arith.constant 384 : index
    %c0_205 = arith.constant 0 : index
    %191 = vector.load %arg8[%c0_204, %c384, %c0_205] : memref<1x576x64xf32, #tpu.memory_space<vmem>>, vector<1x64x64xf32>
    %192 = vector.shape_cast %191 : vector<1x64x64xf32> to vector<64x64xf32>
    %cst_206 = arith.constant dense<0.000000e+00> : vector<128x64xf32>
    %193 = tpu.matmul %190, %192, %cst_206 {dimension_numbers = #tpu.dot_dimension_numbers<[1], [0], [0], [1], [0, 0, 1, 1], [], []>} : vector<128x64xf32>, vector<64x64xf32>, vector<128x64xf32> -> vector<128x64xf32>
    %c33_207 = arith.constant 33 : index
    %c0_208 = arith.constant 0 : index
    %194 = vector.load %arg23[%c33_207, %c0_208] : memref<176x64xf32, #tpu.memory_space<vmem>>, vector<128x64xf32>
    %c0_209 = arith.constant 0 : index
    %c448 = arith.constant 448 : index
    %c0_210 = arith.constant 0 : index
    %195 = vector.load %arg8[%c0_209, %c448, %c0_210] : memref<1x576x64xf32, #tpu.memory_space<vmem>>, vector<1x64x64xf32>
    %196 = vector.shape_cast %195 : vector<1x64x64xf32> to vector<64x64xf32>
    %cst_211 = arith.constant dense<0.000000e+00> : vector<128x64xf32>
    %197 = tpu.matmul %194, %196, %cst_211 {dimension_numbers = #tpu.dot_dimension_numbers<[1], [0], [0], [1], [0, 0, 1, 1], [], []>} : vector<128x64xf32>, vector<64x64xf32>, vector<128x64xf32> -> vector<128x64xf32>
    %198 = arith.addf %193, %197 : vector<128x64xf32>
    %c34 = arith.constant 34 : index
    %c0_212 = arith.constant 0 : index
    %199 = vector.load %arg23[%c34, %c0_212] : memref<176x64xf32, #tpu.memory_space<vmem>>, vector<128x64xf32>
    %c0_213 = arith.constant 0 : index
    %c512 = arith.constant 512 : index
    %c0_214 = arith.constant 0 : index
    %200 = vector.load %arg8[%c0_213, %c512, %c0_214] : memref<1x576x64xf32, #tpu.memory_space<vmem>>, vector<1x64x64xf32>
    %201 = vector.shape_cast %200 : vector<1x64x64xf32> to vector<64x64xf32>
    %cst_215 = arith.constant dense<0.000000e+00> : vector<128x64xf32>
    %202 = tpu.matmul %199, %201, %cst_215 {dimension_numbers = #tpu.dot_dimension_numbers<[1], [0], [0], [1], [0, 0, 1, 1], [], []>} : vector<128x64xf32>, vector<64x64xf32>, vector<128x64xf32> -> vector<128x64xf32>
    %203 = arith.addf %198, %202 : vector<128x64xf32>
    %204 = arith.addf %175, %189 : vector<128x64xf32>
    %205 = arith.addf %204, %203 : vector<128x64xf32>
    %c0_216 = arith.constant 0 : index
    %c0_217 = arith.constant 0 : index
    %c0_218 = arith.constant 0 : index
    %206 = vector.load %arg9[%c0_216, %c0_217, %c0_218] : memref<1x1x64xf32, #tpu.memory_space<vmem>>, vector<1x1x64xf32>
    %207 = vector.shape_cast %206 : vector<1x1x64xf32> to vector<1x64xf32>
    %208 = vector.broadcast %207 : vector<1x64xf32> to vector<128x64xf32>
    %209 = arith.addf %205, %208 : vector<128x64xf32>
    %cst_219 = arith.constant 0.000000e+00 : f32
    %210 = vector.broadcast %cst_219 : f32 to vector<128x64xf32>
    %211 = arith.maximumf %209, %210 : vector<128x64xf32>
    %c16_220 = arith.constant 16 : index
    %c0_221 = arith.constant 0 : index
    %212 = vector.load %arg23[%c16_220, %c0_221] : memref<176x64xf32, #tpu.memory_space<vmem>>, vector<128x64xf32>
    tpu.vector_store %arg23[%c16_220, %c0_221], %211 {strides = array<i32>} : memref<176x64xf32, #tpu.memory_space<vmem>>, vector<128x64xf32>,
    %c16_222 = arith.constant 16 : index
    %c0_223 = arith.constant 0 : index
    %213 = vector.load %arg23[%c16_222, %c0_223] : memref<176x64xf32, #tpu.memory_space<vmem>>, vector<128x64xf32>
    %c17_224 = arith.constant 17 : index
    %c0_225 = arith.constant 0 : index
    %214 = vector.load %arg23[%c17_224, %c0_225] : memref<176x64xf32, #tpu.memory_space<vmem>>, vector<128x64xf32>
    %215 = arith.maximumf %213, %214 : vector<128x64xf32>
    %c18_226 = arith.constant 18 : index
    %c0_227 = arith.constant 0 : index
    %216 = vector.load %arg23[%c18_226, %c0_227] : memref<176x64xf32, #tpu.memory_space<vmem>>, vector<128x64xf32>
    %217 = arith.maximumf %215, %216 : vector<128x64xf32>
    %c19 = arith.constant 19 : index
    %c0_228 = arith.constant 0 : index
    %218 = vector.load %arg23[%c19, %c0_228] : memref<176x64xf32, #tpu.memory_space<vmem>>, vector<128x64xf32>
    %219 = arith.maximumf %217, %218 : vector<128x64xf32>
    %c24_229 = arith.constant 24 : index
    %c0_230 = arith.constant 0 : index
    %220 = vector.load %arg23[%c24_229, %c0_230] : memref<176x64xf32, #tpu.memory_space<vmem>>, vector<128x64xf32>
    %221 = arith.maximumf %219, %220 : vector<128x64xf32>
    %c25_231 = arith.constant 25 : index
    %c0_232 = arith.constant 0 : index
    %222 = vector.load %arg23[%c25_231, %c0_232] : memref<176x64xf32, #tpu.memory_space<vmem>>, vector<128x64xf32>
    %223 = arith.maximumf %221, %222 : vector<128x64xf32>
    %c26_233 = arith.constant 26 : index
    %c0_234 = arith.constant 0 : index
    %224 = vector.load %arg23[%c26_233, %c0_234] : memref<176x64xf32, #tpu.memory_space<vmem>>, vector<128x64xf32>
    %225 = arith.maximumf %223, %224 : vector<128x64xf32>
    %c27 = arith.constant 27 : index
    %c0_235 = arith.constant 0 : index
    %226 = vector.load %arg23[%c27, %c0_235] : memref<176x64xf32, #tpu.memory_space<vmem>>, vector<128x64xf32>
    %227 = arith.maximumf %225, %226 : vector<128x64xf32>
    %c32_236 = arith.constant 32 : index
    %c0_237 = arith.constant 0 : index
    %228 = vector.load %arg23[%c32_236, %c0_237] : memref<176x64xf32, #tpu.memory_space<vmem>>, vector<128x64xf32>
    %229 = arith.maximumf %227, %228 : vector<128x64xf32>
    %c33_238 = arith.constant 33 : index
    %c0_239 = arith.constant 0 : index
    %230 = vector.load %arg23[%c33_238, %c0_239] : memref<176x64xf32, #tpu.memory_space<vmem>>, vector<128x64xf32>
    %231 = arith.maximumf %229, %230 : vector<128x64xf32>
    %c34_240 = arith.constant 34 : index
    %c0_241 = arith.constant 0 : index
    %232 = vector.load %arg23[%c34_240, %c0_241] : memref<176x64xf32, #tpu.memory_space<vmem>>, vector<128x64xf32>
    %233 = arith.maximumf %231, %232 : vector<128x64xf32>
    %c35 = arith.constant 35 : index
    %c0_242 = arith.constant 0 : index
    %234 = vector.load %arg23[%c35, %c0_242] : memref<176x64xf32, #tpu.memory_space<vmem>>, vector<128x64xf32>
    %235 = arith.maximumf %233, %234 : vector<128x64xf32>
    %c40_243 = arith.constant 40 : index
    %c0_244 = arith.constant 0 : index
    %236 = vector.load %arg23[%c40_243, %c0_244] : memref<176x64xf32, #tpu.memory_space<vmem>>, vector<128x64xf32>
    %237 = arith.maximumf %235, %236 : vector<128x64xf32>
    %c41_245 = arith.constant 41 : index
    %c0_246 = arith.constant 0 : index
    %238 = vector.load %arg23[%c41_245, %c0_246] : memref<176x64xf32, #tpu.memory_space<vmem>>, vector<128x64xf32>
    %239 = arith.maximumf %237, %238 : vector<128x64xf32>
    %c42_247 = arith.constant 42 : index
    %c0_248 = arith.constant 0 : index
    %240 = vector.load %arg23[%c42_247, %c0_248] : memref<176x64xf32, #tpu.memory_space<vmem>>, vector<128x64xf32>
    %241 = arith.maximumf %239, %240 : vector<128x64xf32>
    %c43 = arith.constant 43 : index
    %c0_249 = arith.constant 0 : index
    %242 = vector.load %arg23[%c43, %c0_249] : memref<176x64xf32, #tpu.memory_space<vmem>>, vector<128x64xf32>
    %243 = arith.maximumf %241, %242 : vector<128x64xf32>
    %c16_250 = arith.constant 16 : index
    %c0_251 = arith.constant 0 : index
    %244 = vector.load %arg23[%c16_250, %c0_251] : memref<176x64xf32, #tpu.memory_space<vmem>>, vector<128x64xf32>
    tpu.vector_store %arg23[%c16_250, %c0_251], %243 {strides = array<i32>} : memref<176x64xf32, #tpu.memory_space<vmem>>, vector<128x64xf32>,
    %c25_252 = arith.constant 25 : index
    %c0_253 = arith.constant 0 : index
    %245 = tpu.strided_load %arg23[%c25_252, %c0_253] {strides = array<i32: 64, 1>} : memref<176x64xf32, #tpu.memory_space<vmem>>, vector<2x64xf32>
    %c0_254 = arith.constant 0 : index
    %c0_255 = arith.constant 0 : index
    %246 = vector.load %arg24[%c0_254, %c0_255] : memref<8x64xf32, #tpu.memory_space<vmem>>, vector<2x64xf32>
    tpu.vector_store %arg24[%c0_254, %c0_255], %245 {strides = array<i32>} : memref<8x64xf32, #tpu.memory_space<vmem>>, vector<2x64xf32>,
    %c0_256 = arith.constant 0 : index
    %c0_257 = arith.constant 0 : index
    %247 = vector.load %arg24[%c0_256, %c0_257] : memref<8x64xf32, #tpu.memory_space<vmem>>, vector<8x64xf32>
    %c0_258 = arith.constant 0 : index
    %c0_259 = arith.constant 0 : index
    %c0_260 = arith.constant 0 : index
    %248 = vector.load %arg10[%c0_258, %c0_259, %c0_260] : memref<1x64x100xf32, #tpu.memory_space<vmem>>, vector<1x64x100xf32>
    %249 = vector.shape_cast %248 : vector<1x64x100xf32> to vector<64x100xf32>
    %cst_261 = arith.constant dense<0.000000e+00> : vector<8x100xf32>
    %250 = tpu.matmul %247, %249, %cst_261 {dimension_numbers = #tpu.dot_dimension_numbers<[1], [0], [0], [1], [0, 0, 1, 1], [], []>} : vector<8x64xf32>, vector<64x100xf32>, vector<8x100xf32> -> vector<8x100xf32>
    %c0_262 = arith.constant 0 : index
    %c0_263 = arith.constant 0 : index
    %c0_264 = arith.constant 0 : index
    %251 = vector.load %arg11[%c0_262, %c0_263, %c0_264] : memref<1x1x100xf32, #tpu.memory_space<vmem>>, vector<1x1x100xf32>
    %252 = vector.shape_cast %251 : vector<1x1x100xf32> to vector<1x100xf32>
    %253 = vector.broadcast %252 : vector<1x100xf32> to vector<8x100xf32>
    %254 = arith.addf %250, %253 : vector<8x100xf32>
    %cst_265 = arith.constant 0.000000e+00 : f32
    %255 = vector.broadcast %cst_265 : f32 to vector<8x100xf32>
    %256 = arith.maximumf %254, %255 : vector<8x100xf32>
    %c0_266 = arith.constant 0 : index
    %c0_267 = arith.constant 0 : index
    %c0_268 = arith.constant 0 : index
    %257 = vector.load %arg12[%c0_266, %c0_267, %c0_268] : memref<1x100x128xf32, #tpu.memory_space<vmem>>, vector<1x100x128xf32>
    %258 = vector.shape_cast %257 : vector<1x100x128xf32> to vector<100x128xf32>
    %cst_269 = arith.constant dense<0.000000e+00> : vector<8x128xf32>
    %259 = tpu.matmul %256, %258, %cst_269 {dimension_numbers = #tpu.dot_dimension_numbers<[1], [0], [0], [1], [0, 0, 1, 1], [], []>} : vector<8x100xf32>, vector<100x128xf32>, vector<8x128xf32> -> vector<8x128xf32>
    %c0_270 = arith.constant 0 : index
    %c0_271 = arith.constant 0 : index
    %c0_272 = arith.constant 0 : index
    %260 = vector.load %arg13[%c0_270, %c0_271, %c0_272] : memref<1x1x128xf32, #tpu.memory_space<vmem>>, vector<1x1x128xf32>
    %261 = vector.shape_cast %260 : vector<1x1x128xf32> to vector<1x128xf32>
    %262 = vector.broadcast %261 : vector<1x128xf32> to vector<8x128xf32>
    %263 = arith.addf %259, %262 : vector<8x128xf32>
    %c0_273 = arith.constant 0 : index
    %c0_274 = arith.constant 0 : index
    %264 = vector.load %arg18[%c0_273, %c0_274] : memref<8x128xf32, #tpu.memory_space<vmem>>, vector<8x128xf32>
    tpu.vector_store %arg18[%c0_273, %c0_274], %263 {strides = array<i32>} : memref<8x128xf32, #tpu.memory_space<vmem>>, vector<8x128xf32>,
    %c0_275 = arith.constant 0 : index
    %c0_276 = arith.constant 0 : index
    %c0_277 = arith.constant 0 : index
    %265 = vector.load %arg14[%c0_275, %c0_276, %c0_277] : memref<1x128x32xf32, #tpu.memory_space<vmem>>, vector<1x128x32xf32>
    %266 = vector.shape_cast %265 : vector<1x128x32xf32> to vector<128x32xf32>
    %cst_278 = arith.constant dense<0.000000e+00> : vector<8x32xf32>
    %267 = tpu.matmul %263, %266, %cst_278 {dimension_numbers = #tpu.dot_dimension_numbers<[1], [0], [0], [1], [0, 0, 1, 1], [], []>} : vector<8x128xf32>, vector<128x32xf32>, vector<8x32xf32> -> vector<8x32xf32>
    %c0_i32 = arith.constant 0 : i32
    %268 = arith.cmpi eq, %arg0, %c0_i32 : i32
    %269 = arith.extui %268 : i1 to i32
    %c0_i32_279 = arith.constant 0 : i32
    %270 = arith.cmpi ne, %269, %c0_i32_279 : i32
    scf.if %270 {
      %c0_281 = arith.constant 0 : index
      %c0_282 = arith.constant 0 : index
      %274 = vector.load %arg25[%c0_281, %c0_282] : memref<8x32xf32, #tpu.memory_space<vmem>>, vector<8x32xf32>
      tpu.vector_store %arg25[%c0_281, %c0_282], %267 {strides = array<i32>} : memref<8x32xf32, #tpu.memory_space<vmem>>, vector<8x32xf32>,
    } else {
    }
    %c1_i32 = arith.constant 1 : i32
    %271 = arith.cmpi eq, %arg0, %c1_i32 : i32
    %272 = arith.extui %271 : i1 to i32
    %c0_i32_280 = arith.constant 0 : i32
    %273 = arith.cmpi ne, %272, %c0_i32_280 : i32
    scf.if %273 {
      %c0_281 = arith.constant 0 : index
      %c0_282 = arith.constant 0 : index
      %274 = vector.load %arg25[%c0_281, %c0_282] : memref<8x32xf32, #tpu.memory_space<vmem>>, vector<8x32xf32>
      %275 = arith.addf %274, %267 : vector<8x32xf32>
      %c0_283 = arith.constant 0 : index
      %c0_284 = arith.constant 0 : index
      %276 = vector.load %arg15[%c0_283, %c0_284] : memref<1x32xf32, #tpu.memory_space<vmem>>, vector<1x32xf32>
      %277 = vector.broadcast %276 : vector<1x32xf32> to vector<8x32xf32>
      %278 = arith.addf %275, %277 : vector<8x32xf32>
      %cst_285 = arith.constant 0.000000e+00 : f32
      %279 = vector.broadcast %cst_285 : f32 to vector<8x32xf32>
      %280 = arith.maximumf %278, %279 : vector<8x32xf32>
      %c0_286 = arith.constant 0 : index
      %c0_287 = arith.constant 0 : index
      %281 = vector.load %arg16[%c0_286, %c0_287] : memref<32x128xf32, #tpu.memory_space<vmem>>, vector<32x128xf32>
      %cst_288 = arith.constant dense<0.000000e+00> : vector<8x128xf32>
      %282 = tpu.matmul %280, %281, %cst_288 {dimension_numbers = #tpu.dot_dimension_numbers<[1], [0], [0], [1], [0, 0, 1, 1], [], []>} : vector<8x32xf32>, vector<32x128xf32>, vector<8x128xf32> -> vector<8x128xf32>
      %c0_289 = arith.constant 0 : index
      %c0_290 = arith.constant 0 : index
      %283 = vector.load %arg17[%c0_289, %c0_290] : memref<1x128xf32, #tpu.memory_space<vmem>>, vector<1x128xf32>
      %284 = vector.broadcast %283 : vector<1x128xf32> to vector<8x128xf32>
      %285 = arith.addf %282, %284 : vector<8x128xf32>
      %c0_291 = arith.constant 0 : index
      %c0_292 = arith.constant 0 : index
      %286 = vector.load %arg19[%c0_291, %c0_292] : memref<8x128xf32, #tpu.memory_space<vmem>>, vector<8x128xf32>
      tpu.vector_store %arg19[%c0_291, %c0_292], %285 {strides = array<i32>} : memref<8x128xf32, #tpu.memory_space<vmem>>, vector<8x128xf32>,
    } else {
    }
    return
  }
  func.func @transform_0(%arg0: i32) -> (i32, i32, i32) {
    %c0_i32 = arith.constant 0 : i32
    %c0_i32_0 = arith.constant 0 : i32
    %c0_i32_1 = arith.constant 0 : i32
    return %arg0, %c0_i32, %c0_i32_0 : i32, i32, i32
  }
  func.func @transform_1(%arg0: i32) -> (i32, i32, i32) {
    %c0_i32 = arith.constant 0 : i32
    %c0_i32_0 = arith.constant 0 : i32
    %c0_i32_1 = arith.constant 0 : i32
    return %arg0, %c0_i32, %c0_i32_0 : i32, i32, i32
  }
  func.func @transform_2(%arg0: i32) -> (i32, i32, i32) {
    %c0_i32 = arith.constant 0 : i32
    %c0_i32_0 = arith.constant 0 : i32
    %c0_i32_1 = arith.constant 0 : i32
    return %arg0, %c0_i32, %c0_i32_0 : i32, i32, i32
  }
  func.func @transform_3(%arg0: i32) -> (i32, i32, i32) {
    %c0_i32 = arith.constant 0 : i32
    %c0_i32_0 = arith.constant 0 : i32
    %c0_i32_1 = arith.constant 0 : i32
    return %arg0, %c0_i32, %c0_i32_0 : i32, i32, i32
  }
  func.func @transform_4(%arg0: i32) -> (i32, i32, i32) {
    %c0_i32 = arith.constant 0 : i32
    %c0_i32_0 = arith.constant 0 : i32
    %c0_i32_1 = arith.constant 0 : i32
    return %arg0, %c0_i32, %c0_i32_0 : i32, i32, i32
  }
  func.func @transform_5(%arg0: i32) -> (i32, i32, i32) {
    %c0_i32 = arith.constant 0 : i32
    %c0_i32_0 = arith.constant 0 : i32
    %c0_i32_1 = arith.constant 0 : i32
    return %arg0, %c0_i32, %c0_i32_0 : i32, i32, i32
  }
  func.func @transform_6(%arg0: i32) -> (i32, i32, i32) {
    %c0_i32 = arith.constant 0 : i32
    %c0_i32_0 = arith.constant 0 : i32
    %c0_i32_1 = arith.constant 0 : i32
    return %arg0, %c0_i32, %c0_i32_0 : i32, i32, i32
  }
  func.func @transform_7(%arg0: i32) -> (i32, i32, i32) {
    %c0_i32 = arith.constant 0 : i32
    %c0_i32_0 = arith.constant 0 : i32
    %c0_i32_1 = arith.constant 0 : i32
    return %arg0, %c0_i32, %c0_i32_0 : i32, i32, i32
  }
  func.func @transform_8(%arg0: i32) -> (i32, i32, i32) {
    %c0_i32 = arith.constant 0 : i32
    %c0_i32_0 = arith.constant 0 : i32
    %c0_i32_1 = arith.constant 0 : i32
    return %arg0, %c0_i32, %c0_i32_0 : i32, i32, i32
  }
  func.func @transform_9(%arg0: i32) -> (i32, i32, i32) {
    %c0_i32 = arith.constant 0 : i32
    %c0_i32_0 = arith.constant 0 : i32
    %c0_i32_1 = arith.constant 0 : i32
    return %arg0, %c0_i32, %c0_i32_0 : i32, i32, i32
  }
  func.func @transform_10(%arg0: i32) -> (i32, i32, i32) {
    %c0_i32 = arith.constant 0 : i32
    %c0_i32_0 = arith.constant 0 : i32
    %c0_i32_1 = arith.constant 0 : i32
    return %arg0, %c0_i32, %c0_i32_0 : i32, i32, i32
  }
  func.func @transform_11(%arg0: i32) -> (i32, i32, i32) {
    %c0_i32 = arith.constant 0 : i32
    %c0_i32_0 = arith.constant 0 : i32
    %c0_i32_1 = arith.constant 0 : i32
    return %arg0, %c0_i32, %c0_i32_0 : i32, i32, i32
  }
  func.func @transform_12(%arg0: i32) -> (i32, i32, i32) {
    %c0_i32 = arith.constant 0 : i32
    %c0_i32_0 = arith.constant 0 : i32
    %c0_i32_1 = arith.constant 0 : i32
    return %arg0, %c0_i32, %c0_i32_0 : i32, i32, i32
  }
  func.func @transform_13(%arg0: i32) -> (i32, i32, i32) {
    %c0_i32 = arith.constant 0 : i32
    %c0_i32_0 = arith.constant 0 : i32
    %c0_i32_1 = arith.constant 0 : i32
    return %arg0, %c0_i32, %c0_i32_0 : i32, i32, i32
  }
  func.func @transform_14(%arg0: i32) -> (i32, i32) {
    %c0_i32 = arith.constant 0 : i32
    %c0_i32_0 = arith.constant 0 : i32
    %c0_i32_1 = arith.constant 0 : i32
    return %c0_i32, %c0_i32_0 : i32, i32
  }
  func.func @transform_15(%arg0: i32) -> (i32, i32) {
    %c0_i32 = arith.constant 0 : i32
    %c0_i32_0 = arith.constant 0 : i32
    %c0_i32_1 = arith.constant 0 : i32
    return %c0_i32, %c0_i32_0 : i32, i32
  }
  func.func @transform_16(%arg0: i32) -> (i32, i32) {
    %c0_i32 = arith.constant 0 : i32
    %c0_i32_0 = arith.constant 0 : i32
    %c0_i32_1 = arith.constant 0 : i32
    return %c0_i32, %c0_i32_0 : i32, i32
  }
  func.func @transform_17(%arg0: i32) -> (i32, i32) {
    %c0_i32 = arith.constant 0 : i32
    %c0_i32_0 = arith.constant 0 : i32
    return %arg0, %c0_i32 : i32, i32
  }
  func.func @transform_18(%arg0: i32) -> (i32, i32) {
    %c0_i32 = arith.constant 0 : i32
    %c0_i32_0 = arith.constant 0 : i32
    %c0_i32_1 = arith.constant 0 : i32
    return %c0_i32, %c0_i32_0 : i32, i32
  }
}

</mosaic_0001>

<bundles_post_ra>
// kernel: forward.1
= control target key start
LH: loop header
LB: loop body
LE: loop exit
PB: predicated region body
PF: predicated region fallthrough
CT: control target
= control target key end

     0   :  { %s11092_s27 = smov 0   ;;  %s15336_s0 = inlined_call_operand.vmem [shape: f32[2,512,9], index: 0, kind: input, shape index: {}]   ;;  %s15337_s1 = inlined_call_operand.vmem [shape: f32[2,9,16], index: 1, kind: input, shape index: {}]   ;;  %s15338_s2 = inlined_call_operand.vmem [shape: f32[2,1,16], index: 2, kind: input, shape index: {}]   ;;  %s15339_s3 = inlined_call_operand.vmem [shape: f32[2,144,32], index: 3, kind: input, shape index: {}]   ;;  %s15340_s4 = inlined_call_operand.vmem [shape: f32[2,1,32], index: 4, kind: input, shape index: {}]   ;;  %s15341_s5 = inlined_call_operand.vmem [shape: f32[2,288,64], index: 5, kind: input, shape index: {}]   ;;  %s15342_s6 = inlined_call_operand.vmem [shape: f32[2,1,64], index: 6, kind: input, shape index: {}]   ;;  %s15343_s7 = inlined_call_operand.vmem [shape: f32[2,576,64], index: 7, kind: input, shape index: {}]   ;;  %s15344_s8 = inlined_call_operand.vmem [shape: f32[2,1,64], index: 8, kind: input, shape index: {}]   ;;  %s15345_s9 = inlined_call_operand.vmem [shape: f32[2,64,100], index: 9, kind: input, shape index: {}]   ;;  %s15346_s10 = inlined_call_operand.vmem [shape: f32[2,1,100], index: 10, kind: input, shape index: {}]   ;;  %s15347_s11 = inlined_call_operand.vmem [shape: f32[2,100,128], index: 11, kind: input, shape index: {}]   ;;  %s15348_s12 = inlined_call_operand.vmem [shape: f32[2,1,128], index: 12, kind: input, shape index: {}]   ;;  %s15349_s13 = inlined_call_operand.vmem [shape: f32[2,128,32], index: 13, kind: input, shape index: {}]   ;;  %s15350_s14 = inlined_call_operand.vmem [shape: f32[1,32], index: 14, kind: input, shape index: {}]   ;;  %s15351_s15 = inlined_call_operand.vmem [shape: f32[32,128], index: 15, kind: input, shape index: {}]   ;;  %s15352_s16 = inlined_call_operand.vmem [shape: f32[1,128], index: 16, kind: input, shape index: {}]   ;;  %s15353_s17 = inlined_call_operand.vmem [shape: f32[16,128], index: 17, kind: output, shape index: {0}]   ;;  %s15354_s18 = inlined_call_operand.vmem [shape: f32[8,128], index: 18, kind: output, shape index: {1}]  }
   0x1   :  { %15364 = sst [smem:[#allocation127_spill]] %s15336_s0 }
   0x2   :  { %15365 = sst [smem:[#allocation128_spill]] %s15337_s1 }
   0x3   :  { %15366 = sst [smem:[#allocation129_spill]] %s15338_s2 }
   0x4 LB: > { %s11098_s28 = sadd.s32 4294967295, %s10994_s27   ;;  %p9989_p0 = scmp.ge.s32.totalorder %s10994_s27, 1  ;;  %s10994_s27 = sphi %s11092_s27, %s29_s27  }
   0x5   : > { %p628_p1 = scmp.lt.s32.totalorder %s10994_s27, 3 }
   0x7   : > { %p629_p2 = pnand %p9989_p0, %p628_p1 }
   0x9   : > { %632 = sbr.rel (%p629_p2) target bundleno = 3272 (0xcc8), region = 88 }
   0xe   : > { %p734_p3 = scmp.lt.s32.totalorder %s11098_s28, 1  ;;  %vm1103_vm0 = vcmask 1040384   ;;  %s15367_s20 = sld [smem:[#allocation128_spill]]  ;;  %vm910_vm1 = vcmask 72704   ;;  %vm821_vm2 = vcmask 130048   ;;  %v15355_v48 = vmov 0.0  }
   0xf   : > { %s15368_s23 = sld [smem:[#allocation127_spill]]  ;;  %823 = vst.msk [vmem:[#allocation2 + $0x208] sm:$0xff] %vm821_vm2, %v15355_v48  ;;  %vm796_vm3 = vcmask 261120   ;;  %vm6553_vm4 = vcmask 259072   ;;  %vm819_vm5 = vcmask 523264   ;;  %vm9678_vm6 = vcmask 1043456  }
  0x10   : > { %s11104_s29 = scalar_select %p734_p3, %s11098_s28, 1  ;;  %824 = vst.msk [vmem:[#allocation2 + $0x210] sm:$0xff] %vm821_vm2, %v15355_v48  ;;  %vm9618_vm7 = vcmask 517120   ;;  %vm9674_vm8 = vcmask 818176  }
  0x11   : > { %825 = vst.msk [vmem:[#allocation2 + $0x218] sm:$0xff] %vm821_vm2, %v15355_v48  ;;  %p10935_p4 = scmp.ne.s32.totalorder %s11098_s28, 0 }
  0x12   : > { %s10941_s30 = sshll.u32 %s11104_s29, 4  ;;  %s10940_s0 = sshll.u32 %s11104_s29, 9  ;;  %826 = vst.msk [vmem:[#allocation2 + $0x220] sm:$0xff] %vm821_vm2, %v15355_v48 }
  0x13   : > { %s10950_s19 = smul.u32 144, %s11104_s29  ;;  %827 = vst.msk [vmem:[#allocation2 + $0x228] sm:$0xff] %vm821_vm2, %v15355_v48  ;;  %s762_s2 = scalar_lea.vmem %s15342_s6, %s11104_s29 }
  0x14   : > { %s743_s21 = scalar_lea.vmem %s15367_s20, %s10941_s30  ;;  %s15369_s30 = sld [smem:[#allocation129_spill]] }
  0x15   : > { %s11114_s24 = scalar_lea.vmem %s15368_s23, %s10940_s0  ;;  %v905_v0 = vld [vmem:[%s743_s21 + $0x8] sm:$0x1]  ;;  %v904_v1 = vld [vmem:[%s743_s21] sm:$0xff]  ;;  %s11166_s21 = scalar_lea.vmem %s15339_s3, %s10950_s19 }
  0x16   : > { %10003 = vmatpush.msk.msra.mxu0 %vm1103_vm0, %v905_v0  ;;  %10944 = vmatpush.msk.msra.mxu3 %vm1103_vm0, %v905_v0  ;;  %v840_v2 = vld [vmem:[%s11114_s24] sm:$0xff]  ;;  %v898_v3 = vld [vmem:[%s11114_s24 + $0x1d0] sm:$0xff]  ;;  %v841_v4 = vld [vmem:[%s11114_s24 + $0x8] sm:$0xff]  ;;  %s10951_s22 = smul.u32 288, %s11104_s29 }
  0x17   : > { %v899_v5 = vld [vmem:[%s11114_s24 + $0x1d8] sm:$0xff]  ;;  %v842_v6 = vld [vmem:[%s11114_s24 + $0x10] sm:$0xff]  ;;  %v900_v7 = vld [vmem:[%s11114_s24 + $0x1e0] sm:$0xff]  ;;  %s10953_s25 = smul.u32 104, %s11104_s29 }
  0x18   : > { %1122 = vmatpush.msra.mxu0 %v904_v1  ;;  %10945 = vmatpush.msra.mxu3 %v904_v1  ;;  %v843_v8 = vld [vmem:[%s11114_s24 + $0x18] sm:$0xff]  ;;  %v901_v9 = vld [vmem:[%s11114_s24 + $0x1e8] sm:$0xff]  ;;  %v844_v10 = vld [vmem:[%s11114_s24 + $0x20] sm:$0xff] }
  0x19   : > { %10004 = vmatmul.msk.f32.vlgmr.msra.gmra.mxu0 %vm910_vm1, %v840_v2  ;;  %10062 = vmatmul.msk.f32.vlgmr.msra.gmra.mxu3 %vm910_vm1, %v898_v3  ;;  %v902_v11 = vld [vmem:[%s11114_s24 + $0x1f0] sm:$0xff]  ;;  %v845_v12 = vld [vmem:[%s11114_s24 + $0x28] sm:$0xff]  ;;  %v903_v13 = vld [vmem:[%s11114_s24 + $0x1f8] sm:$0xff] }
  0x1a   : > { %s11122_s0 = scalar_lea.vmem %s15369_s30, %s11104_s29  ;;  %v846_v14 = vld [vmem:[%s11114_s24 + $0x30] sm:$0xff]  ;;  %v847_v15 = vld [vmem:[%s11114_s24 + $0x38] sm:$0xff]  ;;  %v848_v16 = vld [vmem:[%s11114_s24 + $0x40] sm:$0xff]  ;;  %s12894_s30 = scalar_lea.vmem %s15340_s4, %s11104_s29 }
  0x1b   : > { %v849_v17 = vld [vmem:[%s11114_s24 + $0x48] sm:$0xff]  ;;  %v850_v18 = vld [vmem:[%s11114_s24 + $0x50] sm:$0xff]  ;;  %v851_v19 = vld [vmem:[%s11114_s24 + $0x58] sm:$0xff] }
  0x1c   : > { %v852_v20 = vld [vmem:[%s11114_s24 + $0x60] sm:$0xff]  ;;  %v853_v21 = vld [vmem:[%s11114_s24 + $0x68] sm:$0xff]  ;;  %v854_v22 = vld [vmem:[%s11114_s24 + $0x70] sm:$0xff] }
  0x1d   : > { %v1575_v23 = vld [vmem:[%s11166_s21 + $0x18] sm:$0xff]  ;;  %v1574_v24 = vld [vmem:[%s11166_s21 + $0x10] sm:$0xff]  ;;  %v3040_v25 = vld [vmem:[%s11166_s21 + $0x48] sm:$0xff] }
  0x1e   : > { %1782 = vmatpush.msra.mxu1 %v1575_v23  ;;  %10946 = vmatpush.msra.mxu2 %v1575_v23  ;;  %v2974_v26 = vld [vmem:[%s11166_s21 + $0x38] sm:$0xff]  ;;  %v11177_v28 = vld [vmem:[%s11122_s0] ss:$0 sm:$0xff]  ;;  %v857_v36 = vld [vmem:[%s11114_s24 + $0x88] sm:$0xff] }
  0x1f   : > { %10947 = vmatpush.msrb.mxu3 %v1575_v23  ;;  %3247 = vmatpush.msrb.mxu0 %v3040_v25  ;;  %v855_v27 = vld [vmem:[%s11114_s24 + $0x78] sm:$0xff]  ;;  %v856_v30 = vld [vmem:[%s11114_s24 + $0x80] sm:$0xff]  ;;  %v858_v43 = vld [vmem:[%s11114_s24 + $0x90] sm:$0xff] }
  0x20   : > { %1783 = vmatpush.msra.mxu1 %v1574_v24  ;;  %10948 = vmatpush.msra.mxu2 %v1574_v24  ;;  %v859_v52 = vld [vmem:[%s11114_s24 + $0x98] sm:$0xff]  ;;  %v860_v61 = vld [vmem:[%s11114_s24 + $0xa0] sm:$0xff]  ;;  %v1509_v62 = vld [vmem:[%s11166_s21 + $0x8] sm:$0xff] }
  0x21   : > { %10005 = vmatmul.msk.f32.gmra.mxu0 %vm910_vm1, %v841_v4  ;;  %10063 = vmatmul.msk.f32.gmra.mxu3 %vm910_vm1, %v899_v5  ;;  %v2443_v63 = vld [vmem:[%s11166_s21 + $0x28] sm:$0xff]  ;;  %v1508_v3 = vld [vmem:[%s11166_s21] sm:$0xff] }
  0x22   : > { %10949 = vmatpush.msrb.mxu3 %v1574_v24  ;;  %3648 = vmatpush.msrb.mxu1 %v2974_v26  ;;  %v2442_v4 = vld [vmem:[%s11166_s21 + $0x20] sm:$0xff]  ;;  %v863_v26 = vld [vmem:[%s11114_s24 + $0xb8] sm:$0xff] }
  0x23   : > { %2183 = vmatpush.msrb.mxu2 %v1509_v62 }
  0x24   : > { %2650 = vmatpush.msra.mxu3 %v2443_v63  ;;  %v868_v63 = vld [vmem:[%s11114_s24 + $0xe0] sm:$0xff] }
  0x25   : > { %2184 = vmatpush.msrb.mxu2 %v1508_v3 }
  0x26   : > { %2651 = vmatpush.msra.mxu3 %v2442_v4 }
  0x29   : > { %10006 = vmatmul.msk.f32.gmra.mxu0 %vm910_vm1, %v842_v6  ;;  %10064 = vmatmul.msk.f32.gmra.mxu3 %vm910_vm1, %v900_v7 }
  0x31   : > { %10007 = vmatmul.msk.f32.gmra.mxu0 %vm910_vm1, %v843_v8  ;;  %10065 = vmatmul.msk.f32.gmra.mxu3 %vm910_vm1, %v901_v9 }
  0x39   : > { %10008 = vmatmul.msk.f32.gmra.mxu0 %vm910_vm1, %v844_v10  ;;  %10066 = vmatmul.msk.f32.gmra.mxu3 %vm910_vm1, %v902_v11  ;;  %v861_v10 = vld [vmem:[%s11114_s24 + $0xa8] sm:$0xff] }
  0x41   : > { %10009 = vmatmul.msk.f32.gmra.mxu0 %vm910_vm1, %v845_v12  ;;  %10067 = vmatmul.msk.f32.gmra.mxu3 %vm910_vm1, %v903_v13 }
  0x49   : > { %10010 = vmatmul.msk.f32.gmra.mxu0 %vm910_vm1, %v846_v14 }
  0x51   : > { %10011 = vmatmul.msk.f32.gmra.mxu0 %vm910_vm1, %v847_v15 }
  0x59   : > { %10012 = vmatmul.msk.f32.gmra.mxu0 %vm910_vm1, %v848_v16 }
  0x61   : > { %10013 = vmatmul.msk.f32.gmra.mxu0 %vm910_vm1, %v849_v17 }
  0x69   : > { %10014 = vmatmul.msk.f32.gmra.mxu0 %vm910_vm1, %v850_v18 }
  0x71   : > { %10015 = vmatmul.msk.f32.gmra.mxu0 %vm910_vm1, %v851_v19  ;;  %v862_v19 = vld [vmem:[%s11114_s24 + $0xb0] sm:$0xff] }
  0x79   : > { %10016 = vmatmul.msk.f32.gmra.mxu0 %vm910_vm1, %v852_v20 }
  0x81   : > { %10017 = vmatmul.msk.f32.gmra.mxu0 %vm910_vm1, %v853_v21 }
  0x89   : > { %10018 = vmatmul.msk.f32.gmra.mxu0 %vm910_vm1, %v854_v22 }
  0x91   : > { %10019 = vmatmul.msk.f32.gmra.mxu0 %vm910_vm1, %v855_v27 }
  0x96   : > { %v1124_v29 = vpop.f32.mrf.mxu0 }
  0x97   : > { %v1125_v31 = vadd.f32 %v11177_v28, %v1124_v29 }
  0x99   : > { %v1316_v32 = vmax.f32 %v1125_v31, 0.0  ;;  %10020 = vmatmul.msk.f32.gmra.mxu0 %vm910_vm1, %v856_v30 }
  0x9b   : > { %1380 = vst.msk [vmem:[#allocation2 + $0x8] sm:$0xff] %vm821_vm2, %v1316_v32 }
  0x9c   : > { %v1298_v33 = vpop.f32.mrf.mxu3 }
  0x9d   : > { %v1299_v34 = vadd.f32 %v11177_v28, %v1298_v33 }
  0x9e   : > { %v1127_v35 = vpop.f32.mrf.mxu0 }
  0x9f   : > { %v1374_v37 = vmax.f32 %v1299_v34, 0.0  ;;  %v1128_v38 = vadd.f32 %v11177_v28, %v1127_v35  ;;  %v864_v34 = vld [vmem:[%s11114_s24 + $0xc0] sm:$0xff] }
  0xa1   : > { %1438 = vst.msk [vmem:[#allocation2 + $0x1d8] sm:$0xff] %vm821_vm2, %v1374_v37  ;;  %v1317_v39 = vmax.f32 %v1128_v38, 0.0  ;;  %10021 = vmatmul.msk.f32.gmra.mxu0 %vm910_vm1, %v857_v36 }
  0xa2   : > { %v1444_v36 = vld [vmem:[#allocation2 + $0x8] sm:$0xff] }
  0xa3   : > { %1381 = vst.msk [vmem:[#allocation2 + $0x10] sm:$0xff] %vm821_vm2, %v1317_v39 }
  0xa4   : > { %v1301_v40 = vpop.f32.mrf.mxu3 }
  0xa5   : > { %v1302_v41 = vadd.f32 %v11177_v28, %v1301_v40 }
  0xa6   : > { %v1130_v42 = vpop.f32.mrf.mxu0 }
  0xa7   : > { %v1375_v44 = vmax.f32 %v1302_v41, 0.0  ;;  %v1131_v45 = vadd.f32 %v11177_v28, %v1130_v42  ;;  %v865_v41 = vld [vmem:[%s11114_s24 + $0xc8] sm:$0xff] }
  0xa9   : > { %1439 = vst.msk [vmem:[#allocation2 + $0x1e0] sm:$0xff] %vm821_vm2, %v1375_v44  ;;  %v1318_v46 = vmax.f32 %v1131_v45, 0.0  ;;  %10022 = vmatmul.msk.f32.gmra.mxu0 %vm910_vm1, %v858_v43 }
  0xaa   : > { %v1510_v47 = vld [vmem:[#allocation2 + $0x9] sm:$0xff] }
  0xab   : > { %1382 = vst.msk [vmem:[#allocation2 + $0x18] sm:$0xff] %vm821_vm2, %v1318_v46  ;;  %10068 = vmatmul.msk.f32.vlgmr.msra.gmra.mxu1 %vm821_vm2, %v1510_v47  ;;  %v2378_v38 = vld [vmem:[#allocation2 + $0xa] sm:$0xff] }
  0xac   : > { %v1304_v49 = vpop.f32.mrf.mxu3  ;;  %v1445_v43 = vld [vmem:[#allocation2 + $0x10] sm:$0xff] }
  0xad   : > { %v1305_v50 = vadd.f32 %v11177_v28, %v1304_v49  ;;  %v866_v49 = vld [vmem:[%s11114_s24 + $0xd0] sm:$0xff] }
  0xae   : > { %v1133_v51 = vpop.f32.mrf.mxu0 }
  0xaf   : > { %v1376_v53 = vmax.f32 %v1305_v50, 0.0  ;;  %v1134_v54 = vadd.f32 %v11177_v28, %v1133_v51 }
  0xb0   : > { %v1568_v55 = vld [vmem:[#allocation2 + $0x1d9] sm:$0xff] }
  0xb1   : > { %1440 = vst.msk [vmem:[#allocation2 + $0x1e8] sm:$0xff] %vm821_vm2, %v1376_v53  ;;  %v1319_v56 = vmax.f32 %v1134_v54, 0.0  ;;  %10023 = vmatmul.msk.f32.gmra.mxu0 %vm910_vm1, %v859_v52  ;;  %10126 = vmatmul.msk.f32.vlgmr.msra.gmra.mxu2 %vm821_vm2, %v1568_v55 }
  0xb2   : > { %v1511_v57 = vld [vmem:[#allocation2 + $0x11] sm:$0xff] }
  0xb3   : > { %1383 = vst.msk [vmem:[#allocation2 + $0x20] sm:$0xff] %vm821_vm2, %v1319_v56  ;;  %10069 = vmatmul.msk.f32.gmra.mxu1 %vm821_vm2, %v1511_v57  ;;  %v2379_v45 = vld [vmem:[#allocation2 + $0x12] sm:$0xff] }
  0xb4   : > { %v1307_v58 = vpop.f32.mrf.mxu3  ;;  %v1446_v51 = vld [vmem:[#allocation2 + $0x18] sm:$0xff] }
  0xb5   : > { %v1308_v59 = vadd.f32 %v11177_v28, %v1307_v58  ;;  %v867_v56 = vld [vmem:[%s11114_s24 + $0xd8] sm:$0xff] }
  0xb6   : > { %v1136_v60 = vpop.f32.mrf.mxu0 }
  0xb7   : > { %v1377_v0 = vmax.f32 %v1308_v59, 0.0  ;;  %v1137_v1 = vadd.f32 %v11177_v28, %v1136_v60 }
  0xb8   : > { %v1569_v2 = vld [vmem:[#allocation2 + $0x1e1] sm:$0xff] }
  0xb9   : > { %1441 = vst.msk [vmem:[#allocation2 + $0x1f0] sm:$0xff] %vm821_vm2, %v1377_v0  ;;  %v1320_v5 = vmax.f32 %v1137_v1, 0.0  ;;  %10024 = vmatmul.msk.f32.gmra.mxu0 %vm910_vm1, %v860_v61  ;;  %10127 = vmatmul.msk.f32.gmra.mxu2 %vm821_vm2, %v1569_v2 }
  0xba   : > { %v1512_v6 = vld [vmem:[#allocation2 + $0x19] sm:$0xff] }
  0xbb   : > { %1384 = vst.msk [vmem:[#allocation2 + $0x28] sm:$0xff] %vm821_vm2, %v1320_v5  ;;  %10070 = vmatmul.msk.f32.gmra.mxu1 %vm821_vm2, %v1512_v6  ;;  %v2380_v53 = vld [vmem:[#allocation2 + $0x1a] sm:$0xff]  ;;  %v869_v6 = vld [vmem:[%s11114_s24 + $0xe8] sm:$0xff] }
  0xbc   : > { %v1310_v7 = vpop.f32.mrf.mxu3  ;;  %v1447_v58 = vld [vmem:[#allocation2 + $0x20] sm:$0xff] }
  0xbd   : > { %v1311_v8 = vadd.f32 %v11177_v28, %v1310_v7 }
  0xbe   : > { %v1139_v9 = vpop.f32.mrf.mxu0 }
  0xbf   : > { %v1378_v11 = vmax.f32 %v1311_v8, 0.0  ;;  %v1140_v12 = vadd.f32 %v11177_v28, %v1139_v9 }
  0xc0   : > { %v1570_v13 = vld [vmem:[#allocation2 + $0x1e9] sm:$0xff] }
  0xc1   : > { %1442 = vst.msk [vmem:[#allocation2 + $0x1f8] sm:$0xff] %vm821_vm2, %v1378_v11  ;;  %v1321_v14 = vmax.f32 %v1140_v12, 0.0  ;;  %10025 = vmatmul.msk.f32.gmra.mxu0 %vm910_vm1, %v861_v10  ;;  %10128 = vmatmul.msk.f32.gmra.mxu2 %vm821_vm2, %v1570_v13  ;;  %v870_v13 = vld [vmem:[%s11114_s24 + $0xf0] sm:$0xff] }
  0xc2   : > { %v1513_v15 = vld [vmem:[#allocation2 + $0x21] sm:$0xff] }
  0xc3   : > { %1385 = vst.msk [vmem:[#allocation2 + $0x30] sm:$0xff] %vm821_vm2, %v1321_v14  ;;  %10071 = vmatmul.msk.f32.gmra.mxu1 %vm821_vm2, %v1513_v15  ;;  %v2381_v60 = vld [vmem:[#allocation2 + $0x22] sm:$0xff] }
  0xc4   : > { %v1313_v16 = vpop.f32.mrf.mxu3  ;;  %v1448_v1 = vld [vmem:[#allocation2 + $0x28] sm:$0xff] }
  0xc5   : > { %v1314_v17 = vadd.f32 %v11177_v28, %v1313_v16 }
  0xc6   : > { %v1142_v18 = vpop.f32.mrf.mxu0 }
  0xc7   : > { %v1379_v20 = vmax.f32 %v1314_v17, 0.0  ;;  %v1143_v21 = vadd.f32 %v11177_v28, %v1142_v18 }
  0xc8   : > { %v1571_v22 = vld [vmem:[#allocation2 + $0x1f1] sm:$0xff] }
  0xc9   : > { %1443 = vst.msk [vmem:[#allocation2 + $0x200] sm:$0xff] %vm821_vm2, %v1379_v20  ;;  %v1322_v23 = vmax.f32 %v1143_v21, 0.0  ;;  %10026 = vmatmul.msk.f32.gmra.mxu0 %vm910_vm1, %v862_v19  ;;  %10129 = vmatmul.msk.f32.gmra.mxu2 %vm821_vm2, %v1571_v22  ;;  %v871_v20 = vld [vmem:[%s11114_s24 + $0xf8] sm:$0xff] }
  0xca   : > { %v1514_v24 = vld [vmem:[#allocation2 + $0x29] sm:$0xff] }
  0xcb   : > { %1386 = vst.msk [vmem:[#allocation2 + $0x38] sm:$0xff] %vm821_vm2, %v1322_v23  ;;  %10072 = vmatmul.msk.f32.gmra.mxu1 %vm821_vm2, %v1514_v24  ;;  %v2382_v3 = vld [vmem:[#allocation2 + $0x2a] sm:$0xff] }
  0xcc   : > { %v1449_v8 = vld [vmem:[#allocation2 + $0x30] sm:$0xff] }
  0xce   : > { %v1145_v25 = vpop.f32.mrf.mxu0 }
  0xcf   : > { %v1146_v27 = vadd.f32 %v11177_v28, %v1145_v25 }
  0xd0   : > { %v1572_v29 = vld [vmem:[#allocation2 + $0x1f9] sm:$0xff]  ;;  %v1573_v30 = vld [vmem:[#allocation2 + $0x201] sm:$0xff] }
  0xd1   : > { %v1323_v31 = vmax.f32 %v1146_v27, 0.0  ;;  %10027 = vmatmul.msk.f32.gmra.mxu0 %vm910_vm1, %v863_v26  ;;  %10130 = vmatmul.msk.f32.gmra.mxu2 %vm821_vm2, %v1572_v29  ;;  %v872_v27 = vld [vmem:[%s11114_s24 + $0x100] sm:$0xff] }
  0xd2   : > { %10131 = vmatmul.msk.f32.vlgmr.msrb.gmra.mxu3 %vm821_vm2, %v1573_v30  ;;  %v1515_v32 = vld [vmem:[#allocation2 + $0x31] sm:$0xff] }
  0xd3   : > { %1387 = vst.msk [vmem:[#allocation2 + $0x40] sm:$0xff] %vm821_vm2, %v1323_v31  ;;  %10073 = vmatmul.msk.f32.gmra.mxu1 %vm821_vm2, %v1515_v32  ;;  %v2383_v10 = vld [vmem:[#allocation2 + $0x32] sm:$0xff] }
  0xd4   : > { %v1450_v15 = vld [vmem:[#allocation2 + $0x38] sm:$0xff] }
  0xd6   : > { %v1148_v33 = vpop.f32.mrf.mxu0 }
  0xd7   : > { %v1149_v35 = vadd.f32 %v11177_v28, %v1148_v33 }
  0xd9   : > { %v1324_v37 = vmax.f32 %v1149_v35, 0.0  ;;  %10028 = vmatmul.msk.f32.gmra.mxu0 %vm910_vm1, %v864_v34  ;;  %10132 = vmatmul.msk.f32.vlgmr.msrb.gmra.mxu2 %vm821_vm2, %v1444_v36  ;;  %v873_v35 = vld [vmem:[%s11114_s24 + $0x108] sm:$0xff] }
  0xda   : > { %10196 = vmatmul.msk.f32.vlgmr.msra.gmra.mxu3 %vm821_vm2, %v2378_v38  ;;  %v1516_v39 = vld [vmem:[#allocation2 + $0x39] sm:$0xff] }
  0xdb   : > { %1388 = vst.msk [vmem:[#allocation2 + $0x48] sm:$0xff] %vm821_vm2, %v1324_v37  ;;  %10074 = vmatmul.msk.f32.gmra.mxu1 %vm821_vm2, %v1516_v39  ;;  %v2384_v17 = vld [vmem:[#allocation2 + $0x3a] sm:$0xff] }
  0xdc   : > { %v1451_v22 = vld [vmem:[#allocation2 + $0x40] sm:$0xff] }
  0xde   : > { %v1151_v40 = vpop.f32.mrf.mxu0 }
  0xdf   : > { %v1152_v42 = vadd.f32 %v11177_v28, %v1151_v40 }
  0xe1   : > { %v1325_v44 = vmax.f32 %v1152_v42, 0.0  ;;  %10029 = vmatmul.msk.f32.gmra.mxu0 %vm910_vm1, %v865_v41  ;;  %10133 = vmatmul.msk.f32.gmra.mxu2 %vm821_vm2, %v1445_v43  ;;  %v874_v42 = vld [vmem:[%s11114_s24 + $0x110] sm:$0xff] }
  0xe2   : > { %10197 = vmatmul.msk.f32.gmra.mxu3 %vm821_vm2, %v2379_v45  ;;  %v1517_v46 = vld [vmem:[#allocation2 + $0x41] sm:$0xff] }
  0xe3   : > { %1389 = vst.msk [vmem:[#allocation2 + $0x50] sm:$0xff] %vm821_vm2, %v1325_v44  ;;  %10075 = vmatmul.msk.f32.gmra.mxu1 %vm821_vm2, %v1517_v46  ;;  %v2385_v24 = vld [vmem:[#allocation2 + $0x42] sm:$0xff] }
  0xe4   : > { %v1452_v30 = vld [vmem:[#allocation2 + $0x48] sm:$0xff] }
  0xe6   : > { %v1154_v47 = vpop.f32.mrf.mxu0 }
  0xe7   : > { %v1155_v50 = vadd.f32 %v11177_v28, %v1154_v47 }
  0xe9   : > { %v1326_v52 = vmax.f32 %v1155_v50, 0.0  ;;  %10030 = vmatmul.msk.f32.gmra.mxu0 %vm910_vm1, %v866_v49  ;;  %10134 = vmatmul.msk.f32.gmra.mxu2 %vm821_vm2, %v1446_v51  ;;  %v875_v51 = vld [vmem:[%s11114_s24 + $0x118] sm:$0xff] }
  0xea   : > { %10198 = vmatmul.msk.f32.gmra.mxu3 %vm821_vm2, %v2380_v53  ;;  %v1518_v54 = vld [vmem:[#allocation2 + $0x49] sm:$0xff] }
  0xeb   : > { %1390 = vst.msk [vmem:[#allocation2 + $0x58] sm:$0xff] %vm821_vm2, %v1326_v52  ;;  %10076 = vmatmul.msk.f32.gmra.mxu1 %vm821_vm2, %v1518_v54  ;;  %v2386_v32 = vld [vmem:[#allocation2 + $0x4a] sm:$0xff] }
  0xec   : > { %v1453_v37 = vld [vmem:[#allocation2 + $0x50] sm:$0xff] }
  0xee   : > { %v1157_v55 = vpop.f32.mrf.mxu0 }
  0xef   : > { %v1158_v57 = vadd.f32 %v11177_v28, %v1157_v55 }
  0xf1   : > { %v1327_v59 = vmax.f32 %v1158_v57, 0.0  ;;  %10031 = vmatmul.msk.f32.gmra.mxu0 %vm910_vm1, %v867_v56  ;;  %10135 = vmatmul.msk.f32.gmra.mxu2 %vm821_vm2, %v1447_v58 }
  0xf2   : > { %10199 = vmatmul.msk.f32.gmra.mxu3 %vm821_vm2, %v2381_v60  ;;  %v1519_v61 = vld [vmem:[#allocation2 + $0x51] sm:$0xff]  ;;  %v876_v60 = vld [vmem:[%s11114_s24 + $0x120] sm:$0xff] }
  0xf3   : > { %1391 = vst.msk [vmem:[#allocation2 + $0x60] sm:$0xff] %vm821_vm2, %v1327_v59  ;;  %10077 = vmatmul.msk.f32.gmra.mxu1 %vm821_vm2, %v1519_v61  ;;  %v2387_v39 = vld [vmem:[#allocation2 + $0x52] sm:$0xff] }
  0xf4   : > { %v1454_v45 = vld [vmem:[#allocation2 + $0x58] sm:$0xff] }
  0xf6   : > { %v1160_v62 = vpop.f32.mrf.mxu0 }
  0xf7   : > { %v1161_v0 = vadd.f32 %v11177_v28, %v1160_v62 }
  0xf9   : > { %v1328_v2 = vmax.f32 %v1161_v0, 0.0  ;;  %10032 = vmatmul.msk.f32.gmra.mxu0 %vm910_vm1, %v868_v63  ;;  %10136 = vmatmul.msk.f32.gmra.mxu2 %vm821_vm2, %v1448_v1 }
  0xfa   : > { %10200 = vmatmul.msk.f32.gmra.mxu3 %vm821_vm2, %v2382_v3  ;;  %v1520_v4 = vld [vmem:[#allocation2 + $0x59] sm:$0xff] }
  0xfb   : > { %1392 = vst.msk [vmem:[#allocation2 + $0x68] sm:$0xff] %vm821_vm2, %v1328_v2  ;;  %10078 = vmatmul.msk.f32.gmra.mxu1 %vm821_vm2, %v1520_v4  ;;  %v2388_v47 = vld [vmem:[#allocation2 + $0x5a] sm:$0xff] }
  0xfc   : > { %v1455_v54 = vld [vmem:[#allocation2 + $0x60] sm:$0xff] }
  0xfe   : > { %v1163_v5 = vpop.f32.mrf.mxu0 }
  0xff   : > { %v1164_v7 = vadd.f32 %v11177_v28, %v1163_v5  ;;  %v877_v5 = vld [vmem:[%s11114_s24 + $0x128] sm:$0xff] }
 0x101   : > { %v1329_v9 = vmax.f32 %v1164_v7, 0.0  ;;  %10033 = vmatmul.msk.f32.gmra.mxu0 %vm910_vm1, %v869_v6  ;;  %10137 = vmatmul.msk.f32.gmra.mxu2 %vm821_vm2, %v1449_v8 }
 0x102   : > { %10201 = vmatmul.msk.f32.gmra.mxu3 %vm821_vm2, %v2383_v10  ;;  %v1521_v11 = vld [vmem:[#allocation2 + $0x61] sm:$0xff] }
 0x103   : > { %1393 = vst.msk [vmem:[#allocation2 + $0x70] sm:$0xff] %vm821_vm2, %v1329_v9  ;;  %10079 = vmatmul.msk.f32.gmra.mxu1 %vm821_vm2, %v1521_v11  ;;  %v2389_v56 = vld [vmem:[#allocation2 + $0x62] sm:$0xff] }
 0x104   : > { %v1456_v63 = vld [vmem:[#allocation2 + $0x68] sm:$0xff] }
 0x106   : > { %v1166_v12 = vpop.f32.mrf.mxu0 }
 0x107   : > { %v1167_v14 = vadd.f32 %v11177_v28, %v1166_v12 }
 0x109   : > { %v1330_v16 = vmax.f32 %v1167_v14, 0.0  ;;  %10034 = vmatmul.msk.f32.gmra.mxu0 %vm910_vm1, %v870_v13  ;;  %10138 = vmatmul.msk.f32.gmra.mxu2 %vm821_vm2, %v1450_v15  ;;  %v878_v14 = vld [vmem:[%s11114_s24 + $0x130] sm:$0xff] }
 0x10a   : > { %10202 = vmatmul.msk.f32.gmra.mxu3 %vm821_vm2, %v2384_v17  ;;  %v1522_v18 = vld [vmem:[#allocation2 + $0x69] sm:$0xff] }
 0x10b   : > { %1394 = vst.msk [vmem:[#allocation2 + $0x78] sm:$0xff] %vm821_vm2, %v1330_v16  ;;  %10080 = vmatmul.msk.f32.gmra.mxu1 %vm821_vm2, %v1522_v18  ;;  %v2390_v1 = vld [vmem:[#allocation2 + $0x6a] sm:$0xff] }
 0x10c   : > { %v1457_v8 = vld [vmem:[#allocation2 + $0x70] sm:$0xff] }
 0x10e   : > { %v1169_v19 = vpop.f32.mrf.mxu0 }
 0x10f   : > { %v1170_v21 = vadd.f32 %v11177_v28, %v1169_v19 }
 0x111   : > { %v1331_v23 = vmax.f32 %v1170_v21, 0.0  ;;  %10035 = vmatmul.msk.f32.gmra.mxu0 %vm910_vm1, %v871_v20  ;;  %10139 = vmatmul.msk.f32.gmra.mxu2 %vm821_vm2, %v1451_v22 }
 0x112   : > { %10203 = vmatmul.msk.f32.gmra.mxu3 %vm821_vm2, %v2385_v24  ;;  %v1523_v25 = vld [vmem:[#allocation2 + $0x71] sm:$0xff] }
 0x113   : > { %1395 = vst.msk [vmem:[#allocation2 + $0x80] sm:$0xff] %vm821_vm2, %v1331_v23  ;;  %10081 = vmatmul.msk.f32.gmra.mxu1 %vm821_vm2, %v1523_v25  ;;  %v2391_v10 = vld [vmem:[#allocation2 + $0x72] sm:$0xff] }
 0x114   : > { %v1458_v17 = vld [vmem:[#allocation2 + $0x78] sm:$0xff] }
 0x115   : > { %v879_v23 = vld [vmem:[%s11114_s24 + $0x138] sm:$0xff] }
 0x116   : > { %v1172_v26 = vpop.f32.mrf.mxu0 }
 0x117   : > { %v1173_v29 = vadd.f32 %v11177_v28, %v1172_v26 }
 0x119   : > { %v1332_v31 = vmax.f32 %v1173_v29, 0.0  ;;  %10036 = vmatmul.msk.f32.gmra.mxu0 %vm910_vm1, %v872_v27  ;;  %10140 = vmatmul.msk.f32.gmra.mxu2 %vm821_vm2, %v1452_v30 }
 0x11a   : > { %10204 = vmatmul.msk.f32.gmra.mxu3 %vm821_vm2, %v2386_v32  ;;  %v1524_v33 = vld [vmem:[#allocation2 + $0x79] sm:$0xff] }
 0x11b   : > { %1396 = vst.msk [vmem:[#allocation2 + $0x88] sm:$0xff] %vm821_vm2, %v1332_v31  ;;  %10082 = vmatmul.msk.f32.gmra.mxu1 %vm821_vm2, %v1524_v33  ;;  %v2392_v19 = vld [vmem:[#allocation2 + $0x7a] sm:$0xff] }
 0x11c   : > { %v1459_v26 = vld [vmem:[#allocation2 + $0x80] sm:$0xff] }
 0x11e   : > { %v1175_v34 = vpop.f32.mrf.mxu0 }
 0x11f   : > { %v1176_v36 = vadd.f32 %v11177_v28, %v1175_v34  ;;  %v880_v34 = vld [vmem:[%s11114_s24 + $0x140] sm:$0xff] }
 0x121   : > { %v1333_v38 = vmax.f32 %v1176_v36, 0.0  ;;  %10037 = vmatmul.msk.f32.gmra.mxu0 %vm910_vm1, %v873_v35  ;;  %10141 = vmatmul.msk.f32.gmra.mxu2 %vm821_vm2, %v1453_v37 }
 0x122   : > { %10205 = vmatmul.msk.f32.gmra.mxu3 %vm821_vm2, %v2387_v39  ;;  %v1525_v40 = vld [vmem:[#allocation2 + $0x81] sm:$0xff] }
 0x123   : > { %1397 = vst.msk [vmem:[#allocation2 + $0x90] sm:$0xff] %vm821_vm2, %v1333_v38  ;;  %10083 = vmatmul.msk.f32.gmra.mxu1 %vm821_vm2, %v1525_v40  ;;  %v2393_v29 = vld [vmem:[#allocation2 + $0x82] sm:$0xff] }
 0x124   : > { %v1460_v37 = vld [vmem:[#allocation2 + $0x88] sm:$0xff] }
 0x126   : > { %v1178_v41 = vpop.f32.mrf.mxu0 }
 0x127   : > { %v1179_v43 = vadd.f32 %v11177_v28, %v1178_v41 }
 0x128   : > { %v11321_v44 = vpop.f32.mrf.mxu1 }
 0x129   : > { %v1334_v46 = vmax.f32 %v1179_v43, 0.0  ;;  %10038 = vmatmul.msk.f32.gmra.mxu0 %vm910_vm1, %v874_v42  ;;  %10142 = vmatmul.msk.f32.gmra.mxu2 %vm821_vm2, %v1454_v45 }
 0x12a   : > { %10206 = vmatmul.msk.f32.gmra.mxu3 %vm821_vm2, %v2388_v47  ;;  %v1526_v49 = vld [vmem:[#allocation2 + $0x89] sm:$0xff] }
 0x12b   : > { %1398 = vst.msk [vmem:[#allocation2 + $0x98] sm:$0xff] %vm821_vm2, %v1334_v46  ;;  %10084 = vmatmul.msk.f32.gmra.mxu1 %vm821_vm2, %v1526_v49  ;;  %v2394_v39 = vld [vmem:[#allocation2 + $0x8a] sm:$0xff] }
 0x12c   : > { %v881_v46 = vld [vmem:[%s11114_s24 + $0x148] sm:$0xff] }
 0x12e   : > { %v1181_v50 = vpop.f32.mrf.mxu0 }
 0x12f   : > { %v1182_v52 = vadd.f32 %v11177_v28, %v1181_v50 }
 0x130   : > { %v11330_v53 = vpop.f32.mrf.mxu1 }
 0x131   : > { %v1335_v55 = vmax.f32 %v1182_v52, 0.0  ;;  %10039 = vmatmul.msk.f32.gmra.mxu0 %vm910_vm1, %v875_v51  ;;  %10143 = vmatmul.msk.f32.gmra.mxu2 %vm821_vm2, %v1455_v54  ;;  %v1461_v51 = vld [vmem:[#allocation2 + $0x90] sm:$0xff] }
 0x132   : > { %10207 = vmatmul.msk.f32.gmra.mxu3 %vm821_vm2, %v2389_v56  ;;  %v1527_v57 = vld [vmem:[#allocation2 + $0x91] sm:$0xff] }
 0x133   : > { %1399 = vst.msk [vmem:[#allocation2 + $0xa0] sm:$0xff] %vm821_vm2, %v1335_v55  ;;  %10085 = vmatmul.msk.f32.gmra.mxu1 %vm821_vm2, %v1527_v57  ;;  %v2395_v54 = vld [vmem:[#allocation2 + $0x92] sm:$0xff] }
 0x134   : > { %v11337_v58 = vpop.f32.mrf.mxu2 }
 0x136   : > { %v1184_v59 = vpop.f32.mrf.mxu0 }
 0x137   : > { %v1185_v61 = vadd.f32 %v11177_v28, %v1184_v59 }
 0x138   : > { %v11341_v62 = vpop.f32.mrf.mxu1 }
 0x139   : > { %v1336_v0 = vmax.f32 %v1185_v61, 0.0  ;;  %10040 = vmatmul.msk.f32.gmra.mxu0 %vm910_vm1, %v876_v60  ;;  %10144 = vmatmul.msk.f32.gmra.mxu2 %vm821_vm2, %v1456_v63  ;;  %v882_v60 = vld [vmem:[%s11114_s24 + $0x150] sm:$0xff] }
 0x13a   : > { %10208 = vmatmul.msk.f32.gmra.mxu3 %vm821_vm2, %v2390_v1  ;;  %v1528_v2 = vld [vmem:[#allocation2 + $0x99] sm:$0xff] }
 0x13b   : > { %1400 = vst.msk [vmem:[#allocation2 + $0xa8] sm:$0xff] %vm821_vm2, %v1336_v0  ;;  %10086 = vmatmul.msk.f32.gmra.mxu1 %vm821_vm2, %v1528_v2  ;;  %v1462_v1 = vld [vmem:[#allocation2 + $0x98] sm:$0xff] }
 0x13c   : > { %v11348_v3 = vpop.f32.mrf.mxu2 }
 0x13e   : > { %v1187_v4 = vpop.f32.mrf.mxu0 }
 0x13f   : > { %v1188_v6 = vadd.f32 %v11177_v28, %v1187_v4  ;;  %v2396_v4 = vld [vmem:[#allocation2 + $0x9a] sm:$0xff] }
 0x140   : > { %v11352_v7 = vpop.f32.mrf.mxu1 }
 0x141   : > { %v1337_v9 = vmax.f32 %v1188_v6, 0.0  ;;  %10041 = vmatmul.msk.f32.gmra.mxu0 %vm910_vm1, %v877_v5  ;;  %10145 = vmatmul.msk.f32.gmra.mxu2 %vm821_vm2, %v1457_v8 }
 0x142   : > { %10209 = vmatmul.msk.f32.gmra.mxu3 %vm821_vm2, %v2391_v10  ;;  %v1529_v11 = vld [vmem:[#allocation2 + $0xa1] sm:$0xff]  ;;  %v883_v10 = vld [vmem:[%s11114_s24 + $0x158] sm:$0xff] }
 0x143   : > { %1401 = vst.msk [vmem:[#allocation2 + $0xb0] sm:$0xff] %vm821_vm2, %v1337_v9  ;;  %10087 = vmatmul.msk.f32.gmra.mxu1 %vm821_vm2, %v1529_v11 }
 0x144   : > { %v11359_v12 = vpop.f32.mrf.mxu2 }
 0x146   : > { %v1190_v13 = vpop.f32.mrf.mxu0 }
 0x147   : > { %v1191_v15 = vadd.f32 %v11177_v28, %v1190_v13 }
 0x148   : > { %v11363_v16 = vpop.f32.mrf.mxu1 }
 0x149   : > { %v1338_v18 = vmax.f32 %v1191_v15, 0.0  ;;  %10042 = vmatmul.msk.f32.gmra.mxu0 %vm910_vm1, %v878_v14  ;;  %10146 = vmatmul.msk.f32.gmra.mxu2 %vm821_vm2, %v1458_v17  ;;  %v1463_v15 = vld [vmem:[#allocation2 + $0xa0] sm:$0xff] }
 0x14a   : > { %10210 = vmatmul.msk.f32.gmra.mxu3 %vm821_vm2, %v2392_v19  ;;  %v1530_v20 = vld [vmem:[#allocation2 + $0xa9] sm:$0xff]  ;;  %v3039_v19 = vld [vmem:[%s11166_s21 + $0x40] sm:$0xff] }
 0x14b   : > { %1402 = vst.msk [vmem:[#allocation2 + $0xb8] sm:$0xff] %vm821_vm2, %v1338_v18  ;;  %10088 = vmatmul.msk.f32.gmra.mxu1 %vm821_vm2, %v1530_v20  ;;  %v2397_v18 = vld [vmem:[#allocation2 + $0xa2] sm:$0xff]  ;;  %v2973_v20 = vld [vmem:[%s11166_s21 + $0x30] sm:$0xff]  ;;  %3248 = vmatpush.msrb.mxu0 %v3039_v19 }
 0x14c   : > { %v11370_v21 = vpop.f32.mrf.mxu2  ;;  %3649 = vmatpush.msrb.mxu1 %v2973_v20 }
 0x14e   : > { %v1193_v22 = vpop.f32.mrf.mxu0 }
 0x14f   : > { %v1194_v24 = vadd.f32 %v11177_v28, %v1193_v22 }
 0x150   : > { %v11374_v25 = vpop.f32.mrf.mxu1 }
 0x151   : > { %v1339_v27 = vmax.f32 %v1194_v24, 0.0  ;;  %10043 = vmatmul.msk.f32.gmra.mxu0 %vm910_vm1, %v879_v23  ;;  %10147 = vmatmul.msk.f32.gmra.mxu2 %vm821_vm2, %v1459_v26 }
 0x152   : > { %10211 = vmatmul.msk.f32.gmra.mxu3 %vm821_vm2, %v2393_v29  ;;  %v1531_v30 = vld [vmem:[#allocation2 + $0xb1] sm:$0xff] }
 0x153   : > { %1403 = vst.msk [vmem:[#allocation2 + $0xc0] sm:$0xff] %vm821_vm2, %v1339_v27  ;;  %10089 = vmatmul.msk.f32.gmra.mxu1 %vm821_vm2, %v1531_v30  ;;  %v884_v27 = vld [vmem:[%s11114_s24 + $0x160] sm:$0xff] }
 0x154   : > { %v11381_v31 = vpop.f32.mrf.mxu2 }
 0x155   : > { %v11383_v32 = vpop.f32.mrf.mxu3 }
 0x156   : > { %v1196_v33 = vpop.f32.mrf.mxu0 }
 0x157   : > { %v1197_v35 = vadd.f32 %v11177_v28, %v1196_v33 }
 0x158   : > { %v11387_v36 = vpop.f32.mrf.mxu1 }
 0x159   : > { %v1340_v38 = vmax.f32 %v1197_v35, 0.0  ;;  %10044 = vmatmul.msk.f32.gmra.mxu0 %vm910_vm1, %v880_v34  ;;  %10148 = vmatmul.msk.f32.gmra.mxu2 %vm821_vm2, %v1460_v37  ;;  %v1464_v34 = vld [vmem:[#allocation2 + $0xa8] sm:$0xff] }
 0x15a   : > { %10212 = vmatmul.msk.f32.gmra.mxu3 %vm821_vm2, %v2394_v39  ;;  %v1532_v40 = vld [vmem:[#allocation2 + $0xb9] sm:$0xff]  ;;  %v2398_v37 = vld [vmem:[#allocation2 + $0xaa] sm:$0xff] }
 0x15b   : > { %1404 = vst.msk [vmem:[#allocation2 + $0xc8] sm:$0xff] %vm821_vm2, %v1340_v38  ;;  %10090 = vmatmul.msk.f32.gmra.mxu1 %vm821_vm2, %v1532_v40 }
 0x15c   : > { %v2186_v41 = vpop.f32.mrf.mxu2 }
 0x15d   : > { %v2187_v42 = vadd.f32 %v2186_v41, %v11321_v44  ;;  %v2653_v43 = vpop.f32.mrf.mxu3 }
 0x15e   : > { %v1199_v45 = vpop.f32.mrf.mxu0 }
 0x15f   : > { %v11396_v47 = vadd.f32 %v2653_v43, %v2187_v42  ;;  %v1200_v49 = vadd.f32 %v11177_v28, %v1199_v45  ;;  %v885_v42 = vld [vmem:[%s11114_s24 + $0x168] sm:$0xff] }
 0x160   : > { %v11399_v50 = vpop.f32.mrf.mxu1 }
 0x161   : > { %v1341_v52 = vmax.f32 %v1200_v49, 0.0  ;;  %10045 = vmatmul.msk.f32.gmra.mxu0 %vm910_vm1, %v881_v46  ;;  %10149 = vmatmul.msk.f32.gmra.mxu2 %vm821_vm2, %v1461_v51  ;;  %v1465_v49 = vld [vmem:[#allocation2 + $0xb0] sm:$0xff] }
 0x162   : > { %10213 = vmatmul.msk.f32.gmra.mxu3 %vm821_vm2, %v2395_v54  ;;  %v1533_v44 = vld [vmem:[#allocation2 + $0xc1] sm:$0xff] }
 0x163   : > { %1405 = vst.msk [vmem:[#allocation2 + $0xd0] sm:$0xff] %vm821_vm2, %v1341_v52  ;;  %10091 = vmatmul.msk.f32.gmra.mxu1 %vm821_vm2, %v1533_v44  ;;  %v2399_v52 = vld [vmem:[#allocation2 + $0xb2] sm:$0xff] }
 0x164   : > { %v2189_v55 = vpop.f32.mrf.mxu2 }
 0x165   : > { %v2190_v56 = vadd.f32 %v2189_v55, %v11330_v53  ;;  %v2656_v57 = vpop.f32.mrf.mxu3 }
 0x166   : > { %v1202_v59 = vpop.f32.mrf.mxu0 }
 0x167   : > { %v11408_v61 = vadd.f32 %v2656_v57, %v2190_v56  ;;  %v1203_v63 = vadd.f32 %v11177_v28, %v1202_v59  ;;  %v886_v57 = vld [vmem:[%s11114_s24 + $0x170] sm:$0xff] }
 0x168   : > { %v11411_v0 = vpop.f32.mrf.mxu1 }
 0x169   : > { %v1342_v2 = vmax.f32 %v1203_v63, 0.0  ;;  %10046 = vmatmul.msk.f32.gmra.mxu0 %vm910_vm1, %v882_v60  ;;  %10150 = vmatmul.msk.f32.gmra.mxu2 %vm821_vm2, %v1462_v1  ;;  %v1466_v1 = vld [vmem:[#allocation2 + $0xb8] sm:$0xff] }
 0x16a   : > { %10214 = vmatmul.msk.f32.gmra.mxu3 %vm821_vm2, %v2396_v4  ;;  %v1534_v53 = vld [vmem:[#allocation2 + $0xc9] sm:$0xff]  ;;  %v2400_v4 = vld [vmem:[#allocation2 + $0xba] sm:$0xff] }
 0x16b   : > { %1406 = vst.msk [vmem:[#allocation2 + $0xd8] sm:$0xff] %vm821_vm2, %v1342_v2  ;;  %10092 = vmatmul.msk.f32.gmra.mxu1 %vm821_vm2, %v1534_v53 }
 0x16c   : > { %v2192_v5 = vpop.f32.mrf.mxu2 }
 0x16d   : > { %v2193_v6 = vadd.f32 %v2192_v5, %v11341_v62  ;;  %v2659_v8 = vpop.f32.mrf.mxu3 }
 0x16e   : > { %v1205_v9 = vpop.f32.mrf.mxu0 }
 0x16f   : > { %v11420_v11 = vadd.f32 %v2659_v8, %v2193_v6  ;;  %v1206_v13 = vadd.f32 %v11177_v28, %v1205_v9  ;;  %v887_v9 = vld [vmem:[%s11114_s24 + $0x178] sm:$0xff] }
 0x170   : > { %v11423_v14 = vpop.f32.mrf.mxu1 }
 0x171   : > { %v1343_v17 = vmax.f32 %v1206_v13, 0.0  ;;  %10047 = vmatmul.msk.f32.gmra.mxu0 %vm910_vm1, %v883_v10  ;;  %10151 = vmatmul.msk.f32.gmra.mxu2 %vm821_vm2, %v1463_v15 }
 0x172   : > { %10215 = vmatmul.msk.f32.gmra.mxu3 %vm821_vm2, %v2397_v18  ;;  %v1535_v62 = vld [vmem:[#allocation2 + $0xd1] sm:$0xff] }
 0x173   : > { %1407 = vst.msk [vmem:[#allocation2 + $0xe0] sm:$0xff] %vm821_vm2, %v1343_v17  ;;  %10093 = vmatmul.msk.f32.gmra.mxu1 %vm821_vm2, %v1535_v62  ;;  %v1467_v17 = vld [vmem:[#allocation2 + $0xc0] sm:$0xff] }
 0x174   : > { %v2195_v22 = vpop.f32.mrf.mxu2  ;;  %v2401_v62 = vld [vmem:[#allocation2 + $0xc2] sm:$0xff] }
 0x175   : > { %v2196_v23 = vadd.f32 %v2195_v22, %v11352_v7  ;;  %v2662_v24 = vpop.f32.mrf.mxu3 }
 0x176   : > { %v1208_v26 = vpop.f32.mrf.mxu0 }
 0x177   : > { %v11434_v29 = vadd.f32 %v2662_v24, %v2196_v23  ;;  %v1209_v30 = vadd.f32 %v11177_v28, %v1208_v26  ;;  %v888_v24 = vld [vmem:[%s11114_s24 + $0x180] sm:$0xff] }
 0x178   : > { %v11437_v33 = vpop.f32.mrf.mxu1 }
 0x179   : > { %v1344_v35 = vmax.f32 %v1209_v30, 0.0  ;;  %10048 = vmatmul.msk.f32.gmra.mxu0 %vm910_vm1, %v884_v27  ;;  %10152 = vmatmul.msk.f32.gmra.mxu2 %vm821_vm2, %v1464_v34  ;;  %v1468_v34 = vld [vmem:[#allocation2 + $0xc8] sm:$0xff] }
 0x17a   : > { %10216 = vmatmul.msk.f32.gmra.mxu3 %vm821_vm2, %v2398_v37  ;;  %v1536_v7 = vld [vmem:[#allocation2 + $0xd9] sm:$0xff]  ;;  %v2402_v37 = vld [vmem:[#allocation2 + $0xca] sm:$0xff] }
 0x17b   : > { %1408 = vst.msk [vmem:[#allocation2 + $0xe8] sm:$0xff] %vm821_vm2, %v1344_v35  ;;  %10094 = vmatmul.msk.f32.gmra.mxu1 %vm821_vm2, %v1536_v7 }
 0x17c   : > { %v2198_v38 = vpop.f32.mrf.mxu2 }
 0x17d   : > { %v2199_v39 = vadd.f32 %v2198_v38, %v11363_v16  ;;  %v2665_v40 = vpop.f32.mrf.mxu3 }
 0x17e   : > { %v1211_v41 = vpop.f32.mrf.mxu0 }
 0x17f   : > { %v11446_v43 = vadd.f32 %v2665_v40, %v2199_v39  ;;  %v1212_v45 = vadd.f32 %v11177_v28, %v1211_v41  ;;  %v889_v41 = vld [vmem:[%s11114_s24 + $0x188] sm:$0xff] }
 0x180   : > { %v11449_v46 = vpop.f32.mrf.mxu1 }
 0x181   : > { %v1345_v51 = vmax.f32 %v1212_v45, 0.0  ;;  %10049 = vmatmul.msk.f32.gmra.mxu0 %vm910_vm1, %v885_v42  ;;  %10153 = vmatmul.msk.f32.gmra.mxu2 %vm821_vm2, %v1465_v49 }
 0x182   : > { %10217 = vmatmul.msk.f32.gmra.mxu3 %vm821_vm2, %v2399_v52  ;;  %v1537_v16 = vld [vmem:[#allocation2 + $0xe1] sm:$0xff] }
 0x183   : > { %1409 = vst.msk [vmem:[#allocation2 + $0xf0] sm:$0xff] %vm821_vm2, %v1345_v51  ;;  %10095 = vmatmul.msk.f32.gmra.mxu1 %vm821_vm2, %v1537_v16  ;;  %v1469_v51 = vld [vmem:[#allocation2 + $0xd0] sm:$0xff] }
 0x184   : > { %v2201_v54 = vpop.f32.mrf.mxu2  ;;  %v2403_v16 = vld [vmem:[#allocation2 + $0xd2] sm:$0xff] }
 0x185   : > { %v2202_v44 = vadd.f32 %v2201_v54, %v11374_v25  ;;  %v2668_v55 = vpop.f32.mrf.mxu3 }
 0x186   : > { %v1214_v56 = vpop.f32.mrf.mxu0 }
 0x187   : > { %v11458_v59 = vadd.f32 %v2668_v55, %v2202_v44  ;;  %v1215_v60 = vadd.f32 %v11177_v28, %v1214_v56 }
 0x188   : > { %v11461_v63 = vpop.f32.mrf.mxu1 }
 0x189   : > { %v1346_v2 = vmax.f32 %v1215_v60, 0.0  ;;  %10050 = vmatmul.msk.f32.gmra.mxu0 %vm910_vm1, %v886_v57  ;;  %10154 = vmatmul.msk.f32.gmra.mxu2 %vm821_vm2, %v1466_v1  ;;  %v890_v57 = vld [vmem:[%s11114_s24 + $0x190] sm:$0xff] }
 0x18a   : > { %10218 = vmatmul.msk.f32.gmra.mxu3 %vm821_vm2, %v2400_v4  ;;  %v1538_v25 = vld [vmem:[#allocation2 + $0xe9] sm:$0xff]  ;;  %v1470_v4 = vld [vmem:[#allocation2 + $0xd8] sm:$0xff] }
 0x18b   : > { %1410 = vst.msk [vmem:[#allocation2 + $0xf8] sm:$0xff] %vm821_vm2, %v1346_v2  ;;  %10096 = vmatmul.msk.f32.gmra.mxu1 %vm821_vm2, %v1538_v25 }
 0x18c   : > { %v2204_v53 = vpop.f32.mrf.mxu2 }
 0x18d   : > { %v2205_v5 = vadd.f32 %v2204_v53, %v11387_v36  ;;  %v2671_v6 = vpop.f32.mrf.mxu3  ;;  %v2404_v53 = vld [vmem:[#allocation2 + $0xda] sm:$0xff] }
 0x18e   : > { %v1217_v8 = vpop.f32.mrf.mxu0 }
 0x18f   : > { %v11470_v10 = vadd.f32 %v2671_v6, %v2205_v5  ;;  %v1218_v13 = vadd.f32 %v11177_v28, %v1217_v8 }
 0x190   : > { %v11473_v15 = vpop.f32.mrf.mxu1 }
 0x191   : > { %v1347_v18 = vmax.f32 %v1218_v13, 0.0  ;;  %10051 = vmatmul.msk.f32.gmra.mxu0 %vm910_vm1, %v887_v9  ;;  %10155 = vmatmul.msk.f32.gmra.mxu2 %vm821_vm2, %v1467_v17  ;;  %v891_v13 = vld [vmem:[%s11114_s24 + $0x198] sm:$0xff] }
 0x192   : > { %10219 = vmatmul.msk.f32.gmra.mxu3 %vm821_vm2, %v2401_v62  ;;  %v1539_v36 = vld [vmem:[#allocation2 + $0xf1] sm:$0xff] }
 0x193   : > { %1411 = vst.msk [vmem:[#allocation2 + $0x100] sm:$0xff] %vm821_vm2, %v1347_v18  ;;  %10097 = vmatmul.msk.f32.gmra.mxu1 %vm821_vm2, %v1539_v36  ;;  %v1471_v36 = vld [vmem:[#allocation2 + $0xe0] sm:$0xff] }
 0x194   : > { %v2207_v19 = vpop.f32.mrf.mxu2 }
 0x195   : > { %v2208_v20 = vadd.f32 %v2207_v19, %v11399_v50  ;;  %v2674_v22 = vpop.f32.mrf.mxu3 }
 0x196   : > { %v1220_v23 = vpop.f32.mrf.mxu0 }
 0x197   : > { %v11482_v26 = vadd.f32 %v2674_v22, %v2208_v20  ;;  %v1221_v27 = vadd.f32 %v11177_v28, %v1220_v23  ;;  %v2405_v20 = vld [vmem:[#allocation2 + $0xe2] sm:$0xff] }
 0x198   : > { %v11485_v30 = vpop.f32.mrf.mxu1 }
 0x199   : > { %15370 = vst [vmem:[#allocation8_spill] sm:$0xff] %v11482_v26  ;;  %v1348_v35 = vmax.f32 %v1221_v27, 0.0  ;;  %10052 = vmatmul.msk.f32.gmra.mxu0 %vm910_vm1, %v888_v24  ;;  %10156 = vmatmul.msk.f32.gmra.mxu2 %vm821_vm2, %v1468_v34  ;;  %v892_v27 = vld [vmem:[%s11114_s24 + $0x1a0] sm:$0xff]  ;;  %v4504_v26 = vld [vmem:[%s11166_s21 + $0x70] sm:$0xff] }
 0x19a   : > { %10220 = vmatmul.msk.f32.gmra.mxu3 %vm821_vm2, %v2402_v37  ;;  %v1540_v50 = vld [vmem:[#allocation2 + $0xf9] sm:$0xff] }
 0x19b   : > { %1412 = vst.msk [vmem:[#allocation2 + $0x108] sm:$0xff] %vm821_vm2, %v1348_v35  ;;  %10098 = vmatmul.msk.f32.gmra.mxu1 %vm821_vm2, %v1540_v50  ;;  %v11533_v35 = vld [vmem:[%s11122_s0] ss:$0 sm:$0xff]  ;;  %s10952_s0 = smul.u32 576, %s11104_s29 }
 0x19c   : > { %v2210_v7 = vpop.f32.mrf.mxu2 }
 0x19d   : > { %v2211_v38 = vadd.f32 %v2210_v7, %v11411_v0  ;;  %v2677_v39 = vpop.f32.mrf.mxu3  ;;  %v1472_v7 = vld [vmem:[#allocation2 + $0xe8] sm:$0xff]  ;;  %s13700_s20 = scalar_lea.vmem %s15343_s7, %s10952_s0  ;;  %s10942_s0 = sshll.u32 %s11104_s29, 6 }
 0x19e   : > { %v1223_v40 = vpop.f32.mrf.mxu0 }
 0x19f   : > { %v11494_v42 = vadd.f32 %v2677_v39, %v2211_v38  ;;  %v1224_v45 = vadd.f32 %v11177_v28, %v1223_v40  ;;  %v2406_v39 = vld [vmem:[#allocation2 + $0xea] sm:$0xff] }
 0x1a0   : > { %v11497_v49 = vpop.f32.mrf.mxu1 }
 0x1a1   : > { %15371 = vst [vmem:[#allocation9_spill] sm:$0xff] %v11494_v42  ;;  %v1349_v52 = vmax.f32 %v1224_v45, 0.0  ;;  %10053 = vmatmul.msk.f32.gmra.mxu0 %vm910_vm1, %v889_v41  ;;  %10157 = vmatmul.msk.f32.gmra.mxu2 %vm821_vm2, %v1469_v51  ;;  %v1504_v42 = vld [vmem:[#allocation2 + $0x1e8] sm:$0xff] }
 0x1a2   : > { %10221 = vmatmul.msk.f32.gmra.mxu3 %vm821_vm2, %v2403_v16  ;;  %v1541_v0 = vld [vmem:[#allocation2 + $0x101] sm:$0xff] }
 0x1a3   : > { %1413 = vst.msk [vmem:[#allocation2 + $0x110] sm:$0xff] %vm821_vm2, %v1349_v52  ;;  %10099 = vmatmul.msk.f32.gmra.mxu1 %vm821_vm2, %v1541_v0  ;;  %v893_v52 = vld [vmem:[%s11114_s24 + $0x1a8] sm:$0xff] }
 0x1a4   : > { %v2213_v54 = vpop.f32.mrf.mxu2 }
 0x1a5   : > { %v2214_v44 = vadd.f32 %v2213_v54, %v11423_v14  ;;  %v2680_v55 = vpop.f32.mrf.mxu3 }
 0x1a6   : > { %v1226_v56 = vpop.f32.mrf.mxu0 }
 0x1a7   : > { %v11506_v60 = vadd.f32 %v2680_v55, %v2214_v44  ;;  %v1227_v1 = vadd.f32 %v11177_v28, %v1226_v56  ;;  %v1473_v44 = vld [vmem:[#allocation2 + $0xf0] sm:$0xff] }
 0x1a8   : > { %v11509_v2 = vpop.f32.mrf.mxu1  ;;  %v2407_v56 = vld [vmem:[#allocation2 + $0xf2] sm:$0xff] }
 0x1a9   : > { %15372 = vst [vmem:[#allocation10_spill] sm:$0xff] %v11506_v60  ;;  %v1350_v25 = vmax.f32 %v1227_v1, 0.0  ;;  %10054 = vmatmul.msk.f32.gmra.mxu0 %vm910_vm1, %v890_v57  ;;  %10158 = vmatmul.msk.f32.gmra.mxu2 %vm821_vm2, %v1470_v4  ;;  %v11958_v60 = vld [vmem:[#allocation2 + $0xe1] sm:$0xff] }
 0x1aa   : > { %10222 = vmatmul.msk.f32.gmra.mxu3 %vm821_vm2, %v2404_v53  ;;  %v1542_v14 = vld [vmem:[#allocation2 + $0x109] sm:$0xff] }
 0x1ab   : > { %1414 = vst.msk [vmem:[#allocation2 + $0x118] sm:$0xff] %vm821_vm2, %v1350_v25  ;;  %10100 = vmatmul.msk.f32.gmra.mxu1 %vm821_vm2, %v1542_v14  ;;  %v894_v53 = vld [vmem:[%s11114_s24 + $0x1b0] sm:$0xff] }
 0x1ac   : > { %v2216_v5 = vpop.f32.mrf.mxu2 }
 0x1ad   : > { %v2217_v6 = vadd.f32 %v2216_v5, %v11437_v33  ;;  %v2683_v8 = vpop.f32.mrf.mxu3 }
 0x1ae   : > { %v1229_v9 = vpop.f32.mrf.mxu0 }
 0x1af   : > { %v11518_v17 = vadd.f32 %v2683_v8, %v2217_v6  ;;  %v1230_v18 = vadd.f32 %v11177_v28, %v1229_v9  ;;  %v1474_v8 = vld [vmem:[#allocation2 + $0xf8] sm:$0xff] }
 0x1b0   : > { %v11521_v62 = vpop.f32.mrf.mxu1 }
 0x1b1   : > { %15373 = vst [vmem:[#allocation11_spill] sm:$0xff] %v11518_v17  ;;  %v1351_v19 = vmax.f32 %v1230_v18, 0.0  ;;  %10055 = vmatmul.msk.f32.gmra.mxu0 %vm910_vm1, %v891_v13  ;;  %10159 = vmatmul.msk.f32.gmra.mxu2 %vm821_vm2, %v1471_v36  ;;  %v2408_v13 = vld [vmem:[#allocation2 + $0xfa] sm:$0xff] }
 0x1b2   : > { %10223 = vmatmul.msk.f32.gmra.mxu3 %vm821_vm2, %v2405_v20  ;;  %v1543_v33 = vld [vmem:[#allocation2 + $0x111] sm:$0xff]  ;;  %v2436_v17 = vld [vmem:[#allocation2 + $0x1da] sm:$0xff] }
 0x1b3   : > { %1415 = vst.msk [vmem:[#allocation2 + $0x120] sm:$0xff] %vm821_vm2, %v1351_v19  ;;  %10101 = vmatmul.msk.f32.gmra.mxu1 %vm821_vm2, %v1543_v33  ;;  %v895_v33 = vld [vmem:[%s11114_s24 + $0x1b8] sm:$0xff] }
 0x1b4   : > { %v2219_v22 = vpop.f32.mrf.mxu2 }
 0x1b5   : > { %v2220_v28 = vadd.f32 %v2219_v22, %v11449_v46  ;;  %v2686_v23 = vpop.f32.mrf.mxu3 }
 0x1b6   : > { %v1232_v24 = vpop.f32.mrf.mxu0 }
 0x1b7   : > { %v11530_v34 = vadd.f32 %v2686_v23, %v2220_v28  ;;  %v1233_v37 = vadd.f32 %v11533_v35, %v1232_v24  ;;  %v1475_v24 = vld [vmem:[#allocation2 + $0x100] sm:$0xff] }
 0x1b8   : > { %v11536_v50 = vpop.f32.mrf.mxu1 }
 0x1b9   : > { %15374 = vst [vmem:[#allocation12_spill] sm:$0xff] %v11530_v34  ;;  %v1352_v38 = vmax.f32 %v1233_v37, 0.0  ;;  %10056 = vmatmul.msk.f32.gmra.mxu0 %vm910_vm1, %v892_v27  ;;  %10160 = vmatmul.msk.f32.gmra.mxu2 %vm821_vm2, %v1472_v7  ;;  %v2409_v37 = vld [vmem:[#allocation2 + $0x102] sm:$0xff]  ;;  %v11944_v34 = vld [vmem:[#allocation2 + $0xd9] sm:$0xff] }
 0x1ba   : > { %10224 = vmatmul.msk.f32.gmra.mxu3 %vm821_vm2, %v2406_v39  ;;  %v1544_v46 = vld [vmem:[#allocation2 + $0x119] sm:$0xff] }
 0x1bb   : > { %1416 = vst.msk [vmem:[#allocation2 + $0x128] sm:$0xff] %vm821_vm2, %v1352_v38  ;;  %10102 = vmatmul.msk.f32.gmra.mxu1 %vm821_vm2, %v1544_v46 }
 0x1bc   : > { %v2222_v40 = vpop.f32.mrf.mxu2 }
 0x1bd   : > { %v2223_v41 = vadd.f32 %v2222_v40, %v11461_v63  ;;  %v2689_v45 = vpop.f32.mrf.mxu3  ;;  %v896_v40 = vld [vmem:[%s11114_s24 + $0x1c0] sm:$0xff] }
 0x1be   : > { %v1235_v51 = vpop.f32.mrf.mxu0 }
 0x1bf   : > { %v11545_v16 = vadd.f32 %v2689_v45, %v2223_v41  ;;  %v1236_v0 = vadd.f32 %v11533_v35, %v1235_v51 }
 0x1c0   : > { %v11548_v54 = vpop.f32.mrf.mxu1 }
 0x1c1   : > { %15375 = vst [vmem:[#allocation13_spill] sm:$0xff] %v11545_v16  ;;  %v1353_v55 = vmax.f32 %v1236_v0, 0.0  ;;  %10057 = vmatmul.msk.f32.gmra.mxu0 %vm910_vm1, %v893_v52  ;;  %10161 = vmatmul.msk.f32.gmra.mxu2 %vm821_vm2, %v1473_v44  ;;  %v1476_v52 = vld [vmem:[#allocation2 + $0x108] sm:$0xff] }
 0x1c2   : > { %10225 = vmatmul.msk.f32.gmra.mxu3 %vm821_vm2, %v2407_v56  ;;  %v1545_v63 = vld [vmem:[#allocation2 + $0x121] sm:$0xff]  ;;  %v2410_v44 = vld [vmem:[#allocation2 + $0x10a] sm:$0xff] }
 0x1c3   : > { %1417 = vst.msk [vmem:[#allocation2 + $0x130] sm:$0xff] %vm821_vm2, %v1353_v55  ;;  %10103 = vmatmul.msk.f32.gmra.mxu1 %vm821_vm2, %v1545_v63 }
 0x1c4   : > { %v2225_v57 = vpop.f32.mrf.mxu2 }
 0x1c5   : > { %v2226_v1 = vadd.f32 %v2225_v57, %v11473_v15  ;;  %v2692_v4 = vpop.f32.mrf.mxu3 }
 0x1c6   : > { %v1238_v25 = vpop.f32.mrf.mxu0 }
 0x1c7   : > { %v11557_v14 = vadd.f32 %v2692_v4, %v2226_v1  ;;  %v1239_v5 = vadd.f32 %v11533_v35, %v1238_v25  ;;  %v897_v1 = vld [vmem:[%s11114_s24 + $0x1c8] sm:$0xff]  ;;  %s12810_s24 = scalar_lea.vmem %s15341_s5, %s10951_s22 }
 0x1c8   : > { %v11560_v6 = vpop.f32.mrf.mxu1 }
 0x1c9   : > { %15376 = vst [vmem:[#allocation14_spill] sm:$0xff] %v11557_v14  ;;  %v1354_v9 = vmax.f32 %v1239_v5, 0.0  ;;  %10058 = vmatmul.msk.f32.gmra.mxu0 %vm910_vm1, %v894_v53  ;;  %10162 = vmatmul.msk.f32.gmra.mxu2 %vm821_vm2, %v1474_v8  ;;  %v1477_v5 = vld [vmem:[#allocation2 + $0x110] sm:$0xff] }
 0x1ca   : > { %10226 = vmatmul.msk.f32.gmra.mxu3 %vm821_vm2, %v2408_v13  ;;  %v1546_v15 = vld [vmem:[#allocation2 + $0x129] sm:$0xff]  ;;  %v11930_v14 = vld [vmem:[#allocation2 + $0xd1] sm:$0xff] }
 0x1cb   : > { %1418 = vst.msk [vmem:[#allocation2 + $0x138] sm:$0xff] %vm821_vm2, %v1354_v9  ;;  %10104 = vmatmul.msk.f32.gmra.mxu1 %vm821_vm2, %v1546_v15  ;;  %v2411_v9 = vld [vmem:[#allocation2 + $0x112] sm:$0xff] }
 0x1cc   : > { %v2228_v18 = vpop.f32.mrf.mxu2 }
 0x1cd   : > { %v2229_v36 = vadd.f32 %v2228_v18, %v11485_v30  ;;  %v2695_v19 = vpop.f32.mrf.mxu3 }
 0x1ce   : > { %v1241_v20 = vpop.f32.mrf.mxu0 }
 0x1cf   : > { %v11569_v22 = vadd.f32 %v2695_v19, %v2229_v36  ;;  %v1242_v28 = vadd.f32 %v11533_v35, %v1241_v20 }
 0x1d0   : > { %v11572_v23 = vpop.f32.mrf.mxu1 }
 0x1d1   : > { %15377 = vst [vmem:[#allocation15_spill] sm:$0xff] %v11569_v22  ;;  %v1355_v27 = vmax.f32 %v1242_v28, 0.0  ;;  %10059 = vmatmul.msk.f32.gmra.mxu0 %vm910_vm1, %v895_v33  ;;  %10163 = vmatmul.msk.f32.gmra.mxu2 %vm821_vm2, %v1475_v24  ;;  %v1478_v28 = vld [vmem:[#allocation2 + $0x118] sm:$0xff] }
 0x1d2   : > { %10227 = vmatmul.msk.f32.gmra.mxu3 %vm821_vm2, %v2409_v37  ;;  %v1547_v30 = vld [vmem:[#allocation2 + $0x131] sm:$0xff]  ;;  %v2975_v24 = vld [vmem:[#allocation2 + $0x19] sm:$0xff] }
 0x1d3   : > { %1419 = vst.msk [vmem:[#allocation2 + $0x140] sm:$0xff] %vm821_vm2, %v1355_v27  ;;  %10105 = vmatmul.msk.f32.gmra.mxu1 %vm821_vm2, %v1547_v30  ;;  %v2412_v37 = vld [vmem:[#allocation2 + $0x11a] sm:$0xff] }
 0x1d4   : > { %v2231_v7 = vpop.f32.mrf.mxu2 }
 0x1d5   : > { %v2232_v38 = vadd.f32 %v2231_v7, %v11497_v49  ;;  %v2698_v39 = vpop.f32.mrf.mxu3 }
 0x1d6   : > { %v1244_v46 = vpop.f32.mrf.mxu0 }
 0x1d7   : > { %v11581_v41 = vadd.f32 %v2698_v39, %v2232_v38  ;;  %v1245_v45 = vadd.f32 %v11533_v35, %v1244_v46 }
 0x1d8   : > { %v11584_v51 = vpop.f32.mrf.mxu1 }
 0x1d9   : > { %15378 = vst [vmem:[#allocation16_spill] sm:$0xff] %v11581_v41  ;;  %v1356_v0 = vmax.f32 %v1245_v45, 0.0  ;;  %10060 = vmatmul.msk.f32.gmra.mxu0 %vm910_vm1, %v896_v40  ;;  %10164 = vmatmul.msk.f32.gmra.mxu2 %vm821_vm2, %v1476_v52  ;;  %v1479_v52 = vld [vmem:[#allocation2 + $0x120] sm:$0xff]  ;;  %v11916_v41 = vld [vmem:[#allocation2 + $0xc9] sm:$0xff] }
 0x1da   : > { %10228 = vmatmul.msk.f32.gmra.mxu3 %vm821_vm2, %v2410_v44  ;;  %v1548_v49 = vld [vmem:[#allocation2 + $0x139] sm:$0xff] }
 0x1db   : > { %1420 = vst.msk [vmem:[#allocation2 + $0x148] sm:$0xff] %vm821_vm2, %v1356_v0  ;;  %10106 = vmatmul.msk.f32.gmra.mxu1 %vm821_vm2, %v1548_v49  ;;  %v2976_v0 = vld [vmem:[#allocation2 + $0x21] sm:$0xff] }
 0x1dc   : > { %v2234_v55 = vpop.f32.mrf.mxu2  ;;  %v2413_v49 = vld [vmem:[#allocation2 + $0x122] sm:$0xff] }
 0x1dd   : > { %v2235_v56 = vadd.f32 %v2234_v55, %v11509_v2  ;;  %v2701_v63 = vpop.f32.mrf.mxu3 }
 0x1de   : > { %v1247_v57 = vpop.f32.mrf.mxu0 }
 0x1df   : > { %v11593_v4 = vadd.f32 %v2701_v63, %v2235_v56  ;;  %v1248_v25 = vadd.f32 %v11533_v35, %v1247_v57 }
 0x1e0   : > { %v11596_v53 = vpop.f32.mrf.mxu1 }
 0x1e1   : > { %15379 = vst [vmem:[#allocation17_spill] sm:$0xff] %v11593_v4  ;;  %v1357_v8 = vmax.f32 %v1248_v25, 0.0  ;;  %10061 = vmatmul.msk.f32.gmra.mxu0 %vm910_vm1, %v897_v1  ;;  %10165 = vmatmul.msk.f32.gmra.mxu2 %vm821_vm2, %v1477_v5 }
 0x1e2   : > { %10229 = vmatmul.msk.f32.gmra.mxu3 %vm821_vm2, %v2411_v9  ;;  %v1549_v13 = vld [vmem:[#allocation2 + $0x141] sm:$0xff]  ;;  %v11631_v9 = vld [vmem:[#allocation2 + $0x29] sm:$0xff] }
 0x1e3   : > { %1421 = vst.msk [vmem:[#allocation2 + $0x150] sm:$0xff] %vm821_vm2, %v1357_v8  ;;  %10107 = vmatmul.msk.f32.gmra.mxu1 %vm821_vm2, %v1549_v13  ;;  %v1480_v8 = vld [vmem:[#allocation2 + $0x128] sm:$0xff] }
 0x1e4   : > { %v2237_v2 = vpop.f32.mrf.mxu2 }
 0x1e5   : > { %v2238_v15 = vadd.f32 %v2237_v2, %v11521_v62  ;;  %v2704_v18 = vpop.f32.mrf.mxu3  ;;  %v2414_v2 = vld [vmem:[#allocation2 + $0x12a] sm:$0xff] }
 0x1e6   : > { %v1250_v36 = vpop.f32.mrf.mxu0 }
 0x1e7   : > { %v11604_v19 = vadd.f32 %v2704_v18, %v2238_v15  ;;  %v1251_v20 = vadd.f32 %v11533_v35, %v1250_v36 }
 0x1e8   : > { %v11607_v33 = vpop.f32.mrf.mxu1 }
 0x1e9   : > { %15380 = vst [vmem:[#allocation18_spill] sm:$0xff] %v11604_v19  ;;  %v1358_v27 = vmax.f32 %v1251_v20, 0.0  ;;  %10166 = vmatmul.msk.f32.gmra.mxu2 %vm821_vm2, %v1478_v28  ;;  %10260 = vmatmul.msk.f32.vlgmr.msrb.gmra.mxu0 %vm821_vm2, %v2975_v24  ;;  %v11902_v19 = vld [vmem:[#allocation2 + $0xc1] sm:$0xff] }
 0x1ea   : > { %10230 = vmatmul.msk.f32.gmra.mxu3 %vm821_vm2, %v2412_v37  ;;  %v1550_v30 = vld [vmem:[#allocation2 + $0x149] sm:$0xff] }
 0x1eb   : > { %1422 = vst.msk [vmem:[#allocation2 + $0x158] sm:$0xff] %vm821_vm2, %v1358_v27  ;;  %10108 = vmatmul.msk.f32.gmra.mxu1 %vm821_vm2, %v1550_v30  ;;  %v1481_v37 = vld [vmem:[#allocation2 + $0x130] sm:$0xff] }
 0x1ec   : > { %v2240_v62 = vpop.f32.mrf.mxu2  ;;  %v11645_v30 = vld [vmem:[#allocation2 + $0x31] sm:$0xff] }
 0x1ed   : > { %v2241_v7 = vadd.f32 %v2240_v62, %v11536_v50  ;;  %v2707_v38 = vpop.f32.mrf.mxu3 }
 0x1ee   : > { %v1253_v39 = vpop.f32.mrf.mxu0 }
 0x1ef   : > { %v11615_v46 = vadd.f32 %v2707_v38, %v2241_v7  ;;  %v1254_v40 = vadd.f32 %v11533_v35, %v1253_v39  ;;  %v2415_v7 = vld [vmem:[#allocation2 + $0x132] sm:$0xff] }
 0x1f0   : > { %v11618_v45 = vpop.f32.mrf.mxu1 }
 0x1f1   : > { %15381 = vst [vmem:[#allocation19_spill] sm:$0xff] %v11615_v46  ;;  %v1359_v44 = vmax.f32 %v1254_v40, 0.0  ;;  %10167 = vmatmul.msk.f32.gmra.mxu2 %vm821_vm2, %v1479_v52  ;;  %10261 = vmatmul.msk.f32.gmra.mxu0 %vm821_vm2, %v2976_v0 }
 0x1f2   : > { %10231 = vmatmul.msk.f32.gmra.mxu3 %vm821_vm2, %v2413_v49  ;;  %v1551_v55 = vld [vmem:[#allocation2 + $0x151] sm:$0xff] }
 0x1f3   : > { %1423 = vst.msk [vmem:[#allocation2 + $0x160] sm:$0xff] %vm821_vm2, %v1359_v44  ;;  %10109 = vmatmul.msk.f32.gmra.mxu1 %vm821_vm2, %v1551_v55  ;;  %v1482_v55 = vld [vmem:[#allocation2 + $0x138] sm:$0xff] }
 0x1f4   : > { %v2243_v50 = vpop.f32.mrf.mxu2 }
 0x1f5   : > { %v2244_v56 = vadd.f32 %v2243_v50, %v11548_v54  ;;  %v2710_v63 = vpop.f32.mrf.mxu3  ;;  %v11659_v50 = vld [vmem:[#allocation2 + $0x39] sm:$0xff] }
 0x1f6   : > { %v1256_v57 = vpop.f32.mrf.mxu0 }
 0x1f7   : > { %v11626_v1 = vadd.f32 %v2710_v63, %v2244_v56  ;;  %v1257_v25 = vadd.f32 %v11533_v35, %v1256_v57  ;;  %v2416_v63 = vld [vmem:[#allocation2 + $0x13a] sm:$0xff] }
 0x1f8   : > { %v11629_v5 = vpop.f32.mrf.mxu1 }
 0x1f9   : > { %15382 = vst [vmem:[#allocation20_spill] sm:$0xff] %v11626_v1  ;;  %v1360_v13 = vmax.f32 %v1257_v25, 0.0  ;;  %10168 = vmatmul.msk.f32.gmra.mxu2 %vm821_vm2, %v1480_v8  ;;  %10262 = vmatmul.msk.f32.gmra.mxu0 %vm821_vm2, %v11631_v9  ;;  %v11888_v1 = vld [vmem:[#allocation2 + $0xb9] sm:$0xff] }
 0x1fa   : > { %10232 = vmatmul.msk.f32.gmra.mxu3 %vm821_vm2, %v2414_v2  ;;  %v1552_v54 = vld [vmem:[#allocation2 + $0x159] sm:$0xff] }
 0x1fb   : > { %1424 = vst.msk [vmem:[#allocation2 + $0x168] sm:$0xff] %vm821_vm2, %v1360_v13  ;;  %10110 = vmatmul.msk.f32.gmra.mxu1 %vm821_vm2, %v1552_v54 }
 0x1fc   : > { %v2246_v15 = vpop.f32.mrf.mxu2 }
 0x1fd   : > { %v2247_v18 = vadd.f32 %v2246_v15, %v11560_v6  ;;  %v2713_v36 = vpop.f32.mrf.mxu3 }
 0x1fe   : > { %v1259_v20 = vpop.f32.mrf.mxu0 }
 0x1ff   : > { %v11640_v28 = vadd.f32 %v2713_v36, %v2247_v18  ;;  %v1260_v24 = vadd.f32 %v11533_v35, %v1259_v20  ;;  %v1483_v18 = vld [vmem:[#allocation2 + $0x140] sm:$0xff] }
 0x200   : > { %v11643_v27 = vpop.f32.mrf.mxu1  ;;  %v11673_v36 = vld [vmem:[#allocation2 + $0x41] sm:$0xff] }
 0x201   : > { %15383 = vst [vmem:[#allocation21_spill] sm:$0xff] %v11640_v28  ;;  %v1361_v62 = vmax.f32 %v1260_v24, 0.0  ;;  %10169 = vmatmul.msk.f32.gmra.mxu2 %vm821_vm2, %v1481_v37  ;;  %10263 = vmatmul.msk.f32.gmra.mxu0 %vm821_vm2, %v11645_v30  ;;  %v2417_v24 = vld [vmem:[#allocation2 + $0x142] sm:$0xff] }
 0x202   : > { %10233 = vmatmul.msk.f32.gmra.mxu3 %vm821_vm2, %v2415_v7  ;;  %v1553_v6 = vld [vmem:[#allocation2 + $0x161] sm:$0xff] }
 0x203   : > { %1425 = vst.msk [vmem:[#allocation2 + $0x170] sm:$0xff] %vm821_vm2, %v1361_v62  ;;  %10111 = vmatmul.msk.f32.gmra.mxu1 %vm821_vm2, %v1553_v6 }
 0x204   : > { %v2249_v38 = vpop.f32.mrf.mxu2 }
 0x205   : > { %v2250_v39 = vadd.f32 %v2249_v38, %v11572_v23  ;;  %v2716_v40 = vpop.f32.mrf.mxu3 }
 0x206   : > { %v1262_v52 = vpop.f32.mrf.mxu0 }
 0x207   : > { %v11654_v0 = vadd.f32 %v2716_v40, %v2250_v39  ;;  %v1263_v44 = vadd.f32 %v11533_v35, %v1262_v52  ;;  %v1484_v52 = vld [vmem:[#allocation2 + $0x148] sm:$0xff] }
 0x208   : > { %v11657_v49 = vpop.f32.mrf.mxu1 }
 0x209   : > { %15384 = vst [vmem:[#allocation22_spill] sm:$0xff] %v11654_v0  ;;  %v1362_v56 = vmax.f32 %v1263_v44, 0.0  ;;  %10170 = vmatmul.msk.f32.gmra.mxu2 %vm821_vm2, %v1482_v55  ;;  %10264 = vmatmul.msk.f32.gmra.mxu0 %vm821_vm2, %v11659_v50  ;;  %v11687_v44 = vld [vmem:[#allocation2 + $0x49] sm:$0xff]  ;;  %v11874_v0 = vld [vmem:[#allocation2 + $0xb1] sm:$0xff] }
 0x20a   : > { %10234 = vmatmul.msk.f32.gmra.mxu3 %vm821_vm2, %v2416_v63  ;;  %v1554_v23 = vld [vmem:[#allocation2 + $0x169] sm:$0xff] }
 0x20b   : > { %1426 = vst.msk [vmem:[#allocation2 + $0x178] sm:$0xff] %vm821_vm2, %v1362_v56  ;;  %10112 = vmatmul.msk.f32.gmra.mxu1 %vm821_vm2, %v1554_v23  ;;  %v2418_v56 = vld [vmem:[#allocation2 + $0x14a] sm:$0xff] }
 0x20c   : > { %v2252_v57 = vpop.f32.mrf.mxu2 }
 0x20d   : > { %v2253_v25 = vadd.f32 %v2252_v57, %v11584_v51  ;;  %v2719_v8 = vpop.f32.mrf.mxu3 }
 0x20e   : > { %v1265_v13 = vpop.f32.mrf.mxu0 }
 0x20f   : > { %v11668_v2 = vadd.f32 %v2719_v8, %v2253_v25  ;;  %v1266_v54 = vadd.f32 %v11533_v35, %v1265_v13 }
 0x210   : > { %v11671_v15 = vpop.f32.mrf.mxu1 }
 0x211   : > { %15385 = vst [vmem:[#allocation23_spill] sm:$0xff] %v11668_v2  ;;  %v1363_v20 = vmax.f32 %v1266_v54, 0.0  ;;  %10171 = vmatmul.msk.f32.gmra.mxu2 %vm821_vm2, %v1483_v18  ;;  %10265 = vmatmul.msk.f32.gmra.mxu0 %vm821_vm2, %v11673_v36  ;;  %v1485_v18 = vld [vmem:[#allocation2 + $0x150] sm:$0xff] }
 0x212   : > { %10235 = vmatmul.msk.f32.gmra.mxu3 %vm821_vm2, %v2417_v24  ;;  %v1555_v51 = vld [vmem:[#allocation2 + $0x171] sm:$0xff] }
 0x213   : > { %1427 = vst.msk [vmem:[#allocation2 + $0x180] sm:$0xff] %vm821_vm2, %v1363_v20  ;;  %10113 = vmatmul.msk.f32.gmra.mxu1 %vm821_vm2, %v1555_v51  ;;  %v11701_v20 = vld [vmem:[#allocation2 + $0x51] sm:$0xff] }
 0x214   : > { %v2255_v37 = vpop.f32.mrf.mxu2  ;;  %v2419_v51 = vld [vmem:[#allocation2 + $0x152] sm:$0xff] }
 0x215   : > { %v2256_v62 = vadd.f32 %v2255_v37, %v11596_v53  ;;  %v2722_v7 = vpop.f32.mrf.mxu3  ;;  %v1490_v48 = vld [vmem:[#allocation2 + $0x178] sm:$0xff] }
 0x216   : > { %v1268_v6 = vpop.f32.mrf.mxu0 }
 0x217   : > { %v11682_v38 = vadd.f32 %v2722_v7, %v2256_v62  ;;  %v1269_v39 = vadd.f32 %v11533_v35, %v1268_v6 }
 0x218   : > { %v11685_v40 = vpop.f32.mrf.mxu1 }
 0x219   : > { %15386 = vst [vmem:[#allocation24_spill] sm:$0xff] %v11682_v38  ;;  %v1364_v55 = vmax.f32 %v1269_v39, 0.0  ;;  %10172 = vmatmul.msk.f32.gmra.mxu2 %vm821_vm2, %v1484_v52  ;;  %10266 = vmatmul.msk.f32.gmra.mxu0 %vm821_vm2, %v11687_v44  ;;  %v11860_v38 = vld [vmem:[#allocation2 + $0xa9] sm:$0xff] }
 0x21a   : > { %10236 = vmatmul.msk.f32.gmra.mxu3 %vm821_vm2, %v2418_v56  ;;  %v1556_v53 = vld [vmem:[#allocation2 + $0x179] sm:$0xff] }
 0x21b   : > { %1428 = vst.msk [vmem:[#allocation2 + $0x188] sm:$0xff] %vm821_vm2, %v1364_v55  ;;  %10114 = vmatmul.msk.f32.gmra.mxu1 %vm821_vm2, %v1556_v53  ;;  %v1486_v56 = vld [vmem:[#allocation2 + $0x158] sm:$0xff] }
 0x21c   : > { %v2258_v63 = vpop.f32.mrf.mxu2  ;;  %v11715_v53 = vld [vmem:[#allocation2 + $0x59] sm:$0xff] }
 0x21d   : > { %v2259_v23 = vadd.f32 %v2258_v63, %v11607_v33  ;;  %v2725_v57 = vpop.f32.mrf.mxu3 }
 0x21e   : > { %v1271_v25 = vpop.f32.mrf.mxu0 }
 0x21f   : > { %v11696_v8 = vadd.f32 %v2725_v57, %v2259_v23  ;;  %v1272_v13 = vadd.f32 %v11533_v35, %v1271_v25  ;;  %v2420_v23 = vld [vmem:[#allocation2 + $0x15a] sm:$0xff] }
 0x220   : > { %v11699_v54 = vpop.f32.mrf.mxu1 }
 0x221   : > { %15387 = vst [vmem:[#allocation25_spill] sm:$0xff] %v11696_v8  ;;  %v1365_v24 = vmax.f32 %v1272_v13, 0.0  ;;  %10173 = vmatmul.msk.f32.gmra.mxu2 %vm821_vm2, %v1485_v18  ;;  %10267 = vmatmul.msk.f32.gmra.mxu0 %vm821_vm2, %v11701_v20  ;;  %v11817_v8 = vld [vmem:[#allocation2 + $0x91] sm:$0xff] }
 0x222   : > { %10237 = vmatmul.msk.f32.gmra.mxu3 %vm821_vm2, %v2419_v51  ;;  %v1557_v33 = vld [vmem:[#allocation2 + $0x181] sm:$0xff] }
 0x223   : > { %1429 = vst.msk [vmem:[#allocation2 + $0x190] sm:$0xff] %vm821_vm2, %v1365_v24  ;;  %10115 = vmatmul.msk.f32.gmra.mxu1 %vm821_vm2, %v1557_v33 }
 0x224   : > { %v2261_v37 = vpop.f32.mrf.mxu2 }
 0x225   : > { %v2262_v62 = vadd.f32 %v2261_v37, %v11618_v45  ;;  %v2728_v7 = vpop.f32.mrf.mxu3  ;;  %v1487_v37 = vld [vmem:[#allocation2 + $0x160] sm:$0xff] }
 0x226   : > { %v1274_v6 = vpop.f32.mrf.mxu0 }
 0x227   : > { %v11710_v39 = vadd.f32 %v2728_v7, %v2262_v62  ;;  %v1275_v52 = vadd.f32 %v11533_v35, %v1274_v6  ;;  %v11729_v62 = vld [vmem:[#allocation2 + $0x61] sm:$0xff] }
 0x228   : > { %v11713_v55 = vpop.f32.mrf.mxu1  ;;  %v2421_v6 = vld [vmem:[#allocation2 + $0x162] sm:$0xff] }
 0x229   : > { %15388 = vst [vmem:[#allocation26_spill] sm:$0xff] %v11710_v39  ;;  %v1366_v63 = vmax.f32 %v1275_v52, 0.0  ;;  %10174 = vmatmul.msk.f32.gmra.mxu2 %vm821_vm2, %v1486_v56  ;;  %10268 = vmatmul.msk.f32.gmra.mxu0 %vm821_vm2, %v11715_v53 }
 0x22a   : > { %10238 = vmatmul.msk.f32.gmra.mxu3 %vm821_vm2, %v2420_v23  ;;  %v1558_v45 = vld [vmem:[#allocation2 + $0x189] sm:$0xff] }
 0x22b   : > { %1430 = vst.msk [vmem:[#allocation2 + $0x198] sm:$0xff] %vm821_vm2, %v1366_v63  ;;  %10116 = vmatmul.msk.f32.gmra.mxu1 %vm821_vm2, %v1558_v45 }
 0x22c   : > { %v2264_v57 = vpop.f32.mrf.mxu2 }
 0x22d   : > { %v2265_v25 = vadd.f32 %v2264_v57, %v11629_v5  ;;  %v2731_v13 = vpop.f32.mrf.mxu3 }
 0x22e   : > { %v1277_v18 = vpop.f32.mrf.mxu0 }
 0x22f   : > { %v11724_v24 = vadd.f32 %v2731_v13, %v2265_v25  ;;  %v1278_v51 = vadd.f32 %v11533_v35, %v1277_v18  ;;  %v1488_v13 = vld [vmem:[#allocation2 + $0x168] sm:$0xff] }
 0x230   : > { %v11727_v33 = vpop.f32.mrf.mxu1  ;;  %v11743_v18 = vld [vmem:[#allocation2 + $0x69] sm:$0xff] }
 0x231   : > { %15389 = vst [vmem:[#allocation27_spill] sm:$0xff] %v11724_v24  ;;  %v1367_v7 = vmax.f32 %v1278_v51, 0.0  ;;  %10175 = vmatmul.msk.f32.gmra.mxu2 %vm821_vm2, %v1487_v37  ;;  %10269 = vmatmul.msk.f32.gmra.mxu0 %vm821_vm2, %v11729_v62  ;;  %v2422_v37 = vld [vmem:[#allocation2 + $0x16a] sm:$0xff] }
 0x232   : > { %10239 = vmatmul.msk.f32.gmra.mxu3 %vm821_vm2, %v2421_v6  ;;  %v1559_v5 = vld [vmem:[#allocation2 + $0x191] sm:$0xff]  ;;  %v11801_v24 = vld [vmem:[#allocation2 + $0x89] sm:$0xff] }
 0x233   : > { %1431 = vst.msk [vmem:[#allocation2 + $0x1a0] sm:$0xff] %vm821_vm2, %v1367_v7  ;;  %10117 = vmatmul.msk.f32.gmra.mxu1 %vm821_vm2, %v1559_v5 }
 0x234   : > { %v2267_v52 = vpop.f32.mrf.mxu2 }
 0x235   : > { %v2268_v56 = vadd.f32 %v2267_v52, %v11643_v27  ;;  %v2734_v63 = vpop.f32.mrf.mxu3 }
 0x236   : > { %v1280_v23 = vpop.f32.mrf.mxu0 }
 0x237   : > { %v11738_v45 = vadd.f32 %v2734_v63, %v2268_v56  ;;  %v1281_v57 = vadd.f32 %v11533_v35, %v1280_v23 }
 0x238   : > { %v11741_v25 = vpop.f32.mrf.mxu1 }
 0x239   : > { %15390 = vst [vmem:[#allocation28_spill] sm:$0xff] %v11738_v45  ;;  %v1368_v51 = vmax.f32 %v1281_v57, 0.0  ;;  %10176 = vmatmul.msk.f32.gmra.mxu2 %vm821_vm2, %v1488_v13  ;;  %10270 = vmatmul.msk.f32.gmra.mxu0 %vm821_vm2, %v11743_v18  ;;  %v1489_v57 = vld [vmem:[#allocation2 + $0x170] sm:$0xff] }
 0x23a   : > { %10240 = vmatmul.msk.f32.gmra.mxu3 %vm821_vm2, %v2422_v37  ;;  %v1560_v27 = vld [vmem:[#allocation2 + $0x199] sm:$0xff]  ;;  %v11757_v13 = vld [vmem:[#allocation2 + $0x71] sm:$0xff] }
 0x23b   : > { %1432 = vst.msk [vmem:[#allocation2 + $0x1a8] sm:$0xff] %vm821_vm2, %v1368_v51  ;;  %10118 = vmatmul.msk.f32.gmra.mxu1 %vm821_vm2, %v1560_v27  ;;  %v2423_v51 = vld [vmem:[#allocation2 + $0x172] sm:$0xff] }
 0x23c   : > { %v2270_v7 = vpop.f32.mrf.mxu2 }
 0x23d   : > { %v2271_v6 = vadd.f32 %v2270_v7, %v11657_v49  ;;  %v2737_v5 = vpop.f32.mrf.mxu3 }
 0x23e   : > { %v1283_v52 = vpop.f32.mrf.mxu0 }
 0x23f   : > { %v11752_v56 = vadd.f32 %v2737_v5, %v2271_v6  ;;  %v1284_v63 = vadd.f32 %v11533_v35, %v1283_v52 }
 0x240   : > { %v11755_v23 = vpop.f32.mrf.mxu1 }
 0x241   : > { %15391 = vst [vmem:[#allocation29_spill] sm:$0xff] %v11752_v56  ;;  %v1369_v37 = vmax.f32 %v1284_v63, 0.0  ;;  %10177 = vmatmul.msk.f32.gmra.mxu2 %vm821_vm2, %v1489_v57  ;;  %10271 = vmatmul.msk.f32.gmra.mxu0 %vm821_vm2, %v11757_v13  ;;  %v11771_v56 = vld [vmem:[#allocation2 + $0x79] sm:$0xff] }
 0x242   : > { %10241 = vmatmul.msk.f32.gmra.mxu3 %vm821_vm2, %v2423_v51  ;;  %v1561_v49 = vld [vmem:[#allocation2 + $0x1a1] sm:$0xff] }
 0x243   : > { %1433 = vst.msk [vmem:[#allocation2 + $0x1b0] sm:$0xff] %vm821_vm2, %v1369_v37  ;;  %10119 = vmatmul.msk.f32.gmra.mxu1 %vm821_vm2, %v1561_v49  ;;  %v2424_v37 = vld [vmem:[#allocation2 + $0x17a] sm:$0xff] }
 0x244   : > { %v2273_v27 = vpop.f32.mrf.mxu2 }
 0x245   : > { %v2274_v7 = vadd.f32 %v2273_v27, %v11671_v15  ;;  %v2740_v6 = vpop.f32.mrf.mxu3 }
 0x246   : > { %v1286_v5 = vpop.f32.mrf.mxu0 }
 0x247   : > { %v11766_v52 = vadd.f32 %v2740_v6, %v2274_v7  ;;  %v1287_v63 = vadd.f32 %v11533_v35, %v1286_v5 }
 0x248   : > { %v11769_v57 = vpop.f32.mrf.mxu1 }
 0x249   : > { %15392 = vst [vmem:[#allocation30_spill] sm:$0xff] %v11766_v52  ;;  %v1370_v51 = vmax.f32 %v1287_v63, 0.0  ;;  %10178 = vmatmul.msk.f32.gmra.mxu2 %vm821_vm2, %v1490_v48  ;;  %10272 = vmatmul.msk.f32.gmra.mxu0 %vm821_vm2, %v11771_v56  ;;  %v1491_v52 = vld [vmem:[#allocation2 + $0x180] sm:$0xff] }
 0x24a   : > { %10242 = vmatmul.msk.f32.gmra.mxu3 %vm821_vm2, %v2424_v37  ;;  %v1562_v15 = vld [vmem:[#allocation2 + $0x1a9] sm:$0xff]  ;;  %v11785_v37 = vld [vmem:[#allocation2 + $0x81] sm:$0xff] }
 0x24b   : > { %1434 = vst.msk [vmem:[#allocation2 + $0x1b8] sm:$0xff] %vm821_vm2, %v1370_v51  ;;  %10120 = vmatmul.msk.f32.gmra.mxu1 %vm821_vm2, %v1562_v15  ;;  %v2425_v51 = vld [vmem:[#allocation2 + $0x182] sm:$0xff]  ;;  %v3908_v15 = vld [vmem:[%s11166_s21 + $0x58] sm:$0xff]  ;;  %v2430_v2 = vld [vmem:[#allocation2 + $0x1aa] sm:$0xff] }
 0x24c   : > { %v2276_v49 = vpop.f32.mrf.mxu2  ;;  %4115 = vmatpush.msra.mxu2 %v3908_v15  ;;  %v2426_v15 = vld [vmem:[#allocation2 + $0x18a] sm:$0xff] }
 0x24d   : > { %v2277_v27 = vadd.f32 %v2276_v49, %v11685_v40  ;;  %v2743_v7 = vpop.f32.mrf.mxu3  ;;  %v4505_v49 = vld [vmem:[%s11166_s21 + $0x78] sm:$0xff] }
 0x24e   : > { %v1289_v6 = vpop.f32.mrf.mxu0  ;;  %4712 = vmatpush.msrb.mxu3 %v4505_v49  ;;  %v4439_v49 = vld [vmem:[%s11166_s21 + $0x68] sm:$0xff] }
 0x24f   : > { %v11780_v5 = vadd.f32 %v2743_v7, %v2277_v27  ;;  %v1290_v48 = vadd.f32 %v11533_v35, %v1289_v6  ;;  %5113 = vmatpush.msra.mxu0 %v4439_v49 }
 0x250   : > { %v11783_v63 = vpop.f32.mrf.mxu1  ;;  %4713 = vmatpush.msrb.mxu3 %v4504_v26  ;;  %v2918_v26 = vld [vmem:[#allocation2 + $0x60] sm:$0xff] }
 0x251   : > { %15393 = vst [vmem:[#allocation31_spill] sm:$0xff] %v11780_v5  ;;  %v1371_v45 = vmax.f32 %v1290_v48, 0.0  ;;  %10179 = vmatmul.msk.f32.gmra.mxu2 %vm821_vm2, %v1491_v52  ;;  %10273 = vmatmul.msk.f32.gmra.mxu0 %vm821_vm2, %v11785_v37 }
 0x252   : > { %10243 = vmatmul.msk.f32.gmra.mxu3 %vm821_vm2, %v2425_v51  ;;  %v1563_v40 = vld [vmem:[#allocation2 + $0x1b1] sm:$0xff] }
 0x253   : > { %1435 = vst.msk [vmem:[#allocation2 + $0x1c0] sm:$0xff] %vm821_vm2, %v1371_v45  ;;  %10121 = vmatmul.msk.f32.gmra.mxu1 %vm821_vm2, %v1563_v40  ;;  %v1492_v45 = vld [vmem:[#allocation2 + $0x188] sm:$0xff]  ;;  %v2431_v28 = vld [vmem:[#allocation2 + $0x1b2] sm:$0xff] }
 0x254   : > { %v2279_v27 = vpop.f32.mrf.mxu2 }
 0x255   : > { %v2280_v7 = vadd.f32 %v2279_v27, %v11699_v54  ;;  %v2746_v52 = vpop.f32.mrf.mxu3  ;;  %v5373_v27 = vld [vmem:[%s11166_s21 + $0x88] sm:$0xff] }
 0x256   : > { %v1292_v6 = vpop.f32.mrf.mxu0  ;;  %5580 = vmatpush.msra.mxu1 %v5373_v27 }
 0x257   : > { %v11796_v48 = vadd.f32 %v2746_v52, %v2280_v7  ;;  %v1293_v51 = vadd.f32 %v11533_v35, %v1292_v6 }
 0x258   : > { %v11799_v5 = vpop.f32.mrf.mxu1 }
 0x259   : > { %15394 = vst [vmem:[#allocation32_spill] sm:$0xff] %v11796_v48  ;;  %v1372_v40 = vmax.f32 %v1293_v51, 0.0  ;;  %10180 = vmatmul.msk.f32.gmra.mxu2 %vm821_vm2, %v1492_v45  ;;  %10274 = vmatmul.msk.f32.gmra.mxu0 %vm821_vm2, %v11801_v24 }
 0x25a   : > { %10244 = vmatmul.msk.f32.gmra.mxu3 %vm821_vm2, %v2426_v15  ;;  %v1564_v54 = vld [vmem:[#allocation2 + $0x1b9] sm:$0xff]  ;;  %v1493_v15 = vld [vmem:[#allocation2 + $0x190] sm:$0xff] }
 0x25b   : > { %1436 = vst.msk [vmem:[#allocation2 + $0x1c8] sm:$0xff] %vm821_vm2, %v1372_v40  ;;  %10122 = vmatmul.msk.f32.gmra.mxu1 %vm821_vm2, %v1564_v54  ;;  %v2427_v54 = vld [vmem:[#allocation2 + $0x192] sm:$0xff]  ;;  %v2432_v46 = vld [vmem:[#allocation2 + $0x1ba] sm:$0xff] }
 0x25c   : > { %v2282_v7 = vpop.f32.mrf.mxu2 }
 0x25d   : > { %v2283_v52 = vadd.f32 %v2282_v7, %v11713_v55  ;;  %v2749_v6 = vpop.f32.mrf.mxu3 }
 0x25e   : > { %v1295_v51 = vpop.f32.mrf.mxu0 }
 0x25f   : > { %v11812_v45 = vadd.f32 %v2749_v6, %v2283_v52  ;;  %v1296_v48 = vadd.f32 %v11533_v35, %v1295_v51  ;;  %v1494_v6 = vld [vmem:[#allocation2 + $0x198] sm:$0xff] }
 0x260   : > { %v11815_v39 = vpop.f32.mrf.mxu1  ;;  %v11832_v51 = vld [vmem:[#allocation2 + $0x99] sm:$0xff] }
 0x261   : > { %15395 = vst [vmem:[#allocation33_spill] sm:$0xff] %v11812_v45  ;;  %v1373_v40 = vmax.f32 %v1296_v48, 0.0  ;;  %10181 = vmatmul.msk.f32.gmra.mxu2 %vm821_vm2, %v1493_v15  ;;  %10275 = vmatmul.msk.f32.gmra.mxu0 %vm821_vm2, %v11817_v8  ;;  %v2428_v15 = vld [vmem:[#allocation2 + $0x19a] sm:$0xff]  ;;  %v2429_v45 = vld [vmem:[#allocation2 + $0x1a2] sm:$0xff] }
 0x262   : > { %10245 = vmatmul.msk.f32.gmra.mxu3 %vm821_vm2, %v2427_v54  ;;  %v1565_v55 = vld [vmem:[#allocation2 + $0x1c1] sm:$0xff] }
 0x263   : > { %1437 = vst.msk [vmem:[#allocation2 + $0x1d0] sm:$0xff] %vm821_vm2, %v1373_v40  ;;  %10123 = vmatmul.msk.f32.gmra.mxu1 %vm821_vm2, %v1565_v55  ;;  %v2433_v4 = vld [vmem:[#allocation2 + $0x1c2] sm:$0xff] }
 0x264   : > { %v2285_v35 = vpop.f32.mrf.mxu2 }
 0x265   : > { %v2286_v49 = vadd.f32 %v2285_v35, %v11727_v33  ;;  %v2752_v27 = vpop.f32.mrf.mxu3 }
 0x266   : > { %v11826_v7 = vpop.f32.mrf.mxu0 }
 0x267   : > { %v11828_v48 = vadd.f32 %v2752_v27, %v2286_v49 }
 0x268   : > { %v11830_v52 = vpop.f32.mrf.mxu1 }
 0x269   : > { %15396 = vst [vmem:[#allocation34_spill] sm:$0xff] %v11828_v48  ;;  %10182 = vmatmul.msk.f32.gmra.mxu2 %vm821_vm2, %v1494_v6  ;;  %10276 = vmatmul.msk.f32.gmra.mxu0 %vm821_vm2, %v11832_v51  ;;  %v1495_v6 = vld [vmem:[#allocation2 + $0x1a0] sm:$0xff] }
 0x26a   : > { %10246 = vmatmul.msk.f32.gmra.mxu3 %vm821_vm2, %v2428_v15  ;;  %v1566_v40 = vld [vmem:[#allocation2 + $0x1c9] sm:$0xff]  ;;  %v11846_v48 = vld [vmem:[#allocation2 + $0xa1] sm:$0xff]  ;;  %v1567_v15 = vld [vmem:[#allocation2 + $0x1d1] sm:$0xff] }
 0x26b   : > { %10124 = vmatmul.msk.f32.gmra.mxu1 %vm821_vm2, %v1566_v40  ;;  %v2434_v22 = vld [vmem:[#allocation2 + $0x1ca] sm:$0xff]  ;;  %v2435_v16 = vld [vmem:[#allocation2 + $0x1d2] sm:$0xff] }
 0x26c   : > { %v2288_v33 = vpop.f32.mrf.mxu2 }
 0x26d   : > { %v2289_v54 = vadd.f32 %v2288_v33, %v11741_v25  ;;  %v2755_v55 = vpop.f32.mrf.mxu3 }
 0x26e   : > { %v11840_v35 = vpop.f32.mrf.mxu0 }
 0x26f   : > { %v11842_v49 = vadd.f32 %v2755_v55, %v2289_v54 }
 0x270   : > { %v11844_v27 = vpop.f32.mrf.mxu1 }
 0x271   : > { %15397 = vst [vmem:[#allocation35_spill] sm:$0xff] %v11842_v49  ;;  %10183 = vmatmul.msk.f32.gmra.mxu2 %vm821_vm2, %v1495_v6  ;;  %10277 = vmatmul.msk.f32.gmra.mxu0 %vm821_vm2, %v11846_v48  ;;  %v1496_v6 = vld [vmem:[#allocation2 + $0x1a8] sm:$0xff] }
 0x272   : > { %10247 = vmatmul.msk.f32.gmra.mxu3 %vm821_vm2, %v2429_v45  ;;  %v2909_v45 = vld [vmem:[#allocation2 + $0x18] sm:$0xff] }
 0x273   : > { %10125 = vmatmul.msk.f32.gmra.mxu1 %vm821_vm2, %v1567_v15 }
 0x274   : > { %v2291_v25 = vpop.f32.mrf.mxu2 }
 0x275   : > { %v2292_v40 = vadd.f32 %v2291_v25, %v11755_v23  ;;  %v2758_v33 = vpop.f32.mrf.mxu3 }
 0x276   : > { %v11854_v54 = vpop.f32.mrf.mxu0 }
 0x277   : > { %v11856_v55 = vadd.f32 %v2758_v33, %v2292_v40 }
 0x278   : > { %v11858_v49 = vpop.f32.mrf.mxu1 }
 0x279   : > { %15398 = vst [vmem:[#allocation36_spill] sm:$0xff] %v11856_v55  ;;  %10184 = vmatmul.msk.f32.gmra.mxu2 %vm821_vm2, %v1496_v6  ;;  %10278 = vmatmul.msk.f32.gmra.mxu0 %vm821_vm2, %v11860_v38  ;;  %v1497_v6 = vld [vmem:[#allocation2 + $0x1b0] sm:$0xff] }
 0x27a   : > { %10248 = vmatmul.msk.f32.gmra.mxu3 %vm821_vm2, %v2430_v2  ;;  %v2910_v2 = vld [vmem:[#allocation2 + $0x20] sm:$0xff] }
 0x27b   : > { %10324 = vmatmul.msk.f32.vlgmr.msrb.gmra.mxu1 %vm821_vm2, %v2909_v45 }
 0x27c   : > { %v2294_v23 = vpop.f32.mrf.mxu2 }
 0x27d   : > { %v2295_v15 = vadd.f32 %v2294_v23, %v11769_v57  ;;  %v2761_v25 = vpop.f32.mrf.mxu3 }
 0x27e   : > { %v11868_v40 = vpop.f32.mrf.mxu0 }
 0x27f   : > { %v11870_v33 = vadd.f32 %v2761_v25, %v2295_v15 }
 0x280   : > { %v11872_v55 = vpop.f32.mrf.mxu1 }
 0x281   : > { %15399 = vst [vmem:[#allocation37_spill] sm:$0xff] %v11870_v33  ;;  %10185 = vmatmul.msk.f32.gmra.mxu2 %vm821_vm2, %v1497_v6  ;;  %10279 = vmatmul.msk.f32.gmra.mxu0 %vm821_vm2, %v11874_v0  ;;  %v1498_v6 = vld [vmem:[#allocation2 + $0x1b8] sm:$0xff] }
 0x282   : > { %10249 = vmatmul.msk.f32.gmra.mxu3 %vm821_vm2, %v2431_v28  ;;  %v2911_v28 = vld [vmem:[#allocation2 + $0x28] sm:$0xff] }
 0x283   : > { %10325 = vmatmul.msk.f32.gmra.mxu1 %vm821_vm2, %v2910_v2 }
 0x284   : > { %v2297_v57 = vpop.f32.mrf.mxu2 }
 0x285   : > { %v2298_v45 = vadd.f32 %v2297_v57, %v11783_v63  ;;  %v2764_v23 = vpop.f32.mrf.mxu3 }
 0x286   : > { %v11882_v15 = vpop.f32.mrf.mxu0 }
 0x287   : > { %v11884_v25 = vadd.f32 %v2764_v23, %v2298_v45 }
 0x288   : > { %v11886_v33 = vpop.f32.mrf.mxu1 }
 0x289   : > { %15400 = vst [vmem:[#allocation38_spill] sm:$0xff] %v11884_v25  ;;  %10186 = vmatmul.msk.f32.gmra.mxu2 %vm821_vm2, %v1498_v6  ;;  %10280 = vmatmul.msk.f32.gmra.mxu0 %vm821_vm2, %v11888_v1  ;;  %v1499_v6 = vld [vmem:[#allocation2 + $0x1c0] sm:$0xff] }
 0x28a   : > { %10250 = vmatmul.msk.f32.gmra.mxu3 %vm821_vm2, %v2432_v46  ;;  %v2912_v46 = vld [vmem:[#allocation2 + $0x30] sm:$0xff] }
 0x28b   : > { %10326 = vmatmul.msk.f32.gmra.mxu1 %vm821_vm2, %v2911_v28 }
 0x28c   : > { %v2300_v63 = vpop.f32.mrf.mxu2 }
 0x28d   : > { %v2301_v2 = vadd.f32 %v2300_v63, %v11799_v5  ;;  %v2767_v57 = vpop.f32.mrf.mxu3 }
 0x28e   : > { %v11896_v45 = vpop.f32.mrf.mxu0 }
 0x28f   : > { %v11898_v23 = vadd.f32 %v2767_v57, %v2301_v2 }
 0x290   : > { %v11900_v25 = vpop.f32.mrf.mxu1 }
 0x291   : > { %15401 = vst [vmem:[#allocation39_spill] sm:$0xff] %v11898_v23  ;;  %10187 = vmatmul.msk.f32.gmra.mxu2 %vm821_vm2, %v1499_v6  ;;  %10281 = vmatmul.msk.f32.gmra.mxu0 %vm821_vm2, %v11902_v19  ;;  %v1500_v6 = vld [vmem:[#allocation2 + $0x1c8] sm:$0xff] }
 0x292   : > { %10251 = vmatmul.msk.f32.gmra.mxu3 %vm821_vm2, %v2433_v4  ;;  %v2913_v4 = vld [vmem:[#allocation2 + $0x38] sm:$0xff] }
 0x293   : > { %10327 = vmatmul.msk.f32.gmra.mxu1 %vm821_vm2, %v2912_v46 }
 0x294   : > { %v2303_v5 = vpop.f32.mrf.mxu2 }
 0x295   : > { %v2304_v28 = vadd.f32 %v2303_v5, %v11815_v39  ;;  %v2770_v63 = vpop.f32.mrf.mxu3 }
 0x296   : > { %v11910_v2 = vpop.f32.mrf.mxu0 }
 0x297   : > { %v11912_v57 = vadd.f32 %v2770_v63, %v2304_v28 }
 0x298   : > { %v11914_v23 = vpop.f32.mrf.mxu1 }
 0x299   : > { %15402 = vst [vmem:[#allocation40_spill] sm:$0xff] %v11912_v57  ;;  %10188 = vmatmul.msk.f32.gmra.mxu2 %vm821_vm2, %v1500_v6  ;;  %10282 = vmatmul.msk.f32.gmra.mxu0 %vm821_vm2, %v11916_v41  ;;  %v1501_v6 = vld [vmem:[#allocation2 + $0x1d0] sm:$0xff] }
 0x29a   : > { %10252 = vmatmul.msk.f32.gmra.mxu3 %vm821_vm2, %v2434_v22  ;;  %v2914_v22 = vld [vmem:[#allocation2 + $0x40] sm:$0xff] }
 0x29b   : > { %10328 = vmatmul.msk.f32.gmra.mxu1 %vm821_vm2, %v2913_v4 }
 0x29c   : > { %v2306_v39 = vpop.f32.mrf.mxu2 }
 0x29d   : > { %v2307_v46 = vadd.f32 %v2306_v39, %v11830_v52  ;;  %v2773_v5 = vpop.f32.mrf.mxu3 }
 0x29e   : > { %v11924_v28 = vpop.f32.mrf.mxu0 }
 0x29f   : > { %15403 = vst [vmem:[#allocation41_spill] sm:$0xff] %v11924_v28  ;;  %v11926_v63 = vadd.f32 %v2773_v5, %v2307_v46  ;;  %v11988_v28 = vld [vmem:[#allocation2 + $0xf1] sm:$0xff] }
 0x2a0   : > { %v11928_v57 = vpop.f32.mrf.mxu1 }
 0x2a1   : > { %15404 = vst [vmem:[#allocation42_spill] sm:$0xff] %v11926_v63  ;;  %10189 = vmatmul.msk.f32.gmra.mxu2 %vm821_vm2, %v1501_v6  ;;  %10283 = vmatmul.msk.f32.gmra.mxu0 %vm821_vm2, %v11930_v14  ;;  %v1502_v6 = vld [vmem:[#allocation2 + $0x1d8] sm:$0xff] }
 0x2a2   : > { %10253 = vmatmul.msk.f32.gmra.mxu3 %vm821_vm2, %v2435_v16  ;;  %v2915_v16 = vld [vmem:[#allocation2 + $0x48] sm:$0xff] }
 0x2a3   : > { %10329 = vmatmul.msk.f32.gmra.mxu1 %vm821_vm2, %v2914_v22 }
 0x2a4   : > { %v2309_v52 = vpop.f32.mrf.mxu2 }
 0x2a5   : > { %v2310_v4 = vadd.f32 %v2309_v52, %v11844_v27  ;;  %v2776_v39 = vpop.f32.mrf.mxu3 }
 0x2a6   : > { %v11938_v46 = vpop.f32.mrf.mxu0 }
 0x2a7   : > { %15405 = vst [vmem:[#allocation43_spill] sm:$0xff] %v11938_v46  ;;  %v11940_v5 = vadd.f32 %v2776_v39, %v2310_v4  ;;  %v3907_v46 = vld [vmem:[%s11166_s21 + $0x50] sm:$0xff] }
 0x2a8   : > { %v11942_v63 = vpop.f32.mrf.mxu1  ;;  %4116 = vmatpush.msra.mxu2 %v3907_v46 }
 0x2a9   : > { %15406 = vst [vmem:[#allocation44_spill] sm:$0xff] %v11940_v5  ;;  %10190 = vmatmul.msk.f32.gmra.mxu2 %vm821_vm2, %v1502_v6  ;;  %10284 = vmatmul.msk.f32.gmra.mxu0 %vm821_vm2, %v11944_v34  ;;  %v1503_v6 = vld [vmem:[#allocation2 + $0x1e0] sm:$0xff] }
 0x2aa   : > { %10254 = vmatmul.msk.f32.gmra.mxu3 %vm821_vm2, %v2436_v17  ;;  %v2437_v17 = vld [vmem:[#allocation2 + $0x1e2] sm:$0xff] }
 0x2ab   : > { %10330 = vmatmul.msk.f32.gmra.mxu1 %vm821_vm2, %v2915_v16 }
 0x2ac   : > { %v2312_v27 = vpop.f32.mrf.mxu2 }
 0x2ad   : > { %v2313_v22 = vadd.f32 %v2312_v27, %v11858_v49  ;;  %v2779_v52 = vpop.f32.mrf.mxu3  ;;  %v2916_v49 = vld [vmem:[#allocation2 + $0x50] sm:$0xff] }
 0x2ae   : > { %v11952_v4 = vpop.f32.mrf.mxu0 }
 0x2af   : > { %15407 = vst [vmem:[#allocation45_spill] sm:$0xff] %v11952_v4  ;;  %v11954_v39 = vadd.f32 %v2779_v52, %v2313_v22  ;;  %v11970_v4 = vld [vmem:[#allocation2 + $0xe9] sm:$0xff] }
 0x2b0   : > { %v11956_v5 = vpop.f32.mrf.mxu1 }
 0x2b1   : > { %15408 = vst [vmem:[#allocation46_spill] sm:$0xff] %v11954_v39  ;;  %10191 = vmatmul.msk.f32.gmra.mxu2 %vm821_vm2, %v1503_v6  ;;  %10285 = vmatmul.msk.f32.gmra.mxu0 %vm821_vm2, %v11958_v60 }
 0x2b2   : > { %10255 = vmatmul.msk.f32.gmra.mxu3 %vm821_vm2, %v2437_v17  ;;  %v2438_v17 = vld [vmem:[#allocation2 + $0x1ea] sm:$0xff] }
 0x2b3   : > { %10331 = vmatmul.msk.f32.gmra.mxu1 %vm821_vm2, %v2916_v49 }
 0x2b4   : > { %v2315_v16 = vpop.f32.mrf.mxu2 }
 0x2b5   : > { %v2316_v27 = vadd.f32 %v2315_v16, %v11872_v55  ;;  %v2782_v22 = vpop.f32.mrf.mxu3  ;;  %v2917_v55 = vld [vmem:[#allocation2 + $0x58] sm:$0xff] }
 0x2b6   : > { %v11966_v52 = vpop.f32.mrf.mxu0 }
 0x2b7   : > { %15409 = vst [vmem:[#allocation47_spill] sm:$0xff] %v11966_v52  ;;  %v11968_v39 = vadd.f32 %v2782_v22, %v2316_v27  ;;  %v1505_v52 = vld [vmem:[#allocation2 + $0x1f0] sm:$0xff] }
 0x2b8   : > { %v11972_v6 = vpop.f32.mrf.mxu1 }
 0x2b9   : > { %15410 = vst [vmem:[#allocation48_spill] sm:$0xff] %v11968_v39  ;;  %10192 = vmatmul.msk.f32.gmra.mxu2 %vm821_vm2, %v1504_v42  ;;  %10286 = vmatmul.msk.f32.gmra.mxu0 %vm821_vm2, %v11970_v4 }
 0x2ba   : > { %10256 = vmatmul.msk.f32.gmra.mxu3 %vm821_vm2, %v2438_v17  ;;  %v2439_v17 = vld [vmem:[#allocation2 + $0x1f2] sm:$0xff] }
 0x2bb   : > { %10332 = vmatmul.msk.f32.gmra.mxu1 %vm821_vm2, %v2917_v55 }
 0x2bc   : > { %v2318_v49 = vpop.f32.mrf.mxu2 }
 0x2bd   : > { %v2319_v16 = vadd.f32 %v2318_v49, %v11886_v33  ;;  %v2785_v27 = vpop.f32.mrf.mxu3 }
 0x2be   : > { %v11982_v22 = vpop.f32.mrf.mxu0 }
 0x2bf   : > { %15411 = vst [vmem:[#allocation49_spill] sm:$0xff] %v11982_v22  ;;  %v11984_v39 = vadd.f32 %v2785_v27, %v2319_v16  ;;  %v2440_v22 = vld [vmem:[#allocation2 + $0x1fa] sm:$0xff] }
 0x2c0   : > { %v11986_v42 = vpop.f32.mrf.mxu1 }
 0x2c1   : > { %15412 = vst [vmem:[#allocation50_spill] sm:$0xff] %v11984_v39  ;;  %10193 = vmatmul.msk.f32.gmra.mxu2 %vm821_vm2, %v1505_v52  ;;  %10287 = vmatmul.msk.f32.gmra.mxu0 %vm821_vm2, %v11988_v28  ;;  %v1506_v52 = vld [vmem:[#allocation2 + $0x1f8] sm:$0xff] }
 0x2c2   : > { %10257 = vmatmul.msk.f32.gmra.mxu3 %vm821_vm2, %v2439_v17  ;;  %v12002_v39 = vld [vmem:[#allocation2 + $0xf9] sm:$0xff]  ;;  %v2919_v17 = vld [vmem:[#allocation2 + $0x68] sm:$0xff] }
 0x2c3   : > { %10333 = vmatmul.msk.f32.gmra.mxu1 %vm821_vm2, %v2918_v26  ;;  %15415 = vst [vmem:[#allocation53_spill] sm:$0xff] %v12002_v39 }
 0x2c4   : > { %v2321_v33 = vpop.f32.mrf.mxu2 }
 0x2c5   : > { %v2322_v46 = vadd.f32 %v2321_v33, %v11900_v25  ;;  %v2788_v55 = vpop.f32.mrf.mxu3 }
 0x2c6   : > { %v11996_v49 = vpop.f32.mrf.mxu0 }
 0x2c7   : > { %15413 = vst [vmem:[#allocation51_spill] sm:$0xff] %v11996_v49  ;;  %v11998_v16 = vadd.f32 %v2788_v55, %v2322_v46  ;;  %v12016_v49 = vld [vmem:[#allocation2 + $0x101] sm:$0xff] }
 0x2c8   : > { %v12000_v27 = vpop.f32.mrf.mxu1 }
 0x2c9   : > { %15414 = vst [vmem:[#allocation52_spill] sm:$0xff] %v11998_v16  ;;  %10194 = vmatmul.msk.f32.gmra.mxu2 %vm821_vm2, %v1506_v52  ;;  %10288 = vmatmul.msk.f32.gmra.mxu0 %vm821_vm2, %v12002_v39  ;;  %v1507_v52 = vld [vmem:[#allocation2 + $0x200] sm:$0xff] }
 0x2ca   : > { %10258 = vmatmul.msk.f32.gmra.mxu3 %vm821_vm2, %v2440_v22  ;;  %v2441_v39 = vld [vmem:[#allocation2 + $0x202] sm:$0xff]  ;;  %v2920_v22 = vld [vmem:[#allocation2 + $0x70] sm:$0xff] }
 0x2cb   : > { %10334 = vmatmul.msk.f32.gmra.mxu1 %vm821_vm2, %v2919_v17 }
 0x2cc   : > { %v2324_v25 = vpop.f32.mrf.mxu2 }
 0x2cd   : > { %v2325_v26 = vadd.f32 %v2324_v25, %v11914_v23  ;;  %v2791_v33 = vpop.f32.mrf.mxu3 }
 0x2ce   : > { %v12010_v46 = vpop.f32.mrf.mxu0 }
 0x2cf   : > { %15416 = vst [vmem:[#allocation54_spill] sm:$0xff] %v12010_v46  ;;  %v12012_v55 = vadd.f32 %v2791_v33, %v2325_v26  ;;  %v3843_v46 = vld [vmem:[#allocation2 + $0x1a] sm:$0xff] }
 0x2d0   : > { %v12014_v16 = vpop.f32.mrf.mxu1 }
 0x2d1   : > { %15417 = vst [vmem:[#allocation55_spill] sm:$0xff] %v12012_v55  ;;  %10195 = vmatmul.msk.f32.gmra.mxu2 %vm821_vm2, %v1507_v52  ;;  %10289 = vmatmul.msk.f32.gmra.mxu0 %vm821_vm2, %v12016_v49  ;;  %v12030_v52 = vld [vmem:[#allocation2 + $0x109] sm:$0xff] }
 0x2d2   : > { %10259 = vmatmul.msk.f32.gmra.mxu3 %vm821_vm2, %v2441_v39  ;;  %15420 = vst [vmem:[#allocation58_spill] sm:$0xff] %v12030_v52  ;;  %v2921_v39 = vld [vmem:[#allocation2 + $0x78] sm:$0xff] }
 0x2d3   : > { %10335 = vmatmul.msk.f32.gmra.mxu1 %vm821_vm2, %v2920_v22 }
 0x2d4   : > { %v2327_v23 = vpop.f32.mrf.mxu2 }
 0x2d5   : > { %v2328_v17 = vadd.f32 %v2327_v23, %v11928_v57  ;;  %v2794_v25 = vpop.f32.mrf.mxu3 }
 0x2d6   : > { %v12024_v26 = vpop.f32.mrf.mxu0 }
 0x2d7   : > { %15418 = vst [vmem:[#allocation56_spill] sm:$0xff] %v12024_v26  ;;  %v12026_v33 = vadd.f32 %v2794_v25, %v2328_v17  ;;  %v12045_v26 = vld [vmem:[#allocation2 + $0x111] sm:$0xff] }
 0x2d8   : > { %v12028_v55 = vpop.f32.mrf.mxu1 }
 0x2d9   : > { %15419 = vst [vmem:[#allocation57_spill] sm:$0xff] %v12026_v33  ;;  %10290 = vmatmul.msk.f32.gmra.mxu0 %vm821_vm2, %v12030_v52  ;;  %10388 = vmatmul.msk.f32.vlgmr.msra.gmra.mxu2 %vm821_vm2, %v3843_v46  ;;  %v3844_v52 = vld [vmem:[#allocation2 + $0x22] sm:$0xff] }
 0x2da   : > { %10452 = vmatmul.msk.f32.vlgmr.msrb.gmra.mxu3 %vm821_vm2, %v11631_v9  ;;  %v2922_v9 = vld [vmem:[#allocation2 + $0x80] sm:$0xff] }
 0x2db   : > { %10336 = vmatmul.msk.f32.gmra.mxu1 %vm821_vm2, %v2921_v39 }
 0x2dc   : > { %v2330_v57 = vpop.f32.mrf.mxu2 }
 0x2dd   : > { %v2331_v22 = vadd.f32 %v2330_v57, %v11942_v63  ;;  %v2797_v23 = vpop.f32.mrf.mxu3 }
 0x2de   : > { %v12039_v17 = vpop.f32.mrf.mxu0 }
 0x2df   : > { %15421 = vst [vmem:[#allocation59_spill] sm:$0xff] %v12039_v17  ;;  %v12041_v25 = vadd.f32 %v2797_v23, %v2331_v22  ;;  %v3845_v17 = vld [vmem:[#allocation2 + $0x2a] sm:$0xff] }
 0x2e0   : > { %v12043_v33 = vpop.f32.mrf.mxu1 }
 0x2e1   : > { %15422 = vst [vmem:[#allocation60_spill] sm:$0xff] %v12041_v25  ;;  %10291 = vmatmul.msk.f32.gmra.mxu0 %vm821_vm2, %v12045_v26  ;;  %10389 = vmatmul.msk.f32.gmra.mxu2 %vm821_vm2, %v3844_v52  ;;  %v12060_v25 = vld [vmem:[#allocation2 + $0x119] sm:$0xff] }
 0x2e2   : > { %10453 = vmatmul.msk.f32.gmra.mxu3 %vm821_vm2, %v11645_v30  ;;  %v2923_v30 = vld [vmem:[#allocation2 + $0x88] sm:$0xff] }
 0x2e3   : > { %10337 = vmatmul.msk.f32.gmra.mxu1 %vm821_vm2, %v2922_v9 }
 0x2e4   : > { %v2333_v63 = vpop.f32.mrf.mxu2 }
 0x2e5   : > { %v2334_v46 = vadd.f32 %v2333_v63, %v11956_v5  ;;  %v2800_v39 = vpop.f32.mrf.mxu3 }
 0x2e6   : > { %v12054_v57 = vpop.f32.mrf.mxu0 }
 0x2e7   : > { %15423 = vst [vmem:[#allocation61_spill] sm:$0xff] %v12054_v57  ;;  %v12056_v22 = vadd.f32 %v2800_v39, %v2334_v46  ;;  %v3846_v57 = vld [vmem:[#allocation2 + $0x32] sm:$0xff] }
 0x2e8   : > { %v12058_v23 = vpop.f32.mrf.mxu1 }
 0x2e9   : > { %15424 = vst [vmem:[#allocation62_spill] sm:$0xff] %v12056_v22  ;;  %10292 = vmatmul.msk.f32.gmra.mxu0 %vm821_vm2, %v12060_v25  ;;  %10390 = vmatmul.msk.f32.gmra.mxu2 %vm821_vm2, %v3845_v17  ;;  %v12075_v22 = vld [vmem:[#allocation2 + $0x121] sm:$0xff] }
 0x2ea   : > { %10454 = vmatmul.msk.f32.gmra.mxu3 %vm821_vm2, %v11659_v50  ;;  %v2924_v50 = vld [vmem:[#allocation2 + $0x90] sm:$0xff] }
 0x2eb   : > { %10338 = vmatmul.msk.f32.gmra.mxu1 %vm821_vm2, %v2923_v30 }
 0x2ec   : > { %v2336_v5 = vpop.f32.mrf.mxu2 }
 0x2ed   : > { %v2337_v52 = vadd.f32 %v2336_v5, %v11972_v6  ;;  %v2803_v9 = vpop.f32.mrf.mxu3 }
 0x2ee   : > { %v12069_v63 = vpop.f32.mrf.mxu0 }
 0x2ef   : > { %15425 = vst [vmem:[#allocation63_spill] sm:$0xff] %v12069_v63  ;;  %v12071_v46 = vadd.f32 %v2803_v9, %v2337_v52  ;;  %v3847_v63 = vld [vmem:[#allocation2 + $0x3a] sm:$0xff] }
 0x2f0   : > { %v12073_v39 = vpop.f32.mrf.mxu1 }
 0x2f1   : > { %15426 = vst [vmem:[#allocation64_spill] sm:$0xff] %v12071_v46  ;;  %10293 = vmatmul.msk.f32.gmra.mxu0 %vm821_vm2, %v12075_v22  ;;  %10391 = vmatmul.msk.f32.gmra.mxu2 %vm821_vm2, %v3846_v57  ;;  %v12090_v46 = vld [vmem:[#allocation2 + $0x129] sm:$0xff] }
 0x2f2   : > { %10455 = vmatmul.msk.f32.gmra.mxu3 %vm821_vm2, %v11673_v36  ;;  %v2925_v36 = vld [vmem:[#allocation2 + $0x98] sm:$0xff] }
 0x2f3   : > { %10339 = vmatmul.msk.f32.gmra.mxu1 %vm821_vm2, %v2924_v50 }
 0x2f4   : > { %v2339_v6 = vpop.f32.mrf.mxu2 }
 0x2f5   : > { %v2340_v17 = vadd.f32 %v2339_v6, %v11986_v42  ;;  %v2806_v30 = vpop.f32.mrf.mxu3 }
 0x2f6   : > { %v12084_v5 = vpop.f32.mrf.mxu0 }
 0x2f7   : > { %15427 = vst [vmem:[#allocation65_spill] sm:$0xff] %v12084_v5  ;;  %v12086_v52 = vadd.f32 %v2806_v30, %v2340_v17  ;;  %v3848_v5 = vld [vmem:[#allocation2 + $0x42] sm:$0xff] }
 0x2f8   : > { %v12088_v9 = vpop.f32.mrf.mxu1 }
 0x2f9   : > { %15428 = vst [vmem:[#allocation66_spill] sm:$0xff] %v12086_v52  ;;  %10294 = vmatmul.msk.f32.gmra.mxu0 %vm821_vm2, %v12090_v46  ;;  %10392 = vmatmul.msk.f32.gmra.mxu2 %vm821_vm2, %v3847_v63  ;;  %v12105_v52 = vld [vmem:[#allocation2 + $0x131] sm:$0xff] }
 0x2fa   : > { %10456 = vmatmul.msk.f32.gmra.mxu3 %vm821_vm2, %v11687_v44  ;;  %v2926_v44 = vld [vmem:[#allocation2 + $0xa0] sm:$0xff] }
 0x2fb   : > { %10340 = vmatmul.msk.f32.gmra.mxu1 %vm821_vm2, %v2925_v36 }
 0x2fc   : > { %v2342_v42 = vpop.f32.mrf.mxu2 }
 0x2fd   : > { %v2343_v57 = vadd.f32 %v2342_v42, %v12000_v27  ;;  %v2809_v50 = vpop.f32.mrf.mxu3 }
 0x2fe   : > { %v12099_v6 = vpop.f32.mrf.mxu0 }
 0x2ff   : > { %15429 = vst [vmem:[#allocation67_spill] sm:$0xff] %v12099_v6  ;;  %v12101_v17 = vadd.f32 %v2809_v50, %v2343_v57  ;;  %v3849_v6 = vld [vmem:[#allocation2 + $0x4a] sm:$0xff] }
 0x300   : > { %v12103_v30 = vpop.f32.mrf.mxu1 }
 0x301   : > { %15430 = vst [vmem:[#allocation68_spill] sm:$0xff] %v12101_v17  ;;  %10295 = vmatmul.msk.f32.gmra.mxu0 %vm821_vm2, %v12105_v52  ;;  %10393 = vmatmul.msk.f32.gmra.mxu2 %vm821_vm2, %v3848_v5  ;;  %v12120_v17 = vld [vmem:[#allocation2 + $0x139] sm:$0xff] }
 0x302   : > { %10457 = vmatmul.msk.f32.gmra.mxu3 %vm821_vm2, %v11701_v20  ;;  %v2927_v20 = vld [vmem:[#allocation2 + $0xa8] sm:$0xff] }
 0x303   : > { %10341 = vmatmul.msk.f32.gmra.mxu1 %vm821_vm2, %v2926_v44 }
 0x304   : > { %v2345_v27 = vpop.f32.mrf.mxu2 }
 0x305   : > { %v2346_v63 = vadd.f32 %v2345_v27, %v12014_v16  ;;  %v2812_v36 = vpop.f32.mrf.mxu3 }
 0x306   : > { %v12114_v42 = vpop.f32.mrf.mxu0 }
 0x307   : > { %15431 = vst [vmem:[#allocation69_spill] sm:$0xff] %v12114_v42  ;;  %v12116_v57 = vadd.f32 %v2812_v36, %v2346_v63  ;;  %v3850_v42 = vld [vmem:[#allocation2 + $0x52] sm:$0xff] }
 0x308   : > { %v12118_v50 = vpop.f32.mrf.mxu1 }
 0x309   : > { %15432 = vst [vmem:[#allocation70_spill] sm:$0xff] %v12116_v57  ;;  %10296 = vmatmul.msk.f32.gmra.mxu0 %vm821_vm2, %v12120_v17  ;;  %10394 = vmatmul.msk.f32.gmra.mxu2 %vm821_vm2, %v3849_v6  ;;  %v12135_v57 = vld [vmem:[#allocation2 + $0x141] sm:$0xff] }
 0x30a   : > { %10458 = vmatmul.msk.f32.gmra.mxu3 %vm821_vm2, %v11715_v53  ;;  %v2928_v53 = vld [vmem:[#allocation2 + $0xb0] sm:$0xff] }
 0x30b   : > { %10342 = vmatmul.msk.f32.gmra.mxu1 %vm821_vm2, %v2927_v20 }
 0x30c   : > { %v2348_v16 = vpop.f32.mrf.mxu2 }
 0x30d   : > { %v2349_v5 = vadd.f32 %v2348_v16, %v12028_v55  ;;  %v2815_v44 = vpop.f32.mrf.mxu3 }
 0x30e   : > { %v12129_v27 = vpop.f32.mrf.mxu0 }
 0x30f   : > { %15433 = vst [vmem:[#allocation71_spill] sm:$0xff] %v12129_v27  ;;  %v12131_v63 = vadd.f32 %v2815_v44, %v2349_v5  ;;  %v3851_v27 = vld [vmem:[#allocation2 + $0x5a] sm:$0xff] }
 0x310   : > { %v12133_v36 = vpop.f32.mrf.mxu1 }
 0x311   : > { %15434 = vst [vmem:[#allocation72_spill] sm:$0xff] %v12131_v63  ;;  %10297 = vmatmul.msk.f32.gmra.mxu0 %vm821_vm2, %v12135_v57  ;;  %10395 = vmatmul.msk.f32.gmra.mxu2 %vm821_vm2, %v3850_v42  ;;  %v12150_v63 = vld [vmem:[#allocation2 + $0x149] sm:$0xff] }
 0x312   : > { %10459 = vmatmul.msk.f32.gmra.mxu3 %vm821_vm2, %v11729_v62  ;;  %v2929_v62 = vld [vmem:[#allocation2 + $0xb8] sm:$0xff] }
 0x313   : > { %10343 = vmatmul.msk.f32.gmra.mxu1 %vm821_vm2, %v2928_v53 }
 0x314   : > { %v2351_v55 = vpop.f32.mrf.mxu2 }
 0x315   : > { %v2352_v6 = vadd.f32 %v2351_v55, %v12043_v33  ;;  %v2818_v20 = vpop.f32.mrf.mxu3 }
 0x316   : > { %v12144_v16 = vpop.f32.mrf.mxu0 }
 0x317   : > { %15435 = vst [vmem:[#allocation73_spill] sm:$0xff] %v12144_v16  ;;  %v12146_v5 = vadd.f32 %v2818_v20, %v2352_v6  ;;  %v3852_v16 = vld [vmem:[#allocation2 + $0x62] sm:$0xff] }
 0x318   : > { %v12148_v44 = vpop.f32.mrf.mxu1 }
 0x319   : > { %15436 = vst [vmem:[#allocation74_spill] sm:$0xff] %v12146_v5  ;;  %10298 = vmatmul.msk.f32.gmra.mxu0 %vm821_vm2, %v12150_v63  ;;  %10396 = vmatmul.msk.f32.gmra.mxu2 %vm821_vm2, %v3851_v27  ;;  %v12165_v5 = vld [vmem:[#allocation2 + $0x151] sm:$0xff] }
 0x31a   : > { %10460 = vmatmul.msk.f32.gmra.mxu3 %vm821_vm2, %v11743_v18  ;;  %v2930_v18 = vld [vmem:[#allocation2 + $0xc0] sm:$0xff] }
 0x31b   : > { %10344 = vmatmul.msk.f32.gmra.mxu1 %vm821_vm2, %v2929_v62 }
 0x31c   : > { %v2354_v33 = vpop.f32.mrf.mxu2 }
 0x31d   : > { %v2355_v42 = vadd.f32 %v2354_v33, %v12058_v23  ;;  %v2821_v53 = vpop.f32.mrf.mxu3 }
 0x31e   : > { %v12159_v55 = vpop.f32.mrf.mxu0 }
 0x31f   : > { %15437 = vst [vmem:[#allocation75_spill] sm:$0xff] %v12159_v55  ;;  %v12161_v6 = vadd.f32 %v2821_v53, %v2355_v42  ;;  %v3853_v55 = vld [vmem:[#allocation2 + $0x6a] sm:$0xff] }
 0x320   : > { %v12163_v20 = vpop.f32.mrf.mxu1 }
 0x321   : > { %15438 = vst [vmem:[#allocation76_spill] sm:$0xff] %v12161_v6  ;;  %10299 = vmatmul.msk.f32.gmra.mxu0 %vm821_vm2, %v12165_v5  ;;  %10397 = vmatmul.msk.f32.gmra.mxu2 %vm821_vm2, %v3852_v16  ;;  %v12180_v6 = vld [vmem:[#allocation2 + $0x159] sm:$0xff] }
 0x322   : > { %10461 = vmatmul.msk.f32.gmra.mxu3 %vm821_vm2, %v11757_v13  ;;  %v2931_v13 = vld [vmem:[#allocation2 + $0xc8] sm:$0xff] }
 0x323   : > { %10345 = vmatmul.msk.f32.gmra.mxu1 %vm821_vm2, %v2930_v18 }
 0x324   : > { %v2357_v23 = vpop.f32.mrf.mxu2 }
 0x325   : > { %v2358_v27 = vadd.f32 %v2357_v23, %v12073_v39  ;;  %v2824_v62 = vpop.f32.mrf.mxu3 }
 0x326   : > { %v12174_v33 = vpop.f32.mrf.mxu0 }
 0x327   : > { %15439 = vst [vmem:[#allocation77_spill] sm:$0xff] %v12174_v33  ;;  %v12176_v42 = vadd.f32 %v2824_v62, %v2358_v27  ;;  %v3854_v33 = vld [vmem:[#allocation2 + $0x72] sm:$0xff] }
 0x328   : > { %v12178_v53 = vpop.f32.mrf.mxu1 }
 0x329   : > { %15440 = vst [vmem:[#allocation78_spill] sm:$0xff] %v12176_v42  ;;  %10300 = vmatmul.msk.f32.gmra.mxu0 %vm821_vm2, %v12180_v6  ;;  %10398 = vmatmul.msk.f32.gmra.mxu2 %vm821_vm2, %v3853_v55  ;;  %v12195_v42 = vld [vmem:[#allocation2 + $0x161] sm:$0xff] }
 0x32a   : > { %10462 = vmatmul.msk.f32.gmra.mxu3 %vm821_vm2, %v11771_v56  ;;  %v2932_v56 = vld [vmem:[#allocation2 + $0xd0] sm:$0xff] }
 0x32b   : > { %10346 = vmatmul.msk.f32.gmra.mxu1 %vm821_vm2, %v2931_v13 }
 0x32c   : > { %v2360_v39 = vpop.f32.mrf.mxu2 }
 0x32d   : > { %v2361_v16 = vadd.f32 %v2360_v39, %v11337_v58  ;;  %v2827_v18 = vpop.f32.mrf.mxu3 }
 0x32e   : > { %v12189_v23 = vpop.f32.mrf.mxu0 }
 0x32f   : > { %15441 = vst [vmem:[#allocation79_spill] sm:$0xff] %v12189_v23  ;;  %v12191_v27 = vadd.f32 %v2827_v18, %v2361_v16  ;;  %v3855_v23 = vld [vmem:[#allocation2 + $0x7a] sm:$0xff] }
 0x330   : > { %v12193_v62 = vpop.f32.mrf.mxu1 }
 0x331   : > { %15442 = vst [vmem:[#allocation80_spill] sm:$0xff] %v12191_v27  ;;  %10301 = vmatmul.msk.f32.gmra.mxu0 %vm821_vm2, %v12195_v42  ;;  %10399 = vmatmul.msk.f32.gmra.mxu2 %vm821_vm2, %v3854_v33  ;;  %v12210_v27 = vld [vmem:[#allocation2 + $0x169] sm:$0xff] }
 0x332   : > { %10463 = vmatmul.msk.f32.gmra.mxu3 %vm821_vm2, %v11785_v37  ;;  %v2933_v37 = vld [vmem:[#allocation2 + $0xd8] sm:$0xff] }
 0x333   : > { %10347 = vmatmul.msk.f32.gmra.mxu1 %vm821_vm2, %v2932_v56 }
 0x334   : > { %v2363_v58 = vpop.f32.mrf.mxu2 }
 0x335   : > { %v2364_v55 = vadd.f32 %v2363_v58, %v11348_v3  ;;  %v2830_v13 = vpop.f32.mrf.mxu3 }
 0x336   : > { %v12204_v39 = vpop.f32.mrf.mxu0 }
 0x337   : > { %15443 = vst [vmem:[#allocation81_spill] sm:$0xff] %v12204_v39  ;;  %v12206_v16 = vadd.f32 %v2830_v13, %v2364_v55  ;;  %v3856_v39 = vld [vmem:[#allocation2 + $0x82] sm:$0xff] }
 0x338   : > { %v12208_v18 = vpop.f32.mrf.mxu1 }
 0x339   : > { %15444 = vst [vmem:[#allocation82_spill] sm:$0xff] %v12206_v16  ;;  %10302 = vmatmul.msk.f32.gmra.mxu0 %vm821_vm2, %v12210_v27  ;;  %10400 = vmatmul.msk.f32.gmra.mxu2 %vm821_vm2, %v3855_v23  ;;  %v12225_v16 = vld [vmem:[#allocation2 + $0x171] sm:$0xff] }
 0x33a   : > { %10464 = vmatmul.msk.f32.gmra.mxu3 %vm821_vm2, %v11801_v24  ;;  %v2934_v24 = vld [vmem:[#allocation2 + $0xe0] sm:$0xff] }
 0x33b   : > { %10348 = vmatmul.msk.f32.gmra.mxu1 %vm821_vm2, %v2933_v37 }
 0x33c   : > { %v2366_v3 = vpop.f32.mrf.mxu2 }
 0x33d   : > { %v2367_v33 = vadd.f32 %v2366_v3, %v11359_v12  ;;  %v2833_v56 = vpop.f32.mrf.mxu3 }
 0x33e   : > { %v12219_v58 = vpop.f32.mrf.mxu0 }
 0x33f   : > { %15445 = vst [vmem:[#allocation83_spill] sm:$0xff] %v12219_v58  ;;  %v12221_v55 = vadd.f32 %v2833_v56, %v2367_v33  ;;  %v3857_v58 = vld [vmem:[#allocation2 + $0x8a] sm:$0xff] }
 0x340   : > { %v12223_v13 = vpop.f32.mrf.mxu1 }
 0x341   : > { %15446 = vst [vmem:[#allocation84_spill] sm:$0xff] %v12221_v55  ;;  %10303 = vmatmul.msk.f32.gmra.mxu0 %vm821_vm2, %v12225_v16  ;;  %10401 = vmatmul.msk.f32.gmra.mxu2 %vm821_vm2, %v3856_v39  ;;  %v12240_v55 = vld [vmem:[#allocation2 + $0x179] sm:$0xff] }
 0x342   : > { %10465 = vmatmul.msk.f32.gmra.mxu3 %vm821_vm2, %v11817_v8  ;;  %v2935_v8 = vld [vmem:[#allocation2 + $0xe8] sm:$0xff] }
 0x343   : > { %10349 = vmatmul.msk.f32.gmra.mxu1 %vm821_vm2, %v2934_v24 }
 0x344   : > { %v2369_v12 = vpop.f32.mrf.mxu2 }
 0x345   : > { %v2370_v23 = vadd.f32 %v2369_v12, %v11370_v21  ;;  %v2836_v37 = vpop.f32.mrf.mxu3 }
 0x346   : > { %v12234_v3 = vpop.f32.mrf.mxu0 }
 0x347   : > { %15447 = vst [vmem:[#allocation85_spill] sm:$0xff] %v12234_v3  ;;  %v12236_v33 = vadd.f32 %v2836_v37, %v2370_v23  ;;  %v3858_v3 = vld [vmem:[#allocation2 + $0x92] sm:$0xff] }
 0x348   : > { %v12238_v56 = vpop.f32.mrf.mxu1 }
 0x349   : > { %15448 = vst [vmem:[#allocation86_spill] sm:$0xff] %v12236_v33  ;;  %10304 = vmatmul.msk.f32.gmra.mxu0 %vm821_vm2, %v12240_v55  ;;  %10402 = vmatmul.msk.f32.gmra.mxu2 %vm821_vm2, %v3857_v58  ;;  %v12255_v33 = vld [vmem:[#allocation2 + $0x181] sm:$0xff] }
 0x34a   : > { %10466 = vmatmul.msk.f32.gmra.mxu3 %vm821_vm2, %v11832_v51 }
 0x34b   : > { %10350 = vmatmul.msk.f32.gmra.mxu1 %vm821_vm2, %v2935_v8 }
 0x34c   : > { %v2372_v21 = vpop.f32.mrf.mxu2 }
 0x34d   : > { %v2373_v39 = vadd.f32 %v2372_v21, %v11381_v31  ;;  %v2839_v24 = vpop.f32.mrf.mxu3  ;;  %v2936_v31 = vld [vmem:[#allocation2 + $0xf0] sm:$0xff] }
 0x34e   : > { %v12249_v12 = vpop.f32.mrf.mxu0 }
 0x34f   : > { %15449 = vst [vmem:[#allocation87_spill] sm:$0xff] %v12249_v12  ;;  %v12251_v23 = vadd.f32 %v2839_v24, %v2373_v39  ;;  %v12291_v12 = vld [vmem:[#allocation2 + $0x191] sm:$0xff] }
 0x350   : > { %v12253_v37 = vpop.f32.mrf.mxu1 }
 0x351   : > { %15450 = vst [vmem:[#allocation88_spill] sm:$0xff] %v12251_v23  ;;  %10305 = vmatmul.msk.f32.gmra.mxu0 %vm821_vm2, %v12255_v33  ;;  %10403 = vmatmul.msk.f32.gmra.mxu2 %vm821_vm2, %v3858_v3  ;;  %v12270_v23 = vld [vmem:[#allocation2 + $0x189] sm:$0xff]  ;;  %v3859_v3 = vld [vmem:[#allocation2 + $0x9a] sm:$0xff] }
 0x352   : > { %10467 = vmatmul.msk.f32.gmra.mxu3 %vm821_vm2, %v11846_v48  ;;  %15453 = vst [vmem:[#allocation91_spill] sm:$0xff] %v12270_v23  ;;  %v2937_v48 = vld [vmem:[#allocation2 + $0xf8] sm:$0xff] }
 0x353   : > { %10351 = vmatmul.msk.f32.gmra.mxu1 %vm821_vm2, %v2936_v31  ;;  %v3652_v31 = vadd.f32 %v12088_v9, %v11826_v7  ;;  %v2938_v7 = vld [vmem:[#allocation2 + $0x100] sm:$0xff]  ;;  %v3655_v9 = vadd.f32 %v12103_v30, %v11840_v35  ;;  %v2939_v35 = vld [vmem:[#allocation2 + $0x108] sm:$0xff]  ;;  %v3658_v30 = vadd.f32 %v12118_v50, %v11854_v54  ;;  %v2940_v54 = vld [vmem:[#allocation2 + $0x110] sm:$0xff]  ;;  %v3661_v50 = vadd.f32 %v12133_v36, %v11868_v40 }
 0x354   : > { %v2375_v51 = vpop.f32.mrf.mxu2  ;;  %v2941_v40 = vld [vmem:[#allocation2 + $0x118] sm:$0xff]  ;;  %v3664_v36 = vadd.f32 %v12148_v44, %v11882_v15  ;;  %v2942_v15 = vld [vmem:[#allocation2 + $0x120] sm:$0xff]  ;;  %v3667_v44 = vadd.f32 %v12163_v20, %v11896_v45  ;;  %v2943_v45 = vld [vmem:[#allocation2 + $0x128] sm:$0xff]  ;;  %v3670_v20 = vadd.f32 %v12178_v53, %v11910_v2 }
 0x355   : > { %v2376_v58 = vadd.f32 %v2375_v51, %v11383_v32  ;;  %v2842_v8 = vpop.f32.mrf.mxu3  ;;  %v4438_v32 = vld [vmem:[%s11166_s21 + $0x60] sm:$0xff]  ;;  %v2944_v2 = vld [vmem:[#allocation2 + $0x130] sm:$0xff]  ;;  %v15466_v53 = vld [vmem:[#allocation41_spill] sm:$0xff] }
 0x356   : > { %v12264_v21 = vpop.f32.mrf.mxu0  ;;  %5114 = vmatpush.msra.mxu0 %v4438_v32  ;;  %v5372_v51 = vld [vmem:[%s11166_s21 + $0x80] sm:$0xff]  ;;  %s10943_s21 = sshll.u32 %s11104_s29, 7 }
 0x357   : > { %15451 = vst [vmem:[#allocation89_spill] sm:$0xff] %v12264_v21  ;;  %v12266_v39 = vadd.f32 %v2842_v8, %v2376_v58  ;;  %5581 = vmatpush.msra.mxu1 %v5372_v51  ;;  %s15276_s23 = scalar_lea.vmem %s15349_s13, %s10943_s21 }
 0x358   : > { %v12268_v24 = vpop.f32.mrf.mxu1 }
 0x359   : > { %15452 = vst [vmem:[#allocation90_spill] sm:$0xff] %v12266_v39  ;;  %10306 = vmatmul.msk.f32.gmra.mxu0 %vm821_vm2, %v12270_v23  ;;  %10404 = vmatmul.msk.f32.gmra.mxu2 %vm821_vm2, %v3859_v3  ;;  %v3860_v23 = vld [vmem:[#allocation2 + $0xa2] sm:$0xff] }
 0x35a   : > { %10468 = vmatmul.msk.f32.gmra.mxu3 %vm821_vm2, %v11860_v38 }
 0x35b   : > { %10352 = vmatmul.msk.f32.gmra.mxu1 %vm821_vm2, %v2937_v48 }
 0x35c   : > { %v4118_v58 = vpop.f32.mrf.mxu2 }
 0x35d   : > { %v4310_v8 = vadd.f32 %v4118_v58, %v3652_v31  ;;  %v12282_v39 = vpop.f32.mrf.mxu3 }
 0x35e   : > { %v12284_v21 = vpop.f32.mrf.mxu0 }
 0x35f   : > { %v12287_v3 = vadd.f32 %v4310_v8, %v11396_v47 }
 0x360   : > { %v12289_v38 = vpop.f32.mrf.mxu1 }
 0x361   : > { %10307 = vmatmul.msk.f32.gmra.mxu0 %vm821_vm2, %v12291_v12  ;;  %10405 = vmatmul.msk.f32.gmra.mxu2 %vm821_vm2, %v3860_v23  ;;  %v12310_v23 = vld [vmem:[#allocation2 + $0x199] sm:$0xff] }
 0x362   : > { %10469 = vmatmul.msk.f32.gmra.mxu3 %vm821_vm2, %v11874_v0  ;;  %v3861_v0 = vld [vmem:[#allocation2 + $0xaa] sm:$0xff] }
 0x363   : > { %10353 = vmatmul.msk.f32.gmra.mxu1 %vm821_vm2, %v2938_v7 }
 0x364   : > { %v4121_v47 = vpop.f32.mrf.mxu2 }
 0x365   : > { %v4311_v48 = vadd.f32 %v4121_v47, %v3655_v9  ;;  %v12301_v32 = vpop.f32.mrf.mxu3 }
 0x366   : > { %15454 = vst [vmem:[#allocation92_spill] sm:$0xff] %v12301_v32  ;;  %v12303_v31 = vpop.f32.mrf.mxu0  ;;  %v3875_v32 = vld [vmem:[#allocation2 + $0x11a] sm:$0xff] }
 0x367   : > { %v12306_v51 = vadd.f32 %v4311_v48, %v11408_v61 }
 0x368   : > { %v12308_v58 = vpop.f32.mrf.mxu1 }
 0x369   : > { %15455 = vst [vmem:[#allocation93_spill] sm:$0xff] %v12306_v51  ;;  %10308 = vmatmul.msk.f32.gmra.mxu0 %vm821_vm2, %v12310_v23  ;;  %10406 = vmatmul.msk.f32.gmra.mxu2 %vm821_vm2, %v3861_v0  ;;  %v12329_v0 = vld [vmem:[#allocation2 + $0x1a1] sm:$0xff]  ;;  %v12515_v51 = vld [vmem:[#allocation2 + $0x1f1] sm:$0xff] }
 0x36a   : > { %10470 = vmatmul.msk.f32.gmra.mxu3 %vm821_vm2, %v11888_v1  ;;  %v3862_v1 = vld [vmem:[#allocation2 + $0xb2] sm:$0xff] }
 0x36b   : > { %10354 = vmatmul.msk.f32.gmra.mxu1 %vm821_vm2, %v2939_v35 }
 0x36c   : > { %v4124_v61 = vpop.f32.mrf.mxu2 }
 0x36d   : > { %v4312_v8 = vadd.f32 %v4124_v61, %v3658_v30  ;;  %v12320_v7 = vpop.f32.mrf.mxu3 }
 0x36e   : > { %15456 = vst [vmem:[#allocation94_spill] sm:$0xff] %v12320_v7  ;;  %v12322_v9 = vpop.f32.mrf.mxu0 }
 0x36f   : > { %v12325_v47 = vadd.f32 %v4312_v8, %v11420_v11 }
 0x370   : > { %v12327_v48 = vpop.f32.mrf.mxu1 }
 0x371   : > { %15457 = vst [vmem:[#allocation95_spill] sm:$0xff] %v12325_v47  ;;  %10309 = vmatmul.msk.f32.gmra.mxu0 %vm821_vm2, %v12329_v0  ;;  %10407 = vmatmul.msk.f32.gmra.mxu2 %vm821_vm2, %v3862_v1  ;;  %v12348_v1 = vld [vmem:[#allocation2 + $0x1a9] sm:$0xff] }
 0x372   : > { %10471 = vmatmul.msk.f32.gmra.mxu3 %vm821_vm2, %v11902_v19  ;;  %v3863_v19 = vld [vmem:[#allocation2 + $0xba] sm:$0xff] }
 0x373   : > { %10355 = vmatmul.msk.f32.gmra.mxu1 %vm821_vm2, %v2940_v54 }
 0x374   : > { %v4127_v11 = vpop.f32.mrf.mxu2 }
 0x375   : > { %v4313_v35 = vadd.f32 %v4127_v11, %v3661_v50  ;;  %v12339_v30 = vpop.f32.mrf.mxu3 }
 0x376   : > { %15458 = vst [vmem:[#allocation96_spill] sm:$0xff] %v12339_v30  ;;  %v12341_v61 = vpop.f32.mrf.mxu0 }
 0x377   : > { %v12344_v8 = vadd.f32 %v4313_v35, %v11434_v29 }
 0x378   : > { %v12346_v47 = vpop.f32.mrf.mxu1 }
 0x379   : > { %15459 = vst [vmem:[#allocation97_spill] sm:$0xff] %v12344_v8  ;;  %10310 = vmatmul.msk.f32.gmra.mxu0 %vm821_vm2, %v12348_v1  ;;  %10408 = vmatmul.msk.f32.gmra.mxu2 %vm821_vm2, %v3863_v19  ;;  %v12367_v19 = vld [vmem:[#allocation2 + $0x1b1] sm:$0xff] }
 0x37a   : > { %10472 = vmatmul.msk.f32.gmra.mxu3 %vm821_vm2, %v11916_v41  ;;  %v3864_v41 = vld [vmem:[#allocation2 + $0xc2] sm:$0xff] }
 0x37b   : > { %10356 = vmatmul.msk.f32.gmra.mxu1 %vm821_vm2, %v2941_v40 }
 0x37c   : > { %v4130_v29 = vpop.f32.mrf.mxu2 }
 0x37d   : > { %v4314_v54 = vadd.f32 %v4130_v29, %v3664_v36  ;;  %v12358_v50 = vpop.f32.mrf.mxu3 }
 0x37e   : > { %15460 = vst [vmem:[#allocation98_spill] sm:$0xff] %v12358_v50  ;;  %v12360_v11 = vpop.f32.mrf.mxu0 }
 0x37f   : > { %v12363_v35 = vadd.f32 %v4314_v54, %v11446_v43 }
 0x380   : > { %v12365_v8 = vpop.f32.mrf.mxu1 }
 0x381   : > { %15461 = vst [vmem:[#allocation99_spill] sm:$0xff] %v12363_v35  ;;  %10311 = vmatmul.msk.f32.gmra.mxu0 %vm821_vm2, %v12367_v19  ;;  %10409 = vmatmul.msk.f32.gmra.mxu2 %vm821_vm2, %v3864_v41  ;;  %v12386_v41 = vld [vmem:[#allocation2 + $0x1b9] sm:$0xff] }
 0x382   : > { %10473 = vmatmul.msk.f32.gmra.mxu3 %vm821_vm2, %v11930_v14  ;;  %v3865_v14 = vld [vmem:[#allocation2 + $0xca] sm:$0xff] }
 0x383   : > { %10357 = vmatmul.msk.f32.gmra.mxu1 %vm821_vm2, %v2942_v15 }
 0x384   : > { %v4133_v43 = vpop.f32.mrf.mxu2 }
 0x385   : > { %v4315_v40 = vadd.f32 %v4133_v43, %v3667_v44  ;;  %v12377_v36 = vpop.f32.mrf.mxu3 }
 0x386   : > { %15462 = vst [vmem:[#allocation100_spill] sm:$0xff] %v12377_v36  ;;  %v12379_v29 = vpop.f32.mrf.mxu0  ;;  %v12422_v36 = vld [vmem:[#allocation2 + $0x1c9] sm:$0xff] }
 0x387   : > { %v12382_v54 = vadd.f32 %v4315_v40, %v11458_v59 }
 0x388   : > { %v12384_v35 = vpop.f32.mrf.mxu1 }
 0x389   : > { %15463 = vst [vmem:[#allocation101_spill] sm:$0xff] %v12382_v54  ;;  %10312 = vmatmul.msk.f32.gmra.mxu0 %vm821_vm2, %v12386_v41  ;;  %10410 = vmatmul.msk.f32.gmra.mxu2 %vm821_vm2, %v3865_v14  ;;  %v12405_v14 = vld [vmem:[#allocation2 + $0x1c1] sm:$0xff] }
 0x38a   : > { %10474 = vmatmul.msk.f32.gmra.mxu3 %vm821_vm2, %v11944_v34  ;;  %v3866_v34 = vld [vmem:[#allocation2 + $0xd2] sm:$0xff] }
 0x38b   : > { %10358 = vmatmul.msk.f32.gmra.mxu1 %vm821_vm2, %v2943_v45 }
 0x38c   : > { %v4136_v59 = vpop.f32.mrf.mxu2 }
 0x38d   : > { %v4316_v15 = vadd.f32 %v4136_v59, %v3670_v20  ;;  %v12401_v40 = vpop.f32.mrf.mxu3 }
 0x38e   : > { %v12396_v44 = vpop.f32.mrf.mxu0  ;;  %15465 = vst [vmem:[#allocation103_spill] sm:$0xff] %v12401_v40 }
 0x38f   : > { %v12399_v43 = vadd.f32 %v4316_v15, %v11470_v10  ;;  %v3673_v10 = vadd.f32 %v12193_v62, %v15466_v53  ;;  %v15467_v15 = vld [vmem:[#allocation8_spill] sm:$0xff]  ;;  %v2945_v62 = vld [vmem:[#allocation2 + $0x138] sm:$0xff] }
 0x390   : > { %v12403_v54 = vpop.f32.mrf.mxu1 }
 0x391   : > { %15464 = vst [vmem:[#allocation102_spill] sm:$0xff] %v12399_v43  ;;  %10313 = vmatmul.msk.f32.gmra.mxu0 %vm821_vm2, %v12405_v14  ;;  %10411 = vmatmul.msk.f32.gmra.mxu2 %vm821_vm2, %v3866_v34  ;;  %v3867_v34 = vld [vmem:[#allocation2 + $0xda] sm:$0xff] }
 0x392   : > { %10475 = vmatmul.msk.f32.gmra.mxu3 %vm821_vm2, %v11958_v60 }
 0x393   : > { %10359 = vmatmul.msk.f32.gmra.mxu1 %vm821_vm2, %v2944_v2  ;;  %v15470_v2 = vld [vmem:[#allocation43_spill] sm:$0xff] }
 0x394   : > { %v4139_v45 = vpop.f32.mrf.mxu2  ;;  %v3676_v53 = vadd.f32 %v12208_v18, %v15470_v2  ;;  %v15473_v18 = vld [vmem:[#allocation45_spill] sm:$0xff] }
 0x395   : > { %v4317_v20 = vadd.f32 %v4139_v45, %v3673_v10  ;;  %v12427_v60 = vpop.f32.mrf.mxu3 }
 0x396   : > { %v12415_v59 = vpop.f32.mrf.mxu0  ;;  %15469 = vst [vmem:[#allocation8_spill] sm:$0xff] %v12427_v60  ;;  %v3868_v60 = vld [vmem:[#allocation2 + $0xe2] sm:$0xff] }
 0x397   : > { %v12418_v43 = vadd.f32 %v4317_v20, %v15467_v15  ;;  %v15471_v15 = vld [vmem:[#allocation9_spill] sm:$0xff] }
 0x398   : > { %v12420_v40 = vpop.f32.mrf.mxu1 }
 0x399   : > { %15468 = vst [vmem:[#allocation41_spill] sm:$0xff] %v12418_v43  ;;  %10314 = vmatmul.msk.f32.gmra.mxu0 %vm821_vm2, %v12422_v36  ;;  %10412 = vmatmul.msk.f32.gmra.mxu2 %vm821_vm2, %v3867_v34  ;;  %v12441_v34 = vld [vmem:[#allocation2 + $0x1d1] sm:$0xff] }
 0x39a   : > { %10476 = vmatmul.msk.f32.gmra.mxu3 %vm821_vm2, %v11970_v4  ;;  %v2946_v4 = vld [vmem:[#allocation2 + $0x140] sm:$0xff] }
 0x39b   : > { %10360 = vmatmul.msk.f32.gmra.mxu1 %vm821_vm2, %v2945_v62  ;;  %v3679_v62 = vadd.f32 %v12223_v13, %v15473_v18  ;;  %v15478_v13 = vld [vmem:[#allocation53_spill] sm:$0xff]  ;;  %v15479_v18 = vld [vmem:[#allocation47_spill] sm:$0xff] }
 0x39c   : > { %v4142_v10 = vpop.f32.mrf.mxu2 }
 0x39d   : > { %v4318_v45 = vadd.f32 %v4142_v10, %v3676_v53  ;;  %v12451_v2 = vpop.f32.mrf.mxu3 }
 0x39e   : > { %v12434_v20 = vpop.f32.mrf.mxu0  ;;  %15474 = vst [vmem:[#allocation9_spill] sm:$0xff] %v12451_v2 }
 0x39f   : > { %v12437_v43 = vadd.f32 %v4318_v45, %v15471_v15  ;;  %v15476_v15 = vld [vmem:[#allocation10_spill] sm:$0xff] }
 0x3a0   : > { %v12439_v50 = vpop.f32.mrf.mxu1 }
 0x3a1   : > { %15472 = vst [vmem:[#allocation43_spill] sm:$0xff] %v12437_v43  ;;  %10315 = vmatmul.msk.f32.gmra.mxu0 %vm821_vm2, %v12441_v34  ;;  %10413 = vmatmul.msk.f32.gmra.mxu2 %vm821_vm2, %v3868_v60  ;;  %v12460_v60 = vld [vmem:[#allocation2 + $0x1d9] sm:$0xff] }
 0x3a2   : > { %10477 = vmatmul.msk.f32.gmra.mxu3 %vm821_vm2, %v11988_v28  ;;  %v3869_v28 = vld [vmem:[#allocation2 + $0xea] sm:$0xff] }
 0x3a3   : > { %10361 = vmatmul.msk.f32.gmra.mxu1 %vm821_vm2, %v2946_v4  ;;  %v2947_v4 = vld [vmem:[#allocation2 + $0x148] sm:$0xff] }
 0x3a4   : > { %v4145_v53 = vpop.f32.mrf.mxu2 }
 0x3a5   : > { %v4319_v10 = vadd.f32 %v4145_v53, %v3679_v62  ;;  %v3682_v62 = vadd.f32 %v12238_v56, %v15479_v18  ;;  %v2948_v56 = vld [vmem:[#allocation2 + $0x150] sm:$0xff] }
 0x3a6   : > { %v12453_v45 = vpop.f32.mrf.mxu0 }
 0x3a7   : > { %15475 = vst [vmem:[#allocation45_spill] sm:$0xff] %v12453_v45  ;;  %v12456_v43 = vadd.f32 %v4319_v10, %v15476_v15  ;;  %v12470_v15 = vpop.f32.mrf.mxu3 }
 0x3a8   : > { %v12458_v30 = vpop.f32.mrf.mxu1  ;;  %15480 = vst [vmem:[#allocation53_spill] sm:$0xff] %v12470_v15 }
 0x3a9   : > { %15477 = vst [vmem:[#allocation10_spill] sm:$0xff] %v12456_v43  ;;  %10316 = vmatmul.msk.f32.gmra.mxu0 %vm821_vm2, %v12460_v60  ;;  %10414 = vmatmul.msk.f32.gmra.mxu2 %vm821_vm2, %v3869_v28  ;;  %v15482_v43 = vld [vmem:[#allocation11_spill] sm:$0xff] }
 0x3aa   : > { %10478 = vmatmul.msk.f32.gmra.mxu3 %vm821_vm2, %v15478_v13  ;;  %v12479_v28 = vld [vmem:[#allocation2 + $0x1e1] sm:$0xff]  ;;  %v3870_v13 = vld [vmem:[#allocation2 + $0xf2] sm:$0xff] }
 0x3ab   : > { %10362 = vmatmul.msk.f32.gmra.mxu1 %vm821_vm2, %v2947_v4  ;;  %v15484_v4 = vld [vmem:[#allocation49_spill] sm:$0xff] }
 0x3ac   : > { %v4148_v53 = vpop.f32.mrf.mxu2  ;;  %v3685_v18 = vadd.f32 %v12253_v37, %v15484_v4  ;;  %v15489_v37 = vld [vmem:[#allocation58_spill] sm:$0xff]  ;;  %v15490_v4 = vld [vmem:[#allocation51_spill] sm:$0xff] }
 0x3ad   : > { %v4320_v10 = vadd.f32 %v4148_v53, %v3682_v62 }
 0x3ae   : > { %v12472_v45 = vpop.f32.mrf.mxu0 }
 0x3af   : > { %15481 = vst [vmem:[#allocation47_spill] sm:$0xff] %v12472_v45  ;;  %v12475_v2 = vadd.f32 %v4320_v10, %v15482_v43  ;;  %v15486_v10 = vld [vmem:[#allocation12_spill] sm:$0xff] }
 0x3b0   : > { %v12477_v7 = vpop.f32.mrf.mxu1 }
 0x3b1   : > { %15483 = vst [vmem:[#allocation11_spill] sm:$0xff] %v12475_v2  ;;  %10317 = vmatmul.msk.f32.gmra.mxu0 %vm821_vm2, %v12479_v28  ;;  %10415 = vmatmul.msk.f32.gmra.mxu2 %vm821_vm2, %v3870_v13  ;;  %v12494_v2 = vpop.f32.mrf.mxu3  ;;  %v12498_v13 = vld [vmem:[#allocation2 + $0x1e9] sm:$0xff] }
 0x3b2   : > { %10479 = vmatmul.msk.f32.gmra.mxu3 %vm821_vm2, %v12016_v49  ;;  %15488 = vst [vmem:[#allocation104_spill] sm:$0xff] %v12494_v2  ;;  %v3871_v49 = vld [vmem:[#allocation2 + $0xfa] sm:$0xff] }
 0x3b3   : > { %10363 = vmatmul.msk.f32.gmra.mxu1 %vm821_vm2, %v2948_v56  ;;  %v2949_v56 = vld [vmem:[#allocation2 + $0x158] sm:$0xff] }
 0x3b4   : > { %v4151_v43 = vpop.f32.mrf.mxu2 }
 0x3b5   : > { %v4321_v62 = vadd.f32 %v4151_v43, %v3685_v18  ;;  %v3688_v18 = vadd.f32 %v12268_v24, %v15490_v4 }
 0x3b6   : > { %v12489_v53 = vpop.f32.mrf.mxu0 }
 0x3b7   : > { %15485 = vst [vmem:[#allocation49_spill] sm:$0xff] %v12489_v53  ;;  %v12492_v45 = vadd.f32 %v4321_v62, %v15486_v10  ;;  %v15492_v53 = vld [vmem:[#allocation13_spill] sm:$0xff] }
 0x3b8   : > { %v12496_v15 = vpop.f32.mrf.mxu1 }
 0x3b9   : > { %15487 = vst [vmem:[#allocation12_spill] sm:$0xff] %v12492_v45  ;;  %10318 = vmatmul.msk.f32.gmra.mxu0 %vm821_vm2, %v12498_v13  ;;  %10416 = vmatmul.msk.f32.gmra.mxu2 %vm821_vm2, %v3871_v49  ;;  %v3872_v49 = vld [vmem:[#allocation2 + $0x102] sm:$0xff]  ;;  %v12520_v24 = vpop.f32.mrf.mxu3 }
 0x3ba   : > { %10480 = vmatmul.msk.f32.gmra.mxu3 %vm821_vm2, %v15489_v37  ;;  %15494 = vst [vmem:[#allocation13_spill] sm:$0xff] %v12520_v24  ;;  %v2950_v37 = vld [vmem:[#allocation2 + $0x160] sm:$0xff]  ;;  %v3873_v24 = vld [vmem:[#allocation2 + $0x10a] sm:$0xff] }
 0x3bb   : > { %10364 = vmatmul.msk.f32.gmra.mxu1 %vm821_vm2, %v2949_v56  ;;  %v15495_v56 = vld [vmem:[#allocation54_spill] sm:$0xff] }
 0x3bc   : > { %v4154_v43 = vpop.f32.mrf.mxu2 }
 0x3bd   : > { %v4322_v62 = vadd.f32 %v4154_v43, %v3688_v18 }
 0x3be   : > { %v12508_v10 = vpop.f32.mrf.mxu0 }
 0x3bf   : > { %15491 = vst [vmem:[#allocation58_spill] sm:$0xff] %v12508_v10  ;;  %v12511_v45 = vadd.f32 %v4322_v62, %v15492_v53  ;;  %v3691_v53 = vadd.f32 %v12289_v38, %v15495_v56  ;;  %v15497_v62 = vld [vmem:[#allocation14_spill] sm:$0xff]  ;;  %v15499_v38 = vld [vmem:[#allocation56_spill] sm:$0xff] }
 0x3c0   : > { %v12513_v2 = vpop.f32.mrf.mxu1 }
 0x3c1   : > { %15493 = vst [vmem:[#allocation51_spill] sm:$0xff] %v12511_v45  ;;  %10319 = vmatmul.msk.f32.gmra.mxu0 %vm821_vm2, %v12515_v51  ;;  %10417 = vmatmul.msk.f32.gmra.mxu2 %vm821_vm2, %v3872_v49  ;;  %v12534_v49 = vld [vmem:[#allocation2 + $0x1f9] sm:$0xff]  ;;  %v12544_v56 = vpop.f32.mrf.mxu3 }
 0x3c2   : > { %10481 = vmatmul.msk.f32.gmra.mxu3 %vm821_vm2, %v12045_v26  ;;  %v2951_v26 = vld [vmem:[#allocation2 + $0x168] sm:$0xff]  ;;  %15500 = vst [vmem:[#allocation56_spill] sm:$0xff] %v12544_v56 }
 0x3c3   : > { %10365 = vmatmul.msk.f32.gmra.mxu1 %vm821_vm2, %v2950_v37  ;;  %v3694_v37 = vadd.f32 %v12308_v58, %v15499_v38  ;;  %v2952_v58 = vld [vmem:[#allocation2 + $0x170] sm:$0xff] }
 0x3c4   : > { %v4157_v4 = vpop.f32.mrf.mxu2 }
 0x3c5   : > { %v4323_v18 = vadd.f32 %v4157_v4, %v3691_v53 }
 0x3c6   : > { %v12527_v43 = vpop.f32.mrf.mxu0 }
 0x3c7   : > { %15496 = vst [vmem:[#allocation54_spill] sm:$0xff] %v12527_v43  ;;  %v12530_v10 = vadd.f32 %v4323_v18, %v15497_v62  ;;  %v15502_v62 = vld [vmem:[#allocation15_spill] sm:$0xff] }
 0x3c8   : > { %v12532_v45 = vpop.f32.mrf.mxu1 }
 0x3c9   : > { %15498 = vst [vmem:[#allocation14_spill] sm:$0xff] %v12530_v10  ;;  %10320 = vmatmul.msk.f32.gmra.mxu0 %vm821_vm2, %v12534_v49  ;;  %10418 = vmatmul.msk.f32.gmra.mxu2 %vm821_vm2, %v3873_v24  ;;  %v12553_v24 = vld [vmem:[#allocation2 + $0x201] sm:$0xff] }
 0x3ca   : > { %10482 = vmatmul.msk.f32.gmra.mxu3 %vm821_vm2, %v12060_v25  ;;  %v3874_v25 = vld [vmem:[#allocation2 + $0x112] sm:$0xff] }
 0x3cb   : > { %10366 = vmatmul.msk.f32.gmra.mxu1 %vm821_vm2, %v2951_v26  ;;  %v15504_v26 = vld [vmem:[#allocation59_spill] sm:$0xff] }
 0x3cc   : > { %v4160_v53 = vpop.f32.mrf.mxu2  ;;  %v3697_v38 = vadd.f32 %v12327_v48, %v15504_v26  ;;  %v15508_v48 = vld [vmem:[#allocation61_spill] sm:$0xff] }
 0x3cd   : > { %v4324_v4 = vadd.f32 %v4160_v53, %v3694_v37 }
 0x3ce   : > { %v12546_v18 = vpop.f32.mrf.mxu0 }
 0x3cf   : > { %15501 = vst [vmem:[#allocation105_spill] sm:$0xff] %v12546_v18  ;;  %v12549_v43 = vadd.f32 %v4324_v4, %v15502_v62  ;;  %v12563_v4 = vpop.f32.mrf.mxu3  ;;  %v3037_v18 = vld [vmem:[#allocation2 + $0x209] sm:$0xff] }
 0x3d0   : > { %v12551_v10 = vpop.f32.mrf.mxu1 }
 0x3d1   : > { %15503 = vst [vmem:[#allocation15_spill] sm:$0xff] %v12549_v43  ;;  %10321 = vmatmul.msk.f32.gmra.mxu0 %vm821_vm2, %v12553_v24  ;;  %10419 = vmatmul.msk.f32.gmra.mxu2 %vm821_vm2, %v3874_v25  ;;  %v15506_v43 = vld [vmem:[#allocation16_spill] sm:$0xff] }
 0x3d2   : > { %10483 = vmatmul.msk.f32.gmra.mxu3 %vm821_vm2, %v12075_v22  ;;  %v2953_v22 = vld [vmem:[#allocation2 + $0x178] sm:$0xff] }
 0x3d3   : > { %10367 = vmatmul.msk.f32.gmra.mxu1 %vm821_vm2, %v2952_v58  ;;  %v3700_v58 = vadd.f32 %v12346_v47, %v15508_v48  ;;  %v15511_v47 = vld [vmem:[#allocation63_spill] sm:$0xff] }
 0x3d4   : > { %v4163_v37 = vpop.f32.mrf.mxu2 }
 0x3d5   : > { %v4325_v53 = vadd.f32 %v4163_v37, %v3697_v38  ;;  %v3038_v37 = vld [vmem:[#allocation2 + $0x211] sm:$0xff] }
 0x3d6   : > { %v12565_v62 = vpop.f32.mrf.mxu0 }
 0x3d7   : > { %15505 = vst [vmem:[#allocation59_spill] sm:$0xff] %v12565_v62  ;;  %v12568_v56 = vadd.f32 %v4325_v53, %v15506_v43  ;;  %v15510_v53 = vld [vmem:[#allocation17_spill] sm:$0xff] }
 0x3d8   : > { %v12570_v25 = vpop.f32.mrf.mxu1 }
 0x3d9   : > { %15507 = vst [vmem:[#allocation16_spill] sm:$0xff] %v12568_v56  ;;  %10322 = vmatmul.msk.f32.gmra.mxu0 %vm821_vm2, %v3037_v18  ;;  %10420 = vmatmul.msk.f32.gmra.mxu2 %vm821_vm2, %v3875_v32  ;;  %v12584_v18 = vpop.f32.mrf.mxu3  ;;  %v3876_v56 = vld [vmem:[#allocation2 + $0x122] sm:$0xff] }
 0x3da   : > { %10484 = vmatmul.msk.f32.gmra.mxu3 %vm821_vm2, %v12090_v46  ;;  %v2954_v46 = vld [vmem:[#allocation2 + $0x180] sm:$0xff] }
 0x3db   : > { %10368 = vmatmul.msk.f32.gmra.mxu1 %vm821_vm2, %v2953_v22  ;;  %v3703_v22 = vadd.f32 %v12365_v8, %v15511_v47  ;;  %v2955_v8 = vld [vmem:[#allocation2 + $0x188] sm:$0xff] }
 0x3dc   : > { %v4166_v26 = vpop.f32.mrf.mxu2 }
 0x3dd   : > { %v4326_v38 = vadd.f32 %v4166_v26, %v3700_v58 }
 0x3de   : > { %v12579_v43 = vpop.f32.mrf.mxu0 }
 0x3df   : > { %15509 = vst [vmem:[#allocation61_spill] sm:$0xff] %v12579_v43  ;;  %v12582_v62 = vadd.f32 %v4326_v38, %v15510_v53  ;;  %v15513_v38 = vld [vmem:[#allocation18_spill] sm:$0xff] }
 0x3e0   : > { %v12586_v32 = vpop.f32.mrf.mxu1 }
 0x3e1   : > { %10323 = vmatmul.msk.f32.gmra.mxu0 %vm821_vm2, %v3038_v37  ;;  %10421 = vmatmul.msk.f32.gmra.mxu2 %vm821_vm2, %v3876_v56  ;;  %v3877_v37 = vld [vmem:[#allocation2 + $0x12a] sm:$0xff] }
 0x3e2   : > { %10485 = vmatmul.msk.f32.gmra.mxu3 %vm821_vm2, %v12105_v52  ;;  %v4374_v56 = vld [vmem:[#allocation2 + $0x28] sm:$0xff]  ;;  %v12604_v52 = vpop.f32.mrf.mxu3 }
 0x3e3   : > { %10369 = vmatmul.msk.f32.gmra.mxu1 %vm821_vm2, %v2954_v46  ;;  %v15515_v46 = vld [vmem:[#allocation65_spill] sm:$0xff] }
 0x3e4   : > { %v4169_v48 = vpop.f32.mrf.mxu2  ;;  %v3706_v47 = vadd.f32 %v12384_v35, %v15515_v46  ;;  %v15519_v35 = vld [vmem:[#allocation67_spill] sm:$0xff] }
 0x3e5   : > { %v4327_v58 = vadd.f32 %v4169_v48, %v3703_v22 }
 0x3e6   : > { %v12595_v26 = vpop.f32.mrf.mxu0 }
 0x3e7   : > { %15512 = vst [vmem:[#allocation17_spill] sm:$0xff] %v12595_v26  ;;  %v12598_v53 = vadd.f32 %v4327_v58, %v15513_v38  ;;  %v15517_v38 = vld [vmem:[#allocation19_spill] sm:$0xff] }
 0x3e8   : > { %v12600_v43 = vpop.f32.mrf.mxu1 }
 0x3e9   : > { %15514 = vst [vmem:[#allocation63_spill] sm:$0xff] %v12598_v53  ;;  %10422 = vmatmul.msk.f32.gmra.mxu2 %vm821_vm2, %v3877_v37  ;;  %10516 = vmatmul.msk.f32.vlgmr.msra.gmra.mxu0 %vm821_vm2, %v4374_v56  ;;  %v3878_v56 = vld [vmem:[#allocation2 + $0x132] sm:$0xff] }
 0x3ea   : > { %10486 = vmatmul.msk.f32.gmra.mxu3 %vm821_vm2, %v12120_v17  ;;  %v4375_v53 = vld [vmem:[#allocation2 + $0x30] sm:$0xff]  ;;  %v12625_v46 = vpop.f32.mrf.mxu3 }
 0x3eb   : > { %10370 = vmatmul.msk.f32.gmra.mxu1 %vm821_vm2, %v2955_v8  ;;  %v2956_v17 = vld [vmem:[#allocation2 + $0x190] sm:$0xff]  ;;  %v3709_v8 = vadd.f32 %v12403_v54, %v15519_v35  ;;  %v15523_v54 = vld [vmem:[#allocation69_spill] sm:$0xff] }
 0x3ec   : > { %v4172_v22 = vpop.f32.mrf.mxu2 }
 0x3ed   : > { %v4328_v48 = vadd.f32 %v4172_v22, %v3706_v47 }
 0x3ee   : > { %v12611_v58 = vpop.f32.mrf.mxu0 }
 0x3ef   : > { %15516 = vst [vmem:[#allocation18_spill] sm:$0xff] %v12611_v58  ;;  %v12614_v26 = vadd.f32 %v4328_v48, %v15517_v38  ;;  %v15521_v38 = vld [vmem:[#allocation20_spill] sm:$0xff] }
 0x3f0   : > { %v12616_v37 = vpop.f32.mrf.mxu1 }
 0x3f1   : > { %15518 = vst [vmem:[#allocation65_spill] sm:$0xff] %v12614_v26  ;;  %10423 = vmatmul.msk.f32.gmra.mxu2 %vm821_vm2, %v3878_v56  ;;  %10517 = vmatmul.msk.f32.gmra.mxu0 %vm821_vm2, %v4375_v53  ;;  %v3879_v53 = vld [vmem:[#allocation2 + $0x13a] sm:$0xff] }
 0x3f2   : > { %10487 = vmatmul.msk.f32.gmra.mxu3 %vm821_vm2, %v12135_v57  ;;  %v4376_v26 = vld [vmem:[#allocation2 + $0x38] sm:$0xff] }
 0x3f3   : > { %10371 = vmatmul.msk.f32.gmra.mxu1 %vm821_vm2, %v2956_v17  ;;  %v2957_v57 = vld [vmem:[#allocation2 + $0x198] sm:$0xff]  ;;  %v3712_v17 = vadd.f32 %v12420_v40, %v15523_v54  ;;  %v15527_v40 = vld [vmem:[#allocation71_spill] sm:$0xff] }
 0x3f4   : > { %v4175_v47 = vpop.f32.mrf.mxu2 }
 0x3f5   : > { %v4329_v22 = vadd.f32 %v4175_v47, %v3709_v8  ;;  %v12641_v47 = vpop.f32.mrf.mxu3 }
 0x3f6   : > { %v12627_v48 = vpop.f32.mrf.mxu0 }
 0x3f7   : > { %15520 = vst [vmem:[#allocation19_spill] sm:$0xff] %v12627_v48  ;;  %v12630_v58 = vadd.f32 %v4329_v22, %v15521_v38  ;;  %v15525_v38 = vld [vmem:[#allocation21_spill] sm:$0xff] }
 0x3f8   : > { %v12632_v56 = vpop.f32.mrf.mxu1 }
 0x3f9   : > { %15522 = vst [vmem:[#allocation67_spill] sm:$0xff] %v12630_v58  ;;  %10424 = vmatmul.msk.f32.gmra.mxu2 %vm821_vm2, %v3879_v53  ;;  %10518 = vmatmul.msk.f32.gmra.mxu0 %vm821_vm2, %v4376_v26  ;;  %v3880_v26 = vld [vmem:[#allocation2 + $0x142] sm:$0xff] }
 0x3fa   : > { %10488 = vmatmul.msk.f32.gmra.mxu3 %vm821_vm2, %v12150_v63  ;;  %v4377_v58 = vld [vmem:[#allocation2 + $0x40] sm:$0xff] }
 0x3fb   : > { %10372 = vmatmul.msk.f32.gmra.mxu1 %vm821_vm2, %v2957_v57  ;;  %v2958_v63 = vld [vmem:[#allocation2 + $0x1a0] sm:$0xff]  ;;  %v3715_v57 = vadd.f32 %v12439_v50, %v15527_v40  ;;  %v15530_v50 = vld [vmem:[#allocation73_spill] sm:$0xff] }
 0x3fc   : > { %v4178_v35 = vpop.f32.mrf.mxu2 }
 0x3fd   : > { %v4330_v8 = vadd.f32 %v4178_v35, %v3712_v17 }
 0x3fe   : > { %v12643_v22 = vpop.f32.mrf.mxu0 }
 0x3ff   : > { %15524 = vst [vmem:[#allocation20_spill] sm:$0xff] %v12643_v22  ;;  %v12646_v48 = vadd.f32 %v4330_v8, %v15525_v38  ;;  %v15529_v8 = vld [vmem:[#allocation22_spill] sm:$0xff]  ;;  %v12662_v22 = vpop.f32.mrf.mxu3 }
 0x400   : > { %v12648_v53 = vpop.f32.mrf.mxu1 }
 0x401   : > { %15526 = vst [vmem:[#allocation69_spill] sm:$0xff] %v12646_v48  ;;  %10425 = vmatmul.msk.f32.gmra.mxu2 %vm821_vm2, %v3880_v26  ;;  %10519 = vmatmul.msk.f32.gmra.mxu0 %vm821_vm2, %v4377_v58  ;;  %v3881_v58 = vld [vmem:[#allocation2 + $0x14a] sm:$0xff] }
 0x402   : > { %10489 = vmatmul.msk.f32.gmra.mxu3 %vm821_vm2, %v12165_v5  ;;  %v4378_v48 = vld [vmem:[#allocation2 + $0x48] sm:$0xff] }
 0x403   : > { %10373 = vmatmul.msk.f32.gmra.mxu1 %vm821_vm2, %v2958_v63  ;;  %v2959_v5 = vld [vmem:[#allocation2 + $0x1a8] sm:$0xff]  ;;  %v3718_v63 = vadd.f32 %v12458_v30, %v15530_v50  ;;  %v2960_v30 = vld [vmem:[#allocation2 + $0x1b0] sm:$0xff] }
 0x404   : > { %v4181_v54 = vpop.f32.mrf.mxu2 }
 0x405   : > { %v4331_v17 = vadd.f32 %v4181_v54, %v3715_v57 }
 0x406   : > { %v12657_v35 = vpop.f32.mrf.mxu0 }
 0x407   : > { %15528 = vst [vmem:[#allocation21_spill] sm:$0xff] %v12657_v35  ;;  %v12660_v38 = vadd.f32 %v4331_v17, %v15529_v8  ;;  %v15532_v17 = vld [vmem:[#allocation23_spill] sm:$0xff] }
 0x408   : > { %v12664_v26 = vpop.f32.mrf.mxu1 }
 0x409   : > { %10426 = vmatmul.msk.f32.gmra.mxu2 %vm821_vm2, %v3881_v58  ;;  %10520 = vmatmul.msk.f32.gmra.mxu0 %vm821_vm2, %v4378_v48  ;;  %v3882_v58 = vld [vmem:[#allocation2 + $0x152] sm:$0xff] }
 0x40a   : > { %10490 = vmatmul.msk.f32.gmra.mxu3 %vm821_vm2, %v12180_v6  ;;  %v4379_v48 = vld [vmem:[#allocation2 + $0x50] sm:$0xff]  ;;  %v12682_v6 = vpop.f32.mrf.mxu3 }
 0x40b   : > { %10374 = vmatmul.msk.f32.gmra.mxu1 %vm821_vm2, %v2959_v5  ;;  %v15534_v5 = vld [vmem:[#allocation75_spill] sm:$0xff] }
 0x40c   : > { %v4184_v40 = vpop.f32.mrf.mxu2  ;;  %v3721_v50 = vadd.f32 %v12477_v7, %v15534_v5  ;;  %v15538_v7 = vld [vmem:[#allocation77_spill] sm:$0xff] }
 0x40d   : > { %v4332_v57 = vadd.f32 %v4184_v40, %v3718_v63 }
 0x40e   : > { %v12673_v54 = vpop.f32.mrf.mxu0 }
 0x40f   : > { %15531 = vst [vmem:[#allocation71_spill] sm:$0xff] %v12673_v54  ;;  %v12676_v8 = vadd.f32 %v4332_v57, %v15532_v17  ;;  %v15536_v17 = vld [vmem:[#allocation24_spill] sm:$0xff] }
 0x410   : > { %v12678_v35 = vpop.f32.mrf.mxu1 }
 0x411   : > { %15533 = vst [vmem:[#allocation22_spill] sm:$0xff] %v12676_v8  ;;  %10427 = vmatmul.msk.f32.gmra.mxu2 %vm821_vm2, %v3882_v58  ;;  %10521 = vmatmul.msk.f32.gmra.mxu0 %vm821_vm2, %v4379_v48  ;;  %v3883_v48 = vld [vmem:[#allocation2 + $0x15a] sm:$0xff] }
 0x412   : > { %10491 = vmatmul.msk.f32.gmra.mxu3 %vm821_vm2, %v12195_v42  ;;  %v4380_v8 = vld [vmem:[#allocation2 + $0x58] sm:$0xff]  ;;  %v12703_v5 = vpop.f32.mrf.mxu3 }
 0x413   : > { %10375 = vmatmul.msk.f32.gmra.mxu1 %vm821_vm2, %v2960_v30  ;;  %v2961_v42 = vld [vmem:[#allocation2 + $0x1b8] sm:$0xff]  ;;  %v3724_v30 = vadd.f32 %v12496_v15, %v15538_v7  ;;  %v15542_v15 = vld [vmem:[#allocation79_spill] sm:$0xff] }
 0x414   : > { %v4187_v63 = vpop.f32.mrf.mxu2 }
 0x415   : > { %v4333_v40 = vadd.f32 %v4187_v63, %v3721_v50 }
 0x416   : > { %v12689_v57 = vpop.f32.mrf.mxu0 }
 0x417   : > { %15535 = vst [vmem:[#allocation73_spill] sm:$0xff] %v12689_v57  ;;  %v12692_v54 = vadd.f32 %v4333_v40, %v15536_v17  ;;  %v15540_v17 = vld [vmem:[#allocation25_spill] sm:$0xff] }
 0x418   : > { %v12694_v58 = vpop.f32.mrf.mxu1 }
 0x419   : > { %15537 = vst [vmem:[#allocation23_spill] sm:$0xff] %v12692_v54  ;;  %10428 = vmatmul.msk.f32.gmra.mxu2 %vm821_vm2, %v3883_v48  ;;  %10522 = vmatmul.msk.f32.gmra.mxu0 %vm821_vm2, %v4380_v8  ;;  %v3884_v8 = vld [vmem:[#allocation2 + $0x162] sm:$0xff] }
 0x41a   : > { %10492 = vmatmul.msk.f32.gmra.mxu3 %vm821_vm2, %v12210_v27  ;;  %v4381_v54 = vld [vmem:[#allocation2 + $0x60] sm:$0xff] }
 0x41b   : > { %10376 = vmatmul.msk.f32.gmra.mxu1 %vm821_vm2, %v2961_v42  ;;  %v2962_v27 = vld [vmem:[#allocation2 + $0x1c0] sm:$0xff]  ;;  %v3727_v42 = vadd.f32 %v12513_v2, %v15542_v15  ;;  %v15546_v2 = vld [vmem:[#allocation81_spill] sm:$0xff] }
 0x41c   : > { %v4190_v50 = vpop.f32.mrf.mxu2 }
 0x41d   : > { %v4334_v63 = vadd.f32 %v4190_v50, %v3724_v30  ;;  %v12719_v50 = vpop.f32.mrf.mxu3 }
 0x41e   : > { %v12705_v40 = vpop.f32.mrf.mxu0 }
 0x41f   : > { %15539 = vst [vmem:[#allocation75_spill] sm:$0xff] %v12705_v40  ;;  %v12708_v57 = vadd.f32 %v4334_v63, %v15540_v17  ;;  %v15544_v17 = vld [vmem:[#allocation26_spill] sm:$0xff] }
 0x420   : > { %v12710_v48 = vpop.f32.mrf.mxu1 }
 0x421   : > { %15541 = vst [vmem:[#allocation24_spill] sm:$0xff] %v12708_v57  ;;  %10429 = vmatmul.msk.f32.gmra.mxu2 %vm821_vm2, %v3884_v8  ;;  %10523 = vmatmul.msk.f32.gmra.mxu0 %vm821_vm2, %v4381_v54  ;;  %v3885_v54 = vld [vmem:[#allocation2 + $0x16a] sm:$0xff] }
 0x422   : > { %10493 = vmatmul.msk.f32.gmra.mxu3 %vm821_vm2, %v12225_v16  ;;  %v4382_v57 = vld [vmem:[#allocation2 + $0x68] sm:$0xff] }
 0x423   : > { %10377 = vmatmul.msk.f32.gmra.mxu1 %vm821_vm2, %v2962_v27  ;;  %v2963_v16 = vld [vmem:[#allocation2 + $0x1c8] sm:$0xff]  ;;  %v3730_v27 = vadd.f32 %v12532_v45, %v15546_v2 }
 0x424   : > { %v4193_v7 = vpop.f32.mrf.mxu2  ;;  %v15549_v45 = vld [vmem:[#allocation83_spill] sm:$0xff] }
 0x425   : > { %v4335_v30 = vadd.f32 %v4193_v7, %v3727_v42 }
 0x426   : > { %v12721_v63 = vpop.f32.mrf.mxu0 }
 0x427   : > { %15543 = vst [vmem:[#allocation77_spill] sm:$0xff] %v12721_v63  ;;  %v12724_v40 = vadd.f32 %v4335_v30, %v15544_v17  ;;  %v15548_v30 = vld [vmem:[#allocation27_spill] sm:$0xff]  ;;  %v12740_v63 = vpop.f32.mrf.mxu3 }
 0x428   : > { %v12726_v8 = vpop.f32.mrf.mxu1 }
 0x429   : > { %15545 = vst [vmem:[#allocation25_spill] sm:$0xff] %v12724_v40  ;;  %10430 = vmatmul.msk.f32.gmra.mxu2 %vm821_vm2, %v3885_v54  ;;  %10524 = vmatmul.msk.f32.gmra.mxu0 %vm821_vm2, %v4382_v57  ;;  %v3886_v57 = vld [vmem:[#allocation2 + $0x172] sm:$0xff] }
 0x42a   : > { %10494 = vmatmul.msk.f32.gmra.mxu3 %vm821_vm2, %v12240_v55  ;;  %v4383_v40 = vld [vmem:[#allocation2 + $0x70] sm:$0xff] }
 0x42b   : > { %10378 = vmatmul.msk.f32.gmra.mxu1 %vm821_vm2, %v2963_v16  ;;  %v2964_v55 = vld [vmem:[#allocation2 + $0x1d0] sm:$0xff]  ;;  %v3733_v16 = vadd.f32 %v12551_v10, %v15549_v45  ;;  %v15554_v10 = vld [vmem:[#allocation91_spill] sm:$0xff]  ;;  %v15555_v45 = vld [vmem:[#allocation85_spill] sm:$0xff] }
 0x42c   : > { %v4196_v15 = vpop.f32.mrf.mxu2 }
 0x42d   : > { %v4336_v42 = vadd.f32 %v4196_v15, %v3730_v27 }
 0x42e   : > { %v12735_v7 = vpop.f32.mrf.mxu0 }
 0x42f   : > { %15547 = vst [vmem:[#allocation79_spill] sm:$0xff] %v12735_v7  ;;  %v12738_v17 = vadd.f32 %v4336_v42, %v15548_v30  ;;  %v15551_v42 = vld [vmem:[#allocation28_spill] sm:$0xff] }
 0x430   : > { %v12742_v54 = vpop.f32.mrf.mxu1 }
 0x431   : > { %10431 = vmatmul.msk.f32.gmra.mxu2 %vm821_vm2, %v3886_v57  ;;  %10525 = vmatmul.msk.f32.gmra.mxu0 %vm821_vm2, %v4383_v40  ;;  %v3887_v57 = vld [vmem:[#allocation2 + $0x17a] sm:$0xff] }
 0x432   : > { %10495 = vmatmul.msk.f32.gmra.mxu3 %vm821_vm2, %v12255_v33  ;;  %v4384_v40 = vld [vmem:[#allocation2 + $0x78] sm:$0xff]  ;;  %v12760_v33 = vpop.f32.mrf.mxu3 }
 0x433   : > { %10379 = vmatmul.msk.f32.gmra.mxu1 %vm821_vm2, %v2964_v55  ;;  %v2965_v55 = vld [vmem:[#allocation2 + $0x1d8] sm:$0xff] }
 0x434   : > { %v4199_v2 = vpop.f32.mrf.mxu2 }
 0x435   : > { %v4337_v27 = vadd.f32 %v4199_v2, %v3733_v16  ;;  %v3736_v16 = vadd.f32 %v12570_v25, %v15555_v45  ;;  %v2966_v25 = vld [vmem:[#allocation2 + $0x1e0] sm:$0xff] }
 0x436   : > { %v12751_v15 = vpop.f32.mrf.mxu0 }
 0x437   : > { %15550 = vst [vmem:[#allocation26_spill] sm:$0xff] %v12751_v15  ;;  %v12754_v30 = vadd.f32 %v4337_v27, %v15551_v42  ;;  %v15557_v15 = vld [vmem:[#allocation29_spill] sm:$0xff] }
 0x438   : > { %v12756_v7 = vpop.f32.mrf.mxu1 }
 0x439   : > { %15552 = vst [vmem:[#allocation81_spill] sm:$0xff] %v12754_v30  ;;  %10432 = vmatmul.msk.f32.gmra.mxu2 %vm821_vm2, %v3887_v57  ;;  %10526 = vmatmul.msk.f32.gmra.mxu0 %vm821_vm2, %v4384_v40  ;;  %v3888_v40 = vld [vmem:[#allocation2 + $0x182] sm:$0xff] }
 0x43a   : > { %15553 = vst [vmem:[#allocation27_spill] sm:$0xff] %v12756_v7  ;;  %10496 = vmatmul.msk.f32.gmra.mxu3 %vm821_vm2, %v15554_v10  ;;  %v4385_v30 = vld [vmem:[#allocation2 + $0x80] sm:$0xff]  ;;  %v15559_v10 = vld [vmem:[#allocation87_spill] sm:$0xff] }
 0x43b   : > { %10380 = vmatmul.msk.f32.gmra.mxu1 %vm821_vm2, %v2965_v55  ;;  %v3739_v55 = vadd.f32 %v12586_v32, %v15559_v10  ;;  %v2967_v32 = vld [vmem:[#allocation2 + $0x1e8] sm:$0xff] }
 0x43c   : > { %v4202_v2 = vpop.f32.mrf.mxu2 }
 0x43d   : > { %v4338_v27 = vadd.f32 %v4202_v2, %v3736_v16 }
 0x43e   : > { %v12767_v42 = vpop.f32.mrf.mxu0 }
 0x43f   : > { %15556 = vst [vmem:[#allocation83_spill] sm:$0xff] %v12767_v42  ;;  %v12770_v7 = vadd.f32 %v4338_v27, %v15557_v15  ;;  %v12781_v15 = vpop.f32.mrf.mxu3  ;;  %v15561_v27 = vld [vmem:[#allocation30_spill] sm:$0xff]  ;;  %v3889_v42 = vld [vmem:[#allocation2 + $0x18a] sm:$0xff] }
 0x440   : > { %v12772_v57 = vpop.f32.mrf.mxu1 }
 0x441   : > { %15558 = vst [vmem:[#allocation28_spill] sm:$0xff] %v12772_v57  ;;  %10433 = vmatmul.msk.f32.gmra.mxu2 %vm821_vm2, %v3888_v40  ;;  %10527 = vmatmul.msk.f32.gmra.mxu0 %vm821_vm2, %v4385_v30  ;;  %v4388_v57 = vld [vmem:[#allocation2 + $0x98] sm:$0xff] }
 0x442   : > { %10497 = vmatmul.msk.f32.gmra.mxu3 %vm821_vm2, %v12291_v12  ;;  %v4386_v12 = vld [vmem:[#allocation2 + $0x88] sm:$0xff] }
 0x443   : > { %10381 = vmatmul.msk.f32.gmra.mxu1 %vm821_vm2, %v2966_v25  ;;  %v15563_v25 = vld [vmem:[#allocation89_spill] sm:$0xff] }
 0x444   : > { %v4205_v45 = vpop.f32.mrf.mxu2  ;;  %v3742_v10 = vadd.f32 %v12600_v43, %v15563_v25  ;;  %v2968_v43 = vld [vmem:[#allocation2 + $0x1f0] sm:$0xff]  ;;  %v6607_v25 = vld [vmem:[%s12810_s24 + $0x18] sm:$0xff] }
 0x445   : > { %v4339_v16 = vadd.f32 %v4205_v45, %v3739_v55  ;;  %6801 = vmatpush.msra.mxu3 %v6607_v25  ;;  %v15571_v25 = vld [vmem:[#allocation33_spill] sm:$0xff] }
 0x446   : > { %v12783_v2 = vpop.f32.mrf.mxu0 }
 0x447   : > { %15560 = vst [vmem:[#allocation91_spill] sm:$0xff] %v12783_v2  ;;  %v12786_v40 = vadd.f32 %v4339_v16, %v15561_v27  ;;  %v12798_v16 = vpop.f32.mrf.mxu3  ;;  %v15565_v2 = vld [vmem:[#allocation31_spill] sm:$0xff] }
 0x448   : > { %v12788_v30 = vpop.f32.mrf.mxu1 }
 0x449   : > { %15562 = vst [vmem:[#allocation85_spill] sm:$0xff] %v12788_v30  ;;  %10434 = vmatmul.msk.f32.gmra.mxu2 %vm821_vm2, %v3889_v42  ;;  %10528 = vmatmul.msk.f32.gmra.mxu0 %vm821_vm2, %v4386_v12  ;;  %v3890_v30 = vld [vmem:[#allocation2 + $0x192] sm:$0xff] }
 0x44a   : > { %10498 = vmatmul.msk.f32.gmra.mxu3 %vm821_vm2, %v12310_v23  ;;  %v4387_v23 = vld [vmem:[#allocation2 + $0x90] sm:$0xff] }
 0x44b   : > { %10382 = vmatmul.msk.f32.gmra.mxu1 %vm821_vm2, %v2967_v32  ;;  %v6627_v32 = vld [vmem:[%s12810_s24 + $0x38] sm:$0xff] }
 0x44c   : > { %v4208_v55 = vpop.f32.mrf.mxu2  ;;  %6688 = vmatpush.msrb.mxu2 %v6627_v32 }
 0x44d   : > { %v4340_v45 = vadd.f32 %v4208_v55, %v3742_v10 }
 0x44e   : > { %v12800_v27 = vpop.f32.mrf.mxu0 }
 0x44f   : > { %15564 = vst [vmem:[#allocation29_spill] sm:$0xff] %v12800_v27  ;;  %v12803_v42 = vadd.f32 %v4340_v45, %v15565_v2  ;;  %v3745_v2 = vadd.f32 %v12616_v37, %v12284_v21  ;;  %v2969_v21 = vld [vmem:[#allocation2 + $0x1f8] sm:$0xff]  ;;  %v3748_v37 = vadd.f32 %v12632_v56, %v12303_v31  ;;  %v2970_v31 = vld [vmem:[#allocation2 + $0x200] sm:$0xff]  ;;  %v3751_v56 = vadd.f32 %v12648_v53, %v12322_v9 }
 0x450   : > { %v12805_v12 = vpop.f32.mrf.mxu1  ;;  %v3754_v9 = vadd.f32 %v12664_v26, %v12341_v61  ;;  %v3757_v61 = vadd.f32 %v12678_v35, %v12360_v11  ;;  %v4392_v11 = vld [vmem:[#allocation2 + $0xb8] sm:$0xff]  ;;  %v5308_v35 = vld [vmem:[#allocation2 + $0x2a] sm:$0xff] }
 0x451   : > { %15566 = vst [vmem:[#allocation87_spill] sm:$0xff] %v12805_v12  ;;  %10435 = vmatmul.msk.f32.gmra.mxu2 %vm821_vm2, %v3890_v30  ;;  %10529 = vmatmul.msk.f32.gmra.mxu0 %vm821_vm2, %v4387_v23  ;;  %v15568_v30 = vld [vmem:[#allocation32_spill] sm:$0xff]  ;;  %v12826_v23 = vpop.f32.mrf.mxu3  ;;  %v3891_v12 = vld [vmem:[#allocation2 + $0x19a] sm:$0xff] }
 0x452   : > { %10499 = vmatmul.msk.f32.gmra.mxu3 %vm821_vm2, %v12329_v0 }
 0x453   : > { %10383 = vmatmul.msk.f32.gmra.mxu1 %vm821_vm2, %v2968_v43 }
 0x454   : > { %v4211_v10 = vpop.f32.mrf.mxu2 }
 0x455   : > { %v4341_v55 = vadd.f32 %v4211_v10, %v3745_v2 }
 0x456   : > { %v12821_v45 = vpop.f32.mrf.mxu0 }
 0x457   : > { %15567 = vst [vmem:[#allocation30_spill] sm:$0xff] %v12821_v45  ;;  %v12824_v27 = vadd.f32 %v4341_v55, %v15568_v30 }
 0x458   : > { %v12828_v0 = vpop.f32.mrf.mxu1 }
 0x459   : > { %15569 = vst [vmem:[#allocation89_spill] sm:$0xff] %v12828_v0  ;;  %10436 = vmatmul.msk.f32.gmra.mxu2 %vm821_vm2, %v3891_v12  ;;  %10530 = vmatmul.msk.f32.gmra.mxu0 %vm821_vm2, %v4388_v57  ;;  %v3892_v12 = vld [vmem:[#allocation2 + $0x1a2] sm:$0xff] }
 0x45a   : > { %10500 = vmatmul.msk.f32.gmra.mxu3 %vm821_vm2, %v12348_v1  ;;  %v4389_v57 = vld [vmem:[#allocation2 + $0xa0] sm:$0xff]  ;;  %v12846_v1 = vpop.f32.mrf.mxu3 }
 0x45b   : > { %10384 = vmatmul.msk.f32.gmra.mxu1 %vm821_vm2, %v2969_v21 }
 0x45c   : > { %v4214_v43 = vpop.f32.mrf.mxu2 }
 0x45d   : > { %v4342_v2 = vadd.f32 %v4214_v43, %v3748_v37  ;;  %v15573_v43 = vld [vmem:[#allocation34_spill] sm:$0xff] }
 0x45e   : > { %v12837_v32 = vpop.f32.mrf.mxu0 }
 0x45f   : > { %15570 = vst [vmem:[#allocation31_spill] sm:$0xff] %v12837_v32  ;;  %v12840_v10 = vadd.f32 %v4342_v2, %v15571_v25  ;;  %v2971_v32 = vld [vmem:[#allocation2 + $0x208] sm:$0xff] }
 0x460   : > { %v12842_v55 = vpop.f32.mrf.mxu1 }
 0x461   : > { %15572 = vst [vmem:[#allocation32_spill] sm:$0xff] %v12842_v55  ;;  %10437 = vmatmul.msk.f32.gmra.mxu2 %vm821_vm2, %v3892_v12  ;;  %10531 = vmatmul.msk.f32.gmra.mxu0 %vm821_vm2, %v4389_v57  ;;  %v3893_v12 = vld [vmem:[#allocation2 + $0x1aa] sm:$0xff]  ;;  %v15605_v55 = vmov 0.0  }
 0x462   : > { %10501 = vmatmul.msk.f32.gmra.mxu3 %vm821_vm2, %v12367_v19  ;;  %v4390_v57 = vld [vmem:[#allocation2 + $0xa8] sm:$0xff]  ;;  %v12867_v19 = vpop.f32.mrf.mxu3  ;;  %797 = vst.msk [vmem:[#allocation4] sm:$0xff] %vm796_vm3, %v15605_v55 }
 0x463   : > { %10385 = vmatmul.msk.f32.gmra.mxu1 %vm821_vm2, %v2970_v31  ;;  %798 = vst.msk [vmem:[#allocation4 + $0x8] sm:$0xff] %vm796_vm3, %v15605_v55 }
 0x464   : > { %v4217_v30 = vpop.f32.mrf.mxu2  ;;  %799 = vst.msk [vmem:[#allocation4 + $0x10] sm:$0xff] %vm796_vm3, %v15605_v55 }
 0x465   : > { %v4343_v21 = vadd.f32 %v4217_v30, %v3751_v56  ;;  %v15576_v30 = vld [vmem:[#allocation35_spill] sm:$0xff]  ;;  %800 = vst.msk [vmem:[#allocation4 + $0x18] sm:$0xff] %vm796_vm3, %v15605_v55 }
 0x466   : > { %v12853_v37 = vpop.f32.mrf.mxu0  ;;  %801 = vst.msk [vmem:[#allocation4 + $0x20] sm:$0xff] %vm796_vm3, %v15605_v55 }
 0x467   : > { %v12856_v2 = vadd.f32 %v4343_v21, %v15573_v43  ;;  %802 = vst.msk [vmem:[#allocation4 + $0x28] sm:$0xff] %vm796_vm3, %v15605_v55 }
 0x468   : > { %v12858_v25 = vpop.f32.mrf.mxu1  ;;  %803 = vst.msk [vmem:[#allocation4 + $0x30] sm:$0xff] %vm796_vm3, %v15605_v55 }
 0x469   : > { %15574 = vst [vmem:[#allocation33_spill] sm:$0xff] %v12856_v2  ;;  %10438 = vmatmul.msk.f32.gmra.mxu2 %vm821_vm2, %v3893_v12  ;;  %10532 = vmatmul.msk.f32.gmra.mxu0 %vm821_vm2, %v4390_v57  ;;  %v3894_v12 = vld [vmem:[#allocation2 + $0x1b2] sm:$0xff] }
 0x46a   : > { %15575 = vst [vmem:[#allocation34_spill] sm:$0xff] %v12858_v25  ;;  %10502 = vmatmul.msk.f32.gmra.mxu3 %vm821_vm2, %v12386_v41  ;;  %v4391_v57 = vld [vmem:[#allocation2 + $0xb0] sm:$0xff]  ;;  %v5319_v25 = vld [vmem:[#allocation2 + $0x82] sm:$0xff] }
 0x46b   : > { %10386 = vmatmul.msk.f32.gmra.mxu1 %vm821_vm2, %v2971_v32  ;;  %v2972_v41 = vld [vmem:[#allocation2 + $0x210] sm:$0xff]  ;;  %804 = vst.msk [vmem:[#allocation4 + $0x38] sm:$0xff] %vm796_vm3, %v15605_v55 }
 0x46c   : > { %v4220_v53 = vpop.f32.mrf.mxu2  ;;  %805 = vst.msk [vmem:[#allocation4 + $0x40] sm:$0xff] %vm796_vm3, %v15605_v55 }
 0x46d   : > { %v4344_v31 = vadd.f32 %v4220_v53, %v3754_v9  ;;  %v12883_v9 = vpop.f32.mrf.mxu3  ;;  %806 = vst.msk [vmem:[#allocation4 + $0x48] sm:$0xff] %vm796_vm3, %v15605_v55 }
 0x46e   : > { %v12869_v56 = vpop.f32.mrf.mxu0  ;;  %807 = vst.msk [vmem:[#allocation4 + $0x50] sm:$0xff] %vm796_vm3, %v15605_v55 }
 0x46f   : > { %v12872_v21 = vadd.f32 %v4344_v31, %v15576_v30  ;;  %v15579_v31 = vld [vmem:[#allocation36_spill] sm:$0xff]  ;;  %808 = vst.msk [vmem:[#allocation4 + $0x58] sm:$0xff] %vm796_vm3, %v15605_v55 }
 0x470   : > { %v12874_v43 = vpop.f32.mrf.mxu1  ;;  %809 = vst.msk [vmem:[#allocation4 + $0x60] sm:$0xff] %vm796_vm3, %v15605_v55 }
 0x471   : > { %15577 = vst [vmem:[#allocation35_spill] sm:$0xff] %v12872_v21  ;;  %10439 = vmatmul.msk.f32.gmra.mxu2 %vm821_vm2, %v3894_v12  ;;  %10533 = vmatmul.msk.f32.gmra.mxu0 %vm821_vm2, %v4391_v57  ;;  %v3895_v12 = vld [vmem:[#allocation2 + $0x1ba] sm:$0xff]  ;;  %v3760_v57 = vadd.f32 %v12694_v58, %v12379_v29  ;;  %v3763_v29 = vadd.f32 %v12710_v48, %v12396_v44 }
 0x472   : > { %15578 = vst [vmem:[#allocation106_spill] sm:$0xff] %v12874_v43  ;;  %10503 = vmatmul.msk.f32.gmra.mxu3 %vm821_vm2, %v12405_v14  ;;  %v5310_v44 = vld [vmem:[#allocation2 + $0x3a] sm:$0xff]  ;;  %v3766_v48 = vadd.f32 %v12726_v8, %v12415_v59  ;;  %v5311_v59 = vld [vmem:[#allocation2 + $0x42] sm:$0xff]  ;;  %v4403_v43 = vld [vmem:[#allocation2 + $0x110] sm:$0xff] }
 0x473   : > { %10387 = vmatmul.msk.f32.gmra.mxu1 %vm821_vm2, %v2972_v41  ;;  %810 = vst.msk [vmem:[#allocation4 + $0x68] sm:$0xff] %vm796_vm3, %v15605_v55  ;;  %v6604_v21 = vld [vmem:[%s12810_s24] sm:$0xff] }
 0x474   : > { %v4223_v26 = vpop.f32.mrf.mxu2  ;;  %811 = vst.msk [vmem:[#allocation4 + $0x70] sm:$0xff] %vm796_vm3, %v15605_v55 }
 0x475   : > { %v4345_v32 = vadd.f32 %v4223_v26, %v3757_v61  ;;  %v12910_v45 = vpop.f32.mrf.mxu3  ;;  %812 = vst.msk [vmem:[#allocation4 + $0x78] sm:$0xff] %vm796_vm3, %v15605_v55 }
 0x476   : > { %v12885_v53 = vpop.f32.mrf.mxu0  ;;  %813 = vst.msk [vmem:[#allocation4 + $0x80] sm:$0xff] %vm796_vm3, %v15605_v55 }
 0x477   : > { %v12888_v30 = vadd.f32 %v4345_v32, %v15579_v31  ;;  %v15582_v32 = vld [vmem:[#allocation37_spill] sm:$0xff]  ;;  %814 = vst.msk [vmem:[#allocation4 + $0x88] sm:$0xff] %vm796_vm3, %v15605_v55 }
 0x478   : > { %v12896_v14 = vpop.f32.mrf.mxu1  ;;  %815 = vst.msk [vmem:[#allocation4 + $0x90] sm:$0xff] %vm796_vm3, %v15605_v55 }
 0x479   : > { %15580 = vst [vmem:[#allocation36_spill] sm:$0xff] %v12888_v30  ;;  %10440 = vmatmul.msk.f32.gmra.mxu2 %vm821_vm2, %v3895_v12  ;;  %10534 = vmatmul.msk.f32.gmra.mxu0 %vm821_vm2, %v4392_v11  ;;  %v3896_v11 = vld [vmem:[#allocation2 + $0x1c2] sm:$0xff] }
 0x47a   : > { %15581 = vst [vmem:[#allocation107_spill] sm:$0xff] %v12896_v14  ;;  %10504 = vmatmul.msk.f32.gmra.mxu3 %vm821_vm2, %v12422_v36  ;;  %v4393_v14 = vld [vmem:[#allocation2 + $0xc0] sm:$0xff]  ;;  %v5309_v36 = vld [vmem:[#allocation2 + $0x32] sm:$0xff] }
 0x47b   : > { %10580 = vmatmul.msk.f32.vlgmr.msra.gmra.mxu1 %vm821_vm2, %v5308_v35  ;;  %816 = vst.msk [vmem:[#allocation4 + $0x98] sm:$0xff] %vm796_vm3, %v15605_v55 }
 0x47c   : > { %v4226_v41 = vpop.f32.mrf.mxu2  ;;  %829 = vst.msk [vmem:[#allocation3 + $0x208] sm:$0xff] %vm796_vm3, %v15605_v55 }
 0x47d   : > { %v4346_v61 = vadd.f32 %v4226_v41, %v3760_v57  ;;  %v15585_v41 = vld [vmem:[#allocation38_spill] sm:$0xff]  ;;  %830 = vst.msk [vmem:[#allocation3 + $0x210] sm:$0xff] %vm796_vm3, %v15605_v55 }
 0x47e   : > { %v12905_v26 = vpop.f32.mrf.mxu0  ;;  %831 = vst.msk [vmem:[#allocation3 + $0x218] sm:$0xff] %vm796_vm3, %v15605_v55 }
 0x47f   : > { %v12908_v31 = vadd.f32 %v4346_v61, %v15582_v32 }
 0x480   : > { %v12912_v12 = vpop.f32.mrf.mxu1 }
 0x481   : > { %15583 = vst [vmem:[#allocation37_spill] sm:$0xff] %v12908_v31  ;;  %10441 = vmatmul.msk.f32.gmra.mxu2 %vm821_vm2, %v3896_v11  ;;  %10535 = vmatmul.msk.f32.gmra.mxu0 %vm821_vm2, %v4393_v14  ;;  %v3897_v11 = vld [vmem:[#allocation2 + $0x1ca] sm:$0xff] }
 0x482   : > { %15584 = vst [vmem:[#allocation108_spill] sm:$0xff] %v12912_v12  ;;  %10505 = vmatmul.msk.f32.gmra.mxu3 %vm821_vm2, %v12441_v34  ;;  %v4394_v14 = vld [vmem:[#allocation2 + $0xc8] sm:$0xff]  ;;  %v12930_v34 = vpop.f32.mrf.mxu3  ;;  %v4401_v12 = vld [vmem:[#allocation2 + $0x100] sm:$0xff] }
 0x483   : > { %10581 = vmatmul.msk.f32.gmra.mxu1 %vm821_vm2, %v5309_v36  ;;  %v4500_v31 = vld [vmem:[#allocation2 + $0x209] sm:$0xff] }
 0x484   : > { %v4229_v58 = vpop.f32.mrf.mxu2 }
 0x485   : > { %v4347_v35 = vadd.f32 %v4229_v58, %v3763_v29 }
 0x486   : > { %v12921_v57 = vpop.f32.mrf.mxu0 }
 0x487   : > { %v12924_v61 = vadd.f32 %v4347_v35, %v15585_v41  ;;  %v15588_v35 = vld [vmem:[#allocation39_spill] sm:$0xff] }
 0x488   : > { %v12926_v32 = vpop.f32.mrf.mxu1 }
 0x489   : > { %15586 = vst [vmem:[#allocation38_spill] sm:$0xff] %v12924_v61  ;;  %10442 = vmatmul.msk.f32.gmra.mxu2 %vm821_vm2, %v3897_v11  ;;  %10536 = vmatmul.msk.f32.gmra.mxu0 %vm821_vm2, %v4394_v14  ;;  %v3898_v14 = vld [vmem:[#allocation2 + $0x1d2] sm:$0xff] }
 0x48a   : > { %15587 = vst [vmem:[#allocation109_spill] sm:$0xff] %v12926_v32  ;;  %10506 = vmatmul.msk.f32.gmra.mxu3 %vm821_vm2, %v12460_v60  ;;  %v4395_v32 = vld [vmem:[#allocation2 + $0xd0] sm:$0xff]  ;;  %v3769_v60 = vadd.f32 %v12742_v54, %v12434_v20  ;;  %v12951_v8 = vpop.f32.mrf.mxu3 }
 0x48b   : > { %10582 = vmatmul.msk.f32.gmra.mxu1 %vm821_vm2, %v5310_v44  ;;  %v5312_v20 = vld [vmem:[#allocation2 + $0x4a] sm:$0xff] }
 0x48c   : > { %v4232_v36 = vpop.f32.mrf.mxu2 }
 0x48d   : > { %v4348_v29 = vadd.f32 %v4232_v36, %v3766_v48 }
 0x48e   : > { %v12937_v58 = vpop.f32.mrf.mxu0 }
 0x48f   : > { %v12940_v41 = vadd.f32 %v4348_v29, %v15588_v35  ;;  %v15591_v29 = vld [vmem:[#allocation40_spill] sm:$0xff] }
 0x490   : > { %v12942_v11 = vpop.f32.mrf.mxu1 }
 0x491   : > { %15589 = vst [vmem:[#allocation39_spill] sm:$0xff] %v12940_v41  ;;  %10443 = vmatmul.msk.f32.gmra.mxu2 %vm821_vm2, %v3898_v14  ;;  %10537 = vmatmul.msk.f32.gmra.mxu0 %vm821_vm2, %v4395_v32  ;;  %v3899_v32 = vld [vmem:[#allocation2 + $0x1da] sm:$0xff] }
 0x492   : > { %15590 = vst [vmem:[#allocation110_spill] sm:$0xff] %v12942_v11  ;;  %10507 = vmatmul.msk.f32.gmra.mxu3 %vm821_vm2, %v12479_v28  ;;  %v4396_v11 = vld [vmem:[#allocation2 + $0xd8] sm:$0xff]  ;;  %v12965_v28 = vpop.f32.mrf.mxu3  ;;  %v13101_v41 = vld [vmem:[%s12894_s30] ss:$0 sm:$0xff] }
 0x493   : > { %10583 = vmatmul.msk.f32.gmra.mxu1 %vm821_vm2, %v5311_v59  ;;  %15594 = vst [vmem:[#allocation112_spill] sm:$0xff] %v12965_v28 }
 0x494   : > { %v4235_v44 = vpop.f32.mrf.mxu2 }
 0x495   : > { %v4349_v48 = vadd.f32 %v4235_v44, %v3769_v60  ;;  %v3900_v60 = vld [vmem:[#allocation2 + $0x1e2] sm:$0xff] }
 0x496   : > { %v12953_v36 = vpop.f32.mrf.mxu0  ;;  %v4397_v44 = vld [vmem:[#allocation2 + $0xe0] sm:$0xff] }
 0x497   : > { %v12956_v35 = vadd.f32 %v4349_v48, %v15591_v29 }
 0x498   : > { %v12958_v14 = vpop.f32.mrf.mxu1 }
 0x499   : > { %15592 = vst [vmem:[#allocation40_spill] sm:$0xff] %v12956_v35  ;;  %10444 = vmatmul.msk.f32.gmra.mxu2 %vm821_vm2, %v3899_v32  ;;  %10538 = vmatmul.msk.f32.gmra.mxu0 %vm821_vm2, %v4396_v11  ;;  %v5313_v11 = vld [vmem:[#allocation2 + $0x52] sm:$0xff]  ;;  %v3901_v32 = vld [vmem:[#allocation2 + $0x1ea] sm:$0xff] }
 0x49a   : > { %15593 = vst [vmem:[#allocation111_spill] sm:$0xff] %v12958_v14  ;;  %10508 = vmatmul.msk.f32.gmra.mxu3 %vm821_vm2, %v12498_v13  ;;  %v12978_v48 = vpop.f32.mrf.mxu3  ;;  %v4408_v35 = vld [vmem:[#allocation2 + $0x138] sm:$0xff] }
 0x49b   : > { %10584 = vmatmul.msk.f32.gmra.mxu1 %vm821_vm2, %v5312_v20  ;;  %15596 = vst [vmem:[#allocation114_spill] sm:$0xff] %v12978_v48  ;;  %v4398_v20 = vld [vmem:[#allocation2 + $0xe8] sm:$0xff] }
 0x49c   : > { %v6588_v48 = vld [vmem:[#allocation4 + $0x7] sm:$0xff] }
 0x49e   : > { %v12967_v54 = vpop.f32.mrf.mxu0 }
 0x4a0   : > { %v12969_v59 = vpop.f32.mrf.mxu1 }
 0x4a1   : > { %15595 = vst [vmem:[#allocation113_spill] sm:$0xff] %v12969_v59  ;;  %10445 = vmatmul.msk.f32.gmra.mxu2 %vm821_vm2, %v3900_v60  ;;  %10539 = vmatmul.msk.f32.gmra.mxu0 %vm821_vm2, %v4397_v44  ;;  %v5314_v60 = vld [vmem:[#allocation2 + $0x5a] sm:$0xff]  ;;  %v4399_v59 = vld [vmem:[#allocation2 + $0xf0] sm:$0xff] }
 0x4a2   : > { %10509 = vmatmul.msk.f32.gmra.mxu3 %vm821_vm2, %v12515_v51 }
 0x4a3   : > { %10585 = vmatmul.msk.f32.gmra.mxu1 %vm821_vm2, %v5313_v11  ;;  %v3902_v11 = vld [vmem:[#allocation2 + $0x1f2] sm:$0xff] }
 0x4a6   : > { %v12976_v13 = vpop.f32.mrf.mxu0 }
 0x4a8   : > { %v12980_v29 = vpop.f32.mrf.mxu1 }
 0x4a9   : > { %15597 = vst [vmem:[#allocation115_spill] sm:$0xff] %v12980_v29  ;;  %10446 = vmatmul.msk.f32.gmra.mxu2 %vm821_vm2, %v3901_v32  ;;  %10540 = vmatmul.msk.f32.gmra.mxu0 %vm821_vm2, %v4398_v20  ;;  %v12993_v29 = vpop.f32.mrf.mxu3  ;;  %v5315_v32 = vld [vmem:[#allocation2 + $0x62] sm:$0xff] }
 0x4aa   : > { %10510 = vmatmul.msk.f32.gmra.mxu3 %vm821_vm2, %v12534_v49  ;;  %15599 = vst [vmem:[#allocation117_spill] sm:$0xff] %v12993_v29 }
 0x4ab   : > { %10586 = vmatmul.msk.f32.gmra.mxu1 %vm821_vm2, %v5314_v60  ;;  %v3903_v60 = vld [vmem:[#allocation2 + $0x1fa] sm:$0xff] }
 0x4ae   : > { %v12987_v51 = vpop.f32.mrf.mxu0 }
 0x4b0   : > { %v12989_v44 = vpop.f32.mrf.mxu1 }
 0x4b1   : > { %15598 = vst [vmem:[#allocation116_spill] sm:$0xff] %v12989_v44  ;;  %10447 = vmatmul.msk.f32.gmra.mxu2 %vm821_vm2, %v3902_v11  ;;  %10541 = vmatmul.msk.f32.gmra.mxu0 %vm821_vm2, %v4399_v59  ;;  %v4400_v44 = vld [vmem:[#allocation2 + $0xf8] sm:$0xff]  ;;  %v5316_v11 = vld [vmem:[#allocation2 + $0x6a] sm:$0xff] }
 0x4b2   : > { %10511 = vmatmul.msk.f32.gmra.mxu3 %vm821_vm2, %v12553_v24  ;;  %v3904_v24 = vld [vmem:[#allocation2 + $0x202] sm:$0xff] }
 0x4b3   : > { %10587 = vmatmul.msk.f32.gmra.mxu1 %vm821_vm2, %v5315_v32  ;;  %v5317_v32 = vld [vmem:[#allocation2 + $0x72] sm:$0xff] }
 0x4b6   : > { %v12998_v49 = vpop.f32.mrf.mxu0 }
 0x4b8   : > { %v13000_v20 = vpop.f32.mrf.mxu1 }
 0x4b9   : > { %15600 = vst [vmem:[#allocation118_spill] sm:$0xff] %v13000_v20  ;;  %10448 = vmatmul.msk.f32.gmra.mxu2 %vm821_vm2, %v3903_v60  ;;  %10542 = vmatmul.msk.f32.gmra.mxu0 %vm821_vm2, %v4400_v44  ;;  %v3905_v20 = vld [vmem:[#allocation2 + $0x20a] sm:$0xff] }
 0x4bb   : > { %10588 = vmatmul.msk.f32.gmra.mxu1 %vm821_vm2, %v5316_v11  ;;  %v4402_v11 = vld [vmem:[#allocation2 + $0x108] sm:$0xff] }
 0x4be   : > { %v13005_v59 = vpop.f32.mrf.mxu0 }
 0x4c0   : > { %v13007_v14 = vpop.f32.mrf.mxu1 }
 0x4c1   : > { %15601 = vst [vmem:[#allocation119_spill] sm:$0xff] %v13007_v14  ;;  %10449 = vmatmul.msk.f32.gmra.mxu2 %vm821_vm2, %v3904_v24  ;;  %10543 = vmatmul.msk.f32.gmra.mxu0 %vm821_vm2, %v4401_v12  ;;  %v5318_v14 = vld [vmem:[#allocation2 + $0x7a] sm:$0xff]  ;;  %v3906_v24 = vld [vmem:[#allocation2 + $0x212] sm:$0xff] }
 0x4c3   : > { %10589 = vmatmul.msk.f32.gmra.mxu1 %vm821_vm2, %v5317_v32 }
 0x4c6   : > { %v13012_v60 = vpop.f32.mrf.mxu0 }
 0x4c8   : > { %v13014_v44 = vpop.f32.mrf.mxu1 }
 0x4c9   : > { %15602 = vst [vmem:[#allocation120_spill] sm:$0xff] %v13014_v44  ;;  %10450 = vmatmul.msk.f32.gmra.mxu2 %vm821_vm2, %v3905_v20  ;;  %10544 = vmatmul.msk.f32.gmra.mxu0 %vm821_vm2, %v4402_v11  ;;  %v6626_v44 = vld [vmem:[%s12810_s24 + $0x30] sm:$0xff] }
 0x4ca   : > { %v6606_v20 = vld [vmem:[%s12810_s24 + $0x10] sm:$0xff]  ;;  %6689 = vmatpush.msrb.mxu2 %v6626_v44 }
 0x4cb   : > { %10590 = vmatmul.msk.f32.gmra.mxu1 %vm821_vm2, %v5318_v14  ;;  %6802 = vmatpush.msra.mxu3 %v6606_v20  ;;  %v4404_v14 = vld [vmem:[#allocation2 + $0x118] sm:$0xff] }
 0x4cc   : > { %v5321_v20 = vld [vmem:[#allocation2 + $0x92] sm:$0xff] }
 0x4ce   : > { %v13023_v32 = vpop.f32.mrf.mxu0 }
 0x4d0   : > { %v13019_v12 = vpop.f32.mrf.mxu1 }
 0x4d1   : > { %15603 = vst [vmem:[#allocation121_spill] sm:$0xff] %v13019_v12  ;;  %10451 = vmatmul.msk.f32.gmra.mxu2 %vm821_vm2, %v3906_v24  ;;  %10545 = vmatmul.msk.f32.gmra.mxu0 %vm821_vm2, %v4403_v43  ;;  %v5320_v43 = vld [vmem:[#allocation2 + $0x8a] sm:$0xff]  ;;  %v4405_v24 = vld [vmem:[#allocation2 + $0x120] sm:$0xff]  ;;  %v5117_v12 = vadd.f32 %v12853_v37, %v12282_v39 }
 0x4d2   : > { %v15610_v39 = vld [vmem:[#allocation92_spill] sm:$0xff] }
 0x4d3   : > { %10591 = vmatmul.msk.f32.gmra.mxu1 %vm821_vm2, %v5319_v25  ;;  %v5120_v37 = vadd.f32 %v12869_v56, %v15610_v39  ;;  %v4501_v56 = vld [vmem:[#allocation2 + $0x211] sm:$0xff] }
 0x4d6   : > { %v13040_v25 = vpop.f32.mrf.mxu0 }
 0x4d8   : > { %v13028_v11 = vpop.f32.mrf.mxu1 }
 0x4d9   : > { %15604 = vst [vmem:[#allocation122_spill] sm:$0xff] %v13028_v11  ;;  %10546 = vmatmul.msk.f32.gmra.mxu0 %vm821_vm2, %v4404_v14  ;;  %v13096_v11 = vpop.f32.mrf.mxu3  ;;  %10512 = vmatmul.msk.f32.gmra.mxu3 %vm821_vm2, %v4500_v31 }
 0x4da   : > { %15609 = vst [vmem:[#allocation126_spill] sm:$0xff] %v13096_v11 }
 0x4db   : > { %10592 = vmatmul.msk.f32.gmra.mxu1 %vm821_vm2, %v5320_v43 }
 0x4de   : > { %v13066_v14 = vpop.f32.mrf.mxu0 }
 0x4e0   : > { %v13050_v44 = vpop.f32.mrf.mxu1 }
 0x4e1   : > { %15606 = vst [vmem:[#allocation123_spill] sm:$0xff] %v13050_v44  ;;  %10547 = vmatmul.msk.f32.gmra.mxu0 %vm821_vm2, %v4405_v24  ;;  %v4406_v24 = vld [vmem:[#allocation2 + $0x128] sm:$0xff] }
 0x4e3   : > { %10593 = vmatmul.msk.f32.gmra.mxu1 %vm821_vm2, %v5321_v20  ;;  %v5322_v20 = vld [vmem:[#allocation2 + $0x9a] sm:$0xff] }
 0x4e8   : > { %v13072_v43 = vpop.f32.mrf.mxu1 }
 0x4e9   : > { %15607 = vst [vmem:[#allocation124_spill] sm:$0xff] %v13072_v43  ;;  %10548 = vmatmul.msk.f32.gmra.mxu0 %vm821_vm2, %v4406_v24  ;;  %v13086_v43 = vpop.f32.mrf.mxu0  ;;  %v4407_v24 = vld [vmem:[#allocation2 + $0x130] sm:$0xff] }
 0x4eb   : > { %10594 = vmatmul.msk.f32.gmra.mxu1 %vm821_vm2, %v5322_v20  ;;  %v5323_v20 = vld [vmem:[#allocation2 + $0xa2] sm:$0xff] }
 0x4f0   : > { %v13088_v44 = vpop.f32.mrf.mxu1 }
 0x4f1   : > { %15608 = vst [vmem:[#allocation125_spill] sm:$0xff] %v13088_v44  ;;  %10549 = vmatmul.msk.f32.gmra.mxu0 %vm821_vm2, %v4407_v24  ;;  %v13104_v61 = vpop.f32.mrf.mxu0  ;;  %v5324_v24 = vld [vmem:[#allocation2 + $0xaa] sm:$0xff] }
 0x4f3   : > { %10595 = vmatmul.msk.f32.gmra.mxu1 %vm821_vm2, %v5323_v20 }
 0x4f8   : > { %v5583_v0 = vpop.f32.mrf.mxu1 }
 0x4f9   : > { %v5775_v44 = vadd.f32 %v5583_v0, %v5117_v12  ;;  %10550 = vmatmul.msk.f32.gmra.mxu0 %vm821_vm2, %v4408_v35  ;;  %v13112_v0 = vpop.f32.mrf.mxu3  ;;  %v4409_v35 = vld [vmem:[#allocation2 + $0x140] sm:$0xff]  ;;  %10513 = vmatmul.msk.f32.gmra.mxu3 %vm821_vm2, %v4501_v56 }
 0x4fa   : > { %15611 = vst [vmem:[#allocation92_spill] sm:$0xff] %v13112_v0  ;;  %v4502_v56 = vld [vmem:[#allocation2 + $0x219] sm:$0xff] }
 0x4fb   : > { %v5903_v55 = vadd.f32 %v12287_v3, %v5775_v44  ;;  %10596 = vmatmul.msk.f32.gmra.mxu1 %vm821_vm2, %v5324_v24  ;;  %v5325_v3 = vld [vmem:[#allocation2 + $0xb2] sm:$0xff] }
 0x4fc   : > { %v15612_v44 = vld [vmem:[#allocation93_spill] sm:$0xff] }
 0x4fd   : > { %v5971_v20 = vadd.f32 %v13101_v41, %v5903_v55  ;;  %v13118_v55 = vpop.f32.mrf.mxu0 }
 0x4ff   : > { %v6035_v12 = vmax.f32 %v5971_v20, 0.0  ;;  %v15613_v20 = vld [vmem:[#allocation94_spill] sm:$0xff] }
 0x500   : > { %v5586_v11 = vpop.f32.mrf.mxu1  ;;  %v5123_v39 = vadd.f32 %v12885_v53, %v15613_v20  ;;  %v15616_v53 = vld [vmem:[#allocation96_spill] sm:$0xff] }
 0x501   : > { %6099 = vst.msk [vmem:[#allocation3 + $0x8] sm:$0xff] %vm796_vm3, %v6035_v12  ;;  %v5776_v30 = vadd.f32 %v5586_v11, %v5120_v37  ;;  %10551 = vmatmul.msk.f32.gmra.mxu0 %vm821_vm2, %v4409_v35  ;;  %v4410_v11 = vld [vmem:[#allocation2 + $0x148] sm:$0xff]  ;;  %v13124_v37 = vpop.f32.mrf.mxu3  ;;  %v5326_v35 = vld [vmem:[#allocation2 + $0xba] sm:$0xff]  ;;  %10514 = vmatmul.msk.f32.gmra.mxu3 %vm821_vm2, %v4502_v56 }
 0x502   : > { %15614 = vst [vmem:[#allocation93_spill] sm:$0xff] %v13124_v37 }
 0x503   : > { %v5904_v24 = vadd.f32 %v15612_v44, %v5776_v30  ;;  %10597 = vmatmul.msk.f32.gmra.mxu1 %vm821_vm2, %v5325_v3  ;;  %v15615_v3 = vld [vmem:[#allocation95_spill] sm:$0xff] }
 0x505   : > { %v5972_v31 = vadd.f32 %v13101_v41, %v5904_v24  ;;  %v13131_v29 = vpop.f32.mrf.mxu0 }
 0x507   : > { %v6036_v0 = vmax.f32 %v5972_v31, 0.0  ;;  %v5126_v31 = vadd.f32 %v12905_v26, %v15616_v53  ;;  %v4503_v26 = vld [vmem:[#allocation2 + $0x221] sm:$0xff] }
 0x508   : > { %v5589_v12 = vpop.f32.mrf.mxu1 }
 0x509   : > { %6100 = vst.msk [vmem:[#allocation3 + $0x10] sm:$0xff] %vm796_vm3, %v6036_v0  ;;  %v5777_v30 = vadd.f32 %v5589_v12, %v5123_v39  ;;  %10552 = vmatmul.msk.f32.gmra.mxu0 %vm821_vm2, %v4410_v11  ;;  %v4411_v39 = vld [vmem:[#allocation2 + $0x150] sm:$0xff]  ;;  %v5327_v11 = vld [vmem:[#allocation2 + $0xc2] sm:$0xff] }
 0x50b   : > { %v5905_v44 = vadd.f32 %v15615_v3, %v5777_v30  ;;  %10598 = vmatmul.msk.f32.gmra.mxu1 %vm821_vm2, %v5326_v35  ;;  %v13138_v30 = vpop.f32.mrf.mxu3  ;;  %v15618_v35 = vld [vmem:[#allocation97_spill] sm:$0xff]  ;;  %10515 = vmatmul.msk.f32.gmra.mxu3 %vm821_vm2, %v4503_v26 }
 0x50c   : > { %15617 = vst [vmem:[#allocation94_spill] sm:$0xff] %v13138_v30  ;;  %v6163_v26 = vld [vmem:[#allocation3 + $0x8] sm:$0xff]  ;;  %v15620_v30 = vld [vmem:[#allocation99_spill] sm:$0xff] }
 0x50d   : > { %v5973_v24 = vadd.f32 %v13101_v41, %v5905_v44 }
 0x50f   : > { %v6037_v20 = vmax.f32 %v5973_v24, 0.0  ;;  %v15619_v24 = vld [vmem:[#allocation98_spill] sm:$0xff] }
 0x510   : > { %v5592_v0 = vpop.f32.mrf.mxu1  ;;  %v5129_v56 = vadd.f32 %v12921_v57, %v15619_v24  ;;  %v13154_v57 = vpop.f32.mrf.mxu2  ;;  %v6624_v24 = vld [vmem:[%s12810_s24 + $0x20] sm:$0xff] }
 0x511   : > { %6101 = vst.msk [vmem:[#allocation3 + $0x18] sm:$0xff] %vm796_vm3, %v6037_v20  ;;  %v5778_v12 = vadd.f32 %v5592_v0, %v5126_v31  ;;  %10553 = vmatmul.msk.f32.gmra.mxu0 %vm821_vm2, %v4411_v39  ;;  %v13146_v31 = vpop.f32.mrf.mxu0  ;;  %v4412_v0 = vld [vmem:[#allocation2 + $0x158] sm:$0xff] }
 0x512   : > { %15621 = vst [vmem:[#allocation95_spill] sm:$0xff] %v13154_v57 }
 0x513   : > { %v5906_v3 = vadd.f32 %v15618_v35, %v5778_v12  ;;  %10599 = vmatmul.msk.f32.gmra.mxu1 %vm821_vm2, %v5327_v11  ;;  %v5328_v12 = vld [vmem:[#allocation2 + $0xca] sm:$0xff]  ;;  %v6227_v11 = vld [vmem:[#allocation3 + $0x9] sm:$0xff] }
 0x514   : > { %v6625_v35 = vld [vmem:[%s12810_s24 + $0x28] sm:$0xff] }
 0x515   : > { %v5974_v44 = vadd.f32 %v13101_v41, %v5906_v3  ;;  %v6605_v3 = vld [vmem:[%s12810_s24 + $0x8] sm:$0xff]  ;;  %6690 = vmatpush.msrb.mxu2 %v6625_v35 }
 0x516   : > { %6803 = vmatpush.msra.mxu3 %v6605_v3 }
 0x517   : > { %v6038_v53 = vmax.f32 %v5974_v44, 0.0  ;;  %6691 = vmatpush.msrb.mxu2 %v6624_v24 }
 0x518   : > { %v5595_v20 = vpop.f32.mrf.mxu1  ;;  %v6165_v44 = vld [vmem:[#allocation3 + $0x18] sm:$0xff]  ;;  %6804 = vmatpush.msra.mxu3 %v6604_v21  ;;  %v5329_v21 = vld [vmem:[#allocation2 + $0xd2] sm:$0xff] }
 0x519   : > { %6102 = vst.msk [vmem:[#allocation3 + $0x20] sm:$0xff] %vm796_vm3, %v6038_v53  ;;  %v5779_v39 = vadd.f32 %v5595_v20, %v5129_v56  ;;  %10554 = vmatmul.msk.f32.gmra.mxu0 %vm821_vm2, %v4412_v0  ;;  %v13158_v53 = vpop.f32.mrf.mxu3  ;;  %v6291_v56 = vmax.f32 %v6163_v26, %v6227_v11  ;;  %v6608_v0 = vld [vmem:[#allocation4 + $0x8] sm:$0xff]  ;;  %10660 = vmatmul.msk.f32.vlgmr.msra.gmra.mxu3 %vm796_vm3, %v6588_v48  ;;  %v13166_v24 = vpop.f32.mrf.mxu0  ;;  %v6164_v48 = vld [vmem:[#allocation3 + $0x10] sm:$0xff] }
 0x51a   : > { %15622 = vst [vmem:[#allocation96_spill] sm:$0xff] %v13158_v53  ;;  %10644 = vmatmul.msk.f32.vlgmr.msrb.gmra.mxu2 %vm796_vm3, %v6608_v0  ;;  %v6228_v26 = vld [vmem:[#allocation3 + $0x11] sm:$0xff] }
 0x51b   : > { %v5907_v37 = vadd.f32 %v15620_v30, %v5779_v39  ;;  %10600 = vmatmul.msk.f32.gmra.mxu1 %vm821_vm2, %v5328_v12  ;;  %v15623_v30 = vld [vmem:[#allocation100_spill] sm:$0xff]  ;;  %v6357_v12 = vmax.f32 %v6291_v56, %v6165_v44  ;;  %v6292_v0 = vmax.f32 %v6164_v48, %v6228_v26  ;;  %v4414_v48 = vld [vmem:[#allocation2 + $0x168] sm:$0xff] }
 0x51c   : > { %v5132_v39 = vadd.f32 %v12937_v58, %v15623_v30  ;;  %v15624_v58 = vld [vmem:[#allocation101_spill] sm:$0xff] }
 0x51d   : > { %v5975_v20 = vadd.f32 %v13101_v41, %v5907_v37  ;;  %v4413_v37 = vld [vmem:[#allocation2 + $0x160] sm:$0xff] }
 0x51f   : > { %v6039_v35 = vmax.f32 %v5975_v20, 0.0 }
 0x520   : > { %v6229_v3 = vld [vmem:[#allocation3 + $0x19] sm:$0xff]  ;;  %v5598_v57 = vpop.f32.mrf.mxu1 }
 0x521   : > { %v6423_v2 = vmax.f32 %v6357_v12, %v6229_v3  ;;  %6103 = vst.msk [vmem:[#allocation3 + $0x28] sm:$0xff] %vm796_vm3, %v6039_v35  ;;  %v5780_v11 = vadd.f32 %v5598_v57, %v5132_v39  ;;  %10555 = vmatmul.msk.f32.gmra.mxu0 %vm821_vm2, %v4413_v37  ;;  %v6166_v20 = vld [vmem:[#allocation3 + $0x20] sm:$0xff]  ;;  %v13173_v39 = vpop.f32.mrf.mxu2  ;;  %v15626_v35 = vld [vmem:[#allocation103_spill] sm:$0xff]  ;;  %v13178_v53 = vpop.f32.mrf.mxu3 }
 0x522   : > { %v6609_v12 = vld [vmem:[#allocation4 + $0x10] sm:$0xff]  ;;  %15625 = vst [vmem:[#allocation97_spill] sm:$0xff] %v13173_v39  ;;  %v5135_v37 = vadd.f32 %v12953_v36, %v15626_v35  ;;  %v5330_v39 = vld [vmem:[#allocation2 + $0xda] sm:$0xff] }
 0x523   : > { %6487 = vst.msk [vmem:[#allocation3 + $0x8] sm:$0xff] %vm796_vm3, %v6423_v2  ;;  %v5908_v56 = vadd.f32 %v15624_v58, %v5780_v11  ;;  %10601 = vmatmul.msk.f32.gmra.mxu1 %vm821_vm2, %v5329_v21  ;;  %v6589_v57 = vld [vmem:[#allocation4 + $0xf] sm:$0xff]  ;;  %10645 = vmatmul.msk.f32.gmra.mxu2 %vm796_vm3, %v6609_v12  ;;  %v6358_v2 = vmax.f32 %v6292_v0, %v6166_v20  ;;  %v15628_v12 = vld [vmem:[#allocation102_spill] sm:$0xff]  ;;  %v13186_v0 = vpop.f32.mrf.mxu0 }
 0x524   : > { %15627 = vst [vmem:[#allocation98_spill] sm:$0xff] %v13178_v53  ;;  %10661 = vmatmul.msk.f32.gmra.mxu3 %vm796_vm3, %v6589_v57  ;;  %v6293_v57 = vmax.f32 %v6165_v44, %v6229_v3  ;;  %v15630_v44 = vld [vmem:[#allocation41_spill] sm:$0xff] }
 0x525   : > { %v5976_v30 = vadd.f32 %v13101_v41, %v5908_v56 }
 0x527   : > { %v6040_v11 = vmax.f32 %v5976_v30, 0.0 }
 0x528   : > { %v6230_v21 = vld [vmem:[#allocation3 + $0x21] sm:$0xff]  ;;  %v5601_v58 = vpop.f32.mrf.mxu1 }
 0x529   : > { %v6424_v26 = vmax.f32 %v6358_v2, %v6230_v21  ;;  %6104 = vst.msk [vmem:[#allocation3 + $0x30] sm:$0xff] %vm796_vm3, %v6040_v11  ;;  %v5781_v56 = vadd.f32 %v5601_v58, %v5135_v37  ;;  %10556 = vmatmul.msk.f32.gmra.mxu0 %vm821_vm2, %v4414_v48  ;;  %v6167_v30 = vld [vmem:[#allocation3 + $0x28] sm:$0xff]  ;;  %v15629_v2 = vld [vmem:[#allocation8_spill] sm:$0xff] }
 0x52a   : > { %v5138_v11 = vadd.f32 %v12967_v54, %v15629_v2  ;;  %v6359_v37 = vmax.f32 %v6293_v57, %v6167_v30  ;;  %v6294_v54 = vmax.f32 %v6166_v20, %v6230_v21  ;;  %v15632_v20 = vld [vmem:[#allocation43_spill] sm:$0xff] }
 0x52b   : > { %6488 = vst.msk [vmem:[#allocation3 + $0x10] sm:$0xff] %vm796_vm3, %v6424_v26  ;;  %v5909_v36 = vadd.f32 %v15628_v12, %v5781_v56  ;;  %10602 = vmatmul.msk.f32.gmra.mxu1 %vm821_vm2, %v5330_v39  ;;  %v4415_v56 = vld [vmem:[#allocation2 + $0x170] sm:$0xff]  ;;  %v5331_v39 = vld [vmem:[#allocation2 + $0xe2] sm:$0xff]  ;;  %v13197_v57 = vpop.f32.mrf.mxu0 }
 0x52d   : > { %v5977_v35 = vadd.f32 %v13101_v41, %v5909_v36 }
 0x52f   : > { %v6041_v58 = vmax.f32 %v5977_v35, 0.0  ;;  %v15631_v35 = vld [vmem:[#allocation9_spill] sm:$0xff] }
 0x530   : > { %v6231_v53 = vld [vmem:[#allocation3 + $0x29] sm:$0xff]  ;;  %v5604_v48 = vpop.f32.mrf.mxu1  ;;  %v5141_v2 = vadd.f32 %v12976_v13, %v15631_v35 }
 0x531   : > { %v6425_v28 = vmax.f32 %v6359_v37, %v6231_v53  ;;  %6105 = vst.msk [vmem:[#allocation3 + $0x38] sm:$0xff] %vm796_vm3, %v6041_v58  ;;  %v5782_v26 = vadd.f32 %v5604_v48, %v5138_v11  ;;  %10557 = vmatmul.msk.f32.gmra.mxu0 %vm821_vm2, %v4415_v56  ;;  %v6168_v12 = vld [vmem:[#allocation3 + $0x30] sm:$0xff]  ;;  %v6295_v13 = vmax.f32 %v6167_v30, %v6231_v53  ;;  %v5333_v53 = vld [vmem:[#allocation2 + $0xf2] sm:$0xff] }
 0x532   : > { %v6360_v11 = vmax.f32 %v6294_v54, %v6168_v12  ;;  %v15633_v54 = vld [vmem:[#allocation53_spill] sm:$0xff] }
 0x533   : > { %6489 = vst.msk [vmem:[#allocation3 + $0x18] sm:$0xff] %vm796_vm3, %v6425_v28  ;;  %v5910_v3 = vadd.f32 %v15630_v44, %v5782_v26  ;;  %10603 = vmatmul.msk.f32.gmra.mxu1 %vm821_vm2, %v5331_v39  ;;  %v4416_v26 = vld [vmem:[#allocation2 + $0x178] sm:$0xff]  ;;  %v5332_v39 = vld [vmem:[#allocation2 + $0xea] sm:$0xff] }
 0x535   : > { %v5978_v36 = vadd.f32 %v13101_v41, %v5910_v3 }
 0x537   : > { %v6042_v37 = vmax.f32 %v5978_v36, 0.0  ;;  %v5144_v36 = vadd.f32 %v12987_v51, %v15633_v54 }
 0x538   : > { %v6232_v58 = vld [vmem:[#allocation3 + $0x31] sm:$0xff]  ;;  %v5607_v48 = vpop.f32.mrf.mxu1 }
 0x539   : > { %v6426_v56 = vmax.f32 %v6360_v11, %v6232_v58  ;;  %6106 = vst.msk [vmem:[#allocation3 + $0x40] sm:$0xff] %vm796_vm3, %v6042_v37  ;;  %v5783_v28 = vadd.f32 %v5607_v48, %v5141_v2  ;;  %10558 = vmatmul.msk.f32.gmra.mxu0 %vm821_vm2, %v4416_v26  ;;  %v6169_v44 = vld [vmem:[#allocation3 + $0x38] sm:$0xff]  ;;  %v13209_v2 = vpop.f32.mrf.mxu0 }
 0x53a   : > { %v6361_v35 = vmax.f32 %v6295_v13, %v6169_v44 }
 0x53b   : > { %6490 = vst.msk [vmem:[#allocation3 + $0x20] sm:$0xff] %vm796_vm3, %v6426_v56  ;;  %v5911_v21 = vadd.f32 %v15632_v20, %v5783_v28  ;;  %10604 = vmatmul.msk.f32.gmra.mxu1 %vm821_vm2, %v5332_v39  ;;  %v4417_v28 = vld [vmem:[#allocation2 + $0x180] sm:$0xff] }
 0x53c   : > { %v15634_v39 = vld [vmem:[#allocation10_spill] sm:$0xff] }
 0x53d   : > { %v5979_v3 = vadd.f32 %v13101_v41, %v5911_v21  ;;  %v6296_v21 = vmax.f32 %v6168_v12, %v6232_v58  ;;  %v15636_v12 = vld [vmem:[#allocation11_spill] sm:$0xff] }
 0x53f   : > { %v6043_v11 = vmax.f32 %v5979_v3, 0.0  ;;  %v15635_v3 = vld [vmem:[#allocation104_spill] sm:$0xff] }
 0x540   : > { %v6233_v37 = vld [vmem:[#allocation3 + $0x39] sm:$0xff]  ;;  %v5610_v48 = vpop.f32.mrf.mxu1  ;;  %v5147_v54 = vadd.f32 %v12998_v49, %v15635_v3 }
 0x541   : > { %v6427_v26 = vmax.f32 %v6361_v35, %v6233_v37  ;;  %6107 = vst.msk [vmem:[#allocation3 + $0x48] sm:$0xff] %vm796_vm3, %v6043_v11  ;;  %v5784_v56 = vadd.f32 %v5610_v48, %v5144_v36  ;;  %10559 = vmatmul.msk.f32.gmra.mxu0 %vm821_vm2, %v4417_v28  ;;  %v6170_v20 = vld [vmem:[#allocation3 + $0x40] sm:$0xff]  ;;  %v6297_v3 = vmax.f32 %v6169_v44, %v6233_v37 }
 0x542   : > { %v6552_v30 = vld [vmem:[#allocation3 + $0x19] ss:$2 sm:$0x3f]  ;;  %v6362_v36 = vmax.f32 %v6296_v21, %v6170_v20  ;;  %v13229_v21 = vpop.f32.mrf.mxu3 }
 0x543   : > { %6491 = vst.msk [vmem:[#allocation3 + $0x28] sm:$0xff] %vm796_vm3, %v6427_v26  ;;  %v5912_v51 = vadd.f32 %v15634_v39, %v5784_v56  ;;  %10605 = vmatmul.msk.f32.gmra.mxu1 %vm821_vm2, %v5333_v53  ;;  %v4418_v56 = vld [vmem:[#allocation2 + $0x188] sm:$0xff]  ;;  %v13221_v39 = vpop.f32.mrf.mxu0  ;;  %v5334_v53 = vld [vmem:[#allocation2 + $0xfa] sm:$0xff]  ;;  %v15639_v44 = vld [vmem:[#allocation12_spill] sm:$0xff] }
 0x544   : > { %6554 = vst.msk [vmem:[#allocation4 + $0x19] sm:$0x3f] %vm6553_vm4, %v6552_v30 }
 0x545   : > { %v5980_v13 = vadd.f32 %v13101_v41, %v5912_v51  ;;  %v13227_v51 = vpop.f32.mrf.mxu2  ;;  %15637 = vst [vmem:[#allocation99_spill] sm:$0xff] %v13229_v21  ;;  %v4419_v21 = vld [vmem:[#allocation2 + $0x190] sm:$0xff] }
 0x547   : > { %v6044_v35 = vmax.f32 %v5980_v13, 0.0 }
 0x548   : > { %v6234_v11 = vld [vmem:[#allocation3 + $0x41] sm:$0xff]  ;;  %v5613_v48 = vpop.f32.mrf.mxu1 }
 0x549   : > { %v6428_v28 = vmax.f32 %v6362_v36, %v6234_v11  ;;  %6108 = vst.msk [vmem:[#allocation3 + $0x50] sm:$0xff] %vm796_vm3, %v6044_v35  ;;  %v5785_v26 = vadd.f32 %v5613_v48, %v5147_v54  ;;  %10560 = vmatmul.msk.f32.gmra.mxu0 %vm821_vm2, %v4418_v56  ;;  %v6171_v13 = vld [vmem:[#allocation3 + $0x48] sm:$0xff] }
 0x54a   : > { %v15638_v36 = vld [vmem:[#allocation13_spill] sm:$0xff]  ;;  %v6363_v48 = vmax.f32 %v6297_v3, %v6171_v13 }
 0x54b   : > { %6492 = vst.msk [vmem:[#allocation3 + $0x30] sm:$0xff] %vm796_vm3, %v6428_v28  ;;  %v5913_v58 = vadd.f32 %v15636_v12, %v5785_v26  ;;  %10606 = vmatmul.msk.f32.gmra.mxu1 %vm821_vm2, %v5334_v53  ;;  %v6610_v49 = vld [vmem:[#allocation4 + $0x18] sm:$0xff]  ;;  %v5150_v35 = vadd.f32 %v13005_v59, %v15638_v36 }
 0x54c   : > { %v6590_v30 = vld [vmem:[#allocation4 + $0x17] sm:$0xff]  ;;  %10646 = vmatmul.msk.f32.gmra.mxu2 %vm796_vm3, %v6610_v49  ;;  %v5335_v49 = vld [vmem:[#allocation2 + $0x102] sm:$0xff] }
 0x54d   : > { %10662 = vmatmul.msk.f32.gmra.mxu3 %vm796_vm3, %v6590_v30  ;;  %v5981_v54 = vadd.f32 %v13101_v41, %v5913_v58  ;;  %v13241_v58 = vpop.f32.mrf.mxu0  ;;  %v6298_v30 = vmax.f32 %v6170_v20, %v6234_v11  ;;  %v15641_v20 = vld [vmem:[#allocation51_spill] sm:$0xff] }
 0x54f   : > { %v6045_v28 = vmax.f32 %v5981_v54, 0.0  ;;  %v15640_v54 = vld [vmem:[#allocation56_spill] sm:$0xff] }
 0x550   : > { %v6235_v26 = vld [vmem:[#allocation3 + $0x49] sm:$0xff]  ;;  %v5616_v56 = vpop.f32.mrf.mxu1  ;;  %v5153_v36 = vadd.f32 %v13012_v60, %v15640_v54 }
 0x551   : > { %v6429_v53 = vmax.f32 %v6363_v48, %v6235_v26  ;;  %6109 = vst.msk [vmem:[#allocation3 + $0x58] sm:$0xff] %vm796_vm3, %v6045_v28  ;;  %v5786_v12 = vadd.f32 %v5616_v56, %v5150_v35  ;;  %10561 = vmatmul.msk.f32.gmra.mxu0 %vm821_vm2, %v4419_v21  ;;  %v6172_v59 = vld [vmem:[#allocation3 + $0x50] sm:$0xff]  ;;  %v6299_v60 = vmax.f32 %v6171_v13, %v6235_v26 }
 0x552   : > { %v6364_v35 = vmax.f32 %v6298_v30, %v6172_v59  ;;  %v15642_v26 = vld [vmem:[#allocation14_spill] sm:$0xff] }
 0x553   : > { %6493 = vst.msk [vmem:[#allocation3 + $0x38] sm:$0xff] %vm796_vm3, %v6429_v53  ;;  %v5914_v37 = vadd.f32 %v15639_v44, %v5786_v12  ;;  %10607 = vmatmul.msk.f32.gmra.mxu1 %vm821_vm2, %v5335_v49  ;;  %v4420_v12 = vld [vmem:[#allocation2 + $0x198] sm:$0xff]  ;;  %v5336_v49 = vld [vmem:[#allocation2 + $0x10a] sm:$0xff] }
 0x555   : > { %v5982_v3 = vadd.f32 %v13101_v41, %v5914_v37  ;;  %v13252_v30 = vpop.f32.mrf.mxu0 }
 0x557   : > { %v6046_v48 = vmax.f32 %v5982_v3, 0.0  ;;  %v5156_v3 = vadd.f32 %v13023_v32, %v12563_v4 }
 0x558   : > { %v6236_v28 = vld [vmem:[#allocation3 + $0x51] sm:$0xff]  ;;  %v5619_v21 = vpop.f32.mrf.mxu1 }
 0x559   : > { %v6430_v56 = vmax.f32 %v6364_v35, %v6236_v28  ;;  %6110 = vst.msk [vmem:[#allocation3 + $0x60] sm:$0xff] %vm796_vm3, %v6046_v48  ;;  %v5787_v53 = vadd.f32 %v5619_v21, %v5153_v36  ;;  %10562 = vmatmul.msk.f32.gmra.mxu0 %vm821_vm2, %v4420_v12  ;;  %v6173_v44 = vld [vmem:[#allocation3 + $0x58] sm:$0xff]  ;;  %v5337_v12 = vld [vmem:[#allocation2 + $0x112] sm:$0xff]  ;;  %v6300_v32 = vmax.f32 %v6172_v59, %v6236_v28 }
 0x55a   : > { %v6365_v54 = vmax.f32 %v6299_v60, %v6173_v44  ;;  %v15643_v59 = vld [vmem:[#allocation15_spill] sm:$0xff] }
 0x55b   : > { %6494 = vst.msk [vmem:[#allocation3 + $0x40] sm:$0xff] %vm796_vm3, %v6430_v56  ;;  %v5915_v11 = vadd.f32 %v15641_v20, %v5787_v53  ;;  %10608 = vmatmul.msk.f32.gmra.mxu1 %vm821_vm2, %v5336_v49  ;;  %v4421_v53 = vld [vmem:[#allocation2 + $0x1a0] sm:$0xff] }
 0x55d   : > { %v5983_v37 = vadd.f32 %v13101_v41, %v5915_v11  ;;  %v5159_v11 = vadd.f32 %v13040_v25, %v12584_v18 }
 0x55f   : > { %v6047_v36 = vmax.f32 %v5983_v37, 0.0 }
 0x560   : > { %v6237_v35 = vld [vmem:[#allocation3 + $0x59] sm:$0xff]  ;;  %v5622_v48 = vpop.f32.mrf.mxu1 }
 0x561   : > { %v6431_v21 = vmax.f32 %v6365_v54, %v6237_v35  ;;  %6111 = vst.msk [vmem:[#allocation3 + $0x68] sm:$0xff] %vm796_vm3, %v6047_v36  ;;  %v5788_v56 = vadd.f32 %v5622_v48, %v5156_v3  ;;  %10563 = vmatmul.msk.f32.gmra.mxu0 %vm821_vm2, %v4421_v53  ;;  %v6174_v4 = vld [vmem:[#allocation3 + $0x60] sm:$0xff]  ;;  %v13265_v3 = vpop.f32.mrf.mxu0  ;;  %v5338_v53 = vld [vmem:[#allocation2 + $0x11a] sm:$0xff] }
 0x562   : > { %v6556_v13 = vld [vmem:[#allocation3 + $0x39] ss:$2 sm:$0x3f]  ;;  %v6366_v60 = vmax.f32 %v6300_v32, %v6174_v4 }
 0x563   : > { %6495 = vst.msk [vmem:[#allocation3 + $0x48] sm:$0xff] %vm796_vm3, %v6431_v21  ;;  %v5916_v49 = vadd.f32 %v15642_v26, %v5788_v56  ;;  %10609 = vmatmul.msk.f32.gmra.mxu1 %vm821_vm2, %v5337_v12  ;;  %v4422_v56 = vld [vmem:[#allocation2 + $0x1a8] sm:$0xff]  ;;  %v13272_v12 = vpop.f32.mrf.mxu2 }
 0x564   : > { %6557 = vst.msk [vmem:[#allocation4 + $0x21] sm:$0x3f] %vm6553_vm4, %v6556_v13  ;;  %v13274_v13 = vpop.f32.mrf.mxu3 }
 0x565   : > { %v5984_v20 = vadd.f32 %v13101_v41, %v5916_v49  ;;  %v6301_v49 = vmax.f32 %v6173_v44, %v6237_v35  ;;  %v15644_v44 = vld [vmem:[#allocation16_spill] sm:$0xff] }
 0x567   : > { %v6048_v37 = vmax.f32 %v5984_v20, 0.0  ;;  %v5162_v20 = vadd.f32 %v13066_v14, %v12604_v52 }
 0x568   : > { %v6238_v54 = vld [vmem:[#allocation3 + $0x61] sm:$0xff]  ;;  %v5625_v36 = vpop.f32.mrf.mxu1 }
 0x569   : > { %v6432_v48 = vmax.f32 %v6366_v60, %v6238_v54  ;;  %6112 = vst.msk [vmem:[#allocation3 + $0x70] sm:$0xff] %vm796_vm3, %v6048_v37  ;;  %v5789_v21 = vadd.f32 %v5625_v36, %v5159_v11  ;;  %10564 = vmatmul.msk.f32.gmra.mxu0 %vm821_vm2, %v4422_v56  ;;  %v6175_v26 = vld [vmem:[#allocation3 + $0x68] sm:$0xff]  ;;  %v4423_v56 = vld [vmem:[#allocation2 + $0x1b0] sm:$0xff]  ;;  %v6302_v14 = vmax.f32 %v6174_v4, %v6238_v54 }
 0x56a   : > { %v6367_v11 = vmax.f32 %v6301_v49, %v6175_v26 }
 0x56b   : > { %6496 = vst.msk [vmem:[#allocation3 + $0x50] sm:$0xff] %vm796_vm3, %v6432_v48  ;;  %v5917_v28 = vadd.f32 %v15643_v59, %v5789_v21  ;;  %10610 = vmatmul.msk.f32.gmra.mxu1 %vm821_vm2, %v5338_v53  ;;  %v6611_v18 = vld [vmem:[#allocation4 + $0x20] sm:$0xff]  ;;  %v13282_v53 = vpop.f32.mrf.mxu0 }
 0x56c   : > { %v6591_v25 = vld [vmem:[#allocation4 + $0x1f] sm:$0xff]  ;;  %10647 = vmatmul.msk.f32.gmra.mxu2 %vm796_vm3, %v6611_v18  ;;  %v5165_v18 = vadd.f32 %v13086_v43, %v12625_v46 }
 0x56d   : > { %10663 = vmatmul.msk.f32.gmra.mxu3 %vm796_vm3, %v6591_v25  ;;  %v5985_v32 = vadd.f32 %v13101_v41, %v5917_v28  ;;  %v5339_v59 = vld [vmem:[#allocation2 + $0x122] sm:$0xff] }
 0x56f   : > { %v6049_v60 = vmax.f32 %v5985_v32, 0.0 }
 0x570   : > { %v6239_v37 = vld [vmem:[#allocation3 + $0x69] sm:$0xff]  ;;  %v5628_v36 = vpop.f32.mrf.mxu1 }
 0x571   : > { %v6433_v48 = vmax.f32 %v6367_v11, %v6239_v37  ;;  %6113 = vst.msk [vmem:[#allocation3 + $0x78] sm:$0xff] %vm796_vm3, %v6049_v60  ;;  %v5790_v21 = vadd.f32 %v5628_v36, %v5162_v20  ;;  %10565 = vmatmul.msk.f32.gmra.mxu0 %vm821_vm2, %v4423_v56  ;;  %v6176_v52 = vld [vmem:[#allocation3 + $0x70] sm:$0xff]  ;;  %v4424_v36 = vld [vmem:[#allocation2 + $0x1b8] sm:$0xff]  ;;  %v6303_v43 = vmax.f32 %v6175_v26, %v6239_v37  ;;  %v15645_v26 = vld [vmem:[#allocation63_spill] sm:$0xff] }
 0x572   : > { %v6368_v25 = vmax.f32 %v6302_v14, %v6176_v52  ;;  %v5168_v56 = vadd.f32 %v13104_v61, %v12641_v47 }
 0x573   : > { %6497 = vst.msk [vmem:[#allocation3 + $0x58] sm:$0xff] %vm796_vm3, %v6433_v48  ;;  %v5918_v35 = vadd.f32 %v15644_v44, %v5790_v21  ;;  %10611 = vmatmul.msk.f32.gmra.mxu1 %vm821_vm2, %v5339_v59  ;;  %v5340_v48 = vld [vmem:[#allocation2 + $0x12a] sm:$0xff]  ;;  %v13296_v54 = vpop.f32.mrf.mxu0 }
 0x575   : > { %v5986_v28 = vadd.f32 %v13101_v41, %v5918_v35 }
 0x577   : > { %v6050_v49 = vmax.f32 %v5986_v28, 0.0 }
 0x578   : > { %v6240_v32 = vld [vmem:[#allocation3 + $0x71] sm:$0xff]  ;;  %v5631_v20 = vpop.f32.mrf.mxu1 }
 0x579   : > { %v6434_v11 = vmax.f32 %v6368_v25, %v6240_v32  ;;  %6114 = vst.msk [vmem:[#allocation3 + $0x80] sm:$0xff] %vm796_vm3, %v6050_v49  ;;  %v5791_v60 = vadd.f32 %v5631_v20, %v5165_v18  ;;  %10566 = vmatmul.msk.f32.gmra.mxu0 %vm821_vm2, %v4424_v36  ;;  %v6177_v46 = vld [vmem:[#allocation3 + $0x78] sm:$0xff]  ;;  %v5341_v25 = vld [vmem:[#allocation2 + $0x132] sm:$0xff]  ;;  %v6304_v61 = vmax.f32 %v6176_v52, %v6240_v32 }
 0x57a   : > { %v6369_v59 = vmax.f32 %v6303_v43, %v6177_v46  ;;  %v15646_v52 = vld [vmem:[#allocation65_spill] sm:$0xff] }
 0x57b   : > { %6498 = vst.msk [vmem:[#allocation3 + $0x60] sm:$0xff] %vm796_vm3, %v6434_v11  ;;  %v5919_v4 = vadd.f32 %v12582_v62, %v5791_v60  ;;  %10612 = vmatmul.msk.f32.gmra.mxu1 %vm821_vm2, %v5340_v48  ;;  %v4425_v62 = vld [vmem:[#allocation2 + $0x1c0] sm:$0xff]  ;;  %v13308_v11 = vpop.f32.mrf.mxu0  ;;  %v5171_v60 = vadd.f32 %v13118_v55, %v12662_v22  ;;  %v13317_v55 = vpop.f32.mrf.mxu2 }
 0x57d   : > { %v5987_v21 = vadd.f32 %v13101_v41, %v5919_v4 }
 0x57f   : > { %v6051_v44 = vmax.f32 %v5987_v21, 0.0 }
 0x580   : > { %v6241_v35 = vld [vmem:[#allocation3 + $0x79] sm:$0xff]  ;;  %v5634_v14 = vpop.f32.mrf.mxu1 }
 0x581   : > { %v6435_v28 = vmax.f32 %v6369_v59, %v6241_v35  ;;  %6115 = vst.msk [vmem:[#allocation3 + $0x88] sm:$0xff] %vm796_vm3, %v6051_v44  ;;  %v5792_v18 = vadd.f32 %v5634_v14, %v5168_v56  ;;  %10567 = vmatmul.msk.f32.gmra.mxu0 %vm821_vm2, %v4425_v62  ;;  %v6178_v47 = vld [vmem:[#allocation3 + $0x80] sm:$0xff]  ;;  %v4426_v59 = vld [vmem:[#allocation2 + $0x1c8] sm:$0xff]  ;;  %v5342_v44 = vld [vmem:[#allocation2 + $0x13a] sm:$0xff]  ;;  %v6305_v62 = vmax.f32 %v6177_v46, %v6241_v35 }
 0x582   : > { %v6559_v49 = vld [vmem:[#allocation3 + $0x59] ss:$2 sm:$0x3f]  ;;  %v6370_v36 = vmax.f32 %v6304_v61, %v6178_v47 }
 0x583   : > { %6499 = vst.msk [vmem:[#allocation3 + $0x68] sm:$0xff] %vm796_vm3, %v6435_v28  ;;  %v5920_v37 = vadd.f32 %v15645_v26, %v5792_v18  ;;  %10613 = vmatmul.msk.f32.gmra.mxu1 %vm821_vm2, %v5341_v25  ;;  %v13319_v28 = vpop.f32.mrf.mxu3  ;;  %v13326_v61 = vpop.f32.mrf.mxu0  ;;  %v15647_v46 = vld [vmem:[#allocation67_spill] sm:$0xff] }
 0x584   : > { %6560 = vst.msk [vmem:[#allocation4 + $0x29] sm:$0x3f] %vm6553_vm4, %v6559_v49  ;;  %v5174_v49 = vadd.f32 %v13131_v29, %v12682_v6 }
 0x585   : > { %v5988_v20 = vadd.f32 %v13101_v41, %v5920_v37 }
 0x587   : > { %v6052_v48 = vmax.f32 %v5988_v20, 0.0 }
 0x588   : > { %v6242_v4 = vld [vmem:[#allocation3 + $0x81] sm:$0xff]  ;;  %v5637_v43 = vpop.f32.mrf.mxu1 }
 0x589   : > { %v6436_v21 = vmax.f32 %v6370_v36, %v6242_v4  ;;  %6116 = vst.msk [vmem:[#allocation3 + $0x90] sm:$0xff] %vm796_vm3, %v6052_v48  ;;  %v5793_v56 = vadd.f32 %v5637_v43, %v5171_v60  ;;  %10568 = vmatmul.msk.f32.gmra.mxu0 %vm821_vm2, %v4426_v59  ;;  %v6179_v18 = vld [vmem:[#allocation3 + $0x88] sm:$0xff]  ;;  %v4427_v43 = vld [vmem:[#allocation2 + $0x1d0] sm:$0xff]  ;;  %v6306_v29 = vmax.f32 %v6178_v47, %v6242_v4 }
 0x58a   : > { %v6371_v26 = vmax.f32 %v6305_v62, %v6179_v18  ;;  %v5177_v59 = vadd.f32 %v13146_v31, %v12703_v5  ;;  %v15648_v47 = vld [vmem:[#allocation69_spill] sm:$0xff] }
 0x58b   : > { %6500 = vst.msk [vmem:[#allocation3 + $0x70] sm:$0xff] %vm796_vm3, %v6436_v21  ;;  %v5921_v32 = vadd.f32 %v15646_v52, %v5793_v56  ;;  %10614 = vmatmul.msk.f32.gmra.mxu1 %vm821_vm2, %v5342_v44  ;;  %v6612_v14 = vld [vmem:[#allocation4 + $0x28] sm:$0xff] }
 0x58c   : > { %v6592_v22 = vld [vmem:[#allocation4 + $0x27] sm:$0xff]  ;;  %10648 = vmatmul.msk.f32.gmra.mxu2 %vm796_vm3, %v6612_v14 }
 0x58d   : > { %10664 = vmatmul.msk.f32.gmra.mxu3 %vm796_vm3, %v6592_v22  ;;  %v5989_v25 = vadd.f32 %v13101_v41, %v5921_v32  ;;  %v5343_v21 = vld [vmem:[#allocation2 + $0x142] sm:$0xff] }
 0x58f   : > { %v6053_v37 = vmax.f32 %v5989_v25, 0.0  ;;  %v4428_v25 = vld [vmem:[#allocation2 + $0x1d8] sm:$0xff] }
 0x590   : > { %v6243_v20 = vld [vmem:[#allocation3 + $0x89] sm:$0xff]  ;;  %v5640_v60 = vpop.f32.mrf.mxu1 }
 0x591   : > { %v6437_v36 = vmax.f32 %v6371_v26, %v6243_v20  ;;  %6117 = vst.msk [vmem:[#allocation3 + $0x98] sm:$0xff] %vm796_vm3, %v6053_v37  ;;  %v5794_v48 = vadd.f32 %v5640_v60, %v5174_v49  ;;  %10569 = vmatmul.msk.f32.gmra.mxu0 %vm821_vm2, %v4427_v43  ;;  %v6180_v6 = vld [vmem:[#allocation3 + $0x90] sm:$0xff]  ;;  %v13337_v49 = vpop.f32.mrf.mxu0  ;;  %v5344_v26 = vld [vmem:[#allocation2 + $0x14a] sm:$0xff]  ;;  %v6307_v31 = vmax.f32 %v6179_v18, %v6243_v20 }
 0x592   : > { %v6372_v44 = vmax.f32 %v6306_v29, %v6180_v6  ;;  %v5180_v60 = vadd.f32 %v13166_v24, %v12719_v50  ;;  %v4429_v29 = vld [vmem:[#allocation2 + $0x1e0] sm:$0xff] }
 0x593   : > { %6501 = vst.msk [vmem:[#allocation3 + $0x78] sm:$0xff] %vm796_vm3, %v6437_v36  ;;  %v5922_v35 = vadd.f32 %v15647_v46, %v5794_v48  ;;  %10615 = vmatmul.msk.f32.gmra.mxu1 %vm821_vm2, %v5343_v21 }
 0x595   : > { %v5990_v56 = vadd.f32 %v13101_v41, %v5922_v35 }
 0x597   : > { %v6054_v52 = vmax.f32 %v5990_v56, 0.0  ;;  %v5345_v56 = vld [vmem:[#allocation2 + $0x152] sm:$0xff] }
 0x598   : > { %v6244_v32 = vld [vmem:[#allocation3 + $0x91] sm:$0xff]  ;;  %v5643_v14 = vpop.f32.mrf.mxu1 }
 0x599   : > { %v6438_v22 = vmax.f32 %v6372_v44, %v6244_v32  ;;  %6118 = vst.msk [vmem:[#allocation3 + $0xa0] sm:$0xff] %vm796_vm3, %v6054_v52  ;;  %v5795_v62 = vadd.f32 %v5643_v14, %v5177_v59  ;;  %10570 = vmatmul.msk.f32.gmra.mxu0 %vm821_vm2, %v4428_v25  ;;  %v6181_v5 = vld [vmem:[#allocation3 + $0x98] sm:$0xff]  ;;  %v13351_v50 = vpop.f32.mrf.mxu0  ;;  %v6308_v20 = vmax.f32 %v6180_v6, %v6244_v32  ;;  %v15649_v6 = vld [vmem:[#allocation22_spill] sm:$0xff] }
 0x59a   : > { %v6373_v36 = vmax.f32 %v6307_v31, %v6181_v5  ;;  %v5183_v52 = vadd.f32 %v13186_v0, %v12740_v63  ;;  %v13362_v0 = vpop.f32.mrf.mxu2 }
 0x59b   : > { %6502 = vst.msk [vmem:[#allocation3 + $0x80] sm:$0xff] %vm796_vm3, %v6438_v22  ;;  %v5923_v4 = vadd.f32 %v15648_v47, %v5795_v62  ;;  %10616 = vmatmul.msk.f32.gmra.mxu1 %vm821_vm2, %v5344_v26  ;;  %v4430_v47 = vld [vmem:[#allocation2 + $0x1e8] sm:$0xff] }
 0x59d   : > { %v5991_v37 = vadd.f32 %v13101_v41, %v5923_v4  ;;  %v5346_v4 = vld [vmem:[#allocation2 + $0x15a] sm:$0xff] }
 0x59f   : > { %v6055_v48 = vmax.f32 %v5991_v37, 0.0  ;;  %v13364_v37 = vpop.f32.mrf.mxu3 }
 0x5a0   : > { %v6245_v43 = vld [vmem:[#allocation3 + $0x99] sm:$0xff]  ;;  %v5646_v21 = vpop.f32.mrf.mxu1 }
 0x5a1   : > { %v6439_v46 = vmax.f32 %v6373_v36, %v6245_v43  ;;  %6119 = vst.msk [vmem:[#allocation3 + $0xa8] sm:$0xff] %vm796_vm3, %v6055_v48  ;;  %v5796_v35 = vadd.f32 %v5646_v21, %v5180_v60  ;;  %10571 = vmatmul.msk.f32.gmra.mxu0 %vm821_vm2, %v4429_v29  ;;  %v6182_v24 = vld [vmem:[#allocation3 + $0xa0] sm:$0xff]  ;;  %v6309_v36 = vmax.f32 %v6181_v5, %v6245_v43  ;;  %v13369_v21 = vpop.f32.mrf.mxu0  ;;  %v15650_v5 = vld [vmem:[#allocation23_spill] sm:$0xff] }
 0x5a2   : > { %v6562_v59 = vld [vmem:[#allocation3 + $0x79] ss:$2 sm:$0x3f]  ;;  %v6374_v14 = vmax.f32 %v6308_v20, %v6182_v24 }
 0x5a3   : > { %6503 = vst.msk [vmem:[#allocation3 + $0x88] sm:$0xff] %vm796_vm3, %v6439_v46  ;;  %v5924_v18 = vadd.f32 %v12660_v38, %v5796_v35  ;;  %10617 = vmatmul.msk.f32.gmra.mxu1 %vm821_vm2, %v5345_v56  ;;  %v5186_v46 = vadd.f32 %v13197_v57, %v12760_v33 }
 0x5a4   : > { %6563 = vst.msk [vmem:[#allocation4 + $0x31] sm:$0x3f] %vm6553_vm4, %v6562_v59 }
 0x5a5   : > { %v5992_v44 = vadd.f32 %v13101_v41, %v5924_v18 }
 0x5a7   : > { %v6056_v22 = vmax.f32 %v5992_v44, 0.0  ;;  %v4431_v44 = vld [vmem:[#allocation2 + $0x1f0] sm:$0xff] }
 0x5a8   : > { %v6246_v62 = vld [vmem:[#allocation3 + $0xa1] sm:$0xff]  ;;  %v5649_v25 = vpop.f32.mrf.mxu1 }
 0x5a9   : > { %v6440_v26 = vmax.f32 %v6374_v14, %v6246_v62  ;;  %6120 = vst.msk [vmem:[#allocation3 + $0xb0] sm:$0xff] %vm796_vm3, %v6056_v22  ;;  %v5797_v38 = vadd.f32 %v5649_v25, %v5183_v52  ;;  %10572 = vmatmul.msk.f32.gmra.mxu0 %vm821_vm2, %v4430_v47  ;;  %v6183_v60 = vld [vmem:[#allocation3 + $0xa8] sm:$0xff]  ;;  %v5347_v52 = vld [vmem:[#allocation2 + $0x162] sm:$0xff]  ;;  %v6310_v33 = vmax.f32 %v6182_v24, %v6246_v62  ;;  %v15651_v24 = vld [vmem:[#allocation24_spill] sm:$0xff] }
 0x5aa   : > { %v6375_v35 = vmax.f32 %v6309_v36, %v6183_v60  ;;  %v5189_v22 = vadd.f32 %v13209_v2, %v12781_v15 }
 0x5ab   : > { %6504 = vst.msk [vmem:[#allocation3 + $0x90] sm:$0xff] %vm796_vm3, %v6440_v26  ;;  %v5925_v32 = vadd.f32 %v15649_v6, %v5797_v38  ;;  %10618 = vmatmul.msk.f32.gmra.mxu1 %vm821_vm2, %v5346_v4  ;;  %v6613_v31 = vld [vmem:[#allocation4 + $0x30] sm:$0xff]  ;;  %v13381_v38 = vpop.f32.mrf.mxu0 }
 0x5ac   : > { %v6593_v63 = vld [vmem:[#allocation4 + $0x2f] sm:$0xff]  ;;  %10649 = vmatmul.msk.f32.gmra.mxu2 %vm796_vm3, %v6613_v31  ;;  %v4432_v31 = vld [vmem:[#allocation2 + $0x1f8] sm:$0xff] }
 0x5ad   : > { %10665 = vmatmul.msk.f32.gmra.mxu3 %vm796_vm3, %v6593_v63  ;;  %v5993_v48 = vadd.f32 %v13101_v41, %v5925_v32  ;;  %v5348_v63 = vld [vmem:[#allocation2 + $0x16a] sm:$0xff] }
 0x5af   : > { %v6057_v29 = vmax.f32 %v5993_v48, 0.0  ;;  %v5192_v48 = vadd.f32 %v13221_v39, %v12798_v16  ;;  %v15652_v16 = vld [vmem:[#allocation25_spill] sm:$0xff] }
 0x5b0   : > { %v6247_v56 = vld [vmem:[#allocation3 + $0xa9] sm:$0xff]  ;;  %v5652_v59 = vpop.f32.mrf.mxu1 }
 0x5b1   : > { %v6441_v18 = vmax.f32 %v6375_v35, %v6247_v56  ;;  %6121 = vst.msk [vmem:[#allocation3 + $0xb8] sm:$0xff] %vm796_vm3, %v6057_v29  ;;  %v5798_v20 = vadd.f32 %v5652_v59, %v5186_v46  ;;  %10573 = vmatmul.msk.f32.gmra.mxu0 %vm821_vm2, %v4431_v44  ;;  %v6184_v14 = vld [vmem:[#allocation3 + $0xb0] sm:$0xff]  ;;  %v6311_v2 = vmax.f32 %v6183_v60, %v6247_v56  ;;  %v5349_v60 = vld [vmem:[#allocation2 + $0x172] sm:$0xff] }
 0x5b2   : > { %v6376_v25 = vmax.f32 %v6310_v33, %v6184_v14  ;;  %v4433_v44 = vld [vmem:[#allocation2 + $0x200] sm:$0xff] }
 0x5b3   : > { %6505 = vst.msk [vmem:[#allocation3 + $0x98] sm:$0xff] %vm796_vm3, %v6441_v18  ;;  %v5926_v43 = vadd.f32 %v15650_v5, %v5798_v20  ;;  %10619 = vmatmul.msk.f32.gmra.mxu1 %vm821_vm2, %v5347_v52  ;;  %v13392_v52 = vpop.f32.mrf.mxu0 }
 0x5b5   : > { %v5994_v57 = vadd.f32 %v13101_v41, %v5926_v43 }
 0x5b7   : > { %v6058_v26 = vmax.f32 %v5994_v57, 0.0  ;;  %v7703_v57 = vld [vmem:[%s12810_s24 + $0x118] sm:$0xff] }
 0x5b8   : > { %v6248_v47 = vld [vmem:[#allocation3 + $0xb1] sm:$0xff]  ;;  %v5655_v4 = vpop.f32.mrf.mxu1  ;;  %7764 = vmatpush.msrb.mxu0 %v7703_v57 }
 0x5b9   : > { %v6442_v6 = vmax.f32 %v6376_v25, %v6248_v47  ;;  %6122 = vst.msk [vmem:[#allocation3 + $0xc0] sm:$0xff] %vm796_vm3, %v6058_v26  ;;  %v5799_v32 = vadd.f32 %v5655_v4, %v5189_v22  ;;  %10574 = vmatmul.msk.f32.gmra.mxu0 %vm821_vm2, %v4432_v31  ;;  %v6185_v15 = vld [vmem:[#allocation3 + $0xb8] sm:$0xff]  ;;  %v6312_v43 = vmax.f32 %v6184_v14, %v6248_v47  ;;  %v13407_v47 = vpop.f32.mrf.mxu2 }
 0x5ba   : > { %v6377_v46 = vmax.f32 %v6311_v2, %v6185_v15  ;;  %v5195_v22 = vadd.f32 %v13241_v58, %v12826_v23  ;;  %v4434_v4 = vld [vmem:[#allocation2 + $0x208] sm:$0xff]  ;;  %v7700_v2 = vld [vmem:[%s12810_s24 + $0x100] sm:$0xff] }
 0x5bb   : > { %6506 = vst.msk [vmem:[#allocation3 + $0xa0] sm:$0xff] %vm796_vm3, %v6442_v6  ;;  %v5927_v62 = vadd.f32 %v15651_v24, %v5799_v32  ;;  %10620 = vmatmul.msk.f32.gmra.mxu1 %vm821_vm2, %v5348_v63  ;;  %v7702_v6 = vld [vmem:[%s12810_s24 + $0x110] sm:$0xff]  ;;  %v7701_v14 = vld [vmem:[%s12810_s24 + $0x108] sm:$0xff] }
 0x5bc   : > { %7765 = vmatpush.msrb.mxu0 %v7702_v6 }
 0x5bd   : > { %v5995_v36 = vadd.f32 %v13101_v41, %v5927_v62 }
 0x5be   : > { %7766 = vmatpush.msrb.mxu0 %v7701_v14 }
 0x5bf   : > { %v6059_v35 = vmax.f32 %v5995_v36, 0.0  ;;  %v13413_v36 = vpop.f32.mrf.mxu3 }
 0x5c0   : > { %v6249_v29 = vld [vmem:[#allocation3 + $0xb9] sm:$0xff]  ;;  %v5658_v59 = vpop.f32.mrf.mxu1  ;;  %7767 = vmatpush.msrb.mxu0 %v7700_v2 }
 0x5c1   : > { %v6443_v18 = vmax.f32 %v6377_v46, %v6249_v29  ;;  %6123 = vst.msk [vmem:[#allocation3 + $0xc8] sm:$0xff] %vm796_vm3, %v6059_v35  ;;  %v5800_v20 = vadd.f32 %v5658_v59, %v5192_v48  ;;  %10575 = vmatmul.msk.f32.gmra.mxu0 %vm821_vm2, %v4433_v44  ;;  %v6186_v5 = vld [vmem:[#allocation3 + $0xc0] sm:$0xff]  ;;  %v13415_v48 = vpop.f32.mrf.mxu0  ;;  %v6313_v35 = vmax.f32 %v6185_v15, %v6249_v29  ;;  %v13420_v59 = vld [vmem:[%s12894_s30] ss:$0 sm:$0xff]  ;;  %v5351_v15 = vld [vmem:[#allocation2 + $0x182] sm:$0xff] }
 0x5c2   : > { %v6565_v56 = vld [vmem:[#allocation3 + $0x99] ss:$2 sm:$0x3f]  ;;  %v6378_v25 = vmax.f32 %v6312_v43, %v6186_v5 }
 0x5c3   : > { %6507 = vst.msk [vmem:[#allocation3 + $0xa8] sm:$0xff] %vm796_vm3, %v6443_v18  ;;  %v5928_v39 = vadd.f32 %v15652_v16, %v5800_v20  ;;  %10621 = vmatmul.msk.f32.gmra.mxu1 %vm821_vm2, %v5349_v60  ;;  %v4435_v44 = vld [vmem:[#allocation2 + $0x210] sm:$0xff]  ;;  %v5198_v60 = vadd.f32 %v13252_v30, %v12846_v1  ;;  %v5201_v30 = vadd.f32 %v13265_v3, %v12867_v19 }
 0x5c4   : > { %6566 = vst.msk [vmem:[#allocation4 + $0x39] sm:$0x3f] %vm6553_vm4, %v6565_v56 }
 0x5c5   : > { %v5996_v33 = vadd.f32 %v13101_v41, %v5928_v39  ;;  %v5350_v41 = vld [vmem:[#allocation2 + $0x17a] sm:$0xff] }
 0x5c7   : > { %v6060_v26 = vmax.f32 %v5996_v33, 0.0  ;;  %v15653_v33 = vld [vmem:[#allocation81_spill] sm:$0xff] }
 0x5c8   : > { %v6250_v32 = vld [vmem:[#allocation3 + $0xc1] sm:$0xff]  ;;  %v5661_v31 = vpop.f32.mrf.mxu1 }
 0x5c9   : > { %v6444_v63 = vmax.f32 %v6378_v25, %v6250_v32  ;;  %6124 = vst.msk [vmem:[#allocation3 + $0xd0] sm:$0xff] %vm796_vm3, %v6060_v26  ;;  %v5801_v24 = vadd.f32 %v5661_v31, %v5195_v22  ;;  %10576 = vmatmul.msk.f32.gmra.mxu0 %vm821_vm2, %v4434_v4  ;;  %v6187_v46 = vld [vmem:[#allocation3 + $0xc8] sm:$0xff]  ;;  %v6314_v22 = vmax.f32 %v6186_v5, %v6250_v32  ;;  %v13430_v25 = vpop.f32.mrf.mxu0 }
 0x5ca   : > { %v6379_v18 = vmax.f32 %v6313_v35, %v6187_v46  ;;  %v4436_v4 = vld [vmem:[#allocation2 + $0x218] sm:$0xff] }
 0x5cb   : > { %6508 = vst.msk [vmem:[#allocation3 + $0xb0] sm:$0xff] %vm796_vm3, %v6444_v63  ;;  %v5929_v23 = vadd.f32 %v12738_v17, %v5801_v24  ;;  %10622 = vmatmul.msk.f32.gmra.mxu1 %vm821_vm2, %v5350_v41  ;;  %v6614_v58 = vld [vmem:[#allocation4 + $0x38] sm:$0xff]  ;;  %v5352_v41 = vld [vmem:[#allocation2 + $0x18a] sm:$0xff] }
 0x5cc   : > { %v6594_v62 = vld [vmem:[#allocation4 + $0x37] sm:$0xff]  ;;  %10650 = vmatmul.msk.f32.gmra.mxu2 %vm796_vm3, %v6614_v58 }
 0x5cd   : > { %10666 = vmatmul.msk.f32.gmra.mxu3 %vm796_vm3, %v6594_v62  ;;  %v5997_v17 = vadd.f32 %v13420_v59, %v5929_v23  ;;  %v5204_v23 = vadd.f32 %v13282_v53, %v12883_v9  ;;  %v4437_v62 = vld [vmem:[#allocation2 + $0x220] sm:$0xff] }
 0x5cf   : > { %v6061_v20 = vmax.f32 %v5997_v17, 0.0 }
 0x5d0   : > { %v6251_v56 = vld [vmem:[#allocation3 + $0xc9] sm:$0xff]  ;;  %v5664_v16 = vpop.f32.mrf.mxu1 }
 0x5d1   : > { %v6445_v39 = vmax.f32 %v6379_v18, %v6251_v56  ;;  %6125 = vst.msk [vmem:[#allocation3 + $0xd8] sm:$0xff] %vm796_vm3, %v6061_v20  ;;  %v5802_v43 = vadd.f32 %v5664_v16, %v5198_v60  ;;  %10577 = vmatmul.msk.f32.gmra.mxu0 %vm821_vm2, %v4435_v44  ;;  %v6188_v29 = vld [vmem:[#allocation3 + $0xd0] sm:$0xff]  ;;  %v6315_v3 = vmax.f32 %v6187_v46, %v6251_v56  ;;  %v13443_v2 = vpop.f32.mrf.mxu0  ;;  %v5353_v44 = vld [vmem:[#allocation2 + $0x192] sm:$0xff] }
 0x5d2   : > { %v6380_v26 = vmax.f32 %v6314_v22, %v6188_v29  ;;  %v5207_v16 = vadd.f32 %v13296_v54, %v12910_v45  ;;  %v7684_v22 = vld [vmem:[#allocation4 + $0x19] sm:$0xff]  ;;  %v13464_v54 = vpop.f32.mrf.mxu3 }
 0x5d3   : > { %6509 = vst.msk [vmem:[#allocation3 + $0xb8] sm:$0xff] %vm796_vm3, %v6445_v39  ;;  %10623 = vmatmul.msk.f32.gmra.mxu1 %vm821_vm2, %v5351_v15  ;;  %v5930_v57 = vadd.f32 %v15653_v33, %v5802_v43 }
 0x5d5   : > { %v5998_v1 = vadd.f32 %v13420_v59, %v5930_v57 }
 0x5d7   : > { %v6062_v31 = vmax.f32 %v5998_v1, 0.0 }
 0x5d8   : > { %v6252_v6 = vld [vmem:[#allocation3 + $0xd1] sm:$0xff]  ;;  %v5667_v63 = vpop.f32.mrf.mxu1 }
 0x5d9   : > { %v6446_v24 = vmax.f32 %v6380_v26, %v6252_v6  ;;  %v5803_v14 = vadd.f32 %v5667_v63, %v5201_v30  ;;  %6126 = vst.msk [vmem:[#allocation3 + $0xe0] sm:$0xff] %vm796_vm3, %v6062_v31  ;;  %10578 = vmatmul.msk.f32.gmra.mxu0 %vm821_vm2, %v4436_v4  ;;  %v6189_v32 = vld [vmem:[#allocation3 + $0xd8] sm:$0xff]  ;;  %v6316_v53 = vmax.f32 %v6188_v29, %v6252_v6  ;;  %v13455_v1 = vpop.f32.mrf.mxu0  ;;  %v5354_v30 = vld [vmem:[#allocation2 + $0x19a] sm:$0xff]  ;;  %v13458_v4 = vpop.f32.mrf.mxu2 }
 0x5da   : > { %v6381_v35 = vmax.f32 %v6315_v3, %v6189_v32  ;;  %v7685_v3 = vld [vmem:[#allocation4 + $0x21] sm:$0xff] }
 0x5db   : > { %6510 = vst.msk [vmem:[#allocation3 + $0xc0] sm:$0xff] %vm796_vm3, %v6446_v24  ;;  %v5931_v5 = vadd.f32 %v12770_v7, %v5803_v14  ;;  %10624 = vmatmul.msk.f32.gmra.mxu1 %vm821_vm2, %v5352_v41  ;;  %v5210_v41 = vadd.f32 %v13308_v11, %v12930_v34 }
 0x5dd   : > { %v5999_v19 = vadd.f32 %v13420_v59, %v5931_v5 }
 0x5df   : > { %v6063_v58 = vmax.f32 %v5999_v19, 0.0 }
 0x5e0   : > { %v5670_v17 = vpop.f32.mrf.mxu1  ;;  %v6253_v18 = vld [vmem:[#allocation3 + $0xd9] sm:$0xff] }
 0x5e1   : > { %6127 = vst.msk [vmem:[#allocation3 + $0xe8] sm:$0xff] %vm796_vm3, %v6063_v58  ;;  %v5804_v20 = vadd.f32 %v5670_v17, %v5204_v23  ;;  %v6447_v7 = vmax.f32 %v6381_v35, %v6253_v18  ;;  %10579 = vmatmul.msk.f32.gmra.mxu0 %vm821_vm2, %v4437_v62  ;;  %v6190_v9 = vld [vmem:[#allocation3 + $0xe0] sm:$0xff]  ;;  %v6317_v31 = vmax.f32 %v6189_v32, %v6253_v18  ;;  %v5355_v58 = vld [vmem:[#allocation2 + $0x1a2] sm:$0xff]  ;;  %v13474_v32 = vpop.f32.mrf.mxu0 }
 0x5e2   : > { %v6568_v60 = vld [vmem:[#allocation3 + $0xb9] ss:$2 sm:$0x3f]  ;;  %v6382_v39 = vmax.f32 %v6316_v53, %v6190_v9  ;;  %v5213_v17 = vadd.f32 %v13326_v61, %v12951_v8 }
 0x5e3   : > { %v5932_v46 = vadd.f32 %v12786_v40, %v5804_v20  ;;  %10625 = vmatmul.msk.f32.gmra.mxu1 %vm821_vm2, %v5353_v44  ;;  %6569 = vst.msk [vmem:[#allocation4 + $0x41] sm:$0x3f] %vm6553_vm4, %v6568_v60  ;;  %v7686_v53 = vld [vmem:[#allocation4 + $0x29] sm:$0xff] }
 0x5e4   : > { %6511 = vst.msk [vmem:[#allocation3 + $0xc8] sm:$0xff] %vm796_vm3, %v6447_v7 }
 0x5e5   : > { %v6000_v56 = vadd.f32 %v13420_v59, %v5932_v46 }
 0x5e7   : > { %v6064_v43 = vmax.f32 %v6000_v56, 0.0  ;;  %v5356_v56 = vld [vmem:[#allocation2 + $0x1aa] sm:$0xff] }
 0x5e8   : > { %v6254_v15 = vld [vmem:[#allocation3 + $0xe1] sm:$0xff]  ;;  %v5673_v33 = vpop.f32.mrf.mxu1 }
 0x5e9   : > { %v6448_v57 = vmax.f32 %v6382_v39, %v6254_v15  ;;  %6128 = vst.msk [vmem:[#allocation3 + $0xf0] sm:$0xff] %vm796_vm3, %v6064_v43  ;;  %v5805_v40 = vadd.f32 %v5673_v33, %v5207_v16  ;;  %10772 = vmatmul.msk.f32.vlgmr.msrb.gmra.mxu0 %vm796_vm3, %v7684_v22  ;;  %v6191_v6 = vld [vmem:[#allocation3 + $0xe8] sm:$0xff]  ;;  %v6318_v34 = vmax.f32 %v6190_v9, %v6254_v15  ;;  %v13486_v61 = vpop.f32.mrf.mxu0  ;;  %v15654_v39 = vld [vmem:[#allocation112_spill] sm:$0xff] }
 0x5ea   : > { %v6615_v29 = vld [vmem:[#allocation4 + $0x40] sm:$0xff]  ;;  %v6383_v24 = vmax.f32 %v6317_v31, %v6191_v6  ;;  %v5216_v43 = vadd.f32 %v13337_v49, %v15654_v39  ;;  %v15659_v39 = vld [vmem:[#allocation36_spill] sm:$0xff] }
 0x5eb   : > { %v6595_v26 = vld [vmem:[#allocation4 + $0x3f] sm:$0xff]  ;;  %6512 = vst.msk [vmem:[#allocation3 + $0xd0] sm:$0xff] %vm796_vm3, %v6448_v57  ;;  %v5933_v45 = vadd.f32 %v12803_v42, %v5805_v40  ;;  %10626 = vmatmul.msk.f32.gmra.mxu1 %vm821_vm2, %v5354_v30  ;;  %10651 = vmatmul.msk.f32.gmra.mxu2 %vm796_vm3, %v6615_v29  ;;  %v7687_v30 = vld [vmem:[#allocation4 + $0x31] sm:$0xff] }
 0x5ec   : > { %10667 = vmatmul.msk.f32.gmra.mxu3 %vm796_vm3, %v6595_v26  ;;  %v5357_v29 = vld [vmem:[#allocation2 + $0x1b2] sm:$0xff] }
 0x5ed   : > { %v6001_v63 = vadd.f32 %v13420_v59, %v5933_v45  ;;  %v15655_v26 = vld [vmem:[#allocation33_spill] sm:$0xff] }
 0x5ef   : > { %v6065_v14 = vmax.f32 %v6001_v63, 0.0  ;;  %v15656_v63 = vld [vmem:[#allocation114_spill] sm:$0xff] }
 0x5f0   : > { %v6255_v5 = vld [vmem:[#allocation3 + $0xe9] sm:$0xff]  ;;  %v5676_v19 = vpop.f32.mrf.mxu1 }
 0x5f1   : > { %v6449_v42 = vmax.f32 %v6383_v24, %v6255_v5  ;;  %6129 = vst.msk [vmem:[#allocation3 + $0xf8] sm:$0xff] %vm796_vm3, %v6065_v14  ;;  %v5806_v23 = vadd.f32 %v5676_v19, %v5210_v41  ;;  %10773 = vmatmul.msk.f32.gmra.mxu0 %vm796_vm3, %v7685_v3  ;;  %v6192_v62 = vld [vmem:[#allocation3 + $0xf0] sm:$0xff]  ;;  %v6319_v16 = vmax.f32 %v6191_v6, %v6255_v5  ;;  %v13498_v5 = vpop.f32.mrf.mxu0 }
 0x5f2   : > { %v6384_v18 = vmax.f32 %v6318_v34, %v6192_v62  ;;  %v5219_v24 = vadd.f32 %v13351_v50, %v15656_v63  ;;  %v13524_v63 = vpop.f32.mrf.mxu3 }
 0x5f3   : > { %6513 = vst.msk [vmem:[#allocation3 + $0xd8] sm:$0xff] %vm796_vm3, %v6449_v42  ;;  %10627 = vmatmul.msk.f32.gmra.mxu1 %vm821_vm2, %v5355_v58  ;;  %v5934_v35 = vadd.f32 %v12824_v27, %v5806_v23  ;;  %v7688_v58 = vld [vmem:[#allocation4 + $0x39] sm:$0xff] }
 0x5f5   : > { %v6002_v11 = vadd.f32 %v13420_v59, %v5934_v35  ;;  %v5358_v35 = vld [vmem:[#allocation2 + $0x1ba] sm:$0xff] }
 0x5f7   : > { %v6066_v7 = vmax.f32 %v6002_v11, 0.0 }
 0x5f8   : > { %v6256_v20 = vld [vmem:[#allocation3 + $0xf1] sm:$0xff]  ;;  %v5679_v44 = vpop.f32.mrf.mxu1 }
 0x5f9   : > { %v6450_v60 = vmax.f32 %v6384_v18, %v6256_v20  ;;  %v5807_v46 = vadd.f32 %v5679_v44, %v5213_v17  ;;  %6130 = vst.msk [vmem:[#allocation3 + $0x100] sm:$0xff] %vm796_vm3, %v6066_v7  ;;  %10774 = vmatmul.msk.f32.gmra.mxu0 %vm796_vm3, %v7686_v53  ;;  %v6193_v9 = vld [vmem:[#allocation3 + $0xf8] sm:$0xff]  ;;  %v6320_v49 = vmax.f32 %v6192_v62, %v6256_v20  ;;  %v15658_v7 = vld [vmem:[#allocation117_spill] sm:$0xff] }
 0x5fa   : > { %v6385_v33 = vmax.f32 %v6319_v16, %v6193_v9  ;;  %v15657_v62 = vld [vmem:[#allocation35_spill] sm:$0xff]  ;;  %v5222_v44 = vadd.f32 %v13369_v21, %v15658_v7 }
 0x5fb   : > { %6514 = vst.msk [vmem:[#allocation3 + $0xe0] sm:$0xff] %vm796_vm3, %v6450_v60  ;;  %v5935_v27 = vadd.f32 %v12840_v10, %v5807_v46  ;;  %10628 = vmatmul.msk.f32.gmra.mxu1 %vm821_vm2, %v5356_v56  ;;  %v7689_v56 = vld [vmem:[#allocation4 + $0x41] sm:$0xff] }
 0x5fc   : > { %v5359_v16 = vld [vmem:[#allocation2 + $0x1c2] sm:$0xff] }
 0x5fd   : > { %v6003_v8 = vadd.f32 %v13420_v59, %v5935_v27  ;;  %v13509_v27 = vpop.f32.mrf.mxu0 }
 0x5ff   : > { %v6067_v15 = vmax.f32 %v6003_v8, 0.0 }
 0x600   : > { %v5682_v57 = vpop.f32.mrf.mxu1  ;;  %v6257_v40 = vld [vmem:[#allocation3 + $0xf9] sm:$0xff] }
 0x601   : > { %6131 = vst.msk [vmem:[#allocation3 + $0x108] sm:$0xff] %vm796_vm3, %v6067_v15  ;;  %v5808_v22 = vadd.f32 %v5682_v57, %v5216_v43  ;;  %v6451_v10 = vmax.f32 %v6385_v33, %v6257_v40  ;;  %10775 = vmatmul.msk.f32.gmra.mxu0 %vm796_vm3, %v7687_v30  ;;  %v6194_v6 = vld [vmem:[#allocation3 + $0x100] sm:$0xff]  ;;  %v6321_v11 = vmax.f32 %v6193_v9, %v6257_v40  ;;  %v15660_v33 = vld [vmem:[#allocation126_spill] sm:$0xff] }
 0x602   : > { %v6386_v14 = vmax.f32 %v6320_v49, %v6194_v6  ;;  %v5225_v57 = vadd.f32 %v13381_v38, %v15660_v33  ;;  %v15661_v49 = vld [vmem:[#allocation37_spill] sm:$0xff] }
 0x603   : > { %v5936_v45 = vadd.f32 %v15655_v26, %v5808_v22  ;;  %10629 = vmatmul.msk.f32.gmra.mxu1 %vm821_vm2, %v5357_v29  ;;  %6515 = vst.msk [vmem:[#allocation3 + $0xe8] sm:$0xff] %vm796_vm3, %v6451_v10 }
 0x605   : > { %v6004_v31 = vadd.f32 %v13420_v59, %v5936_v45  ;;  %v5360_v45 = vld [vmem:[#allocation2 + $0x1ca] sm:$0xff] }
 0x607   : > { %v6068_v41 = vmax.f32 %v6004_v31, 0.0 }
 0x608   : > { %v6258_v19 = vld [vmem:[#allocation3 + $0x101] sm:$0xff]  ;;  %v5685_v42 = vpop.f32.mrf.mxu1 }
 0x609   : > { %v6452_v3 = vmax.f32 %v6386_v14, %v6258_v19  ;;  %6132 = vst.msk [vmem:[#allocation3 + $0x110] sm:$0xff] %vm796_vm3, %v6068_v41  ;;  %v5809_v23 = vadd.f32 %v5685_v42, %v5219_v24  ;;  %10776 = vmatmul.msk.f32.gmra.mxu0 %vm796_vm3, %v7688_v58  ;;  %v6195_v50 = vld [vmem:[#allocation3 + $0x108] sm:$0xff]  ;;  %v6322_v21 = vmax.f32 %v6194_v6, %v6258_v19  ;;  %v13522_v6 = vpop.f32.mrf.mxu2  ;;  %v13527_v14 = vpop.f32.mrf.mxu0  ;;  %v6616_v19 = vld [vmem:[#allocation4 + $0x48] sm:$0xff] }
 0x60a   : > { %v6387_v18 = vmax.f32 %v6321_v11, %v6195_v50  ;;  %v6596_v42 = vld [vmem:[#allocation4 + $0x47] sm:$0xff]  ;;  %10652 = vmatmul.msk.f32.gmra.mxu2 %vm796_vm3, %v6616_v19 }
 0x60b   : > { %6516 = vst.msk [vmem:[#allocation3 + $0xf0] sm:$0xff] %vm796_vm3, %v6452_v3  ;;  %v5937_v34 = vadd.f32 %v15657_v62, %v5809_v23  ;;  %10630 = vmatmul.msk.f32.gmra.mxu1 %vm821_vm2, %v5358_v35  ;;  %v7690_v3 = vld [vmem:[#allocation4 + $0x49] sm:$0xff]  ;;  %10668 = vmatmul.msk.f32.gmra.mxu3 %vm796_vm3, %v6596_v42 }
 0x60c   : > { %v15662_v23 = vld [vmem:[#allocation92_spill] sm:$0xff] }
 0x60d   : > { %v6005_v17 = vadd.f32 %v13420_v59, %v5937_v34  ;;  %v5228_v58 = vadd.f32 %v13392_v52, %v15662_v23 }
 0x60f   : > { %v6069_v20 = vmax.f32 %v6005_v17, 0.0 }
 0x610   : > { %v6259_v60 = vld [vmem:[#allocation3 + $0x109] sm:$0xff]  ;;  %v5688_v46 = vpop.f32.mrf.mxu1 }
 0x611   : > { %v6453_v53 = vmax.f32 %v6387_v18, %v6259_v60  ;;  %6133 = vst.msk [vmem:[#allocation3 + $0x118] sm:$0xff] %vm796_vm3, %v6069_v20  ;;  %v5810_v8 = vadd.f32 %v5688_v46, %v5222_v44  ;;  %10777 = vmatmul.msk.f32.gmra.mxu0 %vm796_vm3, %v7689_v56  ;;  %v6196_v9 = vld [vmem:[#allocation3 + $0x110] sm:$0xff]  ;;  %v6323_v41 = vmax.f32 %v6195_v50, %v6259_v60  ;;  %v5361_v18 = vld [vmem:[#allocation2 + $0x1d2] sm:$0xff]  ;;  %v13547_v33 = vpop.f32.mrf.mxu0 }
 0x612   : > { %v6388_v40 = vmax.f32 %v6322_v21, %v6196_v9  ;;  %v15663_v20 = vld [vmem:[#allocation38_spill] sm:$0xff]  ;;  %v6617_v46 = vld [vmem:[#allocation4 + $0x50] sm:$0xff] }
 0x613   : > { %6517 = vst.msk [vmem:[#allocation3 + $0xf8] sm:$0xff] %vm796_vm3, %v6453_v53  ;;  %10631 = vmatmul.msk.f32.gmra.mxu1 %vm821_vm2, %v5359_v16  ;;  %v5938_v43 = vadd.f32 %v15659_v39, %v5810_v8  ;;  %v6597_v53 = vld [vmem:[#allocation4 + $0x4f] sm:$0xff]  ;;  %v13539_v8 = vpop.f32.mrf.mxu2  ;;  %v13541_v16 = vpop.f32.mrf.mxu3  ;;  %v15664_v39 = vld [vmem:[#allocation93_spill] sm:$0xff]  ;;  %10653 = vmatmul.msk.f32.gmra.mxu2 %vm796_vm3, %v6617_v46 }
 0x614   : > { %v7691_v56 = vld [vmem:[#allocation4 + $0x51] sm:$0xff]  ;;  %10669 = vmatmul.msk.f32.gmra.mxu3 %vm796_vm3, %v6597_v53 }
 0x615   : > { %v6006_v15 = vadd.f32 %v13420_v59, %v5938_v43  ;;  %v5231_v43 = vadd.f32 %v13415_v48, %v15664_v39  ;;  %v15665_v48 = vld [vmem:[#allocation39_spill] sm:$0xff]  ;;  %v15672_v39 = vld [vmem:[#allocation42_spill] sm:$0xff] }
 0x617   : > { %v6070_v30 = vmax.f32 %v6006_v15, 0.0 }
 0x618   : > { %v6260_v22 = vld [vmem:[#allocation3 + $0x111] sm:$0xff]  ;;  %v5691_v10 = vpop.f32.mrf.mxu1 }
 0x619   : > { %v6454_v29 = vmax.f32 %v6388_v40, %v6260_v22  ;;  %v5811_v26 = vadd.f32 %v5691_v10, %v5225_v57  ;;  %6134 = vst.msk [vmem:[#allocation3 + $0x120] sm:$0xff] %vm796_vm3, %v6070_v30  ;;  %v6197_v38 = vld [vmem:[#allocation3 + $0x118] sm:$0xff]  ;;  %10778 = vmatmul.msk.f32.gmra.mxu0 %vm796_vm3, %v7690_v3  ;;  %v6324_v44 = vmax.f32 %v6196_v9, %v6260_v22  ;;  %v5362_v30 = vld [vmem:[#allocation2 + $0x1da] sm:$0xff] }
 0x61a   : > { %v6389_v62 = vmax.f32 %v6323_v41, %v6197_v38 }
 0x61b   : > { %6518 = vst.msk [vmem:[#allocation3 + $0x100] sm:$0xff] %vm796_vm3, %v6454_v29  ;;  %v5939_v31 = vadd.f32 %v15661_v49, %v5811_v26  ;;  %10632 = vmatmul.msk.f32.gmra.mxu1 %vm821_vm2, %v5360_v45 }
 0x61d   : > { %v6007_v24 = vadd.f32 %v13420_v59, %v5939_v31 }
 0x61f   : > { %v6071_v35 = vmax.f32 %v6007_v24, 0.0  ;;  %v15666_v24 = vld [vmem:[#allocation94_spill] sm:$0xff] }
 0x620   : > { %v5694_v34 = vpop.f32.mrf.mxu1  ;;  %v6261_v11 = vld [vmem:[#allocation3 + $0x119] sm:$0xff]  ;;  %v5234_v41 = vadd.f32 %v13430_v25, %v15666_v24 }
 0x621   : > { %6135 = vst.msk [vmem:[#allocation3 + $0x128] sm:$0xff] %vm796_vm3, %v6071_v35  ;;  %v5812_v17 = vadd.f32 %v5694_v34, %v5228_v58  ;;  %v6455_v50 = vmax.f32 %v6389_v62, %v6261_v11  ;;  %v6198_v52 = vld [vmem:[#allocation3 + $0x120] sm:$0xff]  ;;  %10779 = vmatmul.msk.f32.gmra.mxu0 %vm796_vm3, %v7691_v56  ;;  %v6325_v26 = vmax.f32 %v6197_v38, %v6261_v11  ;;  %v5363_v58 = vld [vmem:[#allocation2 + $0x1e2] sm:$0xff]  ;;  %v15667_v35 = vld [vmem:[#allocation45_spill] sm:$0xff] }
 0x622   : > { %v6390_v21 = vmax.f32 %v6324_v44, %v6198_v52  ;;  %v15668_v62 = vld [vmem:[#allocation27_spill] sm:$0xff]  ;;  %v15669_v11 = vld [vmem:[#allocation40_spill] sm:$0xff] }
 0x623   : > { %v5940_v7 = vadd.f32 %v15663_v20, %v5812_v17  ;;  %10633 = vmatmul.msk.f32.gmra.mxu1 %vm821_vm2, %v5361_v18  ;;  %6519 = vst.msk [vmem:[#allocation3 + $0x108] sm:$0xff] %vm796_vm3, %v6455_v50  ;;  %v3772_v34 = vadd.f32 %v15668_v62, %v15667_v35  ;;  %v15670_v50 = vld [vmem:[#allocation95_spill] sm:$0xff]  ;;  %v5365_v62 = vld [vmem:[#allocation2 + $0x1f2] sm:$0xff] }
 0x625   : > { %v6008_v60 = vadd.f32 %v13420_v59, %v5940_v7  ;;  %v4350_v18 = vadd.f32 %v15670_v50, %v3772_v34  ;;  %v15671_v7 = vld [vmem:[#allocation96_spill] sm:$0xff] }
 0x626   : > { %v5237_v44 = vadd.f32 %v13443_v2, %v15671_v7  ;;  %v15675_v2 = vld [vmem:[#allocation97_spill] sm:$0xff] }
 0x627   : > { %v6072_v15 = vmax.f32 %v6008_v60, 0.0 }
 0x628   : > { %v6262_v9 = vld [vmem:[#allocation3 + $0x121] sm:$0xff]  ;;  %v5697_v57 = vpop.f32.mrf.mxu1 }
 0x629   : > { %v6456_v40 = vmax.f32 %v6390_v21, %v6262_v9  ;;  %6136 = vst.msk [vmem:[#allocation3 + $0x130] sm:$0xff] %vm796_vm3, %v6072_v15  ;;  %v5813_v22 = vadd.f32 %v5697_v57, %v5231_v43  ;;  %v6199_v29 = vld [vmem:[#allocation3 + $0x128] sm:$0xff]  ;;  %v6326_v25 = vmax.f32 %v6198_v52, %v6262_v9  ;;  %v5879_v43 = vadd.f32 %v4350_v18, %v15672_v39  ;;  %v5364_v57 = vld [vmem:[#allocation2 + $0x1ea] sm:$0xff]  ;;  %v15681_v39 = vld [vmem:[#allocation46_spill] sm:$0xff] }
 0x62a   : > { %v6391_v49 = vmax.f32 %v6325_v26, %v6199_v29 }
 0x62b   : > { %6520 = vst.msk [vmem:[#allocation3 + $0x110] sm:$0xff] %vm796_vm3, %v6456_v40  ;;  %v5941_v10 = vadd.f32 %v15665_v48, %v5813_v22  ;;  %10634 = vmatmul.msk.f32.gmra.mxu1 %vm821_vm2, %v5362_v30  ;;  %v15673_v40 = vld [vmem:[#allocation47_spill] sm:$0xff]  ;;  %v15674_v22 = vld [vmem:[#allocation28_spill] sm:$0xff] }
 0x62c   : > { %v3775_v30 = vadd.f32 %v15674_v22, %v15673_v40 }
 0x62d   : > { %v6009_v45 = vadd.f32 %v13420_v59, %v5941_v10 }
 0x62e   : > { %v4351_v9 = vadd.f32 %v15675_v2, %v3775_v30  ;;  %v15683_v30 = vld [vmem:[#allocation87_spill] sm:$0xff]  ;;  %v13597_v2 = vpop.f32.mrf.mxu3 }
 0x62f   : > { %v6073_v31 = vmax.f32 %v6009_v45, 0.0  ;;  %v15676_v45 = vld [vmem:[#allocation98_spill] sm:$0xff] }
 0x630   : > { %v6263_v19 = vld [vmem:[#allocation3 + $0x129] sm:$0xff]  ;;  %v5700_v42 = vpop.f32.mrf.mxu1 }
 0x631   : > { %v6457_v3 = vmax.f32 %v6391_v49, %v6263_v19  ;;  %6137 = vst.msk [vmem:[#allocation3 + $0x138] sm:$0xff] %vm796_vm3, %v6073_v31  ;;  %v5814_v23 = vadd.f32 %v5700_v42, %v5234_v41  ;;  %v6200_v38 = vld [vmem:[#allocation3 + $0x130] sm:$0xff]  ;;  %v6327_v26 = vmax.f32 %v6199_v29, %v6263_v19  ;;  %v5240_v49 = vadd.f32 %v13455_v1, %v15676_v45  ;;  %v15677_v42 = vld [vmem:[#allocation44_spill] sm:$0xff] }
 0x632   : > { %v6392_v60 = vmax.f32 %v6326_v25, %v6200_v38 }
 0x633   : > { %6521 = vst.msk [vmem:[#allocation3 + $0x118] sm:$0xff] %vm796_vm3, %v6457_v3  ;;  %10635 = vmatmul.msk.f32.gmra.mxu1 %vm821_vm2, %v5363_v58  ;;  %v5942_v17 = vadd.f32 %v15669_v11, %v5814_v23  ;;  %v5880_v3 = vadd.f32 %v4351_v9, %v15677_v42  ;;  %v15678_v11 = vld [vmem:[#allocation49_spill] sm:$0xff]  ;;  %v13599_v9 = vpop.f32.mrf.mxu0 }
 0x635   : > { %v6010_v20 = vadd.f32 %v13420_v59, %v5942_v17  ;;  %v15679_v17 = vld [vmem:[#allocation85_spill] sm:$0xff] }
 0x636   : > { %v3778_v50 = vadd.f32 %v15679_v17, %v15678_v11  ;;  %v5367_v11 = vld [vmem:[#allocation2 + $0x202] sm:$0xff] }
 0x637   : > { %v6074_v53 = vmax.f32 %v6010_v20, 0.0  ;;  %v15680_v20 = vld [vmem:[#allocation99_spill] sm:$0xff]  ;;  %v15685_v17 = vld [vmem:[#allocation54_spill] sm:$0xff] }
 0x638   : > { %v6264_v46 = vld [vmem:[#allocation3 + $0x131] sm:$0xff]  ;;  %v5703_v56 = vpop.f32.mrf.mxu1  ;;  %v4352_v29 = vadd.f32 %v13227_v51, %v3778_v50  ;;  %v5243_v7 = vadd.f32 %v13474_v32, %v15680_v20 }
 0x639   : > { %v6458_v21 = vmax.f32 %v6392_v60, %v6264_v46  ;;  %v5815_v15 = vadd.f32 %v5703_v56, %v5237_v44  ;;  %6138 = vst.msk [vmem:[#allocation3 + $0x140] sm:$0xff] %vm796_vm3, %v6074_v53  ;;  %v6201_v48 = vld [vmem:[#allocation3 + $0x138] sm:$0xff]  ;;  %v6328_v19 = vmax.f32 %v6200_v38, %v6264_v46  ;;  %v13590_v38 = vpop.f32.mrf.mxu2  ;;  %v15682_v32 = vld [vmem:[#allocation58_spill] sm:$0xff] }
 0x63a   : > { %v6393_v24 = vmax.f32 %v6327_v26, %v6201_v48 }
 0x63b   : > { %6522 = vst.msk [vmem:[#allocation3 + $0x120] sm:$0xff] %vm796_vm3, %v6458_v21  ;;  %v5943_v52 = vadd.f32 %v5879_v43, %v5815_v15  ;;  %10636 = vmatmul.msk.f32.gmra.mxu1 %vm821_vm2, %v5364_v57  ;;  %v5881_v43 = vadd.f32 %v4352_v29, %v15681_v39  ;;  %v5366_v57 = vld [vmem:[#allocation2 + $0x1fa] sm:$0xff]  ;;  %v5249_v29 = vadd.f32 %v13498_v5, %v13319_v28 }
 0x63d   : > { %v6011_v10 = vadd.f32 %v13420_v59, %v5943_v52  ;;  %v3781_v52 = vadd.f32 %v15683_v30, %v15682_v32  ;;  %v5369_v30 = vld [vmem:[#allocation2 + $0x212] sm:$0xff] }
 0x63f   : > { %v6075_v31 = vmax.f32 %v6011_v10, 0.0 }
 0x640   : > { %v5706_v41 = vpop.f32.mrf.mxu1  ;;  %v6265_v23 = vld [vmem:[#allocation3 + $0x139] sm:$0xff] }
 0x641   : > { %6139 = vst.msk [vmem:[#allocation3 + $0x148] sm:$0xff] %vm796_vm3, %v6075_v31  ;;  %v5816_v58 = vadd.f32 %v5706_v41, %v5240_v49  ;;  %v6459_v35 = vmax.f32 %v6393_v24, %v6265_v23  ;;  %v6202_v1 = vld [vmem:[#allocation3 + $0x140] sm:$0xff]  ;;  %v6329_v26 = vmax.f32 %v6201_v48, %v6265_v23  ;;  %v4353_v49 = vadd.f32 %v13272_v12, %v3781_v52  ;;  %v15686_v48 = vld [vmem:[#allocation89_spill] sm:$0xff] }
 0x642   : > { %v6571_v34 = vld [vmem:[#allocation3 + $0x119] ss:$2 sm:$0x3f]  ;;  %v6394_v44 = vmax.f32 %v6328_v19, %v6202_v1  ;;  %v5246_v41 = vadd.f32 %v13486_v61, %v13274_v13  ;;  %v3784_v23 = vadd.f32 %v15686_v48, %v15685_v17 }
 0x643   : > { %v5944_v18 = vadd.f32 %v5880_v3, %v5816_v58  ;;  %10637 = vmatmul.msk.f32.gmra.mxu1 %vm821_vm2, %v5365_v62  ;;  %6572 = vst.msk [vmem:[#allocation4 + $0x59] sm:$0x3f] %vm6553_vm4, %v6571_v34  ;;  %v15690_v52 = vld [vmem:[#allocation52_spill] sm:$0xff] }
 0x644   : > { %6523 = vst.msk [vmem:[#allocation3 + $0x128] sm:$0xff] %vm796_vm3, %v6459_v35  ;;  %v15684_v35 = vld [vmem:[#allocation48_spill] sm:$0xff]  ;;  %v4354_v13 = vadd.f32 %v13317_v55, %v3784_v23 }
 0x645   : > { %v6012_v25 = vadd.f32 %v13420_v59, %v5944_v18  ;;  %v5882_v62 = vadd.f32 %v4353_v49, %v15684_v35 }
 0x647   : > { %v6076_v60 = vmax.f32 %v6012_v25, 0.0 }
 0x648   : > { %v6266_v53 = vld [vmem:[#allocation3 + $0x141] sm:$0xff]  ;;  %v5709_v56 = vpop.f32.mrf.mxu1 }
 0x649   : > { %v6460_v21 = vmax.f32 %v6394_v44, %v6266_v53  ;;  %6140 = vst.msk [vmem:[#allocation3 + $0x150] sm:$0xff] %vm796_vm3, %v6076_v60  ;;  %v5817_v15 = vadd.f32 %v5709_v56, %v5243_v7  ;;  %v6203_v10 = vld [vmem:[#allocation3 + $0x148] sm:$0xff]  ;;  %v6330_v61 = vmax.f32 %v6202_v1, %v6266_v53  ;;  %v5368_v44 = vld [vmem:[#allocation2 + $0x20a] sm:$0xff]  ;;  %v15687_v60 = vld [vmem:[#allocation50_spill] sm:$0xff] }
 0x64a   : > { %v6618_v40 = vld [vmem:[#allocation4 + $0x58] sm:$0xff]  ;;  %v6395_v31 = vmax.f32 %v6329_v26, %v6203_v10  ;;  %v5883_v56 = vadd.f32 %v4354_v13, %v15687_v60  ;;  %v15693_v13 = vld [vmem:[#allocation55_spill] sm:$0xff]  ;;  %v13658_v60 = vpop.f32.mrf.mxu3 }
 0x64b   : > { %v6598_v22 = vld [vmem:[#allocation4 + $0x57] sm:$0xff]  ;;  %6524 = vst.msk [vmem:[#allocation3 + $0x130] sm:$0xff] %vm796_vm3, %v6460_v21  ;;  %v5945_v46 = vadd.f32 %v5881_v43, %v5817_v15  ;;  %10638 = vmatmul.msk.f32.gmra.mxu1 %vm821_vm2, %v5366_v57  ;;  %10654 = vmatmul.msk.f32.gmra.mxu2 %vm796_vm3, %v6618_v40  ;;  %v5252_v40 = vadd.f32 %v13509_v27, %v13364_v37 }
 0x64c   : > { %v7692_v51 = vld [vmem:[#allocation4 + $0x59] sm:$0xff]  ;;  %10670 = vmatmul.msk.f32.gmra.mxu3 %vm796_vm3, %v6598_v22  ;;  %v15689_v15 = vld [vmem:[#allocation32_spill] sm:$0xff] }
 0x64d   : > { %10780 = vmatmul.msk.f32.gmra.mxu0 %vm796_vm3, %v7692_v51  ;;  %v6013_v45 = vadd.f32 %v13420_v59, %v5945_v46  ;;  %v15688_v21 = vld [vmem:[#allocation105_spill] sm:$0xff]  ;;  %v13627_v51 = vpop.f32.mrf.mxu0 }
 0x64e   : > { %v3787_v55 = vadd.f32 %v15689_v15, %v15688_v21  ;;  %v6873_v27 = vld [vmem:[%s12810_s24 + $0x58] sm:$0xff]  ;;  %v5258_v15 = vadd.f32 %v13547_v33, %v13464_v54 }
 0x64f   : > { %v6077_v24 = vmax.f32 %v6013_v45, 0.0  ;;  %6934 = vmatpush.msra.mxu2 %v6873_v27 }
 0x650   : > { %v6267_v42 = vld [vmem:[#allocation3 + $0x149] sm:$0xff]  ;;  %v5712_v3 = vpop.f32.mrf.mxu1  ;;  %v4355_v28 = vadd.f32 %v13362_v0, %v3787_v55 }
 0x651   : > { %v6461_v58 = vmax.f32 %v6395_v31, %v6267_v42  ;;  %6141 = vst.msk [vmem:[#allocation3 + $0x158] sm:$0xff] %vm796_vm3, %v6077_v24  ;;  %v5818_v34 = vadd.f32 %v5712_v3, %v5246_v41  ;;  %v6204_v12 = vld [vmem:[#allocation3 + $0x150] sm:$0xff]  ;;  %v6331_v57 = vmax.f32 %v6203_v10, %v6267_v42  ;;  %v15691_v10 = vld [vmem:[#allocation59_spill] sm:$0xff]  ;;  %v7042_v42 = vld [vmem:[%s12810_s24 + $0x98] sm:$0xff] }
 0x652   : > { %v6396_v19 = vmax.f32 %v6330_v61, %v6204_v12  ;;  %v5884_v26 = vadd.f32 %v4355_v28, %v15690_v52  ;;  %v15692_v24 = vld [vmem:[#allocation34_spill] sm:$0xff]  ;;  %7103 = vmatpush.msrb.mxu3 %v7042_v42  ;;  %v15698_v52 = vld [vmem:[#allocation107_spill] sm:$0xff] }
 0x653   : > { %6525 = vst.msk [vmem:[#allocation3 + $0x138] sm:$0xff] %vm796_vm3, %v6461_v58  ;;  %10639 = vmatmul.msk.f32.gmra.mxu1 %vm821_vm2, %v5367_v11  ;;  %v5946_v50 = vadd.f32 %v5882_v62, %v5818_v34  ;;  %v3790_v41 = vadd.f32 %v15692_v24, %v15691_v10  ;;  %v5255_v34 = vadd.f32 %v13527_v14, %v13413_v36  ;;  %v15695_v36 = vld [vmem:[#allocation106_spill] sm:$0xff] }
 0x655   : > { %v6014_v18 = vadd.f32 %v13420_v59, %v5946_v50  ;;  %v4356_v58 = vadd.f32 %v13407_v47, %v3790_v41  ;;  %v5370_v50 = vld [vmem:[#allocation2 + $0x21a] sm:$0xff] }
 0x657   : > { %v6078_v20 = vmax.f32 %v6014_v18, 0.0  ;;  %v5885_v61 = vadd.f32 %v4356_v58, %v15693_v13  ;;  %v13682_v58 = vpop.f32.mrf.mxu3 }
 0x658   : > { %v6268_v25 = vld [vmem:[#allocation3 + $0x151] sm:$0xff]  ;;  %v5715_v7 = vpop.f32.mrf.mxu1 }
 0x659   : > { %v6462_v39 = vmax.f32 %v6396_v19, %v6268_v25  ;;  %v5819_v43 = vadd.f32 %v5715_v7, %v5249_v29  ;;  %6142 = vst.msk [vmem:[#allocation3 + $0x160] sm:$0xff] %vm796_vm3, %v6078_v20  ;;  %v6205_v5 = vld [vmem:[#allocation3 + $0x158] sm:$0xff]  ;;  %v6332_v35 = vmax.f32 %v6204_v12, %v6268_v25  ;;  %v13644_v19 = vpop.f32.mrf.mxu0  ;;  %v15694_v20 = vld [vmem:[#allocation61_spill] sm:$0xff]  ;;  %v13652_v7 = vpop.f32.mrf.mxu2 }
 0x65a   : > { %v6397_v46 = vmax.f32 %v6331_v57, %v6205_v5  ;;  %v3793_v14 = vadd.f32 %v15695_v36, %v15694_v20  ;;  %v5371_v57 = vld [vmem:[#allocation2 + $0x222] sm:$0xff] }
 0x65b   : > { %6526 = vst.msk [vmem:[#allocation3 + $0x140] sm:$0xff] %vm796_vm3, %v6462_v39  ;;  %v5947_v1 = vadd.f32 %v5883_v56, %v5819_v43  ;;  %10640 = vmatmul.msk.f32.gmra.mxu1 %vm821_vm2, %v5368_v44 }
 0x65c   : > { %v4357_v39 = vadd.f32 %v13458_v4, %v3793_v14 }
 0x65d   : > { %v6015_v53 = vadd.f32 %v13420_v59, %v5947_v1 }
 0x65f   : > { %v6079_v22 = vmax.f32 %v6015_v53, 0.0 }
 0x660   : > { %v5718_v32 = vpop.f32.mrf.mxu1  ;;  %v6269_v45 = vld [vmem:[#allocation3 + $0x159] sm:$0xff] }
 0x661   : > { %6143 = vst.msk [vmem:[#allocation3 + $0x168] sm:$0xff] %vm796_vm3, %v6079_v22  ;;  %v5820_v0 = vadd.f32 %v5718_v32, %v5252_v40  ;;  %v6463_v49 = vmax.f32 %v6397_v46, %v6269_v45  ;;  %v6206_v3 = vld [vmem:[#allocation3 + $0x160] sm:$0xff]  ;;  %v6333_v43 = vmax.f32 %v6205_v5, %v6269_v45  ;;  %v15696_v40 = vld [vmem:[#allocation57_spill] sm:$0xff]  ;;  %v13673_v54 = vpop.f32.mrf.mxu0  ;;  %v13680_v42 = vpop.f32.mrf.mxu2 }
 0x662   : > { %v6574_v31 = vld [vmem:[#allocation3 + $0x139] ss:$2 sm:$0x3f]  ;;  %v6398_v11 = vmax.f32 %v6332_v35, %v6206_v3  ;;  %v5886_v22 = vadd.f32 %v4357_v39, %v15696_v40  ;;  %v13706_v39 = vpop.f32.mrf.mxu3  ;;  %v5267_v40 = vadd.f32 %v13644_v19, %v13597_v2 }
 0x663   : > { %v5948_v37 = vadd.f32 %v5884_v26, %v5820_v0  ;;  %10641 = vmatmul.msk.f32.gmra.mxu1 %vm821_vm2, %v5369_v30  ;;  %6575 = vst.msk [vmem:[#allocation4 + $0x61] sm:$0x3f] %vm6553_vm4, %v6574_v31  ;;  %v15697_v30 = vld [vmem:[#allocation17_spill] sm:$0xff] }
 0x664   : > { %6527 = vst.msk [vmem:[#allocation3 + $0x148] sm:$0xff] %vm796_vm3, %v6463_v49  ;;  %v3796_v4 = vadd.f32 %v15698_v52, %v15697_v30  ;;  %v5261_v49 = vadd.f32 %v13599_v9, %v13524_v63 }
 0x665   : > { %v6016_v62 = vadd.f32 %v13420_v59, %v5948_v37  ;;  %v15699_v37 = vld [vmem:[#allocation60_spill] sm:$0xff] }
 0x666   : > { %v4358_v26 = vadd.f32 %v13522_v6, %v3796_v4  ;;  %v15705_v4 = vld [vmem:[#allocation64_spill] sm:$0xff] }
 0x667   : > { %v6080_v17 = vmax.f32 %v6016_v62, 0.0  ;;  %v15701_v62 = vld [vmem:[#allocation108_spill] sm:$0xff] }
 0x668   : > { %v6270_v48 = vld [vmem:[#allocation3 + $0x161] sm:$0xff]  ;;  %v5721_v23 = vpop.f32.mrf.mxu1  ;;  %v5887_v27 = vadd.f32 %v4358_v26, %v15699_v37 }
 0x669   : > { %v6464_v18 = vmax.f32 %v6398_v11, %v6270_v48  ;;  %6144 = vst.msk [vmem:[#allocation3 + $0x170] sm:$0xff] %vm796_vm3, %v6080_v17  ;;  %v5821_v29 = vadd.f32 %v5721_v23, %v5255_v34  ;;  %v6207_v56 = vld [vmem:[#allocation3 + $0x168] sm:$0xff]  ;;  %v6334_v45 = vmax.f32 %v6206_v3, %v6270_v48  ;;  %v15700_v3 = vld [vmem:[#allocation18_spill] sm:$0xff]  ;;  %v13690_v23 = vpop.f32.mrf.mxu0 }
 0x66a   : > { %v13646_v47 = vld [vmem:[#allocation4 + $0x60] sm:$0xff]  ;;  %v6399_v55 = vmax.f32 %v6333_v43, %v6207_v56  ;;  %v3799_v34 = vadd.f32 %v15701_v62, %v15700_v3  ;;  %v13735_v37 = vpop.f32.mrf.mxu3 }
 0x66b   : > { %v6599_v12 = vld [vmem:[#allocation4 + $0x5f] sm:$0xff]  ;;  %6528 = vst.msk [vmem:[#allocation3 + $0x150] sm:$0xff] %vm796_vm3, %v6464_v18  ;;  %v5949_v44 = vadd.f32 %v5885_v61, %v5821_v29  ;;  %10642 = vmatmul.msk.f32.gmra.mxu1 %vm821_vm2, %v5370_v50  ;;  %10655 = vmatmul.msk.f32.gmra.mxu2 %vm796_vm3, %v13646_v47  ;;  %v5264_v50 = vadd.f32 %v13627_v51, %v13541_v16 }
 0x66c   : > { %v13648_v25 = vld [vmem:[#allocation4 + $0x61] sm:$0xff]  ;;  %10671 = vmatmul.msk.f32.gmra.mxu3 %vm796_vm3, %v6599_v12  ;;  %v4359_v11 = vadd.f32 %v13539_v8, %v3799_v34  ;;  %v15704_v16 = vld [vmem:[#allocation109_spill] sm:$0xff] }
 0x66d   : > { %10781 = vmatmul.msk.f32.gmra.mxu0 %vm796_vm3, %v13648_v25  ;;  %v6017_v21 = vadd.f32 %v13420_v59, %v5949_v44  ;;  %v15702_v12 = vld [vmem:[#allocation62_spill] sm:$0xff]  ;;  %v15703_v44 = vld [vmem:[#allocation19_spill] sm:$0xff] }
 0x66e   : > { %v5888_v20 = vadd.f32 %v4359_v11, %v15702_v12  ;;  %v3802_v51 = vadd.f32 %v15704_v16, %v15703_v44  ;;  %v15708_v11 = vld [vmem:[#allocation66_spill] sm:$0xff] }
 0x66f   : > { %v6081_v1 = vmax.f32 %v6017_v21, 0.0  ;;  %v7964_v21 = vld [vmem:[%s13700_s20 + $0x78] sm:$0xff] }
 0x670   : > { %v6271_v28 = vld [vmem:[#allocation3 + $0x169] sm:$0xff]  ;;  %v5724_v53 = vpop.f32.mrf.mxu1  ;;  %8021 = vmatpush.msrb.mxu1 %v7964_v21 }
 0x671   : > { %v6465_v46 = vmax.f32 %v6399_v55, %v6271_v28  ;;  %6145 = vst.msk [vmem:[#allocation3 + $0x178] sm:$0xff] %vm796_vm3, %v6081_v1  ;;  %v5822_v32 = vadd.f32 %v5724_v53, %v5258_v15  ;;  %v6208_v33 = vld [vmem:[#allocation3 + $0x170] sm:$0xff]  ;;  %v6335_v17 = vmax.f32 %v6207_v56, %v6271_v28  ;;  %v13704_v56 = vpop.f32.mrf.mxu2  ;;  %v6872_v15 = vld [vmem:[%s12810_s24 + $0x50] sm:$0xff]  ;;  %v4360_v28 = vadd.f32 %v13590_v38, %v3802_v51 }
 0x672   : > { %v6400_v31 = vmax.f32 %v6334_v45, %v6208_v33  ;;  %v7041_v55 = vld [vmem:[%s12810_s24 + $0x90] sm:$0xff]  ;;  %6935 = vmatpush.msra.mxu2 %v6872_v15  ;;  %v15707_v38 = vld [vmem:[#allocation110_spill] sm:$0xff] }
 0x673   : > { %6529 = vst.msk [vmem:[#allocation3 + $0x158] sm:$0xff] %vm796_vm3, %v6465_v46  ;;  %v5950_v5 = vadd.f32 %v5886_v22, %v5822_v32  ;;  %10643 = vmatmul.msk.f32.gmra.mxu1 %vm821_vm2, %v5371_v57  ;;  %7104 = vmatpush.msrb.mxu3 %v7041_v55  ;;  %v5275_v32 = vpop.f32.mrf.mxu0  ;;  %v15712_v55 = vld [vmem:[#allocation71_spill] sm:$0xff] }
 0x675   : > { %v6018_v0 = vadd.f32 %v13420_v59, %v5950_v5  ;;  %v5889_v5 = vadd.f32 %v4360_v28, %v15705_v4 }
 0x677   : > { %v6082_v10 = vmax.f32 %v6018_v0, 0.0  ;;  %v15706_v0 = vld [vmem:[#allocation20_spill] sm:$0xff] }
 0x678   : > { %v6272_v24 = vld [vmem:[#allocation3 + $0x171] sm:$0xff]  ;;  %v5727_v41 = vpop.f32.mrf.mxu1 }
 0x679   : > { %v6466_v35 = vmax.f32 %v6400_v31, %v6272_v24  ;;  %6146 = vst.msk [vmem:[#allocation3 + $0x180] sm:$0xff] %vm796_vm3, %v6082_v10  ;;  %v5823_v6 = vadd.f32 %v5727_v41, %v5261_v49  ;;  %v6209_v9 = vld [vmem:[#allocation3 + $0x178] sm:$0xff]  ;;  %v6336_v53 = vmax.f32 %v6208_v33, %v6272_v24  ;;  %v3805_v33 = vadd.f32 %v15707_v38, %v15706_v0  ;;  %v13733_v41 = vpop.f32.mrf.mxu2 }
 0x67a   : > { %v6401_v13 = vmax.f32 %v6335_v17, %v6209_v9 }
 0x67b   : > { %6530 = vst.msk [vmem:[#allocation3 + $0x160] sm:$0xff] %vm796_vm3, %v6466_v35  ;;  %v5951_v63 = vadd.f32 %v5887_v27, %v5823_v6  ;;  %v4361_v24 = vadd.f32 %v13652_v7, %v3805_v33  ;;  %v5270_v6 = vadd.f32 %v13673_v54, %v13658_v60 }
 0x67d   : > { %v6019_v48 = vadd.f32 %v13420_v59, %v5951_v63  ;;  %v5890_v17 = vadd.f32 %v4361_v24, %v15708_v11  ;;  %v15716_v24 = vld [vmem:[#allocation115_spill] sm:$0xff] }
 0x67f   : > { %v6083_v61 = vmax.f32 %v6019_v48, 0.0 }
 0x680   : > { %v6273_v18 = vld [vmem:[#allocation3 + $0x179] sm:$0xff]  ;;  %v5730_v29 = vpop.f32.mrf.mxu1 }
 0x681   : > { %v6467_v36 = vmax.f32 %v6401_v13, %v6273_v18  ;;  %6147 = vst.msk [vmem:[#allocation3 + $0x188] sm:$0xff] %vm796_vm3, %v6083_v61  ;;  %v5824_v8 = vadd.f32 %v5730_v29, %v5264_v50  ;;  %v6210_v1 = vld [vmem:[#allocation3 + $0x180] sm:$0xff]  ;;  %v6337_v27 = vmax.f32 %v6209_v9, %v6273_v18  ;;  %v5278_v50 = vpop.f32.mrf.mxu0  ;;  %v15709_v9 = vld [vmem:[#allocation21_spill] sm:$0xff]  ;;  %v15710_v13 = vld [vmem:[#allocation111_spill] sm:$0xff] }
 0x682   : > { %v6577_v14 = vld [vmem:[#allocation3 + $0x159] ss:$2 sm:$0x3f]  ;;  %v6402_v22 = vmax.f32 %v6336_v53, %v6210_v1  ;;  %v3808_v61 = vadd.f32 %v15710_v13, %v15709_v9  ;;  %v5279_v11 = vadd.f32 %v5278_v50, %v13735_v37 }
 0x683   : > { %6531 = vst.msk [vmem:[#allocation3 + $0x168] sm:$0xff] %vm796_vm3, %v6467_v36  ;;  %v5952_v43 = vadd.f32 %v5888_v20, %v5824_v8  ;;  %v13749_v20 = vpop.f32.mrf.mxu2  ;;  %v13751_v36 = vpop.f32.mrf.mxu3  ;;  %v5273_v8 = vadd.f32 %v13690_v23, %v13682_v58  ;;  %v15717_v13 = vld [vmem:[#allocation72_spill] sm:$0xff] }
 0x684   : > { %6578 = vst.msk [vmem:[#allocation4 + $0x69] sm:$0x3f] %vm6553_vm4, %v6577_v14  ;;  %v4362_v60 = vadd.f32 %v13680_v42, %v3808_v61 }
 0x685   : > { %v6020_v57 = vadd.f32 %v13420_v59, %v5952_v43  ;;  %v15711_v43 = vld [vmem:[#allocation68_spill] sm:$0xff] }
 0x686   : > { %v5891_v21 = vadd.f32 %v4362_v60, %v15711_v43 }
 0x687   : > { %v6084_v46 = vmax.f32 %v6020_v57, 0.0 }
 0x688   : > { %v6274_v30 = vld [vmem:[#allocation3 + $0x181] sm:$0xff]  ;;  %v5733_v52 = vpop.f32.mrf.mxu1 }
 0x689   : > { %v6468_v26 = vmax.f32 %v6402_v22, %v6274_v30  ;;  %6148 = vst.msk [vmem:[#allocation3 + $0x190] sm:$0xff] %vm796_vm3, %v6084_v46  ;;  %v5825_v45 = vadd.f32 %v5733_v52, %v5267_v40  ;;  %v6211_v10 = vld [vmem:[#allocation3 + $0x188] sm:$0xff]  ;;  %v6338_v54 = vmax.f32 %v6210_v1, %v6274_v30  ;;  %v5281_v53 = vpop.f32.mrf.mxu0  ;;  %v13762_v40 = vld [vmem:[%s12894_s30] ss:$0 sm:$0xff]  ;;  %v5276_v46 = vadd.f32 %v5275_v32, %v13706_v39  ;;  %v6871_v32 = vld [vmem:[%s12810_s24 + $0x48] sm:$0xff]  ;;  %s770_s30 = scalar_lea.vmem %s15344_s8, %s11104_s29 }
 0x68a   : > { %v6403_v3 = vmax.f32 %v6337_v27, %v6211_v10  ;;  %6936 = vmatpush.msra.mxu2 %v6871_v32 }
 0x68b   : > { %6532 = vst.msk [vmem:[#allocation3 + $0x170] sm:$0xff] %vm796_vm3, %v6468_v26  ;;  %v5953_v49 = vadd.f32 %v5889_v5, %v5825_v45  ;;  %v13722_v31 = vld [vmem:[#allocation4 + $0x68] sm:$0xff]  ;;  %v15714_v26 = vld [vmem:[#allocation70_spill] sm:$0xff]  ;;  %v4286_v0 = vpop.f32.mrf.mxu2  ;;  %v4883_v38 = vpop.f32.mrf.mxu3 }
 0x68c   : > { %v13724_v2 = vld [vmem:[#allocation4 + $0x67] sm:$0xff]  ;;  %10656 = vmatmul.msk.f32.gmra.mxu2 %vm796_vm3, %v13722_v31 }
 0x68d   : > { %v13726_v19 = vld [vmem:[#allocation4 + $0x69] sm:$0xff]  ;;  %10672 = vmatmul.msk.f32.gmra.mxu3 %vm796_vm3, %v13724_v2  ;;  %v6021_v35 = vadd.f32 %v13420_v59, %v5953_v49 }
 0x68e   : > { %10782 = vmatmul.msk.f32.gmra.mxu0 %vm796_vm3, %v13726_v19 }
 0x68f   : > { %v6085_v62 = vmax.f32 %v6021_v35, 0.0  ;;  %v7040_v35 = vld [vmem:[%s12810_s24 + $0x88] sm:$0xff] }
 0x690   : > { %v6275_v34 = vld [vmem:[#allocation3 + $0x189] sm:$0xff]  ;;  %v5736_v63 = vpop.f32.mrf.mxu1  ;;  %7105 = vmatpush.msrb.mxu3 %v7040_v35 }
 0x691   : > { %v6469_v7 = vmax.f32 %v6403_v3, %v6275_v34  ;;  %6149 = vst.msk [vmem:[#allocation3 + $0x198] sm:$0xff] %vm796_vm3, %v6085_v62  ;;  %v5826_v48 = vadd.f32 %v5736_v63, %v5270_v6  ;;  %v6212_v29 = vld [vmem:[#allocation3 + $0x190] sm:$0xff]  ;;  %v6339_v23 = vmax.f32 %v6211_v10, %v6275_v34  ;;  %v15715_v10 = vld [vmem:[#allocation73_spill] sm:$0xff]  ;;  %v5284_v63 = vpop.f32.mrf.mxu0 }
 0x692   : > { %v6404_v14 = vmax.f32 %v6338_v54, %v6212_v29  ;;  %v3814_v27 = vadd.f32 %v15716_v24, %v15715_v10  ;;  %v15718_v54 = vld [vmem:[#allocation75_spill] sm:$0xff] }
 0x693   : > { %6533 = vst.msk [vmem:[#allocation3 + $0x178] sm:$0xff] %vm796_vm3, %v6469_v7  ;;  %v5954_v18 = vadd.f32 %v5890_v17, %v5826_v48 }
 0x694   : > { %v4364_v3 = vadd.f32 %v13733_v41, %v3814_v27  ;;  %v4289_v41 = vpop.f32.mrf.mxu2  ;;  %v15723_v27 = vld [vmem:[#allocation76_spill] sm:$0xff] }
 0x695   : > { %v6022_v12 = vadd.f32 %v13420_v59, %v5954_v18  ;;  %v15713_v59 = vld [vmem:[#allocation113_spill] sm:$0xff] }
 0x696   : > { %v3811_v1 = vadd.f32 %v15713_v59, %v15712_v55  ;;  %v5893_v61 = vadd.f32 %v4364_v3, %v15717_v13 }
 0x697   : > { %v6086_v44 = vmax.f32 %v6022_v12, 0.0  ;;  %v15719_v12 = vld [vmem:[#allocation116_spill] sm:$0xff] }
 0x698   : > { %v6276_v16 = vld [vmem:[#allocation3 + $0x191] sm:$0xff]  ;;  %v5739_v51 = vpop.f32.mrf.mxu1  ;;  %v4363_v58 = vadd.f32 %v13704_v56, %v3811_v1 }
 0x699   : > { %v6470_v15 = vmax.f32 %v6404_v14, %v6276_v16  ;;  %6150 = vst.msk [vmem:[#allocation3 + $0x1a0] sm:$0xff] %vm796_vm3, %v6086_v44  ;;  %v5827_v42 = vadd.f32 %v5739_v51, %v5273_v8  ;;  %v6213_v57 = vld [vmem:[#allocation3 + $0x198] sm:$0xff]  ;;  %v6340_v62 = vmax.f32 %v6212_v29, %v6276_v16  ;;  %v3817_v8 = vadd.f32 %v15719_v12, %v15718_v54  ;;  %v4886_v29 = vpop.f32.mrf.mxu3  ;;  %v5287_v59 = vpop.f32.mrf.mxu0  ;;  %v15726_v54 = vld [vmem:[#allocation78_spill] sm:$0xff] }
 0x69a   : > { %v6405_v30 = vmax.f32 %v6339_v23, %v6213_v57  ;;  %v5892_v45 = vadd.f32 %v4363_v58, %v15714_v26  ;;  %v15720_v58 = vld [vmem:[#allocation74_spill] sm:$0xff] }
 0x69b   : > { %6534 = vst.msk [vmem:[#allocation3 + $0x180] sm:$0xff] %vm796_vm3, %v6470_v15  ;;  %v5955_v28 = vadd.f32 %v5891_v21, %v5827_v42  ;;  %v4365_v51 = vadd.f32 %v13749_v20, %v3817_v8  ;;  %v5282_v15 = vadd.f32 %v5281_v53, %v13751_v36  ;;  %v15721_v20 = vld [vmem:[#allocation77_spill] sm:$0xff] }
 0x69c   : > { %v4292_v36 = vpop.f32.mrf.mxu2 }
 0x69d   : > { %v6023_v22 = vadd.f32 %v13762_v40, %v5955_v28  ;;  %v5894_v23 = vadd.f32 %v4365_v51, %v15720_v58  ;;  %v15728_v51 = vld [vmem:[#allocation120_spill] sm:$0xff] }
 0x69f   : > { %v6087_v52 = vmax.f32 %v6023_v22, 0.0 }
 0x6a0   : > { %v6277_v4 = vld [vmem:[#allocation3 + $0x199] sm:$0xff]  ;;  %v5742_v5 = vpop.f32.mrf.mxu1 }
 0x6a1   : > { %v6471_v33 = vmax.f32 %v6405_v30, %v6277_v4  ;;  %6151 = vst.msk [vmem:[#allocation3 + $0x1a8] sm:$0xff] %vm796_vm3, %v6087_v52  ;;  %v5828_v56 = vadd.f32 %v5742_v5, %v5276_v46  ;;  %v6214_v6 = vld [vmem:[#allocation3 + $0x1a0] sm:$0xff]  ;;  %v6341_v43 = vmax.f32 %v6213_v57, %v6277_v4  ;;  %v15722_v57 = vld [vmem:[#allocation118_spill] sm:$0xff]  ;;  %v4889_v53 = vpop.f32.mrf.mxu3  ;;  %v5290_v3 = vpop.f32.mrf.mxu0 }
 0x6a2   : > { %v6580_v49 = vld [vmem:[#allocation3 + $0x179] ss:$2 sm:$0x3f]  ;;  %v6406_v17 = vmax.f32 %v6340_v62, %v6214_v6  ;;  %v3820_v30 = vadd.f32 %v15722_v57, %v15721_v20 }
 0x6a3   : > { %6535 = vst.msk [vmem:[#allocation3 + $0x188] sm:$0xff] %vm796_vm3, %v6471_v33  ;;  %v5956_v39 = vadd.f32 %v5892_v45, %v5828_v56  ;;  %v5285_v33 = vadd.f32 %v5284_v63, %v4883_v38  ;;  %v15724_v62 = vld [vmem:[#allocation79_spill] sm:$0xff] }
 0x6a4   : > { %6581 = vst.msk [vmem:[#allocation4 + $0x71] sm:$0x3f] %vm6553_vm4, %v6580_v49  ;;  %v4366_v5 = vadd.f32 %v4286_v0, %v3820_v30 }
 0x6a5   : > { %v6024_v34 = vadd.f32 %v13762_v40, %v5956_v39 }
 0x6a6   : > { %v5895_v39 = vadd.f32 %v4366_v5, %v15723_v27 }
 0x6a7   : > { %v6088_v7 = vmax.f32 %v6024_v34, 0.0  ;;  %v15725_v34 = vld [vmem:[#allocation119_spill] sm:$0xff] }
 0x6a8   : > { %v6278_v48 = vld [vmem:[#allocation3 + $0x1a1] sm:$0xff]  ;;  %v5745_v9 = vpop.f32.mrf.mxu1  ;;  %v3823_v0 = vadd.f32 %v15725_v34, %v15724_v62 }
 0x6a9   : > { %v6472_v18 = vmax.f32 %v6406_v17, %v6278_v48  ;;  %6152 = vst.msk [vmem:[#allocation3 + $0x1b0] sm:$0xff] %vm796_vm3, %v6088_v7  ;;  %v5829_v60 = vadd.f32 %v5745_v9, %v5279_v11  ;;  %v6215_v16 = vld [vmem:[#allocation3 + $0x1a8] sm:$0xff]  ;;  %v6342_v26 = vmax.f32 %v6214_v6, %v6278_v48  ;;  %v4295_v7 = vpop.f32.mrf.mxu2  ;;  %v4892_v48 = vpop.f32.mrf.mxu3  ;;  %v5288_v9 = vadd.f32 %v5287_v59, %v4886_v29  ;;  %v7039_v29 = vld [vmem:[%s12810_s24 + $0x80] sm:$0xff] }
 0x6aa   : > { %v6407_v42 = vmax.f32 %v6341_v43, %v6215_v16  ;;  %v4367_v17 = vadd.f32 %v4289_v41, %v3823_v0  ;;  %7106 = vmatpush.msrb.mxu3 %v7039_v29 }
 0x6ab   : > { %6536 = vst.msk [vmem:[#allocation3 + $0x190] sm:$0xff] %vm796_vm3, %v6472_v18  ;;  %v5957_v14 = vadd.f32 %v5893_v61, %v5829_v60  ;;  %v13782_v44 = vld [vmem:[#allocation4 + $0x70] sm:$0xff] }
 0x6ac   : > { %v13784_v37 = vld [vmem:[#allocation4 + $0x6f] sm:$0xff]  ;;  %10657 = vmatmul.msk.f32.gmra.mxu2 %vm796_vm3, %v13782_v44  ;;  %v5896_v12 = vadd.f32 %v4367_v17, %v15726_v54 }
 0x6ad   : > { %v13786_v50 = vld [vmem:[#allocation4 + $0x71] sm:$0xff]  ;;  %10673 = vmatmul.msk.f32.gmra.mxu3 %vm796_vm3, %v13784_v37  ;;  %v6025_v21 = vadd.f32 %v13762_v40, %v5957_v14 }
 0x6ae   : > { %10783 = vmatmul.msk.f32.gmra.mxu0 %vm796_vm3, %v13786_v50 }
 0x6af   : > { %v6089_v55 = vmax.f32 %v6025_v21, 0.0 }
 0x6b0   : > { %v6279_v1 = vld [vmem:[#allocation3 + $0x1a9] sm:$0xff]  ;;  %v5748_v28 = vpop.f32.mrf.mxu1 }
 0x6b1   : > { %v6473_v22 = vmax.f32 %v6407_v42, %v6279_v1  ;;  %6153 = vst.msk [vmem:[#allocation3 + $0x1b8] sm:$0xff] %vm796_vm3, %v6089_v55  ;;  %v5830_v46 = vadd.f32 %v5748_v28, %v5282_v15  ;;  %v6216_v4 = vld [vmem:[#allocation3 + $0x1b0] sm:$0xff]  ;;  %v6343_v38 = vmax.f32 %v6215_v16, %v6279_v1  ;;  %v7963_v15 = vld [vmem:[%s13700_s20 + $0x70] sm:$0xff]  ;;  %v5293_v55 = vpop.f32.mrf.mxu0 }
 0x6b2   : > { %v6408_v56 = vmax.f32 %v6342_v26, %v6216_v4  ;;  %v15727_v16 = vld [vmem:[#allocation26_spill] sm:$0xff]  ;;  %8022 = vmatpush.msrb.mxu1 %v7963_v15  ;;  %v4298_v26 = vpop.f32.mrf.mxu2  ;;  %v5294_v62 = vadd.f32 %v5293_v55, %v4892_v48 }
 0x6b3   : > { %6537 = vst.msk [vmem:[#allocation3 + $0x198] sm:$0xff] %vm796_vm3, %v6473_v22  ;;  %v5958_v52 = vadd.f32 %v5894_v23, %v5830_v46  ;;  %v3826_v43 = vadd.f32 %v15728_v51, %v15727_v16  ;;  %v6870_v42 = vld [vmem:[%s12810_s24 + $0x40] sm:$0xff]  ;;  %v4895_v23 = vpop.f32.mrf.mxu3  ;;  %v5291_v22 = vadd.f32 %v5290_v3, %v4889_v53 }
 0x6b4   : > { %6937 = vmatpush.msra.mxu2 %v6870_v42  ;;  %v15736_v42 = vld [vmem:[#allocation84_spill] sm:$0xff] }
 0x6b5   : > { %v6026_v45 = vadd.f32 %v13762_v40, %v5958_v52  ;;  %v4368_v1 = vadd.f32 %v4292_v36, %v3826_v43  ;;  %v15729_v52 = vld [vmem:[#allocation80_spill] sm:$0xff] }
 0x6b7   : > { %v6090_v49 = vmax.f32 %v6026_v45, 0.0  ;;  %v5897_v5 = vadd.f32 %v4368_v1, %v15729_v52 }
 0x6b8   : > { %v6280_v10 = vld [vmem:[#allocation3 + $0x1b1] sm:$0xff]  ;;  %v5751_v24 = vpop.f32.mrf.mxu1 }
 0x6b9   : > { %v6474_v32 = vmax.f32 %v6408_v56, %v6280_v10  ;;  %6154 = vst.msk [vmem:[#allocation3 + $0x1c0] sm:$0xff] %vm796_vm3, %v6090_v49  ;;  %v5831_v35 = vadd.f32 %v5751_v24, %v5285_v33  ;;  %v6217_v11 = vld [vmem:[#allocation3 + $0x1b8] sm:$0xff]  ;;  %v6344_v28 = vmax.f32 %v6216_v4, %v6280_v10  ;;  %v15731_v49 = vld [vmem:[#allocation121_spill] sm:$0xff]  ;;  %v5296_v3 = vpop.f32.mrf.mxu0 }
 0x6ba   : > { %v6409_v13 = vmax.f32 %v6343_v38, %v6217_v11  ;;  %v15730_v56 = vld [vmem:[#allocation83_spill] sm:$0xff]  ;;  %v15733_v38 = vld [vmem:[#allocation82_spill] sm:$0xff] }
 0x6bb   : > { %6538 = vst.msk [vmem:[#allocation3 + $0x1a0] sm:$0xff] %vm796_vm3, %v6474_v32  ;;  %v5959_v6 = vadd.f32 %v5895_v39, %v5831_v35  ;;  %v3829_v36 = vadd.f32 %v15731_v49, %v15730_v56  ;;  %v15739_v49 = vld [vmem:[#allocation86_spill] sm:$0xff] }
 0x6bd   : > { %v6027_v63 = vadd.f32 %v13762_v40, %v5959_v6  ;;  %v4369_v39 = vadd.f32 %v4295_v7, %v3829_v36  ;;  %v15734_v7 = vld [vmem:[#allocation91_spill] sm:$0xff] }
 0x6bf   : > { %v6091_v61 = vmax.f32 %v6027_v63, 0.0  ;;  %v5898_v63 = vadd.f32 %v4369_v39, %v15733_v38 }
 0x6c0   : > { %v6281_v18 = vld [vmem:[#allocation3 + $0x1b9] sm:$0xff]  ;;  %v5754_v60 = vpop.f32.mrf.mxu1 }
 0x6c1   : > { %v6475_v8 = vmax.f32 %v6409_v13, %v6281_v18  ;;  %6155 = vst.msk [vmem:[#allocation3 + $0x1c8] sm:$0xff] %vm796_vm3, %v6091_v61  ;;  %v5832_v14 = vadd.f32 %v5754_v60, %v5288_v9  ;;  %v6218_v59 = vld [vmem:[#allocation3 + $0x1c0] sm:$0xff]  ;;  %v6345_v32 = vmax.f32 %v6217_v11, %v6281_v18  ;;  %v4898_v9 = vpop.f32.mrf.mxu3  ;;  %v15735_v11 = vld [vmem:[#allocation122_spill] sm:$0xff]  ;;  %v4301_v60 = vpop.f32.mrf.mxu2 }
 0x6c2   : > { %v6583_v41 = vld [vmem:[#allocation3 + $0x199] ss:$2 sm:$0x3f]  ;;  %v6410_v46 = vmax.f32 %v6344_v28, %v6218_v59  ;;  %v3832_v18 = vadd.f32 %v15735_v11, %v15734_v7  ;;  %v5299_v43 = vpop.f32.mrf.mxu0  ;;  %v15737_v28 = vld [vmem:[#allocation29_spill] sm:$0xff] }
 0x6c3   : > { %6539 = vst.msk [vmem:[#allocation3 + $0x1a8] sm:$0xff] %vm796_vm3, %v6475_v8  ;;  %v5960_v21 = vadd.f32 %v5896_v12, %v5832_v14  ;;  %v5297_v8 = vadd.f32 %v5296_v3, %v4895_v23  ;;  %v15740_v3 = vld [vmem:[#allocation30_spill] sm:$0xff] }
 0x6c4   : > { %6584 = vst.msk [vmem:[#allocation4 + $0x79] sm:$0x3f] %vm6553_vm4, %v6583_v41  ;;  %v4370_v48 = vadd.f32 %v4298_v26, %v3832_v18 }
 0x6c5   : > { %v6028_v58 = vadd.f32 %v13762_v40, %v5960_v21 }
 0x6c6   : > { %v5899_v29 = vadd.f32 %v4370_v48, %v15736_v42 }
 0x6c7   : > { %v6092_v20 = vmax.f32 %v6028_v58, 0.0  ;;  %v15738_v58 = vld [vmem:[#allocation123_spill] sm:$0xff] }
 0x6c8   : > { %v6282_v57 = vld [vmem:[#allocation3 + $0x1c1] sm:$0xff]  ;;  %v5757_v30 = vpop.f32.mrf.mxu1 }
 0x6c9   : > { %v6476_v45 = vmax.f32 %v6410_v46, %v6282_v57  ;;  %6156 = vst.msk [vmem:[#allocation3 + $0x1d0] sm:$0xff] %vm796_vm3, %v6092_v20  ;;  %v5833_v33 = vadd.f32 %v5757_v30, %v5291_v22  ;;  %v6219_v27 = vld [vmem:[#allocation3 + $0x1c8] sm:$0xff]  ;;  %v6346_v14 = vmax.f32 %v6218_v59, %v6282_v57  ;;  %v3835_v22 = vadd.f32 %v15738_v58, %v15737_v28  ;;  %v4901_v46 = vpop.f32.mrf.mxu3  ;;  %v4304_v57 = vpop.f32.mrf.mxu2 }
 0x6ca   : > { %v6411_v34 = vmax.f32 %v6345_v32, %v6219_v27  ;;  %v5300_v30 = vadd.f32 %v5299_v43, %v4898_v9  ;;  %v5302_v32 = vpop.f32.mrf.mxu0 }
 0x6cb   : > { %6540 = vst.msk [vmem:[#allocation3 + $0x1b0] sm:$0xff] %vm796_vm3, %v6476_v45  ;;  %v5961_v4 = vadd.f32 %v5897_v5, %v5833_v33  ;;  %v13824_v10 = vld [vmem:[#allocation4 + $0x78] sm:$0xff]  ;;  %v4371_v20 = vadd.f32 %v4301_v60, %v3835_v22  ;;  %v5303_v38 = vadd.f32 %v5302_v32, %v4901_v46  ;;  %v7287_v32 = vld [vmem:[%s12810_s24 + $0xb0] sm:$0xff] }
 0x6cc   : > { %15732 = vst [vmem:[#allocation100_spill] sm:$0xff] %v13824_v10  ;;  %v13826_v53 = vld [vmem:[#allocation4 + $0x77] sm:$0xff]  ;;  %10658 = vmatmul.msk.f32.gmra.mxu2 %vm796_vm3, %v13824_v10 }
 0x6cd   : > { %v13828_v24 = vld [vmem:[#allocation4 + $0x79] sm:$0xff]  ;;  %10674 = vmatmul.msk.f32.gmra.mxu3 %vm796_vm3, %v13826_v53  ;;  %v6029_v35 = vadd.f32 %v13762_v40, %v5961_v4  ;;  %v5900_v36 = vadd.f32 %v4371_v20, %v15739_v49 }
 0x6ce   : > { %10784 = vmatmul.msk.f32.gmra.mxu0 %vm796_vm3, %v13828_v24  ;;  %v7022_v60 = vld [vmem:[%s12810_s24 + $0x78] sm:$0xff] }
 0x6cf   : > { %v6093_v0 = vmax.f32 %v6029_v35, 0.0  ;;  %7216 = vmatpush.msrb.mxu2 %v7022_v60 }
 0x6d0   : > { %v6283_v6 = vld [vmem:[#allocation3 + $0x1c9] sm:$0xff]  ;;  %v5760_v17 = vpop.f32.mrf.mxu1 }
 0x6d1   : > { %v6477_v13 = vmax.f32 %v6411_v34, %v6283_v6  ;;  %6157 = vst.msk [vmem:[#allocation3 + $0x1d8] sm:$0xff] %vm796_vm3, %v6093_v0  ;;  %v5834_v61 = vadd.f32 %v5760_v17, %v5294_v62  ;;  %v6220_v12 = vld [vmem:[#allocation3 + $0x1d0] sm:$0xff]  ;;  %v6347_v52 = vmax.f32 %v6219_v27, %v6283_v6  ;;  %v15741_v62 = vld [vmem:[#allocation124_spill] sm:$0xff]  ;;  %v4904_v17 = vpop.f32.mrf.mxu3 }
 0x6d2   : > { %v6412_v16 = vmax.f32 %v6346_v14, %v6220_v12  ;;  %v3838_v34 = vadd.f32 %v15741_v62, %v15740_v3 }
 0x6d3   : > { %6541 = vst.msk [vmem:[#allocation3 + $0x1b8] sm:$0xff] %vm796_vm3, %v6477_v13  ;;  %v5962_v54 = vadd.f32 %v5898_v63, %v5834_v61  ;;  %v4307_v13 = vpop.f32.mrf.mxu2 }
 0x6d4   : > { %v4372_v6 = vadd.f32 %v4304_v57, %v3838_v34 }
 0x6d5   : > { %v6030_v41 = vadd.f32 %v13762_v40, %v5962_v54  ;;  %v15742_v54 = vld [vmem:[#allocation88_spill] sm:$0xff] }
 0x6d6   : > { %v5901_v48 = vadd.f32 %v4372_v6, %v15742_v54 }
 0x6d7   : > { %v6094_v51 = vmax.f32 %v6030_v41, 0.0  ;;  %v7288_v41 = vld [vmem:[%s12810_s24 + $0xb8] sm:$0xff] }
 0x6d8   : > { %v6284_v21 = vld [vmem:[#allocation3 + $0x1d1] sm:$0xff]  ;;  %v5763_v15 = vpop.f32.mrf.mxu1  ;;  %7349 = vmatpush.msra.mxu3 %v7288_v41 }
 0x6d9   : > { %v6478_v55 = vmax.f32 %v6412_v16, %v6284_v21  ;;  %6158 = vst.msk [vmem:[#allocation3 + $0x1e0] sm:$0xff] %vm796_vm3, %v6094_v51  ;;  %v5835_v1 = vadd.f32 %v5763_v15, %v5297_v8  ;;  %v6221_v23 = vld [vmem:[#allocation3 + $0x1d8] sm:$0xff]  ;;  %v6348_v9 = vmax.f32 %v6220_v12, %v6284_v21  ;;  %v15744_v51 = vld [vmem:[#allocation125_spill] sm:$0xff] }
 0x6da   : > { %v6413_v26 = vmax.f32 %v6347_v52, %v6221_v23  ;;  %v15743_v16 = vld [vmem:[#allocation31_spill] sm:$0xff]  ;;  %7350 = vmatpush.msra.mxu3 %v7287_v32  ;;  %v13951_v32 = vld [vmem:[#allocation4 + $0x38] sm:$0xff] }
 0x6db   : > { %6542 = vst.msk [vmem:[#allocation3 + $0x1c0] sm:$0xff] %vm796_vm3, %v6478_v55  ;;  %v5963_v59 = vadd.f32 %v5899_v29, %v5835_v1  ;;  %v3841_v43 = vadd.f32 %v15744_v51, %v15743_v16  ;;  %v5305_v29 = vpop.f32.mrf.mxu0  ;;  %v13876_v46 = vpop.f32.mrf.mxu2  ;;  %v6421_v16 = vld [vmem:[#allocation3 + $0x209] sm:$0xff]  ;;  %v6422_v51 = vld [vmem:[#allocation3 + $0x211] sm:$0xff] }
 0x6dc   : > { %v5306_v28 = vadd.f32 %v5305_v29, %v4904_v17 }
 0x6dd   : > { %v6031_v5 = vadd.f32 %v13762_v40, %v5963_v59  ;;  %v4373_v1 = vadd.f32 %v4307_v13, %v3841_v43  ;;  %v13878_v59 = vpop.f32.mrf.mxu3 }
 0x6df   : > { %v6095_v45 = vmax.f32 %v6031_v5, 0.0  ;;  %v7962_v5 = vld [vmem:[%s13700_s20 + $0x68] sm:$0xff] }
 0x6e0   : > { %v6285_v33 = vld [vmem:[#allocation3 + $0x1d9] sm:$0xff]  ;;  %v5766_v56 = vpop.f32.mrf.mxu1  ;;  %8023 = vmatpush.msrb.mxu1 %v7962_v5 }
 0x6e1   : > { %v6479_v4 = vmax.f32 %v6413_v26, %v6285_v33  ;;  %6159 = vst.msk [vmem:[#allocation3 + $0x1e8] sm:$0xff] %vm796_vm3, %v6095_v45  ;;  %v5836_v39 = vadd.f32 %v5766_v56, %v5300_v30  ;;  %v6222_v0 = vld [vmem:[#allocation3 + $0x1e0] sm:$0xff]  ;;  %v6349_v22 = vmax.f32 %v6221_v23, %v6285_v33  ;;  %v15746_v26 = vld [vmem:[#allocation90_spill] sm:$0xff]  ;;  %v13925_v5 = vld [vmem:[#allocation4 + $0x28] sm:$0xff] }
 0x6e2   : > { %v6586_v35 = vld [vmem:[#allocation3 + $0x1b9] ss:$2 sm:$0x3f]  ;;  %v6414_v7 = vmax.f32 %v6348_v9, %v6222_v0  ;;  %v5902_v45 = vadd.f32 %v4373_v1, %v15746_v26  ;;  %v13897_v9 = vld [vmem:[#allocation4 + $0x18] sm:$0xff] }
 0x6e3   : > { %6543 = vst.msk [vmem:[#allocation3 + $0x1c8] sm:$0xff] %vm796_vm3, %v6479_v4  ;;  %v5964_v27 = vadd.f32 %v5900_v36, %v5836_v39  ;;  %v6854_v36 = vld [vmem:[#allocation4 + $0x9] sm:$0xff]  ;;  %v13889_v6 = vpop.f32.mrf.mxu2 }
 0x6e4   : > { %6587 = vst.msk [vmem:[#allocation4 + $0x81] sm:$0x3f] %vm6553_vm4, %v6586_v35  ;;  %v7023_v4 = vld [vmem:[#allocation4 + $0x10] sm:$0xff] }
 0x6e5   : > { %v6032_v63 = vadd.f32 %v13762_v40, %v5964_v27  ;;  %v7021_v39 = vld [vmem:[%s12810_s24 + $0x70] sm:$0xff]  ;;  %v13891_v17 = vpop.f32.mrf.mxu3 }
 0x6e6   : > { %7217 = vmatpush.msrb.mxu2 %v7021_v39  ;;  %v13949_v39 = vld [vmem:[#allocation4 + $0x31] sm:$0xff] }
 0x6e7   : > { %v6096_v61 = vmax.f32 %v6032_v63, 0.0  ;;  %v13894_v63 = vld [vmem:[#allocation4 + $0x11] sm:$0xff] }
 0x6e8   : > { %v6286_v11 = vld [vmem:[#allocation3 + $0x1e1] sm:$0xff]  ;;  %v5769_v18 = vpop.f32.mrf.mxu1 }
 0x6e9   : > { %6160 = vst.msk [vmem:[#allocation3 + $0x1f0] sm:$0xff] %vm796_vm3, %v6096_v61  ;;  %v5837_v8 = vadd.f32 %v5769_v18, %v5303_v38  ;;  %v6480_v14 = vmax.f32 %v6414_v7, %v6286_v11  ;;  %v6223_v55 = vld [vmem:[#allocation3 + $0x1e8] sm:$0xff]  ;;  %v6350_v3 = vmax.f32 %v6222_v0, %v6286_v11  ;;  %v6356_v7 = vld [vmem:[#allocation3 + $0x210] sm:$0xff] }
 0x6ea   : > { %v6415_v57 = vmax.f32 %v6349_v22, %v6223_v55  ;;  %v6355_v61 = vld [vmem:[#allocation3 + $0x208] sm:$0xff] }
 0x6eb   : > { %v5965_v15 = vadd.f32 %v5901_v48, %v5837_v8  ;;  %v13862_v12 = vld [vmem:[#allocation4 + $0x80] sm:$0xff]  ;;  %6544 = vst.msk [vmem:[#allocation3 + $0x1d0] sm:$0xff] %vm796_vm3, %v6480_v14  ;;  %v13903_v43 = vpop.f32.mrf.mxu2 }
 0x6ec   : > { %15745 = vst [vmem:[#allocation101_spill] sm:$0xff] %v13862_v12  ;;  %v13864_v21 = vld [vmem:[#allocation4 + $0x7f] sm:$0xff]  ;;  %10659 = vmatmul.msk.f32.gmra.mxu2 %vm796_vm3, %v13862_v12 }
 0x6ed   : > { %v13866_v42 = vld [vmem:[#allocation4 + $0x81] sm:$0xff]  ;;  %10675 = vmatmul.msk.f32.gmra.mxu3 %vm796_vm3, %v13864_v21  ;;  %v6033_v58 = vadd.f32 %v13762_v40, %v5965_v15  ;;  %v13905_v15 = vpop.f32.mrf.mxu3 }
 0x6ee   : > { %10785 = vmatmul.msk.f32.gmra.mxu0 %vm796_vm3, %v13866_v42 }
 0x6ef   : > { %v6097_v20 = vmax.f32 %v6033_v58, 0.0  ;;  %v13910_v58 = vld [vmem:[#allocation4 + $0x20] sm:$0xff] }
 0x6f0   : > { %v5772_v30 = vpop.f32.mrf.mxu1  ;;  %v6287_v52 = vld [vmem:[#allocation3 + $0x1e9] sm:$0xff] }
 0x6f1   : > { %6161 = vst.msk [vmem:[#allocation3 + $0x1f8] sm:$0xff] %vm796_vm3, %v6097_v20  ;;  %v5838_v56 = vadd.f32 %v5772_v30, %v5306_v28  ;;  %v6481_v49 = vmax.f32 %v6415_v57, %v6287_v52  ;;  %v6224_v33 = vld [vmem:[#allocation3 + $0x1f0] sm:$0xff]  ;;  %v6351_v0 = vmax.f32 %v6223_v55, %v6287_v52 }
 0x6f2   : > { %v6416_v34 = vmax.f32 %v6350_v3, %v6224_v33  ;;  %v13908_v28 = vld [vmem:[#allocation4 + $0x19] sm:$0xff]  ;;  %v13923_v52 = vld [vmem:[#allocation4 + $0x21] sm:$0xff] }
 0x6f3   : > { %v5966_v23 = vadd.f32 %v5902_v45, %v5838_v56  ;;  %6545 = vst.msk [vmem:[#allocation3 + $0x1d8] sm:$0xff] %vm796_vm3, %v6481_v49  ;;  %v13919_v57 = vpop.f32.mrf.mxu2  ;;  %v13935_v56 = vld [vmem:[#allocation4 + $0x29] sm:$0xff] }
 0x6f4   : > { %10676 = vmatmul.msk.f32.vlgmr.msra.gmra.mxu2 %vm796_vm3, %v6854_v36  ;;  %v13937_v49 = vld [vmem:[#allocation4 + $0x30] sm:$0xff]  ;;  %v7020_v36 = vld [vmem:[%s12810_s24 + $0x68] sm:$0xff] }
 0x6f5   : > { %10692 = vmatmul.msk.f32.vlgmr.msrb.gmra.mxu3 %vm796_vm3, %v7023_v4  ;;  %v6034_v35 = vadd.f32 %v13762_v40, %v5966_v23  ;;  %v13921_v30 = vpop.f32.mrf.mxu3  ;;  %v7286_v4 = vld [vmem:[%s12810_s24 + $0xa8] sm:$0xff]  ;;  %7218 = vmatpush.msrb.mxu2 %v7020_v36 }
 0x6f6   : > { %7351 = vmatpush.msra.mxu3 %v7286_v4 }
 0x6f7   : > { %v6098_v62 = vmax.f32 %v6034_v35, 0.0 }
 0x6f8   : > { %v6288_v27 = vld [vmem:[#allocation3 + $0x1f1] sm:$0xff] }
 0x6f9   : > { %6162 = vst.msk [vmem:[#allocation3 + $0x200] sm:$0xff] %vm796_vm3, %v6098_v62  ;;  %v6482_v38 = vmax.f32 %v6416_v34, %v6288_v27  ;;  %v6225_v40 = vld [vmem:[#allocation3 + $0x1f8] sm:$0xff]  ;;  %v6352_v13 = vmax.f32 %v6224_v33, %v6288_v27  ;;  %v13961_v62 = vld [vmem:[#allocation4 + $0x39] sm:$0xff] }
 0x6fa   : > { %v6417_v11 = vmax.f32 %v6351_v0, %v6225_v40  ;;  %v13963_v34 = vld [vmem:[#allocation4 + $0x40] sm:$0xff]  ;;  %v10972_v0 = vld [vmem:[#allocation4 + $0x48] sm:$0xff] }
 0x6fb   : > { %6546 = vst.msk [vmem:[#allocation3 + $0x1e0] sm:$0xff] %vm796_vm3, %v6482_v38  ;;  %v13931_v26 = vpop.f32.mrf.mxu2 }
 0x6fc   : > { %10677 = vmatmul.msk.f32.gmra.mxu2 %vm796_vm3, %v13894_v63 }
 0x6fd   : > { %10693 = vmatmul.msk.f32.gmra.mxu3 %vm796_vm3, %v13897_v9  ;;  %v13933_v45 = vpop.f32.mrf.mxu3 }
 0x700   : > { %v6226_v18 = vld [vmem:[#allocation3 + $0x200] sm:$0xff] }
 0x701   : > { %v6289_v60 = vld [vmem:[#allocation3 + $0x1f9] sm:$0xff]  ;;  %v6290_v54 = vld [vmem:[#allocation3 + $0x201] sm:$0xff]  ;;  %v6418_v14 = vmax.f32 %v6352_v13, %v6226_v18  ;;  %v7961_v13 = vld [vmem:[%s13700_s20 + $0x60] sm:$0xff] }
 0x702   : > { %v6353_v48 = vmax.f32 %v6225_v40, %v6289_v60  ;;  %v6354_v8 = vmax.f32 %v6226_v18, %v6290_v54  ;;  %v6483_v41 = vmax.f32 %v6417_v11, %v6289_v60  ;;  %v13973_v40 = vld [vmem:[#allocation4 + $0x41] sm:$0xff]  ;;  %8024 = vmatpush.msrb.mxu1 %v7961_v13  ;;  %v10973_v11 = vld [vmem:[#allocation4 + $0x49] sm:$0xff] }
 0x703   : > { %v6484_v55 = vmax.f32 %v6418_v14, %v6290_v54  ;;  %v13945_v23 = vpop.f32.mrf.mxu2  ;;  %v10974_v18 = vld [vmem:[#allocation4 + $0x50] sm:$0xff]  ;;  %v7019_v60 = vld [vmem:[%s12810_s24 + $0x60] sm:$0xff] }
 0x704   : > { %v6419_v29 = vmax.f32 %v6353_v48, %v6355_v61  ;;  %v6420_v1 = vmax.f32 %v6354_v8, %v6356_v7  ;;  %6547 = vst.msk [vmem:[#allocation3 + $0x1e8] sm:$0xff] %vm796_vm3, %v6483_v41  ;;  %10678 = vmatmul.msk.f32.gmra.mxu2 %vm796_vm3, %v13908_v28  ;;  %v7285_v54 = vld [vmem:[%s12810_s24 + $0xa0] sm:$0xff]  ;;  %v10975_v48 = vld [vmem:[#allocation4 + $0x51] sm:$0xff] }
 0x705   : > { %10694 = vmatmul.msk.f32.gmra.mxu3 %vm796_vm3, %v13910_v58  ;;  %6548 = vst.msk [vmem:[#allocation3 + $0x1f0] sm:$0xff] %vm796_vm3, %v6484_v55  ;;  %v13947_v33 = vpop.f32.mrf.mxu3  ;;  %7219 = vmatpush.msrb.mxu2 %v7019_v60  ;;  %v10976_v8 = vld [vmem:[#allocation4 + $0x58] sm:$0xff] }
 0x706   : > { %v6485_v22 = vmax.f32 %v6419_v29, %v6421_v16  ;;  %v6486_v20 = vmax.f32 %v6420_v1, %v6422_v51  ;;  %7352 = vmatpush.msra.mxu3 %v7285_v54  ;;  %v10977_v16 = vld [vmem:[#allocation4 + $0x59] sm:$0xff]  ;;  %v7003_v54 = vld [vmem:[#allocation4 + $0xf] sm:$0xff] }
 0x707   : > { %v7960_v60 = vld [vmem:[%s13700_s20 + $0x58] sm:$0xff] }
 0x708   : > { %6549 = vst.msk [vmem:[#allocation3 + $0x1f8] sm:$0xff] %vm796_vm3, %v6485_v22  ;;  %v7437_v22 = vld [vmem:[%s12810_s24 + $0xd8] sm:$0xff]  ;;  %8025 = vmatpush.msrb.mxu1 %v7960_v60 }
 0x709   : > { %6550 = vst.msk [vmem:[#allocation3 + $0x200] sm:$0xff] %vm796_vm3, %v6486_v20  ;;  %7631 = vmatpush.msrb.mxu3 %v7437_v22  ;;  %v14052_v22 = vld [vmem:[#allocation4 + $0x17] sm:$0xff] }
 0x70b   : > { %v13957_v35 = vpop.f32.mrf.mxu2 }
 0x70c   : > { %10679 = vmatmul.msk.f32.gmra.mxu2 %vm796_vm3, %v13923_v52 }
 0x70d   : > { %10695 = vmatmul.msk.f32.gmra.mxu3 %vm796_vm3, %v13925_v5  ;;  %v13959_v3 = vpop.f32.mrf.mxu3 }
 0x713   : > { %v13969_v27 = vpop.f32.mrf.mxu2 }
 0x714   : > { %10680 = vmatmul.msk.f32.gmra.mxu2 %vm796_vm3, %v13935_v56 }
 0x715   : > { %10696 = vmatmul.msk.f32.gmra.mxu3 %vm796_vm3, %v13937_v49  ;;  %v13971_v38 = vpop.f32.mrf.mxu3 }
 0x71b   : > { %v13979_v61 = vpop.f32.mrf.mxu2 }
 0x71c   : > { %10681 = vmatmul.msk.f32.gmra.mxu2 %vm796_vm3, %v13949_v39  ;;  %15747 = vst [vmem:[#allocation103_spill] sm:$0xff] %v13979_v61 }
 0x71d   : > { %10697 = vmatmul.msk.f32.gmra.mxu3 %vm796_vm3, %v13951_v32  ;;  %v13981_v7 = vpop.f32.mrf.mxu3 }
 0x71e   : > { %15748 = vst [vmem:[#allocation102_spill] sm:$0xff] %v13981_v7  ;;  %v7434_v7 = vld [vmem:[%s12810_s24 + $0xc0] sm:$0xff] }
 0x723   : > { %v13989_v14 = vpop.f32.mrf.mxu2 }
 0x724   : > { %10682 = vmatmul.msk.f32.gmra.mxu2 %vm796_vm3, %v13961_v62  ;;  %15749 = vst [vmem:[#allocation8_spill] sm:$0xff] %v13989_v14  ;;  %v7454_v14 = vld [vmem:[%s12810_s24 + $0xe0] sm:$0xff] }
 0x725   : > { %10698 = vmatmul.msk.f32.gmra.mxu3 %vm796_vm3, %v13963_v34  ;;  %v13991_v41 = vpop.f32.mrf.mxu3 }
 0x726   : > { %15750 = vst [vmem:[#allocation41_spill] sm:$0xff] %v13991_v41  ;;  %v14124_v41 = vld [vmem:[#allocation4 + $0x4f] sm:$0xff] }
 0x72b   : > { %v13996_v51 = vpop.f32.mrf.mxu2 }
 0x72c   : > { %10683 = vmatmul.msk.f32.gmra.mxu2 %vm796_vm3, %v13973_v40  ;;  %15751 = vst [vmem:[#allocation9_spill] sm:$0xff] %v13996_v51  ;;  %v7959_v51 = vld [vmem:[%s13700_s20 + $0x50] sm:$0xff] }
 0x72d   : > { %10699 = vmatmul.msk.f32.gmra.mxu3 %vm796_vm3, %v10972_v0  ;;  %v13998_v29 = vpop.f32.mrf.mxu3  ;;  %v14034_v0 = vld [vmem:[#allocation4 + $0x88] sm:$0xff]  ;;  %8026 = vmatpush.msrb.mxu1 %v7959_v51 }
 0x72e   : > { %15752 = vst [vmem:[#allocation43_spill] sm:$0xff] %v13998_v29 }
 0x72f   : > { %15761 = vst [vmem:[#allocation14_spill] sm:$0xff] %v14034_v0 }
 0x733   : > { %v14004_v1 = vpop.f32.mrf.mxu2 }
 0x734   : > { %10684 = vmatmul.msk.f32.gmra.mxu2 %vm796_vm3, %v10973_v11  ;;  %15753 = vst [vmem:[#allocation53_spill] sm:$0xff] %v14004_v1 }
 0x735   : > { %10700 = vmatmul.msk.f32.gmra.mxu3 %vm796_vm3, %v10974_v18  ;;  %v14006_v55 = vpop.f32.mrf.mxu3 }
 0x736   : > { %15754 = vst [vmem:[#allocation10_spill] sm:$0xff] %v14006_v55  ;;  %v14114_v55 = vld [vmem:[#allocation4 + $0x47] sm:$0xff] }
 0x73b   : > { %v14014_v20 = vpop.f32.mrf.mxu2 }
 0x73c   : > { %10685 = vmatmul.msk.f32.gmra.mxu2 %vm796_vm3, %v10975_v48  ;;  %15755 = vst [vmem:[#allocation104_spill] sm:$0xff] %v14014_v20  ;;  %v7456_v48 = vld [vmem:[%s12810_s24 + $0xf0] sm:$0xff]  ;;  %v14104_v20 = vld [vmem:[#allocation4 + $0x3f] sm:$0xff] }
 0x73d   : > { %10701 = vmatmul.msk.f32.gmra.mxu3 %vm796_vm3, %v10976_v8  ;;  %v7436_v8 = vld [vmem:[%s12810_s24 + $0xd0] sm:$0xff] }
 0x73e   : > { %7632 = vmatpush.msrb.mxu3 %v7436_v8 }
 0x744   : > { %10686 = vmatmul.msk.f32.gmra.mxu2 %vm796_vm3, %v10977_v16 }
 0x745   : > { %10702 = vmatmul.msk.f32.gmra.mxu3 %vm796_vm3, %v13646_v47  ;;  %v7457_v47 = vld [vmem:[%s12810_s24 + $0xf8] sm:$0xff] }
 0x746   : > { %7518 = vmatpush.msra.mxu2 %v7457_v47 }
 0x748   : > { %7519 = vmatpush.msra.mxu2 %v7456_v48  ;;  %v14072_v48 = vld [vmem:[#allocation4 + $0x27] sm:$0xff] }
 0x74c   : > { %10687 = vmatmul.msk.f32.gmra.mxu2 %vm796_vm3, %v13648_v25  ;;  %v14016_v25 = vpop.f32.mrf.mxu3 }
 0x74d   : > { %10703 = vmatmul.msk.f32.gmra.mxu3 %vm796_vm3, %v13722_v31  ;;  %15756 = vst [vmem:[#allocation11_spill] sm:$0xff] %v14016_v25  ;;  %v14022_v31 = vpop.f32.mrf.mxu2 }
 0x74e   : > { %15757 = vst [vmem:[#allocation13_spill] sm:$0xff] %v14022_v31 }
 0x754   : > { %10688 = vmatmul.msk.f32.gmra.mxu2 %vm796_vm3, %v13726_v19  ;;  %v14024_v36 = vpop.f32.mrf.mxu3 }
 0x755   : > { %10704 = vmatmul.msk.f32.gmra.mxu3 %vm796_vm3, %v13782_v44  ;;  %15758 = vst [vmem:[#allocation12_spill] sm:$0xff] %v14024_v36  ;;  %v14030_v44 = vpop.f32.mrf.mxu2 }
 0x756   : > { %15759 = vst [vmem:[#allocation56_spill] sm:$0xff] %v14030_v44  ;;  %v7435_v44 = vld [vmem:[%s12810_s24 + $0xc8] sm:$0xff] }
 0x757   : > { %7633 = vmatpush.msrb.mxu3 %v7435_v44 }
 0x759   : > { %7634 = vmatpush.msrb.mxu3 %v7434_v7  ;;  %v10979_v7 = vld [vmem:[#allocation4 + $0x61] sm:$0xff] }
 0x75c   : > { %10689 = vmatmul.msk.f32.gmra.mxu2 %vm796_vm3, %v13786_v50  ;;  %v14032_v4 = vpop.f32.mrf.mxu3 }
 0x75d   : > { %10705 = vmatmul.msk.f32.gmra.mxu3 %vm796_vm3, %v13824_v10  ;;  %15760 = vst [vmem:[#allocation51_spill] sm:$0xff] %v14032_v4  ;;  %v14082_v4 = vld [vmem:[#allocation4 + $0x2f] sm:$0xff] }
 0x764   : > { %10690 = vmatmul.msk.f32.gmra.mxu2 %vm796_vm3, %v13828_v24 }
 0x765   : > { %10706 = vmatmul.msk.f32.gmra.mxu3 %vm796_vm3, %v13862_v12  ;;  %v7278_v12 = vld [vmem:[#allocation4 + $0x59] sm:$0xff] }
 0x76c   : > { %10691 = vmatmul.msk.f32.gmra.mxu2 %vm796_vm3, %v13866_v42 }
 0x76d   : > { %10707 = vmatmul.msk.f32.gmra.mxu3 %vm796_vm3, %v14034_v0  ;;  %v14135_v0 = vld [vmem:[#allocation4 + $0x57] sm:$0xff] }
 0x76f   : > { %v6738_v13 = vpop.f32.mrf.mxu2 }
 0x770   : > { %v6851_v11 = vpop.f32.mrf.mxu3 }
 0x771   : > { %v14040_v18 = vadd.f32 %v6851_v11, %v6738_v13  ;;  %v14062_v11 = vld [vmem:[#allocation4 + $0x1f] sm:$0xff] }
 0x774   : > { %10708 = vmatmul.msk.f32.vlgmr.msrb.gmra.mxu2 %vm796_vm3, %v7003_v54 }
 0x775   : > { %10724 = vmatmul.msk.f32.vlgmr.msra.gmra.mxu3 %vm796_vm3, %v13894_v63 }
 0x777   : > { %v14048_v16 = vpop.f32.mrf.mxu2 }
 0x778   : > { %v14050_v47 = vpop.f32.mrf.mxu3 }
 0x77c   : > { %10709 = vmatmul.msk.f32.gmra.mxu2 %vm796_vm3, %v14052_v22 }
 0x77d   : > { %10725 = vmatmul.msk.f32.gmra.mxu3 %vm796_vm3, %v13908_v28 }
 0x77f   : > { %v14058_v13 = vpop.f32.mrf.mxu2 }
 0x780   : > { %v14060_v63 = vpop.f32.mrf.mxu3 }
 0x784   : > { %10710 = vmatmul.msk.f32.gmra.mxu2 %vm796_vm3, %v14062_v11 }
 0x785   : > { %10726 = vmatmul.msk.f32.gmra.mxu3 %vm796_vm3, %v13923_v52  ;;  %v7455_v52 = vld [vmem:[%s12810_s24 + $0xe8] sm:$0xff]  ;;  %s778_s24 = scalar_lea.vmem %s15346_s10, %s11104_s29 }
 0x786   : > { %7520 = vmatpush.msra.mxu2 %v7455_v52 }
 0x787   : > { %v14068_v60 = vpop.f32.mrf.mxu2 }
 0x788   : > { %v14070_v54 = vpop.f32.mrf.mxu3  ;;  %7521 = vmatpush.msra.mxu2 %v7454_v14 }
 0x78c   : > { %10711 = vmatmul.msk.f32.gmra.mxu2 %vm796_vm3, %v14072_v48 }
 0x78d   : > { %10727 = vmatmul.msk.f32.gmra.mxu3 %vm796_vm3, %v13935_v56  ;;  %v14094_v56 = vld [vmem:[#allocation4 + $0x37] sm:$0xff] }
 0x78f   : > { %v14078_v28 = vpop.f32.mrf.mxu2 }
 0x790   : > { %v14080_v8 = vpop.f32.mrf.mxu3 }
 0x794   : > { %10712 = vmatmul.msk.f32.gmra.mxu2 %vm796_vm3, %v14082_v4 }
 0x795   : > { %10728 = vmatmul.msk.f32.gmra.mxu3 %vm796_vm3, %v13949_v39 }
 0x797   : > { %v14090_v36 = vpop.f32.mrf.mxu2 }
 0x798   : > { %v14092_v31 = vpop.f32.mrf.mxu3 }
 0x79c   : > { %10713 = vmatmul.msk.f32.gmra.mxu2 %vm796_vm3, %v14094_v56 }
 0x79d   : > { %10729 = vmatmul.msk.f32.gmra.mxu3 %vm796_vm3, %v13961_v62  ;;  %v7276_v62 = vld [vmem:[#allocation4 + $0x49] sm:$0xff] }
 0x79f   : > { %v14100_v25 = vpop.f32.mrf.mxu2 }
 0x7a0   : > { %v14102_v39 = vpop.f32.mrf.mxu3 }
 0x7a4   : > { %10714 = vmatmul.msk.f32.gmra.mxu2 %vm796_vm3, %v14104_v20 }
 0x7a5   : > { %10730 = vmatmul.msk.f32.gmra.mxu3 %vm796_vm3, %v13973_v40  ;;  %v7277_v40 = vld [vmem:[#allocation4 + $0x51] sm:$0xff] }
 0x7a7   : > { %v14110_v44 = vpop.f32.mrf.mxu2 }
 0x7a8   : > { %v14112_v52 = vpop.f32.mrf.mxu3 }
 0x7ac   : > { %10715 = vmatmul.msk.f32.gmra.mxu2 %vm796_vm3, %v14114_v55 }
 0x7ad   : > { %10731 = vmatmul.msk.f32.gmra.mxu3 %vm796_vm3, %v7276_v62 }
 0x7af   : > { %v14119_v1 = vpop.f32.mrf.mxu2 }
 0x7b0   : > { %v14121_v29 = vpop.f32.mrf.mxu3 }
 0x7b4   : > { %10716 = vmatmul.msk.f32.gmra.mxu2 %vm796_vm3, %v14124_v41 }
 0x7b5   : > { %10732 = vmatmul.msk.f32.gmra.mxu3 %vm796_vm3, %v7277_v40  ;;  %v10978_v40 = vld [vmem:[#allocation4 + $0x5f] sm:$0xff] }
 0x7b7   : > { %v14131_v61 = vpop.f32.mrf.mxu2 }
 0x7b8   : > { %15762 = vst [vmem:[#allocation15_spill] sm:$0xff] %v14131_v61  ;;  %v14133_v62 = vpop.f32.mrf.mxu3 }
 0x7bc   : > { %10717 = vmatmul.msk.f32.gmra.mxu2 %vm796_vm3, %v14135_v0 }
 0x7bd   : > { %10733 = vmatmul.msk.f32.gmra.mxu3 %vm796_vm3, %v7278_v12  ;;  %v7284_v12 = vld [vmem:[#allocation4 + $0x89] sm:$0xff] }
 0x7be   : > { %10786 = vmatmul.msk.f32.gmra.mxu0 %vm796_vm3, %v7284_v12 }
 0x7bf   : > { %v14140_v51 = vpop.f32.mrf.mxu2 }
 0x7c0   : > { %15763 = vst [vmem:[#allocation16_spill] sm:$0xff] %v14140_v51  ;;  %v14142_v10 = vpop.f32.mrf.mxu3 }
 0x7c1   : > { %15764 = vst [vmem:[#allocation63_spill] sm:$0xff] %v14142_v10 }
 0x7c4   : > { %10718 = vmatmul.msk.f32.gmra.mxu2 %vm796_vm3, %v10978_v40 }
 0x7c5   : > { %10734 = vmatmul.msk.f32.gmra.mxu3 %vm796_vm3, %v10979_v7 }
 0x7c7   : > { %v14146_v14 = vpop.f32.mrf.mxu2 }
 0x7c8   : > { %v14148_v61 = vpop.f32.mrf.mxu3 }
 0x7cc   : > { %10719 = vmatmul.msk.f32.gmra.mxu2 %vm796_vm3, %v13724_v2 }
 0x7cd   : > { %10735 = vmatmul.msk.f32.gmra.mxu3 %vm796_vm3, %v13726_v19 }
 0x7cf   : > { %v14155_v51 = vpop.f32.mrf.mxu2 }
 0x7d0   : > { %v14157_v10 = vpop.f32.mrf.mxu3 }
 0x7d4   : > { %10720 = vmatmul.msk.f32.gmra.mxu2 %vm796_vm3, %v13784_v37 }
 0x7d5   : > { %10736 = vmatmul.msk.f32.gmra.mxu3 %vm796_vm3, %v13786_v50 }
 0x7d7   : > { %v14163_v40 = vpop.f32.mrf.mxu2 }
 0x7d8   : > { %15765 = vst [vmem:[#allocation65_spill] sm:$0xff] %v14163_v40  ;;  %v14165_v7 = vpop.f32.mrf.mxu3  ;;  %v14183_v40 = vld [vmem:[#allocation4 + $0x87] sm:$0xff] }
 0x7dc   : > { %10721 = vmatmul.msk.f32.gmra.mxu2 %vm796_vm3, %v13826_v53 }
 0x7dd   : > { %10737 = vmatmul.msk.f32.gmra.mxu3 %vm796_vm3, %v13828_v24 }
 0x7df   : > { %v14171_v2 = vpop.f32.mrf.mxu2 }
 0x7e0   : > { %15766 = vst [vmem:[#allocation67_spill] sm:$0xff] %v14171_v2  ;;  %v14173_v19 = vpop.f32.mrf.mxu3 }
 0x7e1   : > { %15767 = vst [vmem:[#allocation69_spill] sm:$0xff] %v14173_v19 }
 0x7e4   : > { %10722 = vmatmul.msk.f32.gmra.mxu2 %vm796_vm3, %v13864_v21 }
 0x7e5   : > { %10738 = vmatmul.msk.f32.gmra.mxu3 %vm796_vm3, %v13866_v42  ;;  %v7958_v42 = vld [vmem:[%s13700_s20 + $0x48] sm:$0xff] }
 0x7e6   : > { %8027 = vmatpush.msrb.mxu1 %v7958_v42 }
 0x7e7   : > { %v14179_v37 = vpop.f32.mrf.mxu2 }
 0x7e8   : > { %15768 = vst [vmem:[#allocation22_spill] sm:$0xff] %v14179_v37  ;;  %v14181_v50 = vpop.f32.mrf.mxu3 }
 0x7e9   : > { %15769 = vst [vmem:[#allocation23_spill] sm:$0xff] %v14181_v50 }
 0x7ec   : > { %10723 = vmatmul.msk.f32.gmra.mxu2 %vm796_vm3, %v14183_v40 }
 0x7ed   : > { %10739 = vmatmul.msk.f32.gmra.mxu3 %vm796_vm3, %v7284_v12  ;;  %v6807_v12 = vadd.f32 %v13878_v59, %v13876_v46 }
 0x7ef   : > { %v6984_v24 = vpop.f32.mrf.mxu2 }
 0x7f0   : > { %v14188_v2 = vpop.f32.mrf.mxu3  ;;  %v14191_v19 = vadd.f32 %v6984_v24, %v14040_v18  ;;  %v6987_v24 = vadd.f32 %v14048_v16, %v6807_v12 }
 0x7f1   : > { %15770 = vst [vmem:[#allocation24_spill] sm:$0xff] %v14188_v2  ;;  %v6810_v2 = vadd.f32 %v13891_v17, %v13889_v6 }
 0x7f2   : > { %15771 = vst [vmem:[#allocation25_spill] sm:$0xff] %v14191_v19 }
 0x7f3   : > { %v6988_v59 = vadd.f32 %v14058_v13, %v6810_v2  ;;  %v6816_v2 = vadd.f32 %v13921_v30, %v13919_v57 }
 0x7f4   : > { %10740 = vmatmul.msk.f32.vlgmr.msra.gmra.mxu2 %vm796_vm3, %v13897_v9 }
 0x7f5   : > { %10756 = vmatmul.msk.f32.vlgmr.msrb.gmra.mxu3 %vm796_vm3, %v14052_v22 }
 0x7f7   : > { %v7221_v37 = vpop.f32.mrf.mxu2 }
 0x7f8   : > { %v7354_v50 = vpop.f32.mrf.mxu3  ;;  %v7222_v18 = vadd.f32 %v7221_v37, %v14050_v47  ;;  %v6819_v37 = vadd.f32 %v13933_v45, %v13931_v26  ;;  %v7444_v45 = vld [vmem:[#allocation4 + $0x48] sm:$0xff] }
 0x7fa   : > { %v7402_v19 = vadd.f32 %v7354_v50, %v7222_v18  ;;  %v6991_v30 = vadd.f32 %v14090_v36, %v6819_v37  ;;  %v6822_v50 = vadd.f32 %v13947_v33, %v13945_v23  ;;  %v6825_v18 = vadd.f32 %v13959_v3, %v13957_v35  ;;  %v7445_v33 = vld [vmem:[#allocation4 + $0x50] sm:$0xff] }
 0x7fc   : > { %v14206_v9 = vadd.f32 %v7402_v19, %v6987_v24  ;;  %10741 = vmatmul.msk.f32.gmra.mxu2 %vm796_vm3, %v13910_v58  ;;  %v6813_v19 = vadd.f32 %v13905_v15, %v13903_v43  ;;  %v6990_v15 = vadd.f32 %v14078_v28, %v6816_v2  ;;  %v7699_v2 = vld [vmem:[#allocation4 + $0x91] sm:$0xff] }
 0x7fd   : > { %10757 = vmatmul.msk.f32.gmra.mxu3 %vm796_vm3, %v14062_v11  ;;  %10787 = vmatmul.msk.f32.gmra.mxu0 %vm796_vm3, %v7699_v2 }
 0x7fe   : > { %v6989_v17 = vadd.f32 %v14068_v60, %v6813_v19 }
 0x7ff   : > { %v7224_v22 = vpop.f32.mrf.mxu2 }
 0x800   : > { %v7357_v42 = vpop.f32.mrf.mxu3  ;;  %v7225_v46 = vadd.f32 %v7224_v22, %v14060_v63 }
 0x802   : > { %v7403_v47 = vadd.f32 %v7357_v42, %v7225_v46  ;;  %v6828_v42 = vadd.f32 %v13971_v38, %v13969_v27  ;;  %v7446_v46 = vld [vmem:[#allocation4 + $0x58] sm:$0xff]  ;;  %v7447_v27 = vld [vmem:[#allocation4 + $0x60] sm:$0xff] }
 0x803   : > { %v7427_v38 = vld [vmem:[#allocation4 + $0x5f] sm:$0xff] }
 0x804   : > { %v14216_v16 = vadd.f32 %v7403_v47, %v6988_v59  ;;  %10742 = vmatmul.msk.f32.gmra.mxu2 %vm796_vm3, %v13925_v5  ;;  %v6994_v3 = vadd.f32 %v14119_v1, %v6828_v42  ;;  %v7957_v59 = vld [vmem:[%s13700_s20 + $0x40] sm:$0xff]  ;;  %v8209_v42 = vld [vmem:[%s13700_s20 + $0x90] sm:$0xff] }
 0x805   : > { %10758 = vmatmul.msk.f32.gmra.mxu3 %vm796_vm3, %v14072_v48  ;;  %8028 = vmatpush.msrb.mxu1 %v7957_v59  ;;  %v8207_v59 = vld [vmem:[%s13700_s20 + $0x80] sm:$0xff] }
 0x807   : > { %v7227_v58 = vpop.f32.mrf.mxu2 }
 0x808   : > { %v7360_v11 = vpop.f32.mrf.mxu3  ;;  %v7228_v6 = vadd.f32 %v7227_v58, %v14070_v54  ;;  %v7448_v58 = vld [vmem:[#allocation4 + $0x68] sm:$0xff] }
 0x80a   : > { %v7404_v63 = vadd.f32 %v7360_v11, %v7228_v6  ;;  %v7428_v11 = vld [vmem:[#allocation4 + $0x67] sm:$0xff]  ;;  %v10980_v6 = vld [vmem:[#allocation4 + $0x70] sm:$0xff] }
 0x80c   : > { %v14226_v13 = vadd.f32 %v7404_v63, %v6989_v17  ;;  %10743 = vmatmul.msk.f32.gmra.mxu2 %vm796_vm3, %v13937_v49  ;;  %v10981_v17 = vld [vmem:[#allocation4 + $0x6f] sm:$0xff] }
 0x80d   : > { %10759 = vmatmul.msk.f32.gmra.mxu3 %vm796_vm3, %v14082_v4 }
 0x80f   : > { %v7230_v5 = vpop.f32.mrf.mxu2 }
 0x810   : > { %v7363_v48 = vpop.f32.mrf.mxu3  ;;  %v7231_v43 = vadd.f32 %v7230_v5, %v14080_v8 }
 0x812   : > { %v7405_v54 = vadd.f32 %v7363_v48, %v7231_v43  ;;  %v15772_v48 = vld [vmem:[#allocation100_spill] sm:$0xff] }
 0x814   : > { %v14236_v60 = vadd.f32 %v7405_v54, %v6990_v15  ;;  %10744 = vmatmul.msk.f32.gmra.mxu2 %vm796_vm3, %v13951_v32  ;;  %v15773_v54 = vmov 0.0  }
 0x815   : > { %10760 = vmatmul.msk.f32.gmra.mxu3 %vm796_vm3, %v14094_v56  ;;  %820 = vst.msk [vmem:[#allocation6] sm:$0xff] %vm819_vm5, %v15773_v54 }
 0x816   : > { %836 = vst.msk [vmem:[#allocation5 + $0x90] sm:$0xff] %vm819_vm5, %v15773_v54 }
 0x817   : > { %v7233_v49 = vpop.f32.mrf.mxu2  ;;  %837 = vst.msk [vmem:[#allocation5 + $0x98] sm:$0xff] %vm819_vm5, %v15773_v54 }
 0x818   : > { %v7366_v4 = vpop.f32.mrf.mxu3  ;;  %v7234_v57 = vadd.f32 %v7233_v49, %v14092_v31  ;;  %v6992_v31 = vadd.f32 %v14100_v25, %v6822_v50  ;;  %v15774_v49 = vld [vmem:[#allocation101_spill] sm:$0xff]  ;;  %838 = vst.msk [vmem:[#allocation5 + $0xa0] sm:$0xff] %vm819_vm5, %v15773_v54  ;;  %v7769_v50 = vpop.f32.mrf.mxu0 }
 0x819   : > { %839 = vst.msk [vmem:[#allocation5 + $0xa8] sm:$0xff] %vm819_vm5, %v15773_v54 }
 0x81a   : > { %v7406_v8 = vadd.f32 %v7366_v4, %v7234_v57  ;;  %v7939_v57 = vld [vmem:[%s13700_s20 + $0x30] sm:$0xff] }
 0x81c   : > { %v14246_v28 = vadd.f32 %v7406_v8, %v6991_v30  ;;  %10745 = vmatmul.msk.f32.gmra.mxu2 %vm796_vm3, %v13963_v34  ;;  %v7937_v30 = vld [vmem:[%s13700_s20 + $0x20] sm:$0xff] }
 0x81d   : > { %10761 = vmatmul.msk.f32.gmra.mxu3 %vm796_vm3, %v14104_v20  ;;  %v15775_v8 = vld [vmem:[#allocation14_spill] sm:$0xff] }
 0x81f   : > { %v7236_v32 = vpop.f32.mrf.mxu2 }
 0x820   : > { %v7369_v56 = vpop.f32.mrf.mxu3  ;;  %v7237_v26 = vadd.f32 %v7236_v32, %v14102_v39  ;;  %v6993_v39 = vadd.f32 %v14110_v44, %v6825_v18  ;;  %v7936_v32 = vld [vmem:[%s13700_s20 + $0x18] sm:$0xff]  ;;  %v8212_v18 = vld [vmem:[%s13700_s20 + $0xa8] sm:$0xff] }
 0x822   : > { %v7407_v36 = vadd.f32 %v7369_v56, %v7237_v26  ;;  %v8214_v56 = vld [vmem:[%s13700_s20 + $0xb8] sm:$0xff] }
 0x823   : > { %8271 = vmatpush.msra.mxu3 %v8214_v56 }
 0x824   : > { %v14256_v12 = vadd.f32 %v7407_v36, %v6992_v31  ;;  %10746 = vmatmul.msk.f32.gmra.mxu2 %vm796_vm3, %v7444_v45  ;;  %v7935_v31 = vld [vmem:[%s13700_s20 + $0x10] sm:$0xff] }
 0x825   : > { %10762 = vmatmul.msk.f32.gmra.mxu3 %vm796_vm3, %v14114_v55  ;;  %v8213_v36 = vld [vmem:[%s13700_s20 + $0xb0] sm:$0xff] }
 0x826   : > { %8272 = vmatpush.msra.mxu3 %v8213_v36 }
 0x827   : > { %v7239_v34 = vpop.f32.mrf.mxu2 }
 0x828   : > { %v7372_v20 = vpop.f32.mrf.mxu3  ;;  %v7240_v23 = vadd.f32 %v7239_v34, %v14112_v52  ;;  %v7453_v34 = vld [vmem:[#allocation4 + $0x90] sm:$0xff]  ;;  %8273 = vmatpush.msra.mxu3 %v8212_v18 }
 0x82a   : > { %v7408_v25 = vadd.f32 %v7372_v20, %v7240_v23  ;;  %v7934_v20 = vld [vmem:[%s13700_s20 + $0x8] sm:$0xff]  ;;  %v7933_v23 = vld [vmem:[%s13700_s20] sm:$0xff] }
 0x82c   : > { %v14265_v24 = vadd.f32 %v7408_v25, %v6993_v39  ;;  %10747 = vmatmul.msk.f32.gmra.mxu2 %vm796_vm3, %v7445_v33  ;;  %v8211_v33 = vld [vmem:[%s13700_s20 + $0xa0] sm:$0xff]  ;;  %v8210_v39 = vld [vmem:[%s13700_s20 + $0x98] sm:$0xff] }
 0x82d   : > { %10763 = vmatmul.msk.f32.gmra.mxu3 %vm796_vm3, %v14124_v41  ;;  %v8391_v25 = vld [vmem:[%s13700_s20 + $0x138] sm:$0xff] }
 0x82e   : > { %8274 = vmatpush.msra.mxu3 %v8211_v33  ;;  %8448 = vmatpush.msra.mxu0 %v8391_v25  ;;  %v8366_v25 = vld [vmem:[%s13700_s20 + $0xf0] sm:$0xff] }
 0x82f   : > { %v7242_v55 = vpop.f32.mrf.mxu2 }
 0x830   : > { %v7375_v22 = vpop.f32.mrf.mxu3  ;;  %v7243_v35 = vadd.f32 %v7242_v55, %v14121_v29  ;;  %8275 = vmatpush.msra.mxu3 %v8210_v39 }
 0x832   : > { %v7409_v52 = vadd.f32 %v7375_v22, %v7243_v35  ;;  %v8390_v35 = vld [vmem:[%s13700_s20 + $0x130] sm:$0xff]  ;;  %8276 = vmatpush.msra.mxu3 %v8209_v42 }
 0x833   : > { %8449 = vmatpush.msra.mxu0 %v8390_v35 }
 0x834   : > { %v14274_v44 = vadd.f32 %v7409_v52, %v6994_v3  ;;  %10748 = vmatmul.msk.f32.gmra.mxu2 %vm796_vm3, %v7446_v46  ;;  %v7772_v3 = vpop.f32.mrf.mxu0  ;;  %v8208_v52 = vld [vmem:[%s13700_s20 + $0x88] sm:$0xff] }
 0x835   : > { %10764 = vmatmul.msk.f32.gmra.mxu3 %vm796_vm3, %v14135_v0  ;;  %v8389_v46 = vld [vmem:[%s13700_s20 + $0x128] sm:$0xff] }
 0x836   : > { %8450 = vmatpush.msra.mxu0 %v8389_v46  ;;  %8277 = vmatpush.msra.mxu3 %v8208_v52 }
 0x837   : > { %v14280_v41 = vpop.f32.mrf.mxu2 }
 0x838   : > { %v14282_v47 = vpop.f32.mrf.mxu3  ;;  %8278 = vmatpush.msra.mxu3 %v8207_v59 }
 0x83c   : > { %10749 = vmatmul.msk.f32.gmra.mxu2 %vm796_vm3, %v7447_v27  ;;  %v8388_v27 = vld [vmem:[%s13700_s20 + $0x120] sm:$0xff]  ;;  %v7775_v2 = vpop.f32.mrf.mxu0 }
 0x83d   : > { %10765 = vmatmul.msk.f32.gmra.mxu3 %vm796_vm3, %v7427_v38  ;;  %8451 = vmatpush.msra.mxu0 %v8388_v27  ;;  %v8387_v38 = vld [vmem:[%s13700_s20 + $0x118] sm:$0xff] }
 0x83f   : > { %v14286_v29 = vpop.f32.mrf.mxu2  ;;  %8452 = vmatpush.msra.mxu0 %v8387_v38 }
 0x840   : > { %v14288_v1 = vpop.f32.mrf.mxu3 }
 0x844   : > { %10750 = vmatmul.msk.f32.gmra.mxu2 %vm796_vm3, %v7448_v58  ;;  %v7778_v36 = vpop.f32.mrf.mxu0 }
 0x845   : > { %10766 = vmatmul.msk.f32.gmra.mxu3 %vm796_vm3, %v7428_v11 }
 0x847   : > { %v14292_v0 = vpop.f32.mrf.mxu2 }
 0x848   : > { %v14294_v19 = vpop.f32.mrf.mxu3 }
 0x84c   : > { %10751 = vmatmul.msk.f32.gmra.mxu2 %vm796_vm3, %v10980_v6  ;;  %v8386_v6 = vld [vmem:[%s13700_s20 + $0x110] sm:$0xff]  ;;  %v7781_v35 = vpop.f32.mrf.mxu0 }
 0x84d   : > { %10767 = vmatmul.msk.f32.gmra.mxu3 %vm796_vm3, %v10981_v17  ;;  %8453 = vmatpush.msra.mxu0 %v8386_v6 }
 0x84f   : > { %v14298_v63 = vpop.f32.mrf.mxu2 }
 0x850   : > { %v14300_v5 = vpop.f32.mrf.mxu3 }
 0x854   : > { %10752 = vmatmul.msk.f32.gmra.mxu2 %vm796_vm3, %v15772_v48  ;;  %v8385_v48 = vld [vmem:[%s13700_s20 + $0x108] sm:$0xff] }
 0x855   : > { %10768 = vmatmul.msk.f32.gmra.mxu3 %vm796_vm3, %v13826_v53  ;;  %v7940_v53 = vld [vmem:[%s13700_s20 + $0x38] sm:$0xff]  ;;  %8454 = vmatpush.msra.mxu0 %v8385_v48 }
 0x856   : > { %8134 = vmatpush.msrb.mxu2 %v7940_v53  ;;  %v8367_v53 = vld [vmem:[%s13700_s20 + $0xf8] sm:$0xff] }
 0x857   : > { %v14307_v43 = vpop.f32.mrf.mxu2  ;;  %8561 = vmatpush.msra.mxu1 %v8367_v53 }
 0x858   : > { %v14309_v15 = vpop.f32.mrf.mxu3  ;;  %8135 = vmatpush.msrb.mxu2 %v7939_v57  ;;  %v8384_v57 = vld [vmem:[%s13700_s20 + $0x100] sm:$0xff] }
 0x859   : > { %8455 = vmatpush.msra.mxu0 %v8384_v57  ;;  %8562 = vmatpush.msra.mxu1 %v8366_v25 }
 0x85c   : > { %10753 = vmatmul.msk.f32.gmra.mxu2 %vm796_vm3, %v15774_v49  ;;  %v14371_v49 = vld [vmem:[%s762_s2] ss:$0 sm:$0xff] }
 0x85d   : > { %10769 = vmatmul.msk.f32.gmra.mxu3 %vm796_vm3, %v13864_v21  ;;  %v7938_v21 = vld [vmem:[%s13700_s20 + $0x28] sm:$0xff] }
 0x85e   : > { %8136 = vmatpush.msrb.mxu2 %v7938_v21 }
 0x85f   : > { %v14326_v4 = vpop.f32.mrf.mxu2 }
 0x860   : > { %v14328_v37 = vpop.f32.mrf.mxu3  ;;  %8137 = vmatpush.msrb.mxu2 %v7937_v30 }
 0x862   : > { %8138 = vmatpush.msrb.mxu2 %v7936_v32 }
 0x864   : > { %10754 = vmatmul.msk.f32.gmra.mxu2 %vm796_vm3, %v15775_v8 }
 0x865   : > { %10770 = vmatmul.msk.f32.gmra.mxu3 %vm796_vm3, %v14183_v40  ;;  %v7433_v40 = vld [vmem:[#allocation4 + $0x8f] sm:$0xff]  ;;  %8139 = vmatpush.msrb.mxu2 %v7935_v31 }
 0x867   : > { %v14339_v26 = vpop.f32.mrf.mxu2  ;;  %8140 = vmatpush.msrb.mxu2 %v7934_v20 }
 0x868   : > { %v14341_v45 = vpop.f32.mrf.mxu3 }
 0x869   : > { %8141 = vmatpush.msrb.mxu2 %v7933_v23 }
 0x86c   : > { %10755 = vmatmul.msk.f32.gmra.mxu2 %vm796_vm3, %v7453_v34 }
 0x86d   : > { %10771 = vmatmul.msk.f32.gmra.mxu3 %vm796_vm3, %v7433_v40 }
 0x86f   : > { %v14353_v55 = vpop.f32.mrf.mxu2 }
 0x870   : > { %v14355_v22 = vpop.f32.mrf.mxu3 }
 0x877   : > { %v7523_v58 = vpop.f32.mrf.mxu2 }
 0x878   : > { %v7636_v11 = vpop.f32.mrf.mxu3 }
 0x879   : > { %v7637_v17 = vadd.f32 %v7636_v11, %v7523_v58 }
 0x87b   : > { %v7817_v54 = vadd.f32 %v7769_v50, %v7637_v17 }
 0x87d   : > { %v7849_v21 = vadd.f32 %v14206_v9, %v7817_v54 }
 0x87f   : > { %v7869_v30 = vadd.f32 %v14371_v49, %v7849_v21  ;;  %v7526_v8 = vpop.f32.mrf.mxu2 }
 0x880   : > { %v7639_v32 = vpop.f32.mrf.mxu3 }
 0x881   : > { %v7885_v56 = vmax.f32 %v7869_v30, 0.0  ;;  %v7640_v50 = vadd.f32 %v7639_v32, %v7526_v8 }
 0x883   : > { %7901 = vst.msk [vmem:[#allocation5 + $0x10] sm:$0xff] %vm819_vm5, %v7885_v56  ;;  %v7818_v31 = vadd.f32 %v7772_v3, %v7640_v50 }
 0x885   : > { %v7850_v34 = vadd.f32 %v14216_v16, %v7818_v31 }
 0x887   : > { %v7870_v40 = vadd.f32 %v14371_v49, %v7850_v34  ;;  %v7529_v20 = vpop.f32.mrf.mxu2 }
 0x888   : > { %v7642_v18 = vpop.f32.mrf.mxu3 }
 0x889   : > { %v7886_v23 = vmax.f32 %v7870_v40, 0.0  ;;  %v7643_v9 = vadd.f32 %v7642_v18, %v7529_v20 }
 0x88a   : > { %v7917_v33 = vld [vmem:[#allocation5 + $0x10] sm:$0xff] }
 0x88b   : > { %7902 = vst.msk [vmem:[#allocation5 + $0x18] sm:$0xff] %vm819_vm5, %v7886_v23  ;;  %v7819_v39 = vadd.f32 %v7775_v2, %v7643_v9  ;;  %10804 = vmatmul.msk.f32.vlgmr.msrb.gmra.mxu2 %vm819_vm5, %v7917_v33  ;;  %v7784_v2 = vpop.f32.mrf.mxu0 }
 0x88d   : > { %v7851_v42 = vadd.f32 %v14226_v13, %v7819_v39 }
 0x88f   : > { %v7871_v3 = vadd.f32 %v14371_v49, %v7851_v42  ;;  %v7532_v16 = vpop.f32.mrf.mxu2 }
 0x890   : > { %v7645_v52 = vpop.f32.mrf.mxu3 }
 0x891   : > { %v7887_v46 = vmax.f32 %v7871_v3, 0.0  ;;  %v7646_v59 = vadd.f32 %v7645_v52, %v7532_v16 }
 0x892   : > { %v7941_v27 = vld [vmem:[#allocation5 + $0x11] sm:$0xff] }
 0x893   : > { %v14385_v38 = vld [vmem:[#allocation5 + $0x18] sm:$0xff]  ;;  %7903 = vst.msk [vmem:[#allocation5 + $0x20] sm:$0xff] %vm819_vm5, %v7887_v46  ;;  %v7820_v11 = vadd.f32 %v7778_v36, %v7646_v59  ;;  %10788 = vmatmul.msk.f32.vlgmr.msrb.gmra.mxu1 %vm819_vm5, %v7941_v27  ;;  %v7787_v36 = vpop.f32.mrf.mxu0 }
 0x894   : > { %v8191_v58 = vld [vmem:[#allocation5 + $0x12] sm:$0xff]  ;;  %10805 = vmatmul.msk.f32.gmra.mxu2 %vm819_vm5, %v14385_v38 }
 0x895   : > { %10820 = vmatmul.msk.f32.vlgmr.msra.gmra.mxu3 %vm819_vm5, %v8191_v58  ;;  %v7852_v13 = vadd.f32 %v14236_v60, %v7820_v11  ;;  %v8365_v60 = vld [vmem:[%s13700_s20 + $0xe8] sm:$0xff] }
 0x896   : > { %8563 = vmatpush.msra.mxu1 %v8365_v60  ;;  %v15776_v60 = vld [vmem:[#allocation103_spill] sm:$0xff] }
 0x897   : > { %v7872_v6 = vadd.f32 %v14371_v49, %v7852_v13  ;;  %v7535_v17 = vpop.f32.mrf.mxu2 }
 0x898   : > { %v7648_v48 = vpop.f32.mrf.mxu3 }
 0x899   : > { %v7888_v54 = vmax.f32 %v7872_v6, 0.0  ;;  %v7649_v53 = vadd.f32 %v7648_v48, %v7535_v17 }
 0x89a   : > { %v7942_v57 = vld [vmem:[#allocation5 + $0x19] sm:$0xff] }
 0x89b   : > { %v14394_v21 = vld [vmem:[#allocation5 + $0x20] sm:$0xff]  ;;  %7904 = vst.msk [vmem:[#allocation5 + $0x28] sm:$0xff] %vm819_vm5, %v7888_v54  ;;  %v7821_v8 = vadd.f32 %v7781_v35, %v7649_v53  ;;  %10789 = vmatmul.msk.f32.gmra.mxu1 %vm819_vm5, %v7942_v57  ;;  %10836 = vmatmul.msk.f32.vlgmr.msra.gmra.mxu0 %vm819_vm5, %v7942_v57  ;;  %v7790_v46 = vpop.f32.mrf.mxu0  ;;  %v7246_v53 = vadd.f32 %v14280_v41, %v14133_v62  ;;  %v15777_v62 = vld [vmem:[#allocation102_spill] sm:$0xff] }
 0x89c   : > { %v14396_v30 = vld [vmem:[#allocation5 + $0x1a] sm:$0xff]  ;;  %10806 = vmatmul.msk.f32.gmra.mxu2 %vm819_vm5, %v14394_v21  ;;  %v6831_v41 = vadd.f32 %v15777_v62, %v15776_v60 }
 0x89d   : > { %10821 = vmatmul.msk.f32.gmra.mxu3 %vm819_vm5, %v14396_v30  ;;  %v7853_v32 = vadd.f32 %v14246_v28, %v7821_v8 }
 0x89f   : > { %v7873_v56 = vadd.f32 %v14371_v49, %v7853_v32  ;;  %v7538_v50 = vpop.f32.mrf.mxu2  ;;  %v7410_v32 = vadd.f32 %v14282_v47, %v7246_v53 }
 0x8a0   : > { %v7651_v31 = vpop.f32.mrf.mxu3 }
 0x8a1   : > { %v7889_v34 = vmax.f32 %v7873_v56, 0.0  ;;  %v7652_v40 = vadd.f32 %v7651_v31, %v7538_v50 }
 0x8a2   : > { %v14408_v20 = vld [vmem:[#allocation5 + $0x21] sm:$0xff] }
 0x8a3   : > { %v14410_v18 = vld [vmem:[#allocation5 + $0x28] sm:$0xff]  ;;  %7905 = vst.msk [vmem:[#allocation5 + $0x30] sm:$0xff] %vm819_vm5, %v7889_v34  ;;  %v7822_v9 = vadd.f32 %v7784_v2, %v7652_v40  ;;  %10790 = vmatmul.msk.f32.gmra.mxu1 %vm819_vm5, %v14408_v20  ;;  %10837 = vmatmul.msk.f32.gmra.mxu0 %vm819_vm5, %v14408_v20 }
 0x8a4   : > { %v14412_v23 = vld [vmem:[#allocation5 + $0x22] sm:$0xff]  ;;  %10807 = vmatmul.msk.f32.gmra.mxu2 %vm819_vm5, %v14410_v18 }
 0x8a5   : > { %10822 = vmatmul.msk.f32.gmra.mxu3 %vm819_vm5, %v14412_v23  ;;  %v7854_v28 = vadd.f32 %v14256_v12, %v7822_v9  ;;  %v8364_v12 = vld [vmem:[%s13700_s20 + $0xe0] sm:$0xff] }
 0x8a6   : > { %8564 = vmatpush.msra.mxu1 %v8364_v12  ;;  %v15781_v12 = vld [vmem:[#allocation41_spill] sm:$0xff] }
 0x8a7   : > { %v7874_v33 = vadd.f32 %v14371_v49, %v7854_v28  ;;  %v7541_v39 = vpop.f32.mrf.mxu2 }
 0x8a8   : > { %v7654_v25 = vpop.f32.mrf.mxu3 }
 0x8a9   : > { %v7890_v42 = vmax.f32 %v7874_v33, 0.0  ;;  %v7655_v35 = vadd.f32 %v7654_v25, %v7541_v39  ;;  %v15779_v25 = vld [vmem:[#allocation63_spill] sm:$0xff] }
 0x8aa   : > { %v14425_v3 = vld [vmem:[#allocation5 + $0x29] sm:$0xff] }
 0x8ab   : > { %v14427_v16 = vld [vmem:[#allocation5 + $0x30] sm:$0xff]  ;;  %7906 = vst.msk [vmem:[#allocation5 + $0x38] sm:$0xff] %vm819_vm5, %v7890_v42  ;;  %v7823_v59 = vadd.f32 %v7787_v36, %v7655_v35  ;;  %10791 = vmatmul.msk.f32.gmra.mxu1 %vm819_vm5, %v14425_v3  ;;  %10838 = vmatmul.msk.f32.gmra.mxu0 %vm819_vm5, %v14425_v3  ;;  %v15778_v36 = vld [vmem:[#allocation15_spill] sm:$0xff]  ;;  %v7249_v42 = vadd.f32 %v14286_v29, %v15779_v25  ;;  %v8363_v35 = vld [vmem:[%s13700_s20 + $0xd8] sm:$0xff] }
 0x8ac   : > { %v14429_v52 = vld [vmem:[#allocation5 + $0x2a] sm:$0xff]  ;;  %10808 = vmatmul.msk.f32.gmra.mxu2 %vm819_vm5, %v14427_v16  ;;  %v6995_v34 = vadd.f32 %v15778_v36, %v6831_v41  ;;  %8565 = vmatpush.msra.mxu1 %v8363_v35  ;;  %v15780_v29 = vld [vmem:[#allocation8_spill] sm:$0xff]  ;;  %v15784_v36 = vld [vmem:[#allocation43_spill] sm:$0xff] }
 0x8ad   : > { %10823 = vmatmul.msk.f32.gmra.mxu3 %vm819_vm5, %v14429_v52  ;;  %v7855_v27 = vadd.f32 %v14265_v24, %v7823_v59  ;;  %v7793_v24 = vpop.f32.mrf.mxu0 }
 0x8af   : > { %v7875_v58 = vadd.f32 %v14371_v49, %v7855_v27  ;;  %v7544_v11 = vpop.f32.mrf.mxu2  ;;  %v6834_v27 = vadd.f32 %v15781_v12, %v15780_v29  ;;  %v7255_v29 = vadd.f32 %v14298_v63, %v14157_v10  ;;  %v15785_v10 = vld [vmem:[#allocation53_spill] sm:$0xff]  ;;  %v15786_v63 = vld [vmem:[#allocation10_spill] sm:$0xff] }
 0x8b0   : > { %v7657_v13 = vpop.f32.mrf.mxu3 }
 0x8b1   : > { %v7891_v6 = vmax.f32 %v7875_v58, 0.0  ;;  %v7658_v17 = vadd.f32 %v7657_v13, %v7544_v11  ;;  %v7411_v58 = vadd.f32 %v14288_v1, %v7249_v42 }
 0x8b2   : > { %v14443_v48 = vld [vmem:[#allocation5 + $0x31] sm:$0xff] }
 0x8b3   : > { %v14445_v2 = vld [vmem:[#allocation5 + $0x38] sm:$0xff]  ;;  %7907 = vst.msk [vmem:[#allocation5 + $0x40] sm:$0xff] %vm819_vm5, %v7891_v6  ;;  %v7824_v57 = vadd.f32 %v7790_v46, %v7658_v17  ;;  %10792 = vmatmul.msk.f32.gmra.mxu1 %vm819_vm5, %v14443_v48  ;;  %10839 = vmatmul.msk.f32.gmra.mxu0 %vm819_vm5, %v14443_v48  ;;  %v15782_v17 = vld [vmem:[#allocation16_spill] sm:$0xff] }
 0x8b4   : > { %v14447_v54 = vld [vmem:[#allocation5 + $0x32] sm:$0xff]  ;;  %10809 = vmatmul.msk.f32.gmra.mxu2 %vm819_vm5, %v14445_v2  ;;  %v6996_v53 = vadd.f32 %v15782_v17, %v6834_v27 }
 0x8b5   : > { %10824 = vmatmul.msk.f32.gmra.mxu3 %vm819_vm5, %v14447_v54  ;;  %v7856_v8 = vadd.f32 %v14274_v44, %v7824_v57  ;;  %v7841_v44 = vadd.f32 %v7410_v32, %v6995_v34  ;;  %v7796_v46 = vpop.f32.mrf.mxu0  ;;  %v7252_v32 = vadd.f32 %v14292_v0, %v14148_v61 }
 0x8b6   : > { %v7842_v41 = vadd.f32 %v7411_v58, %v6996_v53  ;;  %v6840_v58 = vadd.f32 %v15786_v63, %v15785_v10  ;;  %v8361_v10 = vld [vmem:[%s13700_s20 + $0xc8] sm:$0xff]  ;;  %v8641_v63 = vld [vmem:[%s13700_s20 + $0x178] sm:$0xff] }
 0x8b7   : > { %v7876_v56 = vadd.f32 %v14371_v49, %v7856_v8  ;;  %v7547_v50 = vpop.f32.mrf.mxu2  ;;  %v7412_v0 = vadd.f32 %v14294_v19, %v7252_v32  ;;  %8698 = vmatpush.msra.mxu2 %v8641_v63 }
 0x8b8   : > { %v7660_v31 = vpop.f32.mrf.mxu3  ;;  %v6998_v53 = vadd.f32 %v14155_v51, %v6840_v58  ;;  %v8640_v58 = vld [vmem:[%s13700_s20 + $0x170] sm:$0xff] }
 0x8b9   : > { %v7892_v40 = vmax.f32 %v7876_v56, 0.0  ;;  %v7661_v9 = vadd.f32 %v7660_v31, %v7547_v50  ;;  %v15783_v31 = vld [vmem:[#allocation9_spill] sm:$0xff]  ;;  %8699 = vmatpush.msra.mxu2 %v8640_v58 }
 0x8ba   : > { %v14466_v28 = vld [vmem:[#allocation5 + $0x39] sm:$0xff]  ;;  %v6837_v61 = vadd.f32 %v15784_v36, %v15783_v31 }
 0x8bb   : > { %v14468_v33 = vld [vmem:[#allocation5 + $0x40] sm:$0xff]  ;;  %7908 = vst.msk [vmem:[#allocation5 + $0x48] sm:$0xff] %vm819_vm5, %v7892_v40  ;;  %v7825_v47 = vadd.f32 %v7793_v24, %v7661_v9  ;;  %10793 = vmatmul.msk.f32.gmra.mxu1 %vm819_vm5, %v14466_v28  ;;  %10840 = vmatmul.msk.f32.gmra.mxu0 %vm819_vm5, %v14466_v28 }
 0x8bc   : > { %v14470_v39 = vld [vmem:[#allocation5 + $0x3a] sm:$0xff]  ;;  %10810 = vmatmul.msk.f32.gmra.mxu2 %vm819_vm5, %v14468_v33 }
 0x8bd   : > { %10825 = vmatmul.msk.f32.gmra.mxu3 %vm819_vm5, %v14470_v39  ;;  %v7857_v59 = vadd.f32 %v7841_v44, %v7825_v47  ;;  %v7799_v56 = vpop.f32.mrf.mxu0  ;;  %v6997_v44 = vadd.f32 %v14146_v14, %v6837_v61  ;;  %v8362_v14 = vld [vmem:[%s13700_s20 + $0xd0] sm:$0xff]  ;;  %v15788_v61 = vld [vmem:[#allocation11_spill] sm:$0xff] }
 0x8be   : > { %8566 = vmatpush.msra.mxu1 %v8362_v14  ;;  %v15787_v36 = vld [vmem:[#allocation104_spill] sm:$0xff] }
 0x8bf   : > { %v7877_v11 = vadd.f32 %v14371_v49, %v7857_v59  ;;  %v7550_v13 = vpop.f32.mrf.mxu2  ;;  %v7843_v59 = vadd.f32 %v7412_v0, %v6997_v44 }
 0x8c0   : > { %v7663_v6 = vpop.f32.mrf.mxu3  ;;  %8567 = vmatpush.msra.mxu1 %v8361_v10  ;;  %v15796_v10 = vld [vmem:[#allocation51_spill] sm:$0xff] }
 0x8c1   : > { %v7893_v57 = vmax.f32 %v7877_v11, 0.0  ;;  %v7664_v24 = vadd.f32 %v7663_v6, %v7550_v13  ;;  %v7413_v11 = vadd.f32 %v14300_v5, %v7255_v29 }
 0x8c2   : > { %v14489_v8 = vld [vmem:[#allocation5 + $0x41] sm:$0xff] }
 0x8c3   : > { %v14491_v60 = vld [vmem:[#allocation5 + $0x48] sm:$0xff]  ;;  %7909 = vst.msk [vmem:[#allocation5 + $0x50] sm:$0xff] %vm819_vm5, %v7893_v57  ;;  %v7826_v1 = vadd.f32 %v7796_v46, %v7664_v24  ;;  %10794 = vmatmul.msk.f32.gmra.mxu1 %vm819_vm5, %v14489_v8  ;;  %10841 = vmatmul.msk.f32.gmra.mxu0 %vm819_vm5, %v14489_v8 }
 0x8c4   : > { %v14493_v62 = vld [vmem:[#allocation5 + $0x42] sm:$0xff]  ;;  %10811 = vmatmul.msk.f32.gmra.mxu2 %vm819_vm5, %v14491_v60 }
 0x8c5   : > { %10826 = vmatmul.msk.f32.gmra.mxu3 %vm819_vm5, %v14493_v62  ;;  %v7858_v50 = vadd.f32 %v7842_v41, %v7826_v1  ;;  %v7802_v12 = vpop.f32.mrf.mxu0 }
 0x8c7   : > { %v7878_v34 = vadd.f32 %v14371_v49, %v7858_v50  ;;  %v7553_v40 = vpop.f32.mrf.mxu2  ;;  %v7258_v50 = vadd.f32 %v14307_v43, %v14165_v7  ;;  %v6843_v7 = vadd.f32 %v15788_v61, %v15787_v36  ;;  %v8638_v61 = vld [vmem:[%s13700_s20 + $0x160] sm:$0xff] }
 0x8c8   : > { %v7666_v9 = vpop.f32.mrf.mxu3 }
 0x8c9   : > { %v7894_v25 = vmax.f32 %v7878_v34, 0.0  ;;  %v7667_v42 = vadd.f32 %v7666_v9, %v7553_v40  ;;  %v7414_v43 = vadd.f32 %v14309_v15, %v7258_v50  ;;  %v15789_v9 = vld [vmem:[#allocation65_spill] sm:$0xff] }
 0x8ca   : > { %v14511_v47 = vld [vmem:[#allocation5 + $0x49] sm:$0xff]  ;;  %v6999_v44 = vadd.f32 %v15789_v9, %v6843_v7 }
 0x8cb   : > { %v14513_v35 = vld [vmem:[#allocation5 + $0x50] sm:$0xff]  ;;  %7910 = vst.msk [vmem:[#allocation5 + $0x58] sm:$0xff] %vm819_vm5, %v7894_v25  ;;  %v7827_v19 = vadd.f32 %v7799_v56, %v7667_v42  ;;  %10795 = vmatmul.msk.f32.gmra.mxu1 %vm819_vm5, %v14511_v47  ;;  %10842 = vmatmul.msk.f32.gmra.mxu0 %vm819_vm5, %v14511_v47  ;;  %v7844_v56 = vadd.f32 %v7413_v11, %v6998_v53  ;;  %v15790_v15 = vld [vmem:[#allocation69_spill] sm:$0xff] }
 0x8cc   : > { %v14515_v46 = vld [vmem:[#allocation5 + $0x4a] sm:$0xff]  ;;  %10812 = vmatmul.msk.f32.gmra.mxu2 %vm819_vm5, %v14513_v35  ;;  %v7845_v14 = vadd.f32 %v7414_v43, %v6999_v44 }
 0x8cd   : > { %10827 = vmatmul.msk.f32.gmra.mxu3 %vm819_vm5, %v14515_v46  ;;  %v7859_v27 = vadd.f32 %v7843_v59, %v7827_v19  ;;  %v7805_v51 = vpop.f32.mrf.mxu0  ;;  %v8360_v44 = vld [vmem:[%s13700_s20 + $0xc0] sm:$0xff] }
 0x8ce   : > { %8568 = vmatpush.msra.mxu1 %v8360_v44 }
 0x8cf   : > { %v7879_v13 = vadd.f32 %v14371_v49, %v7859_v27  ;;  %v7556_v6 = vpop.f32.mrf.mxu2 }
 0x8d0   : > { %v7669_v17 = vpop.f32.mrf.mxu3 }
 0x8d1   : > { %v7895_v57 = vmax.f32 %v7879_v13, 0.0  ;;  %v7670_v24 = vadd.f32 %v7669_v17, %v7556_v6  ;;  %v8639_v13 = vld [vmem:[%s13700_s20 + $0x168] sm:$0xff]  ;;  %v15791_v6 = vld [vmem:[#allocation13_spill] sm:$0xff]  ;;  %v15792_v17 = vld [vmem:[#allocation12_spill] sm:$0xff] }
 0x8d2   : > { %v14534_v41 = vld [vmem:[#allocation5 + $0x51] sm:$0xff]  ;;  %v6846_v53 = vadd.f32 %v15792_v17, %v15791_v6  ;;  %8700 = vmatpush.msra.mxu2 %v8639_v13 }
 0x8d3   : > { %v14536_v32 = vld [vmem:[#allocation5 + $0x58] sm:$0xff]  ;;  %7911 = vst.msk [vmem:[#allocation5 + $0x60] sm:$0xff] %vm819_vm5, %v7895_v57  ;;  %v7828_v5 = vadd.f32 %v7802_v12, %v7670_v24  ;;  %10796 = vmatmul.msk.f32.gmra.mxu1 %vm819_vm5, %v14534_v41  ;;  %10843 = vmatmul.msk.f32.gmra.mxu0 %vm819_vm5, %v14534_v41  ;;  %v7261_v12 = vadd.f32 %v14326_v4, %v15790_v15  ;;  %v8817_v15 = vld [vmem:[%s13700_s20 + $0x1f0] sm:$0xff]  ;;  %v15797_v17 = vld [vmem:[#allocation22_spill] sm:$0xff] }
 0x8d4   : > { %v14538_v1 = vld [vmem:[#allocation5 + $0x52] sm:$0xff]  ;;  %10813 = vmatmul.msk.f32.gmra.mxu2 %vm819_vm5, %v14536_v32 }
 0x8d5   : > { %10828 = vmatmul.msk.f32.gmra.mxu3 %vm819_vm5, %v14538_v1  ;;  %v7860_v31 = vadd.f32 %v7844_v56, %v7828_v5  ;;  %v7808_v4 = vpop.f32.mrf.mxu0  ;;  %v7415_v57 = vadd.f32 %v14328_v37, %v7261_v12  ;;  %v15793_v5 = vld [vmem:[#allocation67_spill] sm:$0xff]  ;;  %8701 = vmatpush.msra.mxu2 %v8638_v61  ;;  %v8636_v12 = vld [vmem:[%s13700_s20 + $0x150] sm:$0xff] }
 0x8d7   : > { %v7880_v0 = vadd.f32 %v14371_v49, %v7860_v31  ;;  %v7559_v34 = vpop.f32.mrf.mxu2 }
 0x8d8   : > { %v7672_v40 = vpop.f32.mrf.mxu3 }
 0x8d9   : > { %v7896_v25 = vmax.f32 %v7880_v0, 0.0  ;;  %v7673_v42 = vadd.f32 %v7672_v40, %v7559_v34  ;;  %v15794_v34 = vld [vmem:[#allocation23_spill] sm:$0xff] }
 0x8da   : > { %v14556_v59 = vld [vmem:[#allocation5 + $0x59] sm:$0xff]  ;;  %v7264_v40 = vadd.f32 %v14339_v26, %v15794_v34  ;;  %v8818_v26 = vld [vmem:[%s13700_s20 + $0x1f8] sm:$0xff]  ;;  %v8634_v34 = vld [vmem:[%s13700_s20 + $0x140] sm:$0xff] }
 0x8db   : > { %v14558_v29 = vld [vmem:[#allocation5 + $0x60] sm:$0xff]  ;;  %7912 = vst.msk [vmem:[#allocation5 + $0x68] sm:$0xff] %vm819_vm5, %v7896_v25  ;;  %v7829_v27 = vadd.f32 %v7805_v51, %v7673_v42  ;;  %10797 = vmatmul.msk.f32.gmra.mxu1 %vm819_vm5, %v14556_v59  ;;  %10844 = vmatmul.msk.f32.gmra.mxu0 %vm819_vm5, %v14556_v59  ;;  %v7000_v51 = vadd.f32 %v15793_v5, %v6846_v53  ;;  %v8637_v25 = vld [vmem:[%s13700_s20 + $0x158] sm:$0xff] }
 0x8dc   : > { %v14560_v19 = vld [vmem:[#allocation5 + $0x5a] sm:$0xff]  ;;  %10814 = vmatmul.msk.f32.gmra.mxu2 %vm819_vm5, %v14558_v29  ;;  %8875 = vmatpush.msrb.mxu3 %v8818_v26  ;;  %v7416_v58 = vadd.f32 %v14341_v45, %v7264_v40  ;;  %v8814_v40 = vld [vmem:[%s13700_s20 + $0x1d8] sm:$0xff] }
 0x8dd   : > { %10829 = vmatmul.msk.f32.gmra.mxu3 %vm819_vm5, %v14560_v19  ;;  %v7861_v11 = vadd.f32 %v7845_v14, %v7829_v27  ;;  %v7846_v37 = vadd.f32 %v7415_v57, %v7000_v51  ;;  %v7811_v14 = vpop.f32.mrf.mxu0  ;;  %v15795_v27 = vld [vmem:[#allocation56_spill] sm:$0xff]  ;;  %8702 = vmatpush.msra.mxu2 %v8637_v25 }
 0x8de   : > { %v6849_v63 = vadd.f32 %v15796_v10, %v15795_v27  ;;  %8876 = vmatpush.msrb.mxu3 %v8817_v15  ;;  %v8793_v25 = vld [vmem:[%s13700_s20 + $0x1b0] sm:$0xff] }
 0x8df   : > { %v7881_v24 = vadd.f32 %v14371_v49, %v7861_v11  ;;  %v7562_v56 = vpop.f32.mrf.mxu2  ;;  %v8816_v11 = vld [vmem:[%s13700_s20 + $0x1e8] sm:$0xff]  ;;  %8703 = vmatpush.msra.mxu2 %v8636_v12 }
 0x8e0   : > { %v7675_v50 = vpop.f32.mrf.mxu3  ;;  %v7001_v53 = vadd.f32 %v15797_v17, %v6849_v63  ;;  %8877 = vmatpush.msrb.mxu3 %v8816_v11  ;;  %v8812_v63 = vld [vmem:[%s13700_s20 + $0x1c8] sm:$0xff] }
 0x8e1   : > { %v7897_v31 = vmax.f32 %v7881_v24, 0.0  ;;  %v7676_v36 = vadd.f32 %v7675_v50, %v7562_v56  ;;  %v8635_v56 = vld [vmem:[%s13700_s20 + $0x148] sm:$0xff]  ;;  %v8815_v50 = vld [vmem:[%s13700_s20 + $0x1e0] sm:$0xff] }
 0x8e2   : > { %v14583_v7 = vld [vmem:[#allocation5 + $0x61] sm:$0xff]  ;;  %8704 = vmatpush.msra.mxu2 %v8635_v56  ;;  %8878 = vmatpush.msrb.mxu3 %v8815_v50 }
 0x8e3   : > { %v14585_v43 = vld [vmem:[#allocation5 + $0x68] sm:$0xff]  ;;  %7913 = vst.msk [vmem:[#allocation5 + $0x70] sm:$0xff] %vm819_vm5, %v7897_v31  ;;  %v7830_v9 = vadd.f32 %v7808_v4, %v7676_v36  ;;  %10798 = vmatmul.msk.f32.gmra.mxu1 %vm819_vm5, %v14583_v7  ;;  %10845 = vmatmul.msk.f32.gmra.mxu0 %vm819_vm5, %v14583_v7  ;;  %v7847_v31 = vadd.f32 %v7416_v58, %v7001_v53  ;;  %v15798_v36 = vld [vmem:[#allocation24_spill] sm:$0xff]  ;;  %v8792_v58 = vld [vmem:[%s13700_s20 + $0x1a8] sm:$0xff] }
 0x8e4   : > { %v14587_v0 = vld [vmem:[#allocation5 + $0x62] sm:$0xff]  ;;  %10815 = vmatmul.msk.f32.gmra.mxu2 %vm819_vm5, %v14585_v43  ;;  %v7267_v61 = vadd.f32 %v14353_v55, %v15798_v36  ;;  %8879 = vmatpush.msrb.mxu3 %v8814_v40  ;;  %v8791_v53 = vld [vmem:[%s13700_s20 + $0x1a0] sm:$0xff] }
 0x8e5   : > { %10830 = vmatmul.msk.f32.gmra.mxu3 %vm819_vm5, %v14587_v0  ;;  %v7862_v42 = vadd.f32 %v7846_v37, %v7830_v9  ;;  %v8794_v9 = vld [vmem:[%s13700_s20 + $0x1b8] sm:$0xff]  ;;  %v8813_v55 = vld [vmem:[%s13700_s20 + $0x1d0] sm:$0xff]  ;;  %8705 = vmatpush.msra.mxu2 %v8634_v34 }
 0x8e6   : > { %8988 = vmatpush.msrb.mxu0 %v8794_v9  ;;  %v7417_v26 = vadd.f32 %v14355_v22, %v7267_v61  ;;  %8880 = vmatpush.msrb.mxu3 %v8813_v55  ;;  %v9068_v56 = vld [vmem:[%s13700_s20 + $0x238] sm:$0xff]  ;;  %v8789_v36 = vld [vmem:[%s13700_s20 + $0x190] sm:$0xff] }
 0x8e7   : > { %v7882_v4 = vadd.f32 %v14371_v49, %v7862_v42  ;;  %v7565_v13 = vpop.f32.mrf.mxu2  ;;  %v8790_v50 = vld [vmem:[%s13700_s20 + $0x198] sm:$0xff]  ;;  %9125 = vmatpush.msrb.mxu1 %v9068_v56 }
 0x8e8   : > { %v7678_v6 = vpop.f32.mrf.mxu3  ;;  %8989 = vmatpush.msrb.mxu0 %v8793_v25  ;;  %8881 = vmatpush.msrb.mxu3 %v8812_v63 }
 0x8e9   : > { %v7898_v57 = vmax.f32 %v7882_v4, 0.0  ;;  %v7679_v24 = vadd.f32 %v7678_v6, %v7565_v13  ;;  %v15799_v13 = vld [vmem:[#allocation25_spill] sm:$0xff] }
 0x8ea   : > { %v14613_v5 = vld [vmem:[#allocation5 + $0x69] sm:$0xff]  ;;  %8990 = vmatpush.msrb.mxu0 %v8792_v58  ;;  %v7848_v6 = vadd.f32 %v7417_v26, %v15799_v13  ;;  %v9067_v26 = vld [vmem:[%s13700_s20 + $0x230] sm:$0xff] }
 0x8eb   : > { %v14615_v45 = vld [vmem:[#allocation5 + $0x70] sm:$0xff]  ;;  %7914 = vst.msk [vmem:[#allocation5 + $0x78] sm:$0xff] %vm819_vm5, %v7898_v57  ;;  %v7831_v37 = vadd.f32 %v7811_v14, %v7679_v24  ;;  %10799 = vmatmul.msk.f32.gmra.mxu1 %vm819_vm5, %v14613_v5  ;;  %10846 = vmatmul.msk.f32.gmra.mxu0 %vm819_vm5, %v14613_v5  ;;  %v7814_v14 = vpop.f32.mrf.mxu0 }
 0x8ec   : > { %v14617_v51 = vld [vmem:[#allocation5 + $0x6a] sm:$0xff]  ;;  %10816 = vmatmul.msk.f32.gmra.mxu2 %vm819_vm5, %v14615_v45  ;;  %8991 = vmatpush.msrb.mxu0 %v8791_v53 }
 0x8ed   : > { %10831 = vmatmul.msk.f32.gmra.mxu3 %vm819_vm5, %v14617_v51  ;;  %v7863_v44 = vadd.f32 %v7847_v31, %v7831_v37  ;;  %v8811_v57 = vld [vmem:[%s13700_s20 + $0x1c0] sm:$0xff]  ;;  %v8788_v37 = vld [vmem:[%s13700_s20 + $0x188] sm:$0xff]  ;;  %9126 = vmatpush.msrb.mxu1 %v9067_v26 }
 0x8ee   : > { %8882 = vmatpush.msrb.mxu3 %v8811_v57  ;;  %8992 = vmatpush.msrb.mxu0 %v8790_v50 }
 0x8ef   : > { %v7883_v42 = vadd.f32 %v14371_v49, %v7863_v44  ;;  %v7568_v15 = vpop.f32.mrf.mxu2 }
 0x8f0   : > { %v7681_v12 = vpop.f32.mrf.mxu3  ;;  %8993 = vmatpush.msrb.mxu0 %v8789_v36 }
 0x8f1   : > { %v7899_v27 = vmax.f32 %v7883_v42, 0.0  ;;  %v7682_v10 = vadd.f32 %v7681_v12, %v7568_v15 }
 0x8f2   : > { %v14639_v4 = vld [vmem:[#allocation5 + $0x71] sm:$0xff]  ;;  %8994 = vmatpush.msrb.mxu0 %v8788_v37 }
 0x8f3   : > { %v14641_v11 = vld [vmem:[#allocation5 + $0x78] sm:$0xff]  ;;  %7915 = vst.msk [vmem:[#allocation5 + $0x80] sm:$0xff] %vm819_vm5, %v7899_v27  ;;  %v7832_v17 = vadd.f32 %v7814_v14, %v7682_v10  ;;  %10800 = vmatmul.msk.f32.gmra.mxu1 %vm819_vm5, %v14639_v4  ;;  %10847 = vmatmul.msk.f32.gmra.mxu0 %vm819_vm5, %v14639_v4 }
 0x8f4   : > { %v14643_v22 = vld [vmem:[#allocation5 + $0x72] sm:$0xff]  ;;  %10817 = vmatmul.msk.f32.gmra.mxu2 %vm819_vm5, %v14641_v11 }
 0x8f5   : > { %10832 = vmatmul.msk.f32.gmra.mxu3 %vm819_vm5, %v14643_v22  ;;  %v7864_v24 = vadd.f32 %v7848_v6, %v7832_v17  ;;  %v14705_v27 = vld [vmem:[#allocation5 + $0x91] sm:$0xff] }
 0x8f7   : > { %v7884_v31 = vadd.f32 %v14371_v49, %v7864_v24  ;;  %v8787_v49 = vld [vmem:[%s13700_s20 + $0x180] sm:$0xff] }
 0x8f8   : > { %8995 = vmatpush.msrb.mxu0 %v8787_v49 }
 0x8f9   : > { %v7900_v61 = vmax.f32 %v7884_v31, 0.0 }
 0x8fa   : > { %v14662_v34 = vld [vmem:[#allocation5 + $0x79] sm:$0xff] }
 0x8fb   : > { %v14664_v40 = vld [vmem:[#allocation5 + $0x80] sm:$0xff]  ;;  %7916 = vst.msk [vmem:[#allocation5 + $0x88] sm:$0xff] %vm819_vm5, %v7900_v61  ;;  %10801 = vmatmul.msk.f32.gmra.mxu1 %vm819_vm5, %v14662_v34  ;;  %10848 = vmatmul.msk.f32.gmra.mxu0 %vm819_vm5, %v14662_v34 }
 0x8fc   : > { %v14666_v9 = vld [vmem:[#allocation5 + $0x7a] sm:$0xff]  ;;  %10818 = vmatmul.msk.f32.gmra.mxu2 %vm819_vm5, %v14664_v40 }
 0x8fd   : > { %10833 = vmatmul.msk.f32.gmra.mxu3 %vm819_vm5, %v14666_v9 }
 0x902   : > { %v14678_v44 = vld [vmem:[#allocation5 + $0x81] sm:$0xff]  ;;  %v14693_v42 = vld [vmem:[#allocation5 + $0x89] sm:$0xff] }
 0x903   : > { %v14680_v55 = vld [vmem:[#allocation5 + $0x88] sm:$0xff]  ;;  %10802 = vmatmul.msk.f32.gmra.mxu1 %vm819_vm5, %v14678_v44  ;;  %10849 = vmatmul.msk.f32.gmra.mxu0 %vm819_vm5, %v14678_v44 }
 0x904   : > { %v14682_v25 = vld [vmem:[#allocation5 + $0x82] sm:$0xff]  ;;  %10819 = vmatmul.msk.f32.gmra.mxu2 %vm819_vm5, %v14680_v55  ;;  %v14697_v14 = vld [vmem:[#allocation5 + $0x8a] sm:$0xff] }
 0x905   : > { %10834 = vmatmul.msk.f32.gmra.mxu3 %vm819_vm5, %v14682_v25 }
 0x90b   : > { %10803 = vmatmul.msk.f32.gmra.mxu1 %vm819_vm5, %v14693_v42  ;;  %10850 = vmatmul.msk.f32.gmra.mxu0 %vm819_vm5, %v14693_v42 }
 0x90c   : > { %10868 = vmatmul.msk.f32.vlgmr.msra.gmra.mxu2 %vm819_vm5, %v14396_v30  ;;  %v9066_v30 = vld [vmem:[%s13700_s20 + $0x228] sm:$0xff] }
 0x90d   : > { %10835 = vmatmul.msk.f32.gmra.mxu3 %vm819_vm5, %v14697_v14  ;;  %9127 = vmatpush.msrb.mxu1 %v9066_v30 }
 0x90e   : > { %v8143_v15 = vpop.f32.mrf.mxu2 }
 0x910   : > { %v8030_v12 = vpop.f32.mrf.mxu1 }
 0x911   : > { %v8144_v10 = vadd.f32 %v8143_v15, %v8030_v12 }
 0x913   : > { %10852 = vmatmul.msk.f32.vlgmr.msra.gmra.mxu1 %vm819_vm5, %v14385_v38  ;;  %10851 = vmatmul.msk.f32.gmra.mxu0 %vm819_vm5, %v14705_v27 }
 0x914   : > { %10869 = vmatmul.msk.f32.gmra.mxu2 %vm819_vm5, %v14412_v23 }
 0x915   : > { %10884 = vmatmul.msk.f32.vlgmr.msrb.gmra.mxu3 %vm819_vm5, %v14408_v20 }
 0x917   : > { %v8146_v63 = vpop.f32.mrf.mxu2 }
 0x918   : > { %v8280_v58 = vpop.f32.mrf.mxu3  ;;  %v8033_v6 = vpop.f32.mrf.mxu1 }
 0x919   : > { %v14716_v13 = vadd.f32 %v8280_v58, %v8144_v10  ;;  %v8147_v38 = vadd.f32 %v8146_v63, %v8033_v6 }
 0x91b   : > { %10853 = vmatmul.msk.f32.gmra.mxu1 %vm819_vm5, %v14394_v21  ;;  %10900 = vmatmul.msk.f32.vlgmr.msrb.gmra.mxu0 %vm819_vm5, %v14394_v21 }
 0x91c   : > { %10870 = vmatmul.msk.f32.gmra.mxu2 %vm819_vm5, %v14429_v52 }
 0x91d   : > { %10885 = vmatmul.msk.f32.gmra.mxu3 %vm819_vm5, %v14425_v3  ;;  %v9065_v3 = vld [vmem:[%s13700_s20 + $0x220] sm:$0xff] }
 0x91e   : > { %9128 = vmatpush.msrb.mxu1 %v9065_v3 }
 0x91f   : > { %v8149_v20 = vpop.f32.mrf.mxu2 }
 0x920   : > { %v8283_v17 = vpop.f32.mrf.mxu3  ;;  %v8036_v57 = vpop.f32.mrf.mxu1 }
 0x921   : > { %v14726_v53 = vadd.f32 %v8283_v17, %v8147_v38  ;;  %v8150_v21 = vadd.f32 %v8149_v20, %v8036_v57 }
 0x923   : > { %10854 = vmatmul.msk.f32.gmra.mxu1 %vm819_vm5, %v14410_v18  ;;  %10901 = vmatmul.msk.f32.gmra.mxu0 %vm819_vm5, %v14410_v18 }
 0x924   : > { %10871 = vmatmul.msk.f32.gmra.mxu2 %vm819_vm5, %v14447_v54 }
 0x925   : > { %10886 = vmatmul.msk.f32.gmra.mxu3 %vm819_vm5, %v14443_v48 }
 0x927   : > { %v8152_v24 = vpop.f32.mrf.mxu2 }
 0x928   : > { %v8286_v56 = vpop.f32.mrf.mxu3  ;;  %v8039_v31 = vpop.f32.mrf.mxu1 }
 0x929   : > { %v14737_v50 = vadd.f32 %v8286_v56, %v8150_v21  ;;  %v8153_v18 = vadd.f32 %v8152_v24, %v8039_v31 }
 0x92b   : > { %10855 = vmatmul.msk.f32.gmra.mxu1 %vm819_vm5, %v14427_v16  ;;  %10902 = vmatmul.msk.f32.gmra.mxu0 %vm819_vm5, %v14427_v16 }
 0x92c   : > { %10872 = vmatmul.msk.f32.gmra.mxu2 %vm819_vm5, %v14470_v39 }
 0x92d   : > { %10887 = vmatmul.msk.f32.gmra.mxu3 %vm819_vm5, %v14466_v28  ;;  %v9064_v28 = vld [vmem:[%s13700_s20 + $0x218] sm:$0xff] }
 0x92e   : > { %9129 = vmatpush.msrb.mxu1 %v9064_v28 }
 0x92f   : > { %v8155_v48 = vpop.f32.mrf.mxu2 }
 0x930   : > { %v8289_v36 = vpop.f32.mrf.mxu3  ;;  %v8042_v37 = vpop.f32.mrf.mxu1 }
 0x931   : > { %v14747_v61 = vadd.f32 %v8289_v36, %v8153_v18  ;;  %v8156_v16 = vadd.f32 %v8155_v48, %v8042_v37 }
 0x933   : > { %10856 = vmatmul.msk.f32.gmra.mxu1 %vm819_vm5, %v14445_v2  ;;  %10903 = vmatmul.msk.f32.gmra.mxu0 %vm819_vm5, %v14445_v2 }
 0x934   : > { %10873 = vmatmul.msk.f32.gmra.mxu2 %vm819_vm5, %v14493_v62 }
 0x935   : > { %10888 = vmatmul.msk.f32.gmra.mxu3 %vm819_vm5, %v14489_v8 }
 0x937   : > { %v8158_v49 = vpop.f32.mrf.mxu2 }
 0x938   : > { %v8292_v26 = vpop.f32.mrf.mxu3  ;;  %v8045_v12 = vpop.f32.mrf.mxu1 }
 0x939   : > { %v14758_v15 = vadd.f32 %v8292_v26, %v8156_v16  ;;  %v8159_v2 = vadd.f32 %v8158_v49, %v8045_v12 }
 0x93b   : > { %10857 = vmatmul.msk.f32.gmra.mxu1 %vm819_vm5, %v14468_v33  ;;  %10904 = vmatmul.msk.f32.gmra.mxu0 %vm819_vm5, %v14468_v33 }
 0x93c   : > { %10874 = vmatmul.msk.f32.gmra.mxu2 %vm819_vm5, %v14515_v46 }
 0x93d   : > { %10889 = vmatmul.msk.f32.gmra.mxu3 %vm819_vm5, %v14511_v47  ;;  %v9063_v47 = vld [vmem:[%s13700_s20 + $0x210] sm:$0xff] }
 0x93e   : > { %9130 = vmatpush.msrb.mxu1 %v9063_v47 }
 0x93f   : > { %v8161_v8 = vpop.f32.mrf.mxu2 }
 0x940   : > { %v8295_v30 = vpop.f32.mrf.mxu3  ;;  %v8048_v63 = vpop.f32.mrf.mxu1 }
 0x941   : > { %v14768_v10 = vadd.f32 %v8295_v30, %v8159_v2  ;;  %v8162_v33 = vadd.f32 %v8161_v8, %v8048_v63 }
 0x943   : > { %10858 = vmatmul.msk.f32.gmra.mxu1 %vm819_vm5, %v14491_v60  ;;  %10905 = vmatmul.msk.f32.gmra.mxu0 %vm819_vm5, %v14491_v60  ;;  %v14793_v60 = vpop.f32.mrf.mxu0 }
 0x944   : > { %10875 = vmatmul.msk.f32.gmra.mxu2 %vm819_vm5, %v14538_v1 }
 0x945   : > { %10890 = vmatmul.msk.f32.gmra.mxu3 %vm819_vm5, %v14534_v41 }
 0x947   : > { %v14779_v58 = vpop.f32.mrf.mxu2 }
 0x948   : > { %15800 = vst [vmem:[#allocation81_spill] sm:$0xff] %v14779_v58  ;;  %v8298_v6 = vpop.f32.mrf.mxu3  ;;  %v14783_v20 = vpop.f32.mrf.mxu1 }
 0x949   : > { %v14781_v38 = vadd.f32 %v8298_v6, %v8162_v33  ;;  %15802 = vst [vmem:[#allocation33_spill] sm:$0xff] %v14783_v20  ;;  %v14875_v33 = vld [vmem:[#allocation5 + $0x92] sm:$0xff] }
 0x94b   : > { %15801 = vst [vmem:[#allocation112_spill] sm:$0xff] %v14781_v38  ;;  %10859 = vmatmul.msk.f32.gmra.mxu1 %vm819_vm5, %v14513_v35  ;;  %10906 = vmatmul.msk.f32.gmra.mxu0 %vm819_vm5, %v14513_v35  ;;  %v9062_v35 = vld [vmem:[%s13700_s20 + $0x208] sm:$0xff]  ;;  %v14812_v3 = vpop.f32.mrf.mxu0 }
 0x94c   : > { %10876 = vmatmul.msk.f32.gmra.mxu2 %vm819_vm5, %v14560_v19  ;;  %9131 = vmatpush.msrb.mxu1 %v9062_v35 }
 0x94d   : > { %10891 = vmatmul.msk.f32.gmra.mxu3 %vm819_vm5, %v14556_v59 }
 0x94f   : > { %v14795_v41 = vpop.f32.mrf.mxu2 }
 0x950   : > { %15803 = vst [vmem:[#allocation114_spill] sm:$0xff] %v14795_v41  ;;  %v14797_v17 = vpop.f32.mrf.mxu3  ;;  %v14799_v57 = vpop.f32.mrf.mxu1 }
 0x951   : > { %15804 = vst [vmem:[#allocation35_spill] sm:$0xff] %v14797_v17 }
 0x952   : > { %15805 = vst [vmem:[#allocation117_spill] sm:$0xff] %v14799_v57 }
 0x953   : > { %10860 = vmatmul.msk.f32.gmra.mxu1 %vm819_vm5, %v14536_v32  ;;  %10907 = vmatmul.msk.f32.gmra.mxu0 %vm819_vm5, %v14536_v32  ;;  %v14828_v31 = vpop.f32.mrf.mxu0 }
 0x954   : > { %10877 = vmatmul.msk.f32.gmra.mxu2 %vm819_vm5, %v14587_v0 }
 0x955   : > { %10892 = vmatmul.msk.f32.gmra.mxu3 %vm819_vm5, %v14583_v7 }
 0x957   : > { %v14810_v59 = vpop.f32.mrf.mxu2 }
 0x958   : > { %v14814_v21 = vpop.f32.mrf.mxu3  ;;  %v14816_v24 = vpop.f32.mrf.mxu1 }
 0x959   : > { %15806 = vst [vmem:[#allocation36_spill] sm:$0xff] %v14814_v21  ;;  %v8171_v58 = vadd.f32 %v14810_v59, %v14816_v24  ;;  %v8810_v59 = vld [vmem:[#allocation5 + $0x99] sm:$0xff] }
 0x95b   : > { %10861 = vmatmul.msk.f32.gmra.mxu1 %vm819_vm5, %v14558_v29  ;;  %10908 = vmatmul.msk.f32.gmra.mxu0 %vm819_vm5, %v14558_v29  ;;  %v14841_v28 = vpop.f32.mrf.mxu0 }
 0x95c   : > { %10878 = vmatmul.msk.f32.gmra.mxu2 %vm819_vm5, %v14617_v51 }
 0x95d   : > { %10893 = vmatmul.msk.f32.gmra.mxu3 %vm819_vm5, %v14613_v5  ;;  %v9061_v5 = vld [vmem:[%s13700_s20 + $0x200] sm:$0xff]  ;;  %s15002_s20 = scalar_lea.vmem %s15345_s9, %s10942_s0  ;;  %s15237_s0 = scalar_lea.vmem %s15347_s11, %s10953_s25 }
 0x95e   : > { %9132 = vmatpush.msrb.mxu1 %v9061_v5 }
 0x95f   : > { %v8173_v32 = vpop.f32.mrf.mxu2 }
 0x960   : > { %v14826_v7 = vpop.f32.mrf.mxu3  ;;  %v8060_v56 = vpop.f32.mrf.mxu1 }
 0x961   : > { %v8174_v29 = vadd.f32 %v8173_v32, %v8060_v56  ;;  %v9394_v56 = vld [vmem:[#allocation5 + $0x90] sm:$0xff] }
 0x963   : > { %10862 = vmatmul.msk.f32.gmra.mxu1 %vm819_vm5, %v14585_v43  ;;  %10909 = vmatmul.msk.f32.gmra.mxu0 %vm819_vm5, %v14585_v43 }
 0x964   : > { %10879 = vmatmul.msk.f32.gmra.mxu2 %vm819_vm5, %v14643_v22 }
 0x965   : > { %10894 = vmatmul.msk.f32.gmra.mxu3 %vm819_vm5, %v14639_v4 }
 0x967   : > { %v8176_v18 = vpop.f32.mrf.mxu2 }
 0x968   : > { %v8310_v48 = vpop.f32.mrf.mxu3  ;;  %v8063_v37 = vpop.f32.mrf.mxu1 }
 0x969   : > { %v14839_v36 = vadd.f32 %v8310_v48, %v8174_v29  ;;  %v8177_v43 = vadd.f32 %v8176_v18, %v8063_v37 }
 0x96b   : > { %10863 = vmatmul.msk.f32.gmra.mxu1 %vm819_vm5, %v14615_v45  ;;  %10910 = vmatmul.msk.f32.gmra.mxu0 %vm819_vm5, %v14615_v45 }
 0x96c   : > { %10880 = vmatmul.msk.f32.gmra.mxu2 %vm819_vm5, %v14666_v9 }
 0x96d   : > { %10895 = vmatmul.msk.f32.gmra.mxu3 %vm819_vm5, %v14662_v34  ;;  %v14861_v34 = vpop.f32.mrf.mxu0 }
 0x96f   : > { %v8179_v4 = vpop.f32.mrf.mxu2 }
 0x970   : > { %v8313_v16 = vpop.f32.mrf.mxu3  ;;  %v8066_v26 = vpop.f32.mrf.mxu1 }
 0x971   : > { %v14851_v49 = vadd.f32 %v8313_v16, %v8177_v43  ;;  %v8180_v45 = vadd.f32 %v8179_v4, %v8066_v26  ;;  %v9462_v16 = vld [vmem:[#allocation5 + $0x98] sm:$0xff] }
 0x973   : > { %10864 = vmatmul.msk.f32.gmra.mxu1 %vm819_vm5, %v14641_v11  ;;  %10911 = vmatmul.msk.f32.gmra.mxu0 %vm819_vm5, %v14641_v11 }
 0x974   : > { %10881 = vmatmul.msk.f32.gmra.mxu2 %vm819_vm5, %v14682_v25 }
 0x975   : > { %10896 = vmatmul.msk.f32.gmra.mxu3 %vm819_vm5, %v14678_v44  ;;  %v14873_v63 = vpop.f32.mrf.mxu0 }
 0x977   : > { %v8182_v12 = vpop.f32.mrf.mxu2 }
 0x978   : > { %v8316_v2 = vpop.f32.mrf.mxu3  ;;  %v8069_v30 = vpop.f32.mrf.mxu1 }
 0x979   : > { %v14863_v8 = vadd.f32 %v8316_v2, %v8180_v45  ;;  %v8183_v11 = vadd.f32 %v8182_v12, %v8069_v30 }
 0x97b   : > { %10865 = vmatmul.msk.f32.gmra.mxu1 %vm819_vm5, %v14664_v40  ;;  %10912 = vmatmul.msk.f32.gmra.mxu0 %vm819_vm5, %v14664_v40 }
 0x97c   : > { %10882 = vmatmul.msk.f32.gmra.mxu2 %vm819_vm5, %v14697_v14 }
 0x97d   : > { %10897 = vmatmul.msk.f32.gmra.mxu3 %vm819_vm5, %v14693_v42  ;;  %v14889_v18 = vpop.f32.mrf.mxu0 }
 0x97f   : > { %v8185_v44 = vpop.f32.mrf.mxu2 }
 0x980   : > { %v8319_v47 = vpop.f32.mrf.mxu3  ;;  %v8072_v35 = vpop.f32.mrf.mxu1 }
 0x981   : > { %v14877_v6 = vadd.f32 %v8319_v47, %v8183_v11  ;;  %v8186_v40 = vadd.f32 %v8185_v44, %v8072_v35 }
 0x983   : > { %10866 = vmatmul.msk.f32.gmra.mxu1 %vm819_vm5, %v14680_v55  ;;  %10913 = vmatmul.msk.f32.gmra.mxu0 %vm819_vm5, %v14680_v55 }
 0x984   : > { %10883 = vmatmul.msk.f32.gmra.mxu2 %vm819_vm5, %v14875_v33 }
 0x985   : > { %10898 = vmatmul.msk.f32.gmra.mxu3 %vm819_vm5, %v14705_v27  ;;  %v14903_v26 = vpop.f32.mrf.mxu0 }
 0x986   : > { %15807 = vst [vmem:[#allocation126_spill] sm:$0xff] %v14903_v26 }
 0x987   : > { %v8188_v42 = vpop.f32.mrf.mxu2 }
 0x988   : > { %v8322_v32 = vpop.f32.mrf.mxu3  ;;  %v8075_v29 = vpop.f32.mrf.mxu1 }
 0x989   : > { %v14887_v5 = vadd.f32 %v8322_v32, %v8186_v40  ;;  %v8189_v55 = vadd.f32 %v8188_v42, %v8075_v29 }
 0x98b   : > { %10867 = vmatmul.msk.f32.gmra.mxu1 %vm819_vm5, %v9394_v56  ;;  %10914 = vmatmul.msk.f32.gmra.mxu0 %vm819_vm5, %v9394_v56 }
 0x98d   : > { %v14914_v2 = vpop.f32.mrf.mxu0  ;;  %10899 = vmatmul.msk.f32.gmra.mxu3 %vm819_vm5, %v8810_v59 }
 0x98e   : > { %15808 = vst [vmem:[#allocation37_spill] sm:$0xff] %v14914_v2 }
 0x98f   : > { %v14897_v48 = vpop.f32.mrf.mxu2 }
 0x990   : > { %v8325_v37 = vpop.f32.mrf.mxu3  ;;  %v14901_v4 = vpop.f32.mrf.mxu1 }
 0x991   : > { %v14899_v43 = vadd.f32 %v8325_v37, %v8189_v55 }
 0x993   : > { %10916 = vmatmul.msk.f32.vlgmr.msrb.gmra.mxu1 %vm819_vm5, %v14412_v23  ;;  %10915 = vmatmul.msk.f32.gmra.mxu0 %vm819_vm5, %v9462_v16 }
 0x995   : > { %v8484_v23 = vpop.f32.mrf.mxu0 }
 0x997   : > { %v14908_v45 = vpop.f32.mrf.mxu2 }
 0x998   : > { %v14910_v12 = vpop.f32.mrf.mxu1 }
 0x99b   : > { %10917 = vmatmul.msk.f32.gmra.mxu1 %vm819_vm5, %v14429_v52 }
 0x99d   : > { %v8487_v40 = vpop.f32.mrf.mxu0 }
 0x99f   : > { %v14916_v30 = vpop.f32.mrf.mxu2 }
 0x9a0   : > { %v14918_v11 = vpop.f32.mrf.mxu1 }
 0x9a3   : > { %10918 = vmatmul.msk.f32.gmra.mxu1 %vm819_vm5, %v14447_v54 }
 0x9a5   : > { %v8490_v54 = vpop.f32.mrf.mxu0 }
 0x9a7   : > { %v14922_v44 = vpop.f32.mrf.mxu2 }
 0x9a8   : > { %v14924_v47 = vpop.f32.mrf.mxu1 }
 0x9ab   : > { %10919 = vmatmul.msk.f32.gmra.mxu1 %vm819_vm5, %v14470_v39 }
 0x9ad   : > { %v8493_v39 = vpop.f32.mrf.mxu0 }
 0x9af   : > { %v14928_v35 = vpop.f32.mrf.mxu2 }
 0x9b0   : > { %v14930_v52 = vpop.f32.mrf.mxu1 }
 0x9b3   : > { %10920 = vmatmul.msk.f32.gmra.mxu1 %vm819_vm5, %v14493_v62 }
 0x9b5   : > { %v8496_v41 = vpop.f32.mrf.mxu0 }
 0x9b7   : > { %v14934_v42 = vpop.f32.mrf.mxu2 }
 0x9b8   : > { %v14936_v32 = vpop.f32.mrf.mxu1 }
 0x9bb   : > { %10921 = vmatmul.msk.f32.gmra.mxu1 %vm819_vm5, %v14515_v46  ;;  %v9410_v46 = vmax.f32 %v14705_v27, %v9394_v56 }
 0x9bd   : > { %v8499_v20 = vpop.f32.mrf.mxu0 }
 0x9bf   : > { %v14940_v29 = vpop.f32.mrf.mxu2 }
 0x9c0   : > { %15809 = vst [vmem:[#allocation92_spill] sm:$0xff] %v14940_v29  ;;  %v14942_v55 = vpop.f32.mrf.mxu1 }
 0x9c3   : > { %10922 = vmatmul.msk.f32.gmra.mxu1 %vm819_vm5, %v14538_v1  ;;  %v9427_v1 = vmax.f32 %v9410_v46, %v14875_v33 }
 0x9c5   : > { %v8502_v38 = vpop.f32.mrf.mxu0 }
 0x9c7   : > { %v14946_v37 = vpop.f32.mrf.mxu2 }
 0x9c8   : > { %15810 = vst [vmem:[#allocation38_spill] sm:$0xff] %v14946_v37  ;;  %v14948_v21 = vpop.f32.mrf.mxu1  ;;  %v9445_v37 = vld [vmem:[#allocation5 + $0x93] sm:$0xff] }
 0x9c9   : > { %15811 = vst [vmem:[#allocation93_spill] sm:$0xff] %v14948_v21 }
 0x9cb   : > { %10923 = vmatmul.msk.f32.gmra.mxu1 %vm819_vm5, %v14560_v19 }
 0x9cf   : > { %v14952_v62 = vpop.f32.mrf.mxu2 }
 0x9d0   : > { %15812 = vst [vmem:[#allocation39_spill] sm:$0xff] %v14952_v62  ;;  %v14954_v57 = vpop.f32.mrf.mxu1  ;;  %v8337_v62 = vadd.f32 %v14826_v7, %v8171_v58  ;;  %v9496_v58 = vld [vmem:[#allocation5 + $0x9a] sm:$0xff] }
 0x9d1   : > { %15813 = vst [vmem:[#allocation94_spill] sm:$0xff] %v14954_v57  ;;  %v9444_v57 = vmax.f32 %v9427_v1, %v9445_v37 }
 0x9d3   : > { %10924 = vmatmul.msk.f32.gmra.mxu1 %vm819_vm5, %v14587_v0  ;;  %v9461_v56 = vmax.f32 %v9444_v57, %v9462_v16 }
 0x9d7   : > { %v8734_v2 = vpop.f32.mrf.mxu2 }
 0x9d8   : > { %v8597_v17 = vpop.f32.mrf.mxu1 }
 0x9d9   : > { %v8598_v19 = vadd.f32 %v8597_v17, %v8484_v23  ;;  %v9478_v17 = vmax.f32 %v9461_v56, %v8810_v59 }
 0x9db   : > { %v8764_v21 = vadd.f32 %v8734_v2, %v8598_v19  ;;  %10925 = vmatmul.msk.f32.gmra.mxu1 %vm819_vm5, %v14617_v51  ;;  %v8997_v2 = vpop.f32.mrf.mxu0 }
 0x9dd   : > { %v14965_v0 = vadd.f32 %v8764_v21, %v8337_v62  ;;  %v14973_v21 = vmax.f32 %v9478_v17, %v9496_v58 }
 0x9df   : > { %v8737_v27 = vpop.f32.mrf.mxu2 }
 0x9e0   : > { %v8600_v26 = vpop.f32.mrf.mxu1 }
 0x9e1   : > { %v8601_v46 = vadd.f32 %v8600_v26, %v8487_v40  ;;  %v8884_v26 = vpop.f32.mrf.mxu3 }
 0x9e3   : > { %v8765_v29 = vadd.f32 %v8737_v27, %v8601_v46  ;;  %10926 = vmatmul.msk.f32.gmra.mxu1 %vm819_vm5, %v14643_v22  ;;  %v9000_v1 = vpop.f32.mrf.mxu0 }
 0x9e5   : > { %v14971_v24 = vadd.f32 %v8765_v29, %v14839_v36 }
 0x9e7   : > { %v8740_v51 = vpop.f32.mrf.mxu2 }
 0x9e8   : > { %v8603_v7 = vpop.f32.mrf.mxu1 }
 0x9e9   : > { %v8604_v57 = vadd.f32 %v8603_v7, %v8490_v54  ;;  %v8887_v29 = vpop.f32.mrf.mxu3 }
 0x9eb   : > { %v8766_v16 = vadd.f32 %v8740_v51, %v8604_v57  ;;  %10927 = vmatmul.msk.f32.gmra.mxu1 %vm819_vm5, %v14666_v9 }
 0x9ed   : > { %v14978_v22 = vadd.f32 %v8766_v16, %v14851_v49 }
 0x9ef   : > { %v8743_v23 = vpop.f32.mrf.mxu2 }
 0x9f0   : > { %v8606_v40 = vpop.f32.mrf.mxu1 }
 0x9f1   : > { %v8607_v37 = vadd.f32 %v8606_v40, %v8493_v39  ;;  %v8890_v46 = vpop.f32.mrf.mxu3  ;;  %v15017_v40 = vld [vmem:[%s770_s30] ss:$0 sm:$0xff]  ;;  %s10002_s30 = sshll.u32 %s11104_s29, 3 }
 0x9f2   : > { %s795_s21 = scalar_lea.vmem %s15353_s17, %s10002_s30 }
 0x9f3   : > { %v8767_v62 = vadd.f32 %v8743_v23, %v8607_v37  ;;  %10928 = vmatmul.msk.f32.gmra.mxu1 %vm819_vm5, %v14682_v25  ;;  %v9003_v25 = vpop.f32.mrf.mxu0 }
 0x9f5   : > { %v14983_v36 = vadd.f32 %v8767_v62, %v14863_v8  ;;  %v9001_v62 = vadd.f32 %v9000_v1, %v8887_v29 }
 0x9f7   : > { %v8746_v54 = vpop.f32.mrf.mxu2 }
 0x9f8   : > { %v8609_v19 = vpop.f32.mrf.mxu1 }
 0x9f9   : > { %v8610_v9 = vadd.f32 %v8609_v19, %v8496_v41 }
 0x9fb   : > { %v8768_v27 = vadd.f32 %v8746_v54, %v8610_v9  ;;  %10929 = vmatmul.msk.f32.gmra.mxu1 %vm819_vm5, %v14697_v14  ;;  %v8571_v14 = vadd.f32 %v14901_v4, %v14793_v60  ;;  %v9006_v57 = vpop.f32.mrf.mxu0  ;;  %v8998_v60 = vadd.f32 %v8997_v2, %v8884_v26  ;;  %v8574_v4 = vadd.f32 %v14910_v12, %v14812_v3  ;;  %v9627_v9 = vld [vmem:[%s15002_s20 + $0x30] sm:$0xff] }
 0x9fc   : > { %v8577_v12 = vadd.f32 %v14918_v11, %v14828_v31  ;;  %v8580_v31 = vadd.f32 %v14924_v47, %v14841_v28 }
 0x9fd   : > { %v14988_v49 = vadd.f32 %v8768_v27, %v14877_v6  ;;  %v8893_v6 = vpop.f32.mrf.mxu3 }
 0x9ff   : > { %v8749_v39 = vpop.f32.mrf.mxu2 }
 0xa00   : > { %v8612_v56 = vpop.f32.mrf.mxu1 }
 0xa01   : > { %v8613_v59 = vadd.f32 %v8612_v56, %v8499_v20  ;;  %v8755_v20 = vadd.f32 %v14897_v48, %v8571_v14  ;;  %v9004_v56 = vadd.f32 %v9003_v25, %v8890_v46  ;;  %v9007_v14 = vadd.f32 %v9006_v57, %v8893_v6 }
 0xa03   : > { %v8769_v8 = vadd.f32 %v8749_v39, %v8613_v59  ;;  %10930 = vmatmul.msk.f32.gmra.mxu1 %vm819_vm5, %v14875_v33  ;;  %v9198_v23 = vadd.f32 %v8755_v20, %v14716_v13  ;;  %v9009_v2 = vpop.f32.mrf.mxu0  ;;  %v8583_v20 = vadd.f32 %v14930_v52, %v14861_v34 }
 0xa05   : > { %v14993_v17 = vadd.f32 %v8769_v8, %v14887_v5  ;;  %v8896_v26 = vpop.f32.mrf.mxu3 }
 0xa06   : > { %v9010_v34 = vadd.f32 %v9009_v2, %v8896_v26 }
 0xa07   : > { %v8752_v51 = vpop.f32.mrf.mxu2 }
 0xa08   : > { %v8615_v41 = vpop.f32.mrf.mxu1 }
 0xa09   : > { %v8616_v7 = vadd.f32 %v8615_v41, %v8502_v38  ;;  %v9628_v38 = vld [vmem:[%s15002_s20 + $0x38] sm:$0xff] }
 0xa0a   : > { %9644 = vmatpush.msrb.mxu2 %v9628_v38 }
 0xa0b   : > { %v8770_v16 = vadd.f32 %v8752_v51, %v8616_v7  ;;  %10931 = vmatmul.msk.f32.gmra.mxu1 %vm819_vm5, %v9496_v58  ;;  %v9012_v29 = vpop.f32.mrf.mxu0  ;;  %v8758_v51 = vadd.f32 %v14922_v44, %v8580_v31  ;;  %v9626_v44 = vld [vmem:[%s15002_s20 + $0x28] sm:$0xff] }
 0xa0c   : > { %9645 = vmatpush.msrb.mxu2 %v9627_v9 }
 0xa0d   : > { %v15006_v33 = vadd.f32 %v8770_v16, %v14899_v43  ;;  %v8756_v43 = vadd.f32 %v14908_v45, %v8574_v4  ;;  %v8757_v45 = vadd.f32 %v14916_v30, %v8577_v12  ;;  %v8899_v59 = vpop.f32.mrf.mxu3  ;;  %v9201_v38 = vadd.f32 %v8758_v51, %v14747_v61 }
 0xa0e   : > { %9646 = vmatpush.msrb.mxu2 %v9626_v44  ;;  %v8759_v4 = vadd.f32 %v14928_v35, %v8583_v20  ;;  %v8586_v61 = vadd.f32 %v14936_v32, %v14873_v63  ;;  %v9013_v9 = vadd.f32 %v9012_v29, %v8899_v59  ;;  %v8589_v63 = vadd.f32 %v14942_v55, %v14889_v18 }
 0xa0f   : > { %v9199_v19 = vadd.f32 %v8756_v43, %v14726_v53  ;;  %v9200_v53 = vadd.f32 %v8757_v45, %v14737_v50 }
 0xa10   : > { %v9134_v5 = vpop.f32.mrf.mxu1 }
 0xa11   : > { %v9182_v58 = vadd.f32 %v9134_v5, %v8998_v60 }
 0xa13   : > { %v9214_v48 = vadd.f32 %v9198_v23, %v9182_v58  ;;  %v9015_v47 = vpop.f32.mrf.mxu0 }
 0xa15   : > { %v9234_v37 = vadd.f32 %v15017_v40, %v9214_v48  ;;  %v8902_v28 = vpop.f32.mrf.mxu3 }
 0xa16   : > { %v9016_v51 = vadd.f32 %v9015_v47, %v8902_v28 }
 0xa17   : > { %v9250_v54 = vmax.f32 %v9234_v37, 0.0 }
 0xa18   : > { %v9137_v3 = vpop.f32.mrf.mxu1 }
 0xa19   : > { %9266 = vst.msk [vmem:[#allocation5 + $0x10] sm:$0xff] %vm819_vm5, %v9250_v54  ;;  %v9183_v13 = vadd.f32 %v9137_v3, %v9001_v62  ;;  %v9202_v62 = vadd.f32 %v8759_v4, %v14758_v15 }
 0xa1b   : > { %v9215_v27 = vadd.f32 %v9199_v19, %v9183_v13  ;;  %v9018_v3 = vpop.f32.mrf.mxu0  ;;  %v8760_v13 = vadd.f32 %v14934_v42, %v8586_v61  ;;  %v15820_v61 = vld [vmem:[#allocation38_spill] sm:$0xff] }
 0xa1d   : > { %v9235_v39 = vadd.f32 %v15017_v40, %v9215_v27  ;;  %v8905_v54 = vpop.f32.mrf.mxu3 }
 0xa1f   : > { %v9251_v1 = vmax.f32 %v9235_v39, 0.0 }
 0xa20   : > { %v9140_v8 = vpop.f32.mrf.mxu1  ;;  %v9282_v25 = vld [vmem:[#allocation5 + $0x10] sm:$0xff] }
 0xa21   : > { %9267 = vst.msk [vmem:[#allocation5 + $0x18] sm:$0xff] %vm819_vm5, %v9251_v1  ;;  %v9184_v11 = vadd.f32 %v9140_v8, %v9004_v56  ;;  %v9203_v56 = vadd.f32 %v8760_v13, %v14768_v10 }
 0xa23   : > { %v9216_v41 = vadd.f32 %v9200_v53, %v9184_v11  ;;  %v15814_v11 = vld [vmem:[#allocation92_spill] sm:$0xff]  ;;  %v15061_v53 = vpop.f32.mrf.mxu0 }
 0xa24   : > { %v8761_v59 = vadd.f32 %v15814_v11, %v8589_v63  ;;  %v9625_v63 = vld [vmem:[%s15002_s20 + $0x20] sm:$0xff]  ;;  %v15822_v11 = vld [vmem:[#allocation37_spill] sm:$0xff] }
 0xa25   : > { %v9236_v30 = vadd.f32 %v15017_v40, %v9216_v41  ;;  %v15059_v29 = vpop.f32.mrf.mxu3  ;;  %9647 = vmatpush.msrb.mxu2 %v9625_v63 }
 0xa27   : > { %v9252_v46 = vmax.f32 %v9236_v30, 0.0 }
 0xa28   : > { %v9298_v7 = vld [vmem:[#allocation5 + $0x11] sm:$0xff]  ;;  %v9143_v16 = vpop.f32.mrf.mxu1 }
 0xa29   : > { %v9314_v60 = vmax.f32 %v9282_v25, %v9298_v7  ;;  %9268 = vst.msk [vmem:[#allocation5 + $0x20] sm:$0xff] %vm819_vm5, %v9252_v46  ;;  %v9185_v50 = vadd.f32 %v9143_v16, %v9007_v14  ;;  %v9330_v5 = vld [vmem:[#allocation5 + $0x12] sm:$0xff]  ;;  %v15815_v25 = vld [vmem:[#allocation112_spill] sm:$0xff] }
 0xa2a   : > { %v9362_v23 = vld [vmem:[#allocation5 + $0x13] sm:$0xff]  ;;  %v9204_v7 = vadd.f32 %v8761_v59, %v15815_v25 }
 0xa2b   : > { %v9346_v6 = vmax.f32 %v9314_v60, %v9330_v5  ;;  %v9217_v57 = vadd.f32 %v9201_v38, %v9185_v50  ;;  %v9283_v35 = vld [vmem:[#allocation5 + $0x18] sm:$0xff]  ;;  %v15816_v50 = vld [vmem:[#allocation126_spill] sm:$0xff]  ;;  %v15817_v38 = vld [vmem:[#allocation93_spill] sm:$0xff] }
 0xa2c   : > { %v8592_v44 = vadd.f32 %v15817_v38, %v15816_v50  ;;  %v15823_v59 = vld [vmem:[#allocation94_spill] sm:$0xff] }
 0xa2d   : > { %v9237_v58 = vadd.f32 %v15017_v40, %v9217_v57  ;;  %v9378_v52 = vmax.f32 %v9346_v6, %v9362_v23  ;;  %v15825_v25 = vld [vmem:[#allocation114_spill] sm:$0xff] }
 0xa2f   : > { %v9253_v48 = vmax.f32 %v9237_v58, 0.0  ;;  %v9395_v12 = vmax.f32 %v9378_v52, %v9283_v35  ;;  %v15819_v52 = vld [vmem:[#allocation81_spill] sm:$0xff] }
 0xa30   : > { %v9146_v43 = vpop.f32.mrf.mxu1  ;;  %v9284_v2 = vld [vmem:[#allocation5 + $0x20] sm:$0xff] }
 0xa31   : > { %9269 = vst.msk [vmem:[#allocation5 + $0x28] sm:$0xff] %vm819_vm5, %v9253_v48  ;;  %v9186_v37 = vadd.f32 %v9146_v43, %v9010_v34  ;;  %v9412_v45 = vmax.f32 %v9395_v12, %v9284_v2  ;;  %v9299_v8 = vld [vmem:[#allocation5 + $0x19] sm:$0xff]  ;;  %v9315_v55 = vmax.f32 %v9283_v35, %v9284_v2  ;;  %v15818_v34 = vld [vmem:[#allocation33_spill] sm:$0xff] }
 0xa32   : > { %v9331_v6 = vld [vmem:[#allocation5 + $0x1a] sm:$0xff]  ;;  %v8165_v48 = vadd.f32 %v15819_v52, %v15818_v34  ;;  %v9022_v52 = vadd.f32 %v15061_v53, %v15059_v29 }
 0xa33   : > { %v9218_v26 = vadd.f32 %v9202_v62, %v9186_v37  ;;  %v8762_v37 = vadd.f32 %v15820_v61, %v8592_v44  ;;  %v15826_v44 = vld [vmem:[#allocation39_spill] sm:$0xff] }
 0xa35   : > { %v9238_v19 = vadd.f32 %v15017_v40, %v9218_v26  ;;  %v15821_v26 = vld [vmem:[#allocation35_spill] sm:$0xff] }
 0xa37   : > { %v9254_v27 = vmax.f32 %v9238_v19, 0.0  ;;  %v9019_v19 = vadd.f32 %v9018_v3, %v8905_v54  ;;  %v8595_v54 = vadd.f32 %v15823_v59, %v15822_v11 }
 0xa38   : > { %v9149_v32 = vpop.f32.mrf.mxu1  ;;  %v15053_v39 = vld [vmem:[#allocation5 + $0x28] sm:$0xff] }
 0xa39   : > { %9270 = vst.msk [vmem:[#allocation5 + $0x30] sm:$0xff] %vm819_vm5, %v9254_v27  ;;  %v9187_v15 = vadd.f32 %v9149_v32, %v9013_v9  ;;  %v9429_v1 = vmax.f32 %v9412_v45, %v15053_v39  ;;  %v9300_v41 = vld [vmem:[#allocation5 + $0x21] sm:$0xff]  ;;  %v9347_v14 = vmax.f32 %v9315_v55, %v15053_v39  ;;  %v15080_v9 = vpop.f32.mrf.mxu3  ;;  %v15082_v27 = vpop.f32.mrf.mxu0 }
 0xa3a   : > { %v9316_v60 = vmax.f32 %v9284_v2, %v9300_v41  ;;  %v9332_v23 = vld [vmem:[#allocation5 + $0x22] sm:$0xff]  ;;  %v8335_v2 = vadd.f32 %v15821_v26, %v8165_v48 }
 0xa3b   : > { %v9219_v42 = vadd.f32 %v9203_v56, %v9187_v15  ;;  %v9446_v31 = vmax.f32 %v9429_v1, %v9299_v8  ;;  %v9364_v56 = vld [vmem:[#allocation5 + $0x23] sm:$0xff] }
 0xa3c   : > { %v9348_v43 = vmax.f32 %v9316_v60, %v9332_v23 }
 0xa3d   : > { %v9239_v18 = vadd.f32 %v15017_v40, %v9219_v42  ;;  %v9463_v10 = vmax.f32 %v9446_v31, %v9300_v41 }
 0xa3e   : > { %v9380_v31 = vmax.f32 %v9348_v43, %v9364_v56 }
 0xa3f   : > { %v9255_v30 = vmax.f32 %v9239_v18, 0.0  ;;  %v9205_v18 = vadd.f32 %v8762_v37, %v8335_v2 }
 0xa40   : > { %v9152_v46 = vpop.f32.mrf.mxu1  ;;  %v15066_v16 = vld [vmem:[#allocation5 + $0x30] sm:$0xff]  ;;  %v9397_v38 = vmax.f32 %v9380_v31, %v15053_v39 }
 0xa41   : > { %v15068_v20 = vld [vmem:[#allocation5 + $0x29] sm:$0xff]  ;;  %9271 = vst.msk [vmem:[#allocation5 + $0x38] sm:$0xff] %vm819_vm5, %v9255_v30  ;;  %v9188_v5 = vadd.f32 %v9152_v46, %v9016_v51  ;;  %v9379_v28 = vmax.f32 %v9347_v14, %v15066_v16  ;;  %v9027_v26 = vpop.f32.mrf.mxu0 }
 0xa42   : > { %v9480_v47 = vmax.f32 %v9463_v10, %v15068_v20  ;;  %v9333_v13 = vld [vmem:[#allocation5 + $0x2a] sm:$0xff]  ;;  %v9317_v60 = vmax.f32 %v15053_v39, %v15068_v20 }
 0xa43   : > { %v9220_v57 = vadd.f32 %v9204_v7, %v9188_v5  ;;  %v9396_v4 = vmax.f32 %v9379_v28, %v9299_v8  ;;  %v15824_v46 = vld [vmem:[#allocation117_spill] sm:$0xff]  ;;  %v8763_v5 = vadd.f32 %v15826_v44, %v8595_v54 }
 0xa44   : > { %v9497_v58 = vmax.f32 %v9480_v47, %v9331_v6  ;;  %v8168_v7 = vadd.f32 %v15825_v25, %v15824_v46 }
 0xa45   : > { %v9240_v62 = vadd.f32 %v15017_v40, %v9220_v57  ;;  %v9413_v35 = vmax.f32 %v9396_v4, %v9300_v41  ;;  %v9363_v41 = vld [vmem:[#allocation5 + $0x1b] sm:$0xff]  ;;  %v9365_v57 = vld [vmem:[#allocation5 + $0x2b] sm:$0xff] }
 0xa46   : > { %v9514_v12 = vmax.f32 %v9497_v58, %v9332_v23  ;;  %v15827_v4 = vld [vmem:[#allocation36_spill] sm:$0xff] }
 0xa47   : > { %v9256_v45 = vmax.f32 %v9240_v62, 0.0  ;;  %v9430_v32 = vmax.f32 %v9413_v35, %v15068_v20  ;;  %v8336_v58 = vadd.f32 %v15827_v4, %v8168_v7  ;;  %v9414_v35 = vmax.f32 %v9397_v38, %v15068_v20 }
 0xa48   : > { %v9531_v15 = vmax.f32 %v9514_v12, %v9333_v13  ;;  %v9155_v1 = vpop.f32.mrf.mxu1  ;;  %v15086_v8 = vld [vmem:[#allocation5 + $0x38] sm:$0xff]  ;;  %v8914_v12 = vpop.f32.mrf.mxu3 }
 0xa49   : > { %v15088_v42 = vld [vmem:[#allocation5 + $0x31] sm:$0xff]  ;;  %9272 = vst.msk [vmem:[#allocation5 + $0x40] sm:$0xff] %vm819_vm5, %v9256_v45  ;;  %v9189_v3 = vadd.f32 %v9155_v1, %v9019_v19  ;;  %v9465_v14 = vmax.f32 %v15086_v8, %v15066_v16  ;;  %v9206_v53 = vadd.f32 %v8763_v5, %v8336_v58  ;;  %v9624_v45 = vld [vmem:[%s15002_s20 + $0x18] sm:$0xff]  ;;  %v9431_v11 = vmax.f32 %v9414_v35, %v9333_v13 }
 0xa4a   : > { %v9447_v55 = vmax.f32 %v9430_v32, %v15088_v42  ;;  %v9548_v51 = vmax.f32 %v9531_v15, %v9363_v41  ;;  %v15111_v62 = vld [vmem:[#allocation5 + $0x32] sm:$0xff]  ;;  %9648 = vmatpush.msrb.mxu2 %v9624_v45 }
 0xa4b   : > { %v9221_v30 = vadd.f32 %v9205_v18, %v9189_v3  ;;  %v9482_v43 = vmax.f32 %v9465_v14, %v15088_v42  ;;  %v15125_v18 = vld [vmem:[#allocation5 + $0x33] sm:$0xff] }
 0xa4c   : > { %v9464_v10 = vmax.f32 %v9447_v55, %v9331_v6  ;;  %v9565_v50 = vmax.f32 %v9548_v51, %v9364_v56  ;;  %v9318_v6 = vmax.f32 %v15066_v16, %v15088_v42 }
 0xa4d   : > { %v9241_v28 = vadd.f32 %v15017_v40, %v9221_v30 }
 0xa4e   : > { %v9481_v47 = vmax.f32 %v9464_v10, %v9332_v23  ;;  %v9582_v34 = vmax.f32 %v9565_v50, %v9365_v57  ;;  %v9349_v23 = vmax.f32 %v9317_v60, %v9333_v13  ;;  %v9350_v63 = vmax.f32 %v9318_v6, %v15111_v62 }
 0xa4f   : > { %v9257_v48 = vmax.f32 %v9241_v28, 0.0  ;;  %v9448_v60 = vmax.f32 %v9431_v11, %v9365_v57 }
 0xa50   : > { %v9498_v39 = vmax.f32 %v9481_v47, %v9333_v13  ;;  %v9158_v61 = vpop.f32.mrf.mxu1  ;;  %v15109_v37 = vld [vmem:[#allocation5 + $0x39] sm:$0xff]  ;;  %9598 = vst.msk [vmem:[#allocation5 + $0x10] sm:$0xff] %vm819_vm5, %v9582_v34  ;;  %v9381_v31 = vmax.f32 %v9349_v23, %v9365_v57  ;;  %v9382_v55 = vmax.f32 %v9350_v63, %v15125_v18  ;;  %v8917_v4 = vpop.f32.mrf.mxu3 }
 0xa51   : > { %9273 = vst.msk [vmem:[#allocation5 + $0x48] sm:$0xff] %vm819_vm5, %v9257_v48  ;;  %v9190_v29 = vadd.f32 %v9158_v61, %v9022_v52  ;;  %v9499_v2 = vmax.f32 %v9482_v43, %v15109_v37  ;;  %v15121_v1 = vld [vmem:[#allocation5 + $0x3a] sm:$0xff]  ;;  %v9319_v11 = vmax.f32 %v15086_v8, %v15109_v37 }
 0xa52   : > { %v9515_v19 = vmax.f32 %v9498_v39, %v15111_v62  ;;  %v9398_v7 = vmax.f32 %v9381_v31, %v15066_v16  ;;  %v15137_v44 = vld [vmem:[#allocation5 + $0x3b] sm:$0xff]  ;;  %v9399_v47 = vmax.f32 %v9382_v55, %v15086_v8  ;;  %v9030_v16 = vpop.f32.mrf.mxu0 }
 0xa53   : > { %v9222_v32 = vadd.f32 %v9206_v53, %v9190_v29  ;;  %v9516_v15 = vmax.f32 %v9499_v2, %v15111_v62  ;;  %v9288_v39 = vld [vmem:[#allocation5 + $0x40] sm:$0xff]  ;;  %v9028_v2 = vadd.f32 %v9027_v26, %v8914_v12 }
 0xa54   : > { %v9532_v20 = vmax.f32 %v9515_v19, %v9363_v41  ;;  %v9025_v41 = vadd.f32 %v15082_v27, %v15080_v9  ;;  %v9415_v61 = vmax.f32 %v9398_v7, %v15088_v42  ;;  %v9416_v23 = vmax.f32 %v9399_v47, %v15109_v37 }
 0xa55   : > { %v9242_v59 = vadd.f32 %v15017_v40, %v9222_v32  ;;  %v9533_v54 = vmax.f32 %v9516_v15, %v15121_v1 }
 0xa56   : > { %v9549_v3 = vmax.f32 %v9532_v20, %v9364_v56 }
 0xa57   : > { %v9258_v51 = vmax.f32 %v9242_v59, 0.0  ;;  %v9550_v14 = vmax.f32 %v9533_v54, %v15125_v18  ;;  %v9432_v59 = vmax.f32 %v9415_v61, %v15111_v62  ;;  %v9433_v54 = vmax.f32 %v9416_v23, %v15121_v1 }
 0xa58   : > { %v9566_v30 = vmax.f32 %v9549_v3, %v9365_v57  ;;  %v15131_v10 = vld [vmem:[#allocation5 + $0x48] sm:$0xff]  ;;  %v9161_v25 = vpop.f32.mrf.mxu1 }
 0xa59   : > { %v9304_v46 = vld [vmem:[#allocation5 + $0x41] sm:$0xff]  ;;  %9274 = vst.msk [vmem:[#allocation5 + $0x50] sm:$0xff] %vm819_vm5, %v9258_v51  ;;  %v9191_v28 = vadd.f32 %v9161_v25, %v9025_v41  ;;  %v9567_v27 = vmax.f32 %v9550_v14, %v15137_v44  ;;  %v8920_v14 = vpop.f32.mrf.mxu3  ;;  %v9449_v62 = vmax.f32 %v9432_v59, %v15125_v18 }
 0xa5a   : > { %v9336_v13 = vld [vmem:[#allocation5 + $0x42] sm:$0xff]  ;;  %v9320_v56 = vmax.f32 %v15131_v10, %v9304_v46  ;;  %v9467_v50 = vmax.f32 %v9304_v46, %v15131_v10  ;;  %v9583_v9 = vmax.f32 %v9566_v30, %v15125_v18  ;;  %v9031_v30 = vadd.f32 %v9030_v16, %v8917_v4  ;;  %v9033_v41 = vpop.f32.mrf.mxu0 }
 0xa5b   : > { %v9466_v38 = vmax.f32 %v9336_v13, %v9304_v46  ;;  %v9368_v5 = vld [vmem:[#allocation5 + $0x43] sm:$0xff]  ;;  %v9223_v34 = vadd.f32 %v14965_v0, %v9191_v28  ;;  %v9584_v52 = vmax.f32 %v9567_v27, %v9448_v60 }
 0xa5c   : > { %v9352_v57 = vmax.f32 %v9320_v56, %v9336_v13  ;;  %v9484_v58 = vmax.f32 %v9467_v50, %v9336_v13  ;;  %9599 = vst.msk [vmem:[#allocation5 + $0x18] sm:$0xff] %vm819_vm5, %v9583_v9  ;;  %v9623_v60 = vld [vmem:[%s15002_s20 + $0x10] sm:$0xff] }
 0xa5d   : > { %v9483_v6 = vmax.f32 %v9466_v38, %v9368_v5  ;;  %v9243_v43 = vadd.f32 %v15017_v40, %v9223_v34  ;;  %9600 = vst.msk [vmem:[#allocation5 + $0x20] sm:$0xff] %vm819_vm5, %v9584_v52  ;;  %9649 = vmatpush.msrb.mxu2 %v9623_v60 }
 0xa5e   : > { %v9384_v35 = vmax.f32 %v9352_v57, %v9368_v5  ;;  %v9501_v29 = vmax.f32 %v9484_v58, %v9368_v5 }
 0xa5f   : > { %v9500_v48 = vmax.f32 %v9483_v6, %v15086_v8  ;;  %v9259_v45 = vmax.f32 %v9243_v43, 0.0  ;;  %v9351_v8 = vmax.f32 %v9319_v11, %v15121_v1  ;;  %v9034_v43 = vadd.f32 %v9033_v41, %v8920_v14 }
 0xa60   : > { %v15149_v19 = vld [vmem:[#allocation5 + $0x50] sm:$0xff]  ;;  %v9164_v63 = vpop.f32.mrf.mxu1 }
 0xa61   : > { %v9517_v53 = vmax.f32 %v9500_v48, %v9288_v39  ;;  %v9305_v0 = vld [vmem:[#allocation5 + $0x49] sm:$0xff]  ;;  %v9401_v32 = vmax.f32 %v9384_v35, %v15149_v19  ;;  %9275 = vst.msk [vmem:[#allocation5 + $0x58] sm:$0xff] %vm819_vm5, %v9259_v45  ;;  %v9192_v42 = vadd.f32 %v9164_v63, %v9028_v2  ;;  %v9383_v4 = vmax.f32 %v9351_v8, %v15137_v44  ;;  %v8923_v61 = vpop.f32.mrf.mxu3 }
 0xa62   : > { %v9518_v15 = vmax.f32 %v9501_v29, %v9305_v0  ;;  %v9337_v20 = vld [vmem:[#allocation5 + $0x4a] sm:$0xff]  ;;  %v9321_v28 = vmax.f32 %v15131_v10, %v9305_v0  ;;  %v9036_v23 = vpop.f32.mrf.mxu0 }
 0xa63   : > { %v9534_v31 = vmax.f32 %v9517_v53, %v15109_v37  ;;  %v9418_v12 = vmax.f32 %v9401_v32, %v9305_v0  ;;  %v9369_v3 = vld [vmem:[#allocation5 + $0x4b] sm:$0xff]  ;;  %v9224_v55 = vadd.f32 %v14971_v24, %v9192_v42  ;;  %v9450_v24 = vmax.f32 %v9433_v54, %v15137_v44 }
 0xa64   : > { %v9535_v26 = vmax.f32 %v9518_v15, %v9337_v20  ;;  %v9353_v34 = vmax.f32 %v9321_v28, %v9337_v20 }
 0xa65   : > { %v9551_v51 = vmax.f32 %v9534_v31, %v15121_v1  ;;  %v9435_v46 = vmax.f32 %v9418_v12, %v9337_v20  ;;  %v9244_v25 = vadd.f32 %v15017_v40, %v9224_v55 }
 0xa66   : > { %v9552_v13 = vmax.f32 %v9535_v26, %v9369_v3  ;;  %v9385_v0 = vmax.f32 %v9353_v34, %v9369_v3 }
 0xa67   : > { %v9568_v37 = vmax.f32 %v9551_v51, %v15137_v44  ;;  %v9452_v7 = vmax.f32 %v9435_v46, %v9369_v3  ;;  %v9260_v50 = vmax.f32 %v9244_v25, 0.0  ;;  %v9037_v51 = vadd.f32 %v9036_v23, %v8923_v61 }
 0xa68   : > { %v9569_v56 = vmax.f32 %v9552_v13, %v9288_v39  ;;  %v9167_v38 = vpop.f32.mrf.mxu1  ;;  %v15167_v47 = vld [vmem:[#allocation5 + $0x51] sm:$0xff]  ;;  %v9402_v42 = vmax.f32 %v9385_v0, %v15149_v19 }
 0xa69   : > { %v9585_v5 = vmax.f32 %v9568_v37, %v9449_v62  ;;  %v9193_v9 = vadd.f32 %v9167_v38, %v9031_v30  ;;  %v9469_v27 = vmax.f32 %v9452_v7, %v9288_v39  ;;  %9276 = vst.msk [vmem:[#allocation5 + $0x60] sm:$0xff] %vm819_vm5, %v9260_v50  ;;  %v9536_v18 = vmax.f32 %v9452_v7, %v15167_v47  ;;  %v15173_v57 = vld [vmem:[#allocation5 + $0x58] sm:$0xff]  ;;  %v8926_v3 = vpop.f32.mrf.mxu3 }
 0xa6a   : > { %v9586_v1 = vmax.f32 %v9569_v56, %v9450_v24  ;;  %v15175_v58 = vld [vmem:[#allocation5 + $0x52] sm:$0xff]  ;;  %v9039_v55 = vpop.f32.mrf.mxu0 }
 0xa6b   : > { %v9225_v16 = vadd.f32 %v14978_v22, %v9193_v9  ;;  %9601 = vst.msk [vmem:[#allocation5 + $0x28] sm:$0xff] %vm819_vm5, %v9585_v5  ;;  %v9486_v10 = vmax.f32 %v9469_v27, %v15173_v57  ;;  %v9553_v6 = vmax.f32 %v9536_v18, %v15175_v58  ;;  %v15182_v48 = vld [vmem:[#allocation5 + $0x53] sm:$0xff]  ;;  %v9400_v22 = vmax.f32 %v9383_v4, %v9288_v39 }
 0xa6c   : > { %9602 = vst.msk [vmem:[#allocation5 + $0x30] sm:$0xff] %vm819_vm5, %v9586_v1  ;;  %v9622_v37 = vld [vmem:[%s15002_s20 + $0x8] sm:$0xff] }
 0xa6d   : > { %v9245_v52 = vadd.f32 %v15017_v40, %v9225_v16  ;;  %v9570_v44 = vmax.f32 %v9553_v6, %v15182_v48  ;;  %v9503_v53 = vmax.f32 %v9486_v10, %v15167_v47  ;;  %9650 = vmatpush.msrb.mxu2 %v9622_v37  ;;  %v9040_v16 = vadd.f32 %v9039_v55, %v8926_v3 }
 0xa6f   : > { %v9261_v35 = vmax.f32 %v9245_v52, 0.0  ;;  %v9587_v2 = vmax.f32 %v9570_v44, %v9400_v22 }
 0xa70   : > { %v9170_v29 = vpop.f32.mrf.mxu1  ;;  %v15187_v63 = vld [vmem:[#allocation5 + $0x59] sm:$0xff] }
 0xa71   : > { %9277 = vst.msk [vmem:[#allocation5 + $0x68] sm:$0xff] %vm819_vm5, %v9261_v35  ;;  %v9194_v45 = vadd.f32 %v9170_v29, %v9034_v43  ;;  %v9520_v32 = vmax.f32 %v9503_v53, %v15187_v63  ;;  %v9292_v15 = vld [vmem:[#allocation5 + $0x60] sm:$0xff]  ;;  %v8929_v53 = vpop.f32.mrf.mxu3  ;;  %v9323_v3 = vmax.f32 %v15173_v57, %v15187_v63 }
 0xa72   : > { %9603 = vst.msk [vmem:[#allocation5 + $0x38] sm:$0xff] %vm819_vm5, %v9587_v2  ;;  %v15195_v11 = vld [vmem:[#allocation5 + $0x5a] sm:$0xff]  ;;  %v9322_v12 = vmax.f32 %v15149_v19, %v9292_v15  ;;  %v9419_v26 = vmax.f32 %v9402_v42, %v9292_v15  ;;  %v9042_v2 = vpop.f32.mrf.mxu0 }
 0xa73   : > { %v9226_v39 = vadd.f32 %v14983_v36, %v9194_v45  ;;  %v9537_v20 = vmax.f32 %v9520_v32, %v15175_v58  ;;  %v15202_v62 = vld [vmem:[#allocation5 + $0x5b] sm:$0xff] }
 0xa75   : > { %v9246_v31 = vadd.f32 %v15017_v40, %v9226_v39  ;;  %v9554_v59 = vmax.f32 %v9537_v20, %v15195_v11 }
 0xa77   : > { %v9262_v54 = vmax.f32 %v9246_v31, 0.0  ;;  %v9571_v41 = vmax.f32 %v9554_v59, %v15182_v48 }
 0xa78   : > { %v9293_v36 = vld [vmem:[#allocation5 + $0x68] sm:$0xff]  ;;  %v9173_v14 = vpop.f32.mrf.mxu1 }
 0xa79   : > { %v9308_v30 = vld [vmem:[#allocation5 + $0x61] sm:$0xff]  ;;  %v9404_v46 = vmax.f32 %v9293_v36, %v9292_v15  ;;  %v9354_v13 = vmax.f32 %v9322_v12, %v9293_v36  ;;  %9278 = vst.msk [vmem:[#allocation5 + $0x70] sm:$0xff] %vm819_vm5, %v9262_v54  ;;  %v9195_v7 = vadd.f32 %v9173_v14, %v9037_v51  ;;  %v9588_v60 = vmax.f32 %v9571_v41, %v15202_v62 }
 0xa7a   : > { %v9436_v25 = vmax.f32 %v9419_v26, %v9308_v30  ;;  %v9324_v8 = vmax.f32 %v9292_v15, %v9308_v30  ;;  %v9340_v19 = vld [vmem:[#allocation5 + $0x62] sm:$0xff]  ;;  %v9043_v12 = vadd.f32 %v9042_v2, %v8929_v53  ;;  %v9621_v26 = vld [vmem:[%s15002_s20] sm:$0xff]  ;;  %s786_s20 = scalar_lea.vmem %s15348_s12, %s11104_s29 }
 0xa7b   : > { %v9421_v56 = vmax.f32 %v9404_v46, %v9308_v30  ;;  %v9386_v24 = vmax.f32 %v9354_v13, %v9308_v30  ;;  %v9372_v5 = vld [vmem:[#allocation5 + $0x63] sm:$0xff]  ;;  %v9227_v28 = vadd.f32 %v14988_v49, %v9195_v7  ;;  %9604 = vst.msk [vmem:[#allocation5 + $0x40] sm:$0xff] %vm819_vm5, %v9588_v60  ;;  %9651 = vmatpush.msrb.mxu2 %v9621_v26 }
 0xa7c   : > { %v9453_v50 = vmax.f32 %v9436_v25, %v9340_v19  ;;  %v9356_v38 = vmax.f32 %v9324_v8, %v9340_v19  ;;  %v9513_v8 = vld [vmem:[#allocation5 + $0x9b] sm:$0xff] }
 0xa7d   : > { %v9438_v9 = vmax.f32 %v9421_v56, %v9340_v19  ;;  %v9403_v27 = vmax.f32 %v9386_v24, %v9340_v19  ;;  %v9247_v4 = vadd.f32 %v15017_v40, %v9227_v28 }
 0xa7e   : > { %v9470_v1 = vmax.f32 %v9453_v50, %v9372_v5  ;;  %v9388_v18 = vmax.f32 %v9356_v38, %v9372_v5  ;;  %v9355_v50 = vmax.f32 %v9323_v3, %v15195_v11  ;;  %v9564_v3 = vld [vmem:[#allocation5 + $0xa2] sm:$0xff] }
 0xa7f   : > { %v9455_v10 = vmax.f32 %v9438_v9, %v9372_v5  ;;  %v9420_v6 = vmax.f32 %v9403_v27, %v9372_v5  ;;  %v9263_v43 = vmax.f32 %v9247_v4, 0.0 }
 0xa80   : > { %v9405_v34 = vmax.f32 %v9388_v18, %v9293_v36  ;;  %v9487_v52 = vmax.f32 %v9470_v1, %v15173_v57  ;;  %v9294_v44 = vld [vmem:[#allocation5 + $0x70] sm:$0xff]  ;;  %v9176_v61 = vpop.f32.mrf.mxu1 }
 0xa81   : > { %v9309_v22 = vld [vmem:[#allocation5 + $0x69] sm:$0xff]  ;;  %v9472_v23 = vmax.f32 %v9455_v10, %v9294_v44  ;;  %9279 = vst.msk [vmem:[#allocation5 + $0x78] sm:$0xff] %vm819_vm5, %v9263_v43  ;;  %v9196_v45 = vadd.f32 %v9176_v61, %v9040_v16  ;;  %v9387_v43 = vmax.f32 %v9355_v50, %v15202_v62 }
 0xa82   : > { %v9437_v49 = vmax.f32 %v9420_v6, %v9309_v22  ;;  %v9325_v35 = vmax.f32 %v9293_v36, %v9309_v22  ;;  %v9422_v29 = vmax.f32 %v9405_v34, %v9309_v22  ;;  %v9341_v0 = vld [vmem:[#allocation5 + $0x6a] sm:$0xff]  ;;  %v9504_v32 = vmax.f32 %v9487_v52, %v15167_v47 }
 0xa83   : > { %v9489_v39 = vmax.f32 %v9472_v23, %v9309_v22  ;;  %v9373_v31 = vld [vmem:[#allocation5 + $0x6b] sm:$0xff]  ;;  %v9228_v59 = vadd.f32 %v14993_v17, %v9196_v45 }
 0xa84   : > { %v9454_v15 = vmax.f32 %v9437_v49, %v9341_v0  ;;  %v9357_v20 = vmax.f32 %v9325_v35, %v9341_v0  ;;  %v9439_v42 = vmax.f32 %v9422_v29, %v9341_v0  ;;  %v9521_v54 = vmax.f32 %v9504_v32, %v15187_v63  ;;  %v9547_v29 = vld [vmem:[#allocation5 + $0xa1] sm:$0xff]  ;;  %v9669_v32 = vld [vmem:[%s15237_s0 + $0x60] sm:$0xf] }
 0xa85   : > { %v9506_v55 = vmax.f32 %v9489_v39, %v9341_v0  ;;  %v9248_v14 = vadd.f32 %v15017_v40, %v9228_v59  ;;  %v9668_v59 = vld [vmem:[%s15237_s0 + $0x58] sm:$0xff]  ;;  %10933 = vmatpush.msk.msra.mxu3 %vm9678_vm6, %v9669_v32  ;;  %v9661_v32 = vld [vmem:[%s15237_s0 + $0x20] sm:$0xff] }
 0xa86   : > { %v9471_v51 = vmax.f32 %v9454_v15, %v9373_v31  ;;  %v9389_v36 = vmax.f32 %v9357_v20, %v9373_v31  ;;  %v9456_v30 = vmax.f32 %v9439_v42, %v9373_v31  ;;  %v9538_v41 = vmax.f32 %v9521_v54, %v15175_v58 }
 0xa87   : > { %v9523_v46 = vmax.f32 %v9506_v55, %v9373_v31  ;;  %v9264_v37 = vmax.f32 %v9248_v14, 0.0  ;;  %9686 = vmatpush.msra.mxu3 %v9668_v59 }
 0xa88   : > { %v9406_v13 = vmax.f32 %v9389_v36, %v9294_v44  ;;  %v9473_v17 = vmax.f32 %v9456_v30, %v9294_v44  ;;  %v9488_v25 = vmax.f32 %v9471_v51, %v15173_v57  ;;  %v9179_v19 = vpop.f32.mrf.mxu1  ;;  %v9555_v7 = vmax.f32 %v9538_v41, %v15195_v11  ;;  %v9310_v60 = vld [vmem:[#allocation5 + $0x71] sm:$0xff]  ;;  %v9667_v30 = vld [vmem:[%s15237_s0 + $0x50] sm:$0xff] }
 0xa89   : > { %v9197_v56 = vadd.f32 %v9179_v19, %v9043_v12  ;;  %v9540_v38 = vmax.f32 %v9523_v46, %v9310_v60  ;;  %v9326_v5 = vmax.f32 %v9294_v44, %v9310_v60  ;;  %9280 = vst.msk [vmem:[#allocation5 + $0x80] sm:$0xff] %vm819_vm5, %v9264_v37  ;;  %v15225_v57 = vmax.f32 %v14973_v21, %v9513_v8  ;;  %v9342_v27 = vld [vmem:[#allocation5 + $0x72] sm:$0xff] }
 0xa8a   : > { %v9505_v24 = vmax.f32 %v9488_v25, %v15167_v47  ;;  %v9423_v28 = vmax.f32 %v9406_v13, %v9310_v60  ;;  %v9490_v9 = vmax.f32 %v9473_v17, %v9310_v60  ;;  %v9572_v4 = vmax.f32 %v9555_v7, %v15182_v48  ;;  %v9530_v47 = vld [vmem:[#allocation5 + $0xa0] sm:$0xff]  ;;  %v9374_v52 = vld [vmem:[#allocation5 + $0x73] sm:$0xff]  ;;  %9687 = vmatpush.msra.mxu3 %v9667_v30 }
 0xa8b   : > { %v9229_v1 = vadd.f32 %v15006_v33, %v9197_v56  ;;  %v9557_v16 = vmax.f32 %v9540_v38, %v9342_v27  ;;  %v9358_v10 = vmax.f32 %v9326_v5, %v9342_v27  ;;  %v9529_v49 = vmax.f32 %v15225_v57, %v9530_v47  ;;  %v9295_v35 = vld [vmem:[#allocation5 + $0x78] sm:$0xff]  ;;  %v9665_v19 = vld [vmem:[%s15237_s0 + $0x40] sm:$0xff] }
 0xa8c   : > { %v9522_v18 = vmax.f32 %v9505_v24, %v15187_v63  ;;  %v9440_v6 = vmax.f32 %v9423_v28, %v9342_v27  ;;  %v9507_v34 = vmax.f32 %v9490_v9, %v9342_v27  ;;  %v9589_v21 = vmax.f32 %v9572_v4, %v15202_v62  ;;  %v9666_v25 = vld [vmem:[%s15237_s0 + $0x48] sm:$0xff]  ;;  %v9664_v27 = vld [vmem:[%s15237_s0 + $0x38] sm:$0xff] }
 0xa8d   : > { %v9249_v44 = vadd.f32 %v15017_v40, %v9229_v1  ;;  %v9574_v33 = vmax.f32 %v9557_v16, %v9374_v52  ;;  %v9390_v63 = vmax.f32 %v9358_v10, %v9374_v52  ;;  %v9546_v12 = vmax.f32 %v9529_v49, %v9547_v29  ;;  %v9615_v9 = vld [vmem:[#allocation5 + $0x19] ss:$64 sm:$0x1]  ;;  %9688 = vmatpush.msra.mxu3 %v9666_v25 }
 0xa8e   : > { %v9539_v22 = vmax.f32 %v9522_v18, %v15175_v58  ;;  %v9457_v61 = vmax.f32 %v9440_v6, %v9374_v52  ;;  %v9524_v23 = vmax.f32 %v9507_v34, %v9374_v52  ;;  %9605 = vst.msk [vmem:[#allocation5 + $0x48] sm:$0xff] %vm819_vm5, %v9589_v21  ;;  %v9662_v29 = vld [vmem:[%s15237_s0 + $0x28] sm:$0xff] }
 0xa8f   : > { %v9265_v40 = vmax.f32 %v9249_v44, 0.0  ;;  %v9407_v53 = vmax.f32 %v9390_v63, %v9295_v35  ;;  %v9591_v45 = vmax.f32 %v9574_v33, %v9387_v43  ;;  %v9563_v8 = vmax.f32 %v9546_v12, %v9564_v3  ;;  %9689 = vmatpush.msra.mxu3 %v9665_v19  ;;  %v9715_v19 = vld [vmem:[%s15276_s23 + $0x60] sm:$0xff] }
 0xa90   : > { %v9556_v58 = vmax.f32 %v9539_v22, %v15195_v11  ;;  %v9474_v2 = vmax.f32 %v9457_v61, %v9295_v35  ;;  %v9541_v0 = vmax.f32 %v9524_v23, %v9295_v35  ;;  %v9311_v39 = vld [vmem:[#allocation5 + $0x79] sm:$0xff] }
 0xa91   : > { %9281 = vst.msk [vmem:[#allocation5 + $0x88] sm:$0xff] %vm819_vm5, %v9265_v40  ;;  %v9327_v20 = vmax.f32 %v9295_v35, %v9311_v39  ;;  %v9424_v42 = vmax.f32 %v9407_v53, %v9311_v39  ;;  %v9343_v26 = vld [vmem:[#allocation5 + $0x7a] sm:$0xff]  ;;  %9690 = vmatpush.msra.mxu3 %v9664_v27  ;;  %v10967_v27 = vld [vmem:[%s778_s24] ss:$0 sm:$0xff] }
 0xa92   : > { %v9573_v15 = vmax.f32 %v9556_v58, %v15182_v48  ;;  %v9491_v31 = vmax.f32 %v9474_v2, %v9311_v39  ;;  %v9558_v11 = vmax.f32 %v9541_v0, %v9311_v39  ;;  %9607 = vst.msk [vmem:[#allocation5 + $0x58] sm:$0xff] %vm819_vm5, %v9591_v45  ;;  %v9375_v14 = vld [vmem:[#allocation5 + $0x7b] sm:$0xff] }
 0xa93   : > { %v9359_v55 = vmax.f32 %v9327_v20, %v9343_v26  ;;  %v9441_v51 = vmax.f32 %v9424_v42, %v9343_v26  ;;  %v9296_v37 = vld [vmem:[#allocation5 + $0x80] sm:$0xff]  ;;  %v9660_v42 = vld [vmem:[%s15237_s0 + $0x18] sm:$0xff] }
 0xa94   : > { %v9590_v54 = vmax.f32 %v9573_v15, %v15202_v62  ;;  %v9508_v48 = vmax.f32 %v9491_v31, %v9343_v26  ;;  %v9575_v36 = vmax.f32 %v9558_v11, %v9343_v26  ;;  %v9581_v62 = vld [vmem:[#allocation5 + $0xa3] sm:$0xff] }
 0xa95   : > { %v9391_v41 = vmax.f32 %v9359_v55, %v9375_v14  ;;  %v9458_v46 = vmax.f32 %v9441_v51, %v9375_v14  ;;  %v9580_v6 = vmax.f32 %v9563_v8, %v9581_v62  ;;  %v9663_v61 = vld [vmem:[%s15237_s0 + $0x30] sm:$0xff]  ;;  %v9658_v51 = vld [vmem:[%s15237_s0 + $0x8] sm:$0xff]  ;;  %v9718_v8 = vld [vmem:[%s15276_s23 + $0x78] sm:$0xff] }
 0xa96   : > { %9606 = vst.msk [vmem:[#allocation5 + $0x50] sm:$0xff] %vm819_vm5, %v9590_v54  ;;  %v9525_v13 = vmax.f32 %v9508_v48, %v9375_v14  ;;  %v9592_v17 = vmax.f32 %v9575_v36, %v9375_v14  ;;  %9691 = vmatpush.msra.mxu3 %v9663_v61  ;;  %v9659_v26 = vld [vmem:[%s15237_s0 + $0x10] sm:$0xff]  ;;  %v10982_v36 = vld [vmem:[#allocation5 + $0x90] sm:$0xff]  ;;  %9719 = vmatpush.msra.mxu2 %v9718_v8 }
 0xa97   : > { %v9408_v7 = vmax.f32 %v9391_v41, %v9296_v37  ;;  %v9475_v60 = vmax.f32 %v9458_v46, %v9296_v37  ;;  %v9657_v14 = vld [vmem:[%s15237_s0] sm:$0xff]  ;;  %v9717_v62 = vld [vmem:[%s15276_s23 + $0x70] sm:$0xff] }
 0xa98   : > { %v9542_v56 = vmax.f32 %v9525_v13, %v9296_v37  ;;  %v9297_v24 = vld [vmem:[#allocation5 + $0x88] sm:$0xff]  ;;  %9608 = vst.msk [vmem:[#allocation5 + $0x60] sm:$0xff] %vm819_vm5, %v9592_v17  ;;  %9692 = vmatpush.msra.mxu3 %v9662_v29  ;;  %v10983_v41 = vld [vmem:[#allocation5 + $0x91] sm:$0xff]  ;;  %9720 = vmatpush.msra.mxu2 %v9717_v62 }
 0xa99   : > { %v9312_v50 = vld [vmem:[#allocation5 + $0x81] sm:$0xff]  ;;  %v9313_v38 = vld [vmem:[#allocation5 + $0x89] sm:$0xff]  ;;  %v9616_v10 = vld [vmem:[#allocation5 + $0x19] ss:$64 sm:$0x2] }
 0xa9a   : > { %v9328_v5 = vmax.f32 %v9296_v37, %v9312_v50  ;;  %v9329_v28 = vmax.f32 %v9297_v24, %v9313_v38  ;;  %v9344_v1 = vld [vmem:[#allocation5 + $0x82] sm:$0xff]  ;;  %v9345_v18 = vld [vmem:[#allocation5 + $0x8a] sm:$0xff]  ;;  %v9425_v4 = vmax.f32 %v9408_v7, %v9312_v50  ;;  %v9492_v47 = vmax.f32 %v9475_v60, %v9312_v50  ;;  %9693 = vmatpush.msra.mxu3 %v9661_v32  ;;  %v10984_v13 = vld [vmem:[#allocation5 + $0x92] sm:$0xff] }
 0xa9b   : > { %v9559_v16 = vmax.f32 %v9542_v56, %v9312_v50  ;;  %v9617_v44 = vor.u32 %v9616_v10, %v9615_v9  ;;  %v9376_v22 = vld [vmem:[#allocation5 + $0x83] sm:$0xff]  ;;  %v9377_v21 = vld [vmem:[#allocation5 + $0x8b] sm:$0xff]  ;;  %v9716_v37 = vld [vmem:[%s15276_s23 + $0x68] sm:$0xff] }
 0xa9c   : > { %v9360_v34 = vmax.f32 %v9328_v5, %v9344_v1  ;;  %v9361_v52 = vmax.f32 %v9329_v28, %v9345_v18  ;;  %v9442_v43 = vmax.f32 %v9425_v4, %v9344_v1  ;;  %v9509_v33 = vmax.f32 %v9492_v47, %v9344_v1  ;;  %9694 = vmatpush.msra.mxu3 %v9660_v42  ;;  %v9714_v7 = vld [vmem:[%s15276_s23 + $0x58] sm:$0xff]  ;;  %v9713_v60 = vld [vmem:[%s15276_s23 + $0x50] sm:$0xff]  ;;  %v9712_v56 = vld [vmem:[%s15276_s23 + $0x48] sm:$0xff] }
 0xa9d   : > { %v9576_v63 = vmax.f32 %v9559_v16, %v9344_v1  ;;  %9619 = vst.msk [vmem:[#allocation6] sm:$0x3] %vm9618_vm7, %v9617_v44  ;;  %9721 = vmatpush.msra.mxu2 %v9716_v37  ;;  %v9710_v50 = vld [vmem:[%s15276_s23 + $0x38] sm:$0xff]  ;;  %v9708_v5 = vld [vmem:[%s15276_s23 + $0x28] sm:$0xff]  ;;  %v9707_v28 = vld [vmem:[%s15276_s23 + $0x20] sm:$0xff] }
 0xa9e   : > { %v9392_v23 = vmax.f32 %v9360_v34, %v9376_v22  ;;  %v9393_v49 = vmax.f32 %v9361_v52, %v9377_v21  ;;  %v9459_v35 = vmax.f32 %v9442_v43, %v9376_v22  ;;  %v9526_v40 = vmax.f32 %v9509_v33, %v9376_v22  ;;  %9695 = vmatpush.msra.mxu3 %v9659_v26  ;;  %v9706_v9 = vld [vmem:[%s15276_s23 + $0x18] sm:$0xff]  ;;  %v9705_v1 = vld [vmem:[%s15276_s23 + $0x10] sm:$0xff]  ;;  %v9704_v16 = vld [vmem:[%s15276_s23 + $0x8] sm:$0xff] }
 0xa9f   : > { %v9593_v58 = vmax.f32 %v9576_v63, %v9376_v22  ;;  %9722 = vmatpush.msra.mxu2 %v9715_v19  ;;  %v9703_v10 = vld [vmem:[%s15276_s23] sm:$0xff] }
 0xaa0   : > { %v9597_v53 = vmax.f32 %v9580_v6, %v9393_v49  ;;  %v9409_v2 = vmax.f32 %v9392_v23, %v9297_v24  ;;  %v9476_v0 = vmax.f32 %v9459_v35, %v9297_v24  ;;  %v9543_v45 = vmax.f32 %v9526_v40, %v9297_v24  ;;  %9696 = vmatpush.msra.mxu3 %v9658_v51  ;;  %v9711_v24 = vld [vmem:[%s15276_s23 + $0x40] sm:$0xff] }
 0xaa1   : > { %9609 = vst.msk [vmem:[#allocation5 + $0x68] sm:$0xff] %vm819_vm5, %v9593_v58  ;;  %9723 = vmatpush.msra.mxu2 %v9714_v7  ;;  %v10968_v6 = vld [vmem:[%s786_s20] ss:$0 sm:$0xff] }
 0xaa2   : > { %v9426_v39 = vmax.f32 %v9409_v2, %v9313_v38  ;;  %9613 = vst.msk [vmem:[#allocation5 + $0x88] sm:$0xff] %vm819_vm5, %v9597_v53  ;;  %v9493_v15 = vmax.f32 %v9476_v0, %v9313_v38  ;;  %v9560_v20 = vmax.f32 %v9543_v45, %v9313_v38  ;;  %9697 = vmatpush.msra.mxu3 %v9657_v14  ;;  %v9709_v38 = vld [vmem:[%s15276_s23 + $0x30] sm:$0xff] }
 0xaa3   : > { %9724 = vmatpush.msra.mxu2 %v9713_v60 }
 0xaa4   : > { %v9443_v31 = vmax.f32 %v9426_v39, %v9345_v18  ;;  %v9510_v11 = vmax.f32 %v9493_v15, %v9345_v18  ;;  %v9577_v59 = vmax.f32 %v9560_v20, %v9345_v18  ;;  %v9620_v12 = vld [vmem:[#allocation6] sm:$0xff] }
 0xaa5   : > { %10932 = vmatmul.msk.f32.vlgmr.msrb.gmra.mxu2 %vm819_vm5, %v9620_v12 }
 0xaa6   : > { %v9460_v54 = vmax.f32 %v9443_v31, %v9377_v21  ;;  %v9527_v3 = vmax.f32 %v9510_v11, %v9377_v21  ;;  %v9594_v55 = vmax.f32 %v9577_v59, %v9377_v21  ;;  %9725 = vmatpush.msra.mxu2 %v9712_v56 }
 0xaa8   : > { %v9596_v48 = vmax.f32 %v15225_v57, %v9460_v54  ;;  %v9544_v30 = vmax.f32 %v9527_v3, %v10982_v36  ;;  %9610 = vst.msk [vmem:[#allocation5 + $0x70] sm:$0xff] %vm819_vm5, %v9594_v55  ;;  %v10985_v57 = vld [vmem:[#allocation5 + $0x93] sm:$0xff]  ;;  %9726 = vmatpush.msra.mxu2 %v9711_v24 }
 0xaaa   : > { %9612 = vst.msk [vmem:[#allocation5 + $0x80] sm:$0xff] %vm819_vm5, %v9596_v48  ;;  %v9561_v46 = vmax.f32 %v9544_v30, %v10983_v41  ;;  %9727 = vmatpush.msra.mxu2 %v9710_v50 }
 0xaac   : > { %v9578_v17 = vmax.f32 %v9561_v46, %v10984_v13  ;;  %9728 = vmatpush.msra.mxu2 %v9709_v38 }
 0xaae   : > { %v9595_v25 = vmax.f32 %v9578_v17, %v10985_v57  ;;  %9729 = vmatpush.msra.mxu2 %v9708_v5 }
 0xab0   : > { %9611 = vst.msk [vmem:[#allocation5 + $0x78] sm:$0xff] %vm819_vm5, %v9595_v25  ;;  %9730 = vmatpush.msra.mxu2 %v9707_v28 }
 0xab2   : > { %9731 = vmatpush.msra.mxu2 %v9706_v9 }
 0xab4   : > { %9732 = vmatpush.msra.mxu2 %v9705_v1 }
 0xab6   : > { %9733 = vmatpush.msra.mxu2 %v9704_v16 }
 0xab8   : > { %9734 = vmatpush.msra.mxu2 %v9703_v10 }
 0xb28   : > { %v9653_v18 = vpop.f32.mrf.mxu2 }
 0xb29   : > { %v9654_v4 = vadd.f32 %v10967_v27, %v9653_v18 }
 0xb2b   : > { %v9656_v47 = vmax.f32 %v9654_v4, 0.0 }
 0xb2d   : > { %10934 = vmatmul.msk.f32.vlgmr.msra.gmra.mxu3 %vm9674_vm8, %v9656_v47 }
 0xbb0   : > { %v9699_v34 = vpop.f32.mrf.mxu3 }
 0xbb1   : > { %v9700_v52 = vadd.f32 %v10968_v6, %v9699_v34 }
 0xbb3   : > { %9702 = vst [vmem:[%s795_s21] sm:$0xff] %v9700_v52  ;;  %9735 = vmatmul.f32.vlgmr.msra.gmra.mxu2 %v9700_v52 }
 0xc32   : > { %9742 = sbr.rel (%p10935_p4) target bundleno = 3128 (0xc38), region = 92 }
 0xc36   : > { %v9736_v44 = vpop.f32.mrf.mxu2 }
 0xc37   : > { %9743 = vst.msk [vmem:[#allocation7] sm:$0xff] %vm796_vm3, %v9736_v44 }
 0xc38 PF: > { %p10936_p5 = scmp.ne.s32.totalorder %s11098_s28, 1 }
 0xc3a   : > { %9747 = sbr.rel (%p10936_p5) target bundleno = 3272 (0xcc8), region = 96 }
 0xc3f   : > { %v9759_v22 = vld [vmem:[%s15351_s15 + $0x18] sm:$0xff]  ;;  %v9758_v21 = vld [vmem:[%s15351_s15 + $0x10] sm:$0xff]  ;;  %v9748_v43 = vld [vmem:[#allocation7] sm:$0xff] }
 0xc40   : > { %9779 = vmatpush.msra.mxu0 %v9759_v22  ;;  %v9757_v33 = vld [vmem:[%s15351_s15 + $0x8] sm:$0xff]  ;;  %v9749_v63 = vadd.f32 %v9748_v43, %v9736_v44  ;;  %v10986_v61 = vld [vmem:[%s15350_s14] ss:$0 sm:$0xff] }
 0xc41   : > { %v9756_v23 = vld [vmem:[%s15351_s15] sm:$0xff] }
 0xc42   : > { %9780 = vmatpush.msra.mxu0 %v9758_v21  ;;  %v9754_v49 = vadd.f32 %v10986_v61, %v9749_v63  ;;  %v10987_v40 = vld [vmem:[%s15352_s16] ss:$0 sm:$0xff] }
 0xc44   : > { %9781 = vmatpush.msra.mxu0 %v9757_v33  ;;  %v9755_v35 = vmax.f32 %v9754_v49, 0.0 }
 0xc46   : > { %9782 = vmatpush.msra.mxu0 %v9756_v23 }
 0xc47   : > { %10937 = vmatmul.msk.f32.vlgmr.msra.gmra.mxu0 %vm796_vm3, %v9755_v35 }
 0xcc4   : > { %v9784_v58 = vpop.f32.mrf.mxu0 }
 0xcc5   : > { %v9785_v29 = vadd.f32 %v10987_v40, %v9784_v58 }
 0xcc7   : > { %9787 = vst [vmem:[%s15354_s18] sm:$0xff] %v9785_v29 }
 0xcc8 PF: > { %s29_s27 = sadd.s32 1, %s10994_s27  }
 0xcc9   : > { %p26_p6 = scmp.ge.s32.totalorder %s29_s27, 4  }
 0xccb   :  { %28 = sbr.rel (!%p26_p6) target bundleno = 4 (0x4), region = 186 }

</bundles_post_ra>
